<compile_context>
chip_gen: v6e
topology: v6e:2x2x1
jax: 0.10.0
libtpu: 0.0.40
codegen_flags: <defaults>
</compile_context>

<pallas_src>
from functools import partial

import jax
import jax.numpy as jnp
import numpy as np
from jax.experimental import pallas as pl
from jax.experimental.pallas import tpu as pltpu

# Below v7x's 64 MiB/TC physical VMEM (headroom for double buffers + internal
# scratch); comfortably within v5e/v6e's 128 MiB.
_VMEM_LIMIT = 48 * 1024 * 1024

_TM_CONV = 512   # row tile for the conv GEMMs (K/N tiny -> cheap)
_TM_FC = 256     # row tile for the fused fc head: (256,9216) f32 ~9.4 MiB/buf


def _round_up(x, m):
    return (x + m - 1) // m * m


def _pad_rows(x, mp):
    m = x.shape[0]
    if mp == m:
        return x
    return jnp.pad(x, ((0, mp - m),) + ((0, 0),) * (x.ndim - 1))


# ---------------------------------------------------------------------------
# Pallas kernels
# ---------------------------------------------------------------------------
def _linear_kernel(x_ref, w_ref, b_ref, o_ref, *, relu: bool):
    # o = [relu](x @ w + b) for one M tile; w/b stay resident across the grid.
    acc = jnp.dot(x_ref[...], w_ref[...], preferred_element_type=jnp.float32)
    acc = acc + b_ref[...]                       # b is [1, N]
    if relu:
        acc = jnp.maximum(acc, 0.0)
    o_ref[...] = acc.astype(o_ref.dtype)


def _mlp_head_kernel(x_ref, w1_ref, b1_ref, w2_ref, b2_ref, o_ref):
    # Fused fc1 + relu + fc2 + log_softmax; hidden h never leaves VMEM.
    h = jnp.dot(x_ref[...], w1_ref[...], preferred_element_type=jnp.float32)
    h = jnp.maximum(h + b1_ref[...], 0.0)
    z = jnp.dot(h, w2_ref[...], preferred_element_type=jnp.float32) + b2_ref[...]
    m = jnp.max(z, axis=-1, keepdims=True)
    lse = m + jnp.log(jnp.sum(jnp.exp(z - m), axis=-1, keepdims=True))
    o_ref[...] = (z - lse).astype(o_ref.dtype)


def _maxpool4_kernel(x_ref, o_ref):
    # x_ref: [4, TM, C] holding the 4 positions of each 2x2 window.
    o_ref[...] = jnp.maximum(jnp.maximum(x_ref[0], x_ref[1]),
                             jnp.maximum(x_ref[2], x_ref[3]))


# ---------------------------------------------------------------------------
# Pallas wrappers (M-tiled, weights resident, parallel grid)
# ---------------------------------------------------------------------------
def pallas_linear(x, w, b, *, relu=False, tm=_TM_CONV):
    M, K = x.shape
    _, N = w.shape
    tm_eff = min(tm, _round_up(M, 8))
    Mp = _round_up(M, tm_eff)
    xp = _pad_rows(x, Mp)
    out = pl.pallas_call(
        partial(_linear_kernel, relu=relu),
        out_shape=jax.ShapeDtypeStruct((Mp, N), jnp.float32),
        grid=(Mp // tm_eff,),
        in_specs=[pl.BlockSpec((tm_eff, K), lambda i: (i, 0)),
                  pl.BlockSpec((K, N), lambda i: (0, 0)),      # resident weight
                  pl.BlockSpec((1, N), lambda i: (0, 0))],     # resident bias
        out_specs=pl.BlockSpec((tm_eff, N), lambda i: (i, 0)),
        compiler_params=pltpu.CompilerParams(
            dimension_semantics=("parallel",),
            vmem_limit_bytes=_VMEM_LIMIT),
    )(xp, w, b.reshape(1, N))
    return out[:M] if Mp != M else out


def pallas_mlp_head(x, w1, b1, w2, b2, tm=_TM_FC):
    M, K = x.shape
    H = w1.shape[1]
    N = w2.shape[1]
    tm_eff = min(tm, _round_up(M, 8))
    Mp = _round_up(M, tm_eff)
    xp = _pad_rows(x, Mp)
    out = pl.pallas_call(
        _mlp_head_kernel,
        out_shape=jax.ShapeDtypeStruct((Mp, N), jnp.float32),
        grid=(Mp // tm_eff,),
        in_specs=[pl.BlockSpec((tm_eff, K), lambda i: (i, 0)),
                  pl.BlockSpec((K, H), lambda i: (0, 0)),      # fc1 weight resident
                  pl.BlockSpec((1, H), lambda i: (0, 0)),
                  pl.BlockSpec((H, N), lambda i: (0, 0)),      # fc2 weight resident
                  pl.BlockSpec((1, N), lambda i: (0, 0))],
        out_specs=pl.BlockSpec((tm_eff, N), lambda i: (i, 0)),
        compiler_params=pltpu.CompilerParams(
            dimension_semantics=("parallel",),
            vmem_limit_bytes=_VMEM_LIMIT),
    )(xp, w1, b1.reshape(1, H), w2, b2.reshape(1, N))
    return out[:M] if Mp != M else out


def pallas_maxpool4(x4, tm=_TM_CONV):
    # x4: [4, M, C] -> [M, C]
    _, M, C = x4.shape
    tm_eff = min(tm, _round_up(M, 8))
    Mp = _round_up(M, tm_eff)
    if Mp != M:
        x4 = jnp.pad(x4, ((0, 0), (0, Mp - M), (0, 0)))
    out = pl.pallas_call(
        _maxpool4_kernel,
        out_shape=jax.ShapeDtypeStruct((Mp, C), jnp.float32),
        grid=(Mp // tm_eff,),
        in_specs=[pl.BlockSpec((4, tm_eff, C), lambda i: (0, i, 0))],
        out_specs=pl.BlockSpec((tm_eff, C), lambda i: (i, 0)),
        compiler_params=pltpu.CompilerParams(
            dimension_semantics=("parallel",),
            vmem_limit_bytes=_VMEM_LIMIT),
    )(x4)
    return out[:M] if Mp != M else out


# ---------------------------------------------------------------------------
# Plain-JAX glue
# ---------------------------------------------------------------------------
def im2col(x_nhwc, k=3):
    """[B, H, W, C] -> [B*(H-k+1)*(W-k+1), C*k*k], columns ordered (ci, kh, kw)."""
    B, H, W, C = x_nhwc.shape
    Ho, Wo = H - k + 1, W - k + 1
    taps = []
    for kh in range(k):
        for kw in range(k):
            taps.append(x_nhwc[:, kh:kh + Ho, kw:kw + Wo, :])   # [B, Ho, Wo, C]
    p = jnp.stack(taps, axis=-2)                 # [B, Ho, Wo, k*k, C]
    p = jnp.transpose(p, (0, 1, 2, 4, 3))        # [B, Ho, Wo, C, k*k]
    return p.reshape(B * Ho * Wo, C * k * k)


@jax.jit
def net_forward(x, params):
    """x: [B, 1, 28, 28] float32 (NCHW, like the PyTorch module)."""
    w1c, b1, w2c, b2, wf1p, bf1, wf2t, bf2 = params
    B = x.shape[0]

    xh = jnp.transpose(x, (0, 2, 3, 1))                    # NHWC [B, 28, 28, 1]

    # conv1 (1->32, 3x3, stride 1) + relu
    p1 = im2col(xh, 3)                                     # [B*676, 9]
    y1 = pallas_linear(p1, w1c, b1, relu=True)             # [B*676, 32]
    y1 = y1.reshape(B, 26, 26, 32)

    # conv2 (32->64, 3x3, stride 1) + relu
    # TODO(synk): conv2's im2col is still materialized in HBM; fusing the 9
    # shifted taps into the kernel (halo'd y1 tiles) would cut HBM traffic ~8x.
    p2 = im2col(y1, 3)                                     # [B*576, 288]
    y2 = pallas_linear(p2, w2c, b2, relu=True)             # [B*576, 64]
    y2 = y2.reshape(B, 24, 24, 64)

    # max_pool2d(kernel=2, stride=2)
    pos = jnp.stack([y2[:, 0::2, 0::2, :], y2[:, 0::2, 1::2, :],
                     y2[:, 1::2, 0::2, :], y2[:, 1::2, 1::2, :]], axis=0)
    pooled = pallas_maxpool4(pos.reshape(4, B * 12 * 12, 64))   # [B*144, 64]

    # TODO(synk): Dropout2d(0.25)/Dropout(0.5) are identity in eval/inference
    # mode; training-mode stochastic masking is not implemented here.

    # fc1 weight rows were pre-permuted to NHWC flatten order, so flatten
    # directly (no NCHW transpose needed).
    flat = pooled.reshape(B, 64 * 12 * 12)                 # [B, 9216] (NHWC order)

    # Fused fc1 + relu + fc2 + log_softmax in one Pallas call.
    return pallas_mlp_head(flat, wf1p, bf1, wf2t, bf2)     # [B, 10]


# ---------------------------------------------------------------------------
# Parameters (PyTorch layouts) + conversion to kernel layouts
# ---------------------------------------------------------------------------
def init_torch_params(key):
    ks = jax.random.split(key, 8)
    conv1_w = jax.random.normal(ks[0], (32, 1, 3, 3), jnp.float32) * 0.10
    conv1_b = jax.random.normal(ks[1], (32,), jnp.float32) * 0.01
    conv2_w = jax.random.normal(ks[2], (64, 32, 3, 3), jnp.float32) * 0.05
    conv2_b = jax.random.normal(ks[3], (64,), jnp.float32) * 0.01
    fc1_w = jax.random.normal(ks[4], (128, 9216), jnp.float32) * 0.01
    fc1_b = jax.random.normal(ks[5], (128,), jnp.float32) * 0.01
    fc2_w = jax.random.normal(ks[6], (10, 128), jnp.float32) * 0.05
    fc2_b = jax.random.normal(ks[7], (10,), jnp.float32) * 0.01
    return (conv1_w, conv1_b, conv2_w, conv2_b, fc1_w, fc1_b, fc2_w, fc2_b)


def prepare_params(torch_params):
    """One-time host-side conversion from PyTorch layouts to kernel layouts."""
    c1w, c1b, c2w, c2b, f1w, f1b, f2w, f2b = torch_params
    # conv weights: [out, in, kh, kw] -> [in*3*3, out], matching im2col's
    # (ci, kh, kw) column ordering.
    w1c = c1w.reshape(32, 9).T                             # [9, 32]
    w2c = c2w.reshape(64, 288).T                           # [288, 64]
    # fc1: transpose to [9216, 128] and permute rows from torch's NCHW flatten
    # order (c*144 + h*12 + w) to our NHWC flatten order ((h*12 + w)*64 + c).
    g = np.arange(9216)
    c = g % 64
    w = (g // 64) % 12
    h = g // (64 * 12)
    perm = jnp.asarray(c * 144 + h * 12 + w)
    wf1p = f1w.T[perm]                                     # [9216, 128]
    wf2t = f2w.T                                           # [128, 10]
    return (w1c, c1b, w2c, c2b, wf1p, f1b, wf2t, f2b)


# ---------------------------------------------------------------------------
# Pure-JAX reference (mirrors the PyTorch module exactly) for validation
# ---------------------------------------------------------------------------
def reference_forward(x, torch_params):
    c1w, c1b, c2w, c2b, f1w, f1b, f2w, f2b = torch_params
    dn = ("NCHW", "OIHW", "NCHW")
    y = jax.lax.conv_general_dilated(x, c1w, (1, 1), "VALID", dimension_numbers=dn)
    y = jax.nn.relu(y + c1b[None, :, None, None])
    y = jax.lax.conv_general_dilated(y, c2w, (1, 1), "VALID", dimension_numbers=dn)
    y = jax.nn.relu(y + c2b[None, :, None, None])
    B = x.shape[0]
    y = y.reshape(B, 64, 12, 2, 12, 2).max(axis=(3, 5))    # max_pool2d(2)
    flat = y.reshape(B, 9216)                              # torch.flatten (NCHW)
    h = jax.nn.relu(flat @ f1w.T + f1b)
    z = h @ f2w.T + f2b
    return jax.nn.log_softmax(z, axis=-1)


# ---------------------------------------------------------------------------
# Smoke test
# ---------------------------------------------------------------------------
if __name__ == "__main__":
    key = jax.random.PRNGKey(0)
    k_x, k_p = jax.random.split(key)
    B = 2
    # fc1 expects 9216 = 64*12*12 features, which pins the input to 1x28x28.
    x = jax.random.normal(k_x, (B, 1, 28, 28), dtype=jnp.float32)
    torch_params = init_torch_params(k_p)
    params = prepare_params(torch_params)

    out = jax.block_until_ready(net_forward(x, params))
    assert out.shape == (B, 10), out.shape

    # log_softmax rows must exponentiate-sum to 1
    row_sums = np.exp(np.asarray(out)).sum(axis=1)
    assert np.allclose(row_sums, 1.0, atol=1e-4), row_sums

    # match the pure-JAX reference of the PyTorch module
    ref = jax.block_until_ready(reference_forward(x, torch_params))
    max_err = float(np.max(np.abs(np.asarray(out) - np.asarray(ref))))
    assert max_err < 1e-3, f"max abs err vs reference: {max_err}"

    print("KERNEL_OK")
</pallas_src>

<mosaic_0001>
module attributes {stable_mosaic.version = 11 : i64} {
  func.func @_linear_kernel(%arg0: i32, %arg1: memref<512x9xf32, #tpu.memory_space<vmem>>, %arg2: memref<9x32xf32, #tpu.memory_space<vmem>>, %arg3: memref<1x32xf32, #tpu.memory_space<vmem>>, %arg4: memref<512x32xf32, #tpu.memory_space<vmem>>) attributes {dimension_semantics = [#tpu.dimension_semantics<parallel>], iteration_bounds = array<i64: 3>, scalar_prefetch = 0 : i64, scratch_operands = 0 : i64, tpu.core_type = #tpu.core_type<tc>, window_params = [{transform_indices = @transform_0, window_bounds = array<i64: 512, 9>}, {pipeline_mode = #tpu.pipeline_mode<synchronous>, transform_indices = @transform_1, window_bounds = array<i64: 9, 32>}, {pipeline_mode = #tpu.pipeline_mode<synchronous>, transform_indices = @transform_2, window_bounds = array<i64: 1, 32>}, {transform_indices = @transform_3, window_bounds = array<i64: 512, 32>}]} {
    %c0 = arith.constant 0 : index
    %c0_0 = arith.constant 0 : index
    %0 = vector.load %arg1[%c0, %c0_0] : memref<512x9xf32, #tpu.memory_space<vmem>>, vector<512x9xf32>
    %c0_1 = arith.constant 0 : index
    %c0_2 = arith.constant 0 : index
    %1 = vector.load %arg2[%c0_1, %c0_2] : memref<9x32xf32, #tpu.memory_space<vmem>>, vector<9x32xf32>
    %cst = arith.constant dense<0.000000e+00> : vector<512x32xf32>
    %2 = tpu.matmul %0, %1, %cst {dimension_numbers = #tpu.dot_dimension_numbers<[1], [0], [0], [1], [0, 0, 1, 1], [], []>} : vector<512x9xf32>, vector<9x32xf32>, vector<512x32xf32> -> vector<512x32xf32>
    %c0_3 = arith.constant 0 : index
    %c0_4 = arith.constant 0 : index
    %3 = vector.load %arg3[%c0_3, %c0_4] : memref<1x32xf32, #tpu.memory_space<vmem>>, vector<1x32xf32>
    %4 = vector.broadcast %3 : vector<1x32xf32> to vector<512x32xf32>
    %5 = arith.addf %2, %4 : vector<512x32xf32>
    %cst_5 = arith.constant 0.000000e+00 : f32
    %6 = vector.broadcast %cst_5 : f32 to vector<512x32xf32>
    %7 = arith.maximumf %5, %6 : vector<512x32xf32>
    %c0_6 = arith.constant 0 : index
    %c0_7 = arith.constant 0 : index
    %8 = vector.load %arg4[%c0_6, %c0_7] : memref<512x32xf32, #tpu.memory_space<vmem>>, vector<512x32xf32>
    tpu.vector_store %arg4[%c0_6, %c0_7], %7 {strides = array<i32>} : memref<512x32xf32, #tpu.memory_space<vmem>>, vector<512x32xf32>,
    return
  }
  func.func @transform_0(%arg0: i32) -> (i32, i32) {
    %c0_i32 = arith.constant 0 : i32
    %c0_i32_0 = arith.constant 0 : i32
    return %arg0, %c0_i32 : i32, i32
  }
  func.func @transform_1(%arg0: i32) -> (i32, i32) {
    %c0_i32 = arith.constant 0 : i32
    %c0_i32_0 = arith.constant 0 : i32
    %c0_i32_1 = arith.constant 0 : i32
    return %c0_i32, %c0_i32_0 : i32, i32
  }
  func.func @transform_2(%arg0: i32) -> (i32, i32) {
    %c0_i32 = arith.constant 0 : i32
    %c0_i32_0 = arith.constant 0 : i32
    %c0_i32_1 = arith.constant 0 : i32
    return %c0_i32, %c0_i32_0 : i32, i32
  }
  func.func @transform_3(%arg0: i32) -> (i32, i32) {
    %c0_i32 = arith.constant 0 : i32
    %c0_i32_0 = arith.constant 0 : i32
    return %arg0, %c0_i32 : i32, i32
  }
}

module attributes {stable_mosaic.version = 11 : i64} {
  func.func @_linear_kernel(%arg0: i32, %arg1: memref<512x288xf32, #tpu.memory_space<vmem>>, %arg2: memref<288x64xf32, #tpu.memory_space<vmem>>, %arg3: memref<1x64xf32, #tpu.memory_space<vmem>>, %arg4: memref<512x64xf32, #tpu.memory_space<vmem>>) attributes {dimension_semantics = [#tpu.dimension_semantics<parallel>], iteration_bounds = array<i64: 3>, scalar_prefetch = 0 : i64, scratch_operands = 0 : i64, tpu.core_type = #tpu.core_type<tc>, window_params = [{transform_indices = @transform_0, window_bounds = array<i64: 512, 288>}, {pipeline_mode = #tpu.pipeline_mode<synchronous>, transform_indices = @transform_1, window_bounds = array<i64: 288, 64>}, {pipeline_mode = #tpu.pipeline_mode<synchronous>, transform_indices = @transform_2, window_bounds = array<i64: 1, 64>}, {transform_indices = @transform_3, window_bounds = array<i64: 512, 64>}]} {
    %c0 = arith.constant 0 : index
    %c0_0 = arith.constant 0 : index
    %0 = vector.load %arg1[%c0, %c0_0] : memref<512x288xf32, #tpu.memory_space<vmem>>, vector<512x288xf32>
    %c0_1 = arith.constant 0 : index
    %c0_2 = arith.constant 0 : index
    %1 = vector.load %arg2[%c0_1, %c0_2] : memref<288x64xf32, #tpu.memory_space<vmem>>, vector<288x64xf32>
    %cst = arith.constant dense<0.000000e+00> : vector<512x64xf32>
    %2 = tpu.matmul %0, %1, %cst {dimension_numbers = #tpu.dot_dimension_numbers<[1], [0], [0], [1], [0, 0, 1, 1], [], []>} : vector<512x288xf32>, vector<288x64xf32>, vector<512x64xf32> -> vector<512x64xf32>
    %c0_3 = arith.constant 0 : index
    %c0_4 = arith.constant 0 : index
    %3 = vector.load %arg3[%c0_3, %c0_4] : memref<1x64xf32, #tpu.memory_space<vmem>>, vector<1x64xf32>
    %4 = vector.broadcast %3 : vector<1x64xf32> to vector<512x64xf32>
    %5 = arith.addf %2, %4 : vector<512x64xf32>
    %cst_5 = arith.constant 0.000000e+00 : f32
    %6 = vector.broadcast %cst_5 : f32 to vector<512x64xf32>
    %7 = arith.maximumf %5, %6 : vector<512x64xf32>
    %c0_6 = arith.constant 0 : index
    %c0_7 = arith.constant 0 : index
    %8 = vector.load %arg4[%c0_6, %c0_7] : memref<512x64xf32, #tpu.memory_space<vmem>>, vector<512x64xf32>
    tpu.vector_store %arg4[%c0_6, %c0_7], %7 {strides = array<i32>} : memref<512x64xf32, #tpu.memory_space<vmem>>, vector<512x64xf32>,
    return
  }
  func.func @transform_0(%arg0: i32) -> (i32, i32) {
    %c0_i32 = arith.constant 0 : i32
    %c0_i32_0 = arith.constant 0 : i32
    return %arg0, %c0_i32 : i32, i32
  }
  func.func @transform_1(%arg0: i32) -> (i32, i32) {
    %c0_i32 = arith.constant 0 : i32
    %c0_i32_0 = arith.constant 0 : i32
    %c0_i32_1 = arith.constant 0 : i32
    return %c0_i32, %c0_i32_0 : i32, i32
  }
  func.func @transform_2(%arg0: i32) -> (i32, i32) {
    %c0_i32 = arith.constant 0 : i32
    %c0_i32_0 = arith.constant 0 : i32
    %c0_i32_1 = arith.constant 0 : i32
    return %c0_i32, %c0_i32_0 : i32, i32
  }
  func.func @transform_3(%arg0: i32) -> (i32, i32) {
    %c0_i32 = arith.constant 0 : i32
    %c0_i32_0 = arith.constant 0 : i32
    return %arg0, %c0_i32 : i32, i32
  }
}

module attributes {stable_mosaic.version = 11 : i64} {
  func.func @_maxpool4_kernel(%arg0: i32, %arg1: memref<4x288x64xf32, #tpu.memory_space<vmem>>, %arg2: memref<288x64xf32, #tpu.memory_space<vmem>>) attributes {dimension_semantics = [#tpu.dimension_semantics<parallel>], iteration_bounds = array<i64: 1>, scalar_prefetch = 0 : i64, scratch_operands = 0 : i64, tpu.core_type = #tpu.core_type<tc>, window_params = [{transform_indices = @transform_0, window_bounds = array<i64: 4, 288, 64>}, {transform_indices = @transform_1, window_bounds = array<i64: 288, 64>}]} {
    %c0 = arith.constant 0 : index
    %c0_0 = arith.constant 0 : index
    %c0_1 = arith.constant 0 : index
    %0 = vector.load %arg1[%c0, %c0_0, %c0_1] : memref<4x288x64xf32, #tpu.memory_space<vmem>>, vector<1x288x64xf32>
    %1 = vector.shape_cast %0 : vector<1x288x64xf32> to vector<288x64xf32>
    %c1 = arith.constant 1 : index
    %c0_2 = arith.constant 0 : index
    %c0_3 = arith.constant 0 : index
    %2 = vector.load %arg1[%c1, %c0_2, %c0_3] : memref<4x288x64xf32, #tpu.memory_space<vmem>>, vector<1x288x64xf32>
    %3 = vector.shape_cast %2 : vector<1x288x64xf32> to vector<288x64xf32>
    %4 = arith.maximumf %1, %3 : vector<288x64xf32>
    %c2 = arith.constant 2 : index
    %c0_4 = arith.constant 0 : index
    %c0_5 = arith.constant 0 : index
    %5 = vector.load %arg1[%c2, %c0_4, %c0_5] : memref<4x288x64xf32, #tpu.memory_space<vmem>>, vector<1x288x64xf32>
    %6 = vector.shape_cast %5 : vector<1x288x64xf32> to vector<288x64xf32>
    %c3 = arith.constant 3 : index
    %c0_6 = arith.constant 0 : index
    %c0_7 = arith.constant 0 : index
    %7 = vector.load %arg1[%c3, %c0_6, %c0_7] : memref<4x288x64xf32, #tpu.memory_space<vmem>>, vector<1x288x64xf32>
    %8 = vector.shape_cast %7 : vector<1x288x64xf32> to vector<288x64xf32>
    %9 = arith.maximumf %6, %8 : vector<288x64xf32>
    %10 = arith.maximumf %4, %9 : vector<288x64xf32>
    %c0_8 = arith.constant 0 : index
    %c0_9 = arith.constant 0 : index
    %11 = vector.load %arg2[%c0_8, %c0_9] : memref<288x64xf32, #tpu.memory_space<vmem>>, vector<288x64xf32>
    tpu.vector_store %arg2[%c0_8, %c0_9], %10 {strides = array<i32>} : memref<288x64xf32, #tpu.memory_space<vmem>>, vector<288x64xf32>,
    return
  }
  func.func @transform_0(%arg0: i32) -> (i32, i32, i32) {
    %c0_i32 = arith.constant 0 : i32
    %c0_i32_0 = arith.constant 0 : i32
    %c0_i32_1 = arith.constant 0 : i32
    return %c0_i32, %arg0, %c0_i32_0 : i32, i32, i32
  }
  func.func @transform_1(%arg0: i32) -> (i32, i32) {
    %c0_i32 = arith.constant 0 : i32
    %c0_i32_0 = arith.constant 0 : i32
    return %arg0, %c0_i32 : i32, i32
  }
}

module attributes {stable_mosaic.version = 11 : i64} {
  func.func @_mlp_head_kernel(%arg0: i32, %arg1: memref<8x9216xf32, #tpu.memory_space<vmem>>, %arg2: memref<9216x128xf32, #tpu.memory_space<vmem>>, %arg3: memref<1x128xf32, #tpu.memory_space<vmem>>, %arg4: memref<128x10xf32, #tpu.memory_space<vmem>>, %arg5: memref<1x10xf32, #tpu.memory_space<vmem>>, %arg6: memref<8x10xf32, #tpu.memory_space<vmem>>) attributes {dimension_semantics = [#tpu.dimension_semantics<parallel>], iteration_bounds = array<i64: 1>, scalar_prefetch = 0 : i64, scratch_operands = 0 : i64, tpu.core_type = #tpu.core_type<tc>, window_params = [{transform_indices = @transform_0, window_bounds = array<i64: 8, 9216>}, {pipeline_mode = #tpu.pipeline_mode<synchronous>, transform_indices = @transform_1, window_bounds = array<i64: 9216, 128>}, {pipeline_mode = #tpu.pipeline_mode<synchronous>, transform_indices = @transform_2, window_bounds = array<i64: 1, 128>}, {pipeline_mode = #tpu.pipeline_mode<synchronous>, transform_indices = @transform_3, window_bounds = array<i64: 128, 10>}, {pipeline_mode = #tpu.pipeline_mode<synchronous>, transform_indices = @transform_4, window_bounds = array<i64: 1, 10>}, {transform_indices = @transform_5, window_bounds = array<i64: 8, 10>}]} {
    %c0 = arith.constant 0 : index
    %c0_0 = arith.constant 0 : index
    %0 = vector.load %arg1[%c0, %c0_0] : memref<8x9216xf32, #tpu.memory_space<vmem>>, vector<8x9216xf32>
    %c0_1 = arith.constant 0 : index
    %c0_2 = arith.constant 0 : index
    %1 = vector.load %arg2[%c0_1, %c0_2] : memref<9216x128xf32, #tpu.memory_space<vmem>>, vector<9216x128xf32>
    %cst = arith.constant dense<0.000000e+00> : vector<8x128xf32>
    %2 = tpu.matmul %0, %1, %cst {dimension_numbers = #tpu.dot_dimension_numbers<[1], [0], [0], [1], [0, 0, 1, 1], [], []>} : vector<8x9216xf32>, vector<9216x128xf32>, vector<8x128xf32> -> vector<8x128xf32>
    %c0_3 = arith.constant 0 : index
    %c0_4 = arith.constant 0 : index
    %3 = vector.load %arg3[%c0_3, %c0_4] : memref<1x128xf32, #tpu.memory_space<vmem>>, vector<1x128xf32>
    %4 = vector.broadcast %3 : vector<1x128xf32> to vector<8x128xf32>
    %5 = arith.addf %2, %4 : vector<8x128xf32>
    %cst_5 = arith.constant 0.000000e+00 : f32
    %6 = vector.broadcast %cst_5 : f32 to vector<8x128xf32>
    %7 = arith.maximumf %5, %6 : vector<8x128xf32>
    %c0_6 = arith.constant 0 : index
    %c0_7 = arith.constant 0 : index
    %8 = vector.load %arg4[%c0_6, %c0_7] : memref<128x10xf32, #tpu.memory_space<vmem>>, vector<128x10xf32>
    %cst_8 = arith.constant dense<0.000000e+00> : vector<8x10xf32>
    %9 = tpu.matmul %7, %8, %cst_8 {dimension_numbers = #tpu.dot_dimension_numbers<[1], [0], [0], [1], [0, 0, 1, 1], [], []>} : vector<8x128xf32>, vector<128x10xf32>, vector<8x10xf32> -> vector<8x10xf32>
    %c0_9 = arith.constant 0 : index
    %c0_10 = arith.constant 0 : index
    %10 = vector.load %arg5[%c0_9, %c0_10] : memref<1x10xf32, #tpu.memory_space<vmem>>, vector<1x10xf32>
    %11 = vector.broadcast %10 : vector<1x10xf32> to vector<8x10xf32>
    %12 = arith.addf %9, %11 : vector<8x10xf32>
    %cst_11 = arith.constant dense<0xFF800000> : vector<8xf32>
    %13 = vector.multi_reduction <maximumf>, %12, %cst_11 [1] : vector<8x10xf32> to vector<8xf32>
    %14 = vector.shape_cast %13 : vector<8xf32> to vector<8x1xf32>
    %15 = vector.broadcast %14 : vector<8x1xf32> to vector<8x10xf32>
    %16 = arith.subf %12, %15 : vector<8x10xf32>
    %17 = math.exp %16 : vector<8x10xf32>
    %cst_12 = arith.constant dense<0.000000e+00> : vector<8xf32>
    %18 = vector.multi_reduction <add>, %17, %cst_12 [1] : vector<8x10xf32> to vector<8xf32>
    %19 = vector.shape_cast %18 : vector<8xf32> to vector<8x1xf32>
    %20 = math.log %19 : vector<8x1xf32>
    %21 = arith.addf %14, %20 : vector<8x1xf32>
    %22 = vector.broadcast %21 : vector<8x1xf32> to vector<8x10xf32>
    %23 = arith.subf %12, %22 : vector<8x10xf32>
    %c0_13 = arith.constant 0 : index
    %c0_14 = arith.constant 0 : index
    %24 = vector.load %arg6[%c0_13, %c0_14] : memref<8x10xf32, #tpu.memory_space<vmem>>, vector<8x10xf32>
    tpu.vector_store %arg6[%c0_13, %c0_14], %23 {strides = array<i32>} : memref<8x10xf32, #tpu.memory_space<vmem>>, vector<8x10xf32>,
    return
  }
  func.func @transform_0(%arg0: i32) -> (i32, i32) {
    %c0_i32 = arith.constant 0 : i32
    %c0_i32_0 = arith.constant 0 : i32
    return %arg0, %c0_i32 : i32, i32
  }
  func.func @transform_1(%arg0: i32) -> (i32, i32) {
    %c0_i32 = arith.constant 0 : i32
    %c0_i32_0 = arith.constant 0 : i32
    %c0_i32_1 = arith.constant 0 : i32
    return %c0_i32, %c0_i32_0 : i32, i32
  }
  func.func @transform_2(%arg0: i32) -> (i32, i32) {
    %c0_i32 = arith.constant 0 : i32
    %c0_i32_0 = arith.constant 0 : i32
    %c0_i32_1 = arith.constant 0 : i32
    return %c0_i32, %c0_i32_0 : i32, i32
  }
  func.func @transform_3(%arg0: i32) -> (i32, i32) {
    %c0_i32 = arith.constant 0 : i32
    %c0_i32_0 = arith.constant 0 : i32
    %c0_i32_1 = arith.constant 0 : i32
    return %c0_i32, %c0_i32_0 : i32, i32
  }
  func.func @transform_4(%arg0: i32) -> (i32, i32) {
    %c0_i32 = arith.constant 0 : i32
    %c0_i32_0 = arith.constant 0 : i32
    %c0_i32_1 = arith.constant 0 : i32
    return %c0_i32, %c0_i32_0 : i32, i32
  }
  func.func @transform_5(%arg0: i32) -> (i32, i32) {
    %c0_i32 = arith.constant 0 : i32
    %c0_i32_0 = arith.constant 0 : i32
    return %arg0, %c0_i32 : i32, i32
  }
}

</mosaic_0001>

<bundles_post_ra>
// kernel: net_forward.4
= control target key start
LH: loop header
LB: loop body
LE: loop exit
PB: predicated region body
PF: predicated region fallthrough
CT: control target
= control target key end

     0   :  { %8 = vsyncpa [#allocation3], 0  ;;  %s1836_s0 = inlined_call_operand.vmem [shape: f32[1536,9], index: 0, kind: input, shape index: {}]   ;;  %s1837_s1 = inlined_call_operand.hbm [shape: f32[9,32], index: 1, kind: input, shape index: {}]   ;;  %s1838_s2 = inlined_call_operand.hbm [shape: f32[1,32], index: 2, kind: input, shape index: {}]   ;;  %s1839_s3 = inlined_call_operand.vmem [shape: f32[1536,32], index: 3, kind: output, shape index: {}]  }
   0x1   :  { %9 = vsyncpa [#allocation5], 0  ;;  %s1438_s12 = smov 0  }
   0x2 LB: > { %s1064_s13 = sadd.s32 4294967295, %s1412_s12   ;;  %p1066_p0 = scmp.ge.s32.totalorder %s1412_s12, 1  ;;  %s1412_s12 = sphi %s1438_s12, %s15_s12  }
   0x3   : > { %p114_p1 = scmp.lt.s32.totalorder %s1412_s12, 4  ;;  %s1414_s14 = smov [#allocation2]  }
   0x4   : > { %s126_s15 = sshll.u32 %s1414_s14, 4  ;;  %p1452_p3 = scmp.eq.s32.totalorder %s1064_s13, 0  ;;  %s127_s15 = int_to_ptr.vmem [resolvable:$true] %s126_s15 }
   0x5   : > { %p1446_p2 = pnand %p1066_p0, %p114_p1  ;;  %s1415_s18 = smov [#allocation4]  }
   0x6   : > { %s140_s19 = sshll.u32 %s1415_s18, 4  ;;  %s1357_s21 = scalar_lea.vmem %s127_s15, 256  ;;  %s141_s19 = int_to_ptr.vmem [resolvable:$true] %s140_s19 }
   0x7   : > { %p1323_p4 = pneg %p1446_p2  ;;  %p1358_p7 = scmp.ne.s32.totalorder %s127_s15, %s1357_s21 }
   0x8   : > { %p1365_p10 = scmp.lt.s32.totalorder %s127_s15, %s127_s15  ;;  %p1366_p11 = scmp.lt.s32.totalorder %s1357_s21, %s1357_s21 }
   0x9   : > { %p1460_p5 = pnand %p1452_p3, %p1323_p4 }
   0xa   : > { %p1367_p12 = por %p1366_p11, %p1365_p10 }
   0xb   : > { %p1348_p6 = pneg %p1460_p5 }
   0xd   : > { %p1360_p8 = pnand %p1358_p7, %p1348_p6 }
   0xf   : > { %p1361_p9 = pneg %p1360_p8 }
  0x11   : > { %p1368_p13 = pnand %p1367_p12, %p1361_p9 }
  0x13   : > { %1371 = shalt.err (!%p1368_p13)
}
  0x14   : > { %s1416_s22 = smov 128   ;;  %s1417_s23 = smov 8  }
  0x15   : > { %1326 = dma.hbm_to_vmem [thread:$0]  (!%p1460_p5), %s1837_s1, 256, %s127_s15, [#allocation3], %s1416_s22, %s1416_s22, %s1417_s23  }
  0x16   : > { %s1383_s26 = scalar_lea.vmem %s141_s19, 16  ;;  %s1390_s27 = scalar_lea.vmem %s141_s19, 32 }
  0x17   : > { %p1384_p0 = scmp.ne.s32.totalorder %s141_s19, %s1383_s26  ;;  %p1391_p7 = scmp.lt.s32.totalorder %s141_s19, %s141_s19 }
  0x18   : > { %p1392_p8 = scmp.lt.s32.totalorder %s1390_s27, %s1383_s26 }
  0x19   : > { %p1386_p1 = pnand %p1384_p0, %p1348_p6 }
  0x1a   : > { %p1393_p9 = por %p1392_p8, %p1391_p7 }
  0x1b   : > { %p1387_p4 = pneg %p1386_p1 }
  0x1d   : > { %p1394_p10 = pnand %p1393_p9, %p1387_p4 }
  0x1f   : > { %1397 = shalt.err (!%p1394_p10)
}
  0x20   : > { %1329 = dma.hbm_to_vmem [thread:$0]  (!%p1460_p5), %s1838_s2, 16, %s141_s19, [#allocation5]  }
  0x21   : > { %162 = sbr.rel (%p1446_p2) target bundleno = 310 (0x136), region = 32 }
  0x26   : > { %1403 = dma.done.wait (%p1452_p3), [#allocation3], 256  }
  0x27   : > { %1405 = vsyncadd (%p1452_p3), [#allocation3], 4294967040 }
  0x28   : > { %1407 = dma.done.wait (%p1452_p3), [#allocation5], 16  }
  0x29   : > { %1409 = vsyncadd (%p1452_p3), [#allocation5], 4294967280  ;;  %s1073_s30 = sshll.u32 %s1064_s13, 6  ;;  %vm468_vm0 = vcmask 1040384   ;;  %v267_v0 = vld [vmem:[#allocation2 + $0x8] sm:$0x1] }
  0x2a   : > { %p191_p6 = scmp.lt.s32.totalorder %s1073_s30, 191  ;;  %v266_v1 = vld [vmem:[#allocation2] sm:$0xff]  ;;  %1211 = vmatprep.subr.msk.mxu0 %vm468_vm0, %v267_v0  ;;  %1311 = vmatprep.subr.msk.mxu1 %vm468_vm0, %v267_v0  ;;  %vm275_vm1 = vcmask 72704   ;;  %vm921_vm2 = vcmask 261120  }
  0x2b   : > { %1212 = vmatpush3.msk.msra.mxu0 %vm468_vm0, %v267_v0  ;;  %1313 = vmatpush3.msk.msra.mxu1 %vm468_vm0, %v267_v0 }
  0x2c   : > { %s1844_s30 = smov (!%p191_p6, %s1073_s30), 191  ;;  %1213 = vmatprep.subr.mxu0 %v266_v1  ;;  %1312 = vmatprep.subr.mxu1 %v266_v1 }
  0x2d   : > { %s1074_s4 = sshll.u32 %s1844_s30, 3  ;;  %1214 = vmatpush3.msra.mxu0 %v266_v1  ;;  %1314 = vmatpush3.msra.mxu1 %v266_v1 }
  0x2e   : > { %s1502_s7 = scalar_lea.vmem %s1836_s0, %s1074_s4  ;;  %s1641_s10 = scalar_lea.vmem %s1839_s3, %s1074_s4 }
  0x2f   : > { %v202_v2 = vld [vmem:[%s1502_s7] sm:$0xff]  ;;  %v203_v4 = vld [vmem:[%s1502_s7 + $0x8] sm:$0xff]  ;;  %v204_v6 = vld [vmem:[%s1502_s7 + $0x10] sm:$0xff] }
  0x30   : > { %v234_v3 = vld [vmem:[%s1502_s7 + $0x100] sm:$0xff]  ;;  %v235_v5 = vld [vmem:[%s1502_s7 + $0x108] sm:$0xff]  ;;  %v236_v7 = vld [vmem:[%s1502_s7 + $0x110] sm:$0xff]  ;;  %1215 = vmatprep.mubr.msk.f32.mxu0 %vm275_vm1, %v202_v2 }
  0x31   : > { %1263 = vmatprep.mubr.msk.f32.mxu1 %vm275_vm1, %v234_v3  ;;  %1216 = vmatmul.mubr.msk.f32.vlgmr.msra.gmra.mxu0 %vm275_vm1, %v203_v4  ;;  %v205_v8 = vld [vmem:[%s1502_s7 + $0x18] sm:$0xff]  ;;  %v206_v10 = vld [vmem:[%s1502_s7 + $0x20] sm:$0xff]  ;;  %v207_v12 = vld [vmem:[%s1502_s7 + $0x28] sm:$0xff] }
  0x32   : > { %1264 = vmatmul.mubr.msk.f32.vlgmr.msra.gmra.mxu1 %vm275_vm1, %v235_v5  ;;  %1218 = vmatprep.mubr.msk.f32.mxu0 %vm275_vm1, %v204_v6  ;;  %v237_v9 = vld [vmem:[%s1502_s7 + $0x118] sm:$0xff]  ;;  %v238_v11 = vld [vmem:[%s1502_s7 + $0x120] sm:$0xff]  ;;  %v239_v13 = vld [vmem:[%s1502_s7 + $0x128] sm:$0xff] }
  0x33   : > { %1266 = vmatprep.mubr.msk.f32.mxu1 %vm275_vm1, %v236_v7  ;;  %v208_v14 = vld [vmem:[%s1502_s7 + $0x30] sm:$0xff]  ;;  %v209_v16 = vld [vmem:[%s1502_s7 + $0x38] sm:$0xff]  ;;  %v210_v18 = vld [vmem:[%s1502_s7 + $0x40] sm:$0xff] }
  0x34   : > { %v240_v15 = vld [vmem:[%s1502_s7 + $0x130] sm:$0xff]  ;;  %v241_v17 = vld [vmem:[%s1502_s7 + $0x138] sm:$0xff]  ;;  %v242_v19 = vld [vmem:[%s1502_s7 + $0x140] sm:$0xff] }
  0x35   : > { %1219 = vmatmul.mubr.msk.f32.gmra.mxu0 %vm275_vm1, %v205_v8  ;;  %v211_v20 = vld [vmem:[%s1502_s7 + $0x48] sm:$0xff]  ;;  %v212_v22 = vld [vmem:[%s1502_s7 + $0x50] sm:$0xff]  ;;  %v213_v24 = vld [vmem:[%s1502_s7 + $0x58] sm:$0xff] }
  0x36   : > { %1267 = vmatmul.mubr.msk.f32.gmra.mxu1 %vm275_vm1, %v237_v9  ;;  %1221 = vmatprep.mubr.msk.f32.mxu0 %vm275_vm1, %v206_v10  ;;  %v243_v21 = vld [vmem:[%s1502_s7 + $0x148] sm:$0xff]  ;;  %v244_v23 = vld [vmem:[%s1502_s7 + $0x150] sm:$0xff]  ;;  %v245_v25 = vld [vmem:[%s1502_s7 + $0x158] sm:$0xff] }
  0x37   : > { %1269 = vmatprep.mubr.msk.f32.mxu1 %vm275_vm1, %v238_v11  ;;  %v214_v26 = vld [vmem:[%s1502_s7 + $0x60] sm:$0xff]  ;;  %v215_v28 = vld [vmem:[%s1502_s7 + $0x68] sm:$0xff]  ;;  %v216_v30 = vld [vmem:[%s1502_s7 + $0x70] sm:$0xff] }
  0x38   : > { %v246_v27 = vld [vmem:[%s1502_s7 + $0x160] sm:$0xff]  ;;  %v247_v29 = vld [vmem:[%s1502_s7 + $0x168] sm:$0xff]  ;;  %v248_v31 = vld [vmem:[%s1502_s7 + $0x170] sm:$0xff] }
  0x39   : > { %1222 = vmatmul.mubr.msk.f32.gmra.mxu0 %vm275_vm1, %v207_v12  ;;  %v217_v32 = vld [vmem:[%s1502_s7 + $0x78] sm:$0xff]  ;;  %v218_v34 = vld [vmem:[%s1502_s7 + $0x80] sm:$0xff]  ;;  %v219_v36 = vld [vmem:[%s1502_s7 + $0x88] sm:$0xff] }
  0x3a   : > { %1270 = vmatmul.mubr.msk.f32.gmra.mxu1 %vm275_vm1, %v239_v13  ;;  %1224 = vmatprep.mubr.msk.f32.mxu0 %vm275_vm1, %v208_v14  ;;  %v249_v33 = vld [vmem:[%s1502_s7 + $0x178] sm:$0xff]  ;;  %v250_v35 = vld [vmem:[%s1502_s7 + $0x180] sm:$0xff]  ;;  %v251_v37 = vld [vmem:[%s1502_s7 + $0x188] sm:$0xff] }
  0x3b   : > { %1272 = vmatprep.mubr.msk.f32.mxu1 %vm275_vm1, %v240_v15  ;;  %v220_v38 = vld [vmem:[%s1502_s7 + $0x90] sm:$0xff]  ;;  %v221_v40 = vld [vmem:[%s1502_s7 + $0x98] sm:$0xff]  ;;  %v222_v42 = vld [vmem:[%s1502_s7 + $0xa0] sm:$0xff] }
  0x3c   : > { %v252_v39 = vld [vmem:[%s1502_s7 + $0x190] sm:$0xff]  ;;  %v253_v41 = vld [vmem:[%s1502_s7 + $0x198] sm:$0xff]  ;;  %v254_v43 = vld [vmem:[%s1502_s7 + $0x1a0] sm:$0xff] }
  0x3d   : > { %1225 = vmatmul.mubr.msk.f32.gmra.mxu0 %vm275_vm1, %v209_v16  ;;  %v223_v44 = vld [vmem:[%s1502_s7 + $0xa8] sm:$0xff]  ;;  %v224_v46 = vld [vmem:[%s1502_s7 + $0xb0] sm:$0xff]  ;;  %v225_v48 = vld [vmem:[%s1502_s7 + $0xb8] sm:$0xff] }
  0x3e   : > { %1273 = vmatmul.mubr.msk.f32.gmra.mxu1 %vm275_vm1, %v241_v17  ;;  %1227 = vmatprep.mubr.msk.f32.mxu0 %vm275_vm1, %v210_v18  ;;  %v255_v45 = vld [vmem:[%s1502_s7 + $0x1a8] sm:$0xff]  ;;  %v256_v47 = vld [vmem:[%s1502_s7 + $0x1b0] sm:$0xff]  ;;  %v257_v49 = vld [vmem:[%s1502_s7 + $0x1b8] sm:$0xff] }
  0x3f   : > { %1275 = vmatprep.mubr.msk.f32.mxu1 %vm275_vm1, %v242_v19  ;;  %v226_v50 = vld [vmem:[%s1502_s7 + $0xc0] sm:$0xff]  ;;  %v227_v52 = vld [vmem:[%s1502_s7 + $0xc8] sm:$0xff]  ;;  %v228_v54 = vld [vmem:[%s1502_s7 + $0xd0] sm:$0xff] }
  0x40   : > { %v258_v51 = vld [vmem:[%s1502_s7 + $0x1c0] sm:$0xff]  ;;  %v259_v53 = vld [vmem:[%s1502_s7 + $0x1c8] sm:$0xff]  ;;  %v260_v55 = vld [vmem:[%s1502_s7 + $0x1d0] sm:$0xff] }
  0x41   : > { %1228 = vmatmul.mubr.msk.f32.gmra.mxu0 %vm275_vm1, %v211_v20  ;;  %v229_v56 = vld [vmem:[%s1502_s7 + $0xd8] sm:$0xff]  ;;  %v230_v58 = vld [vmem:[%s1502_s7 + $0xe0] sm:$0xff]  ;;  %v231_v60 = vld [vmem:[%s1502_s7 + $0xe8] sm:$0xff] }
  0x42   : > { %1276 = vmatmul.mubr.msk.f32.gmra.mxu1 %vm275_vm1, %v243_v21  ;;  %1230 = vmatprep.mubr.msk.f32.mxu0 %vm275_vm1, %v212_v22  ;;  %v261_v57 = vld [vmem:[%s1502_s7 + $0x1d8] sm:$0xff]  ;;  %v262_v59 = vld [vmem:[%s1502_s7 + $0x1e0] sm:$0xff]  ;;  %v263_v61 = vld [vmem:[%s1502_s7 + $0x1e8] sm:$0xff] }
  0x43   : > { %1278 = vmatprep.mubr.msk.f32.mxu1 %vm275_vm1, %v244_v23  ;;  %v232_v62 = vld [vmem:[%s1502_s7 + $0xf0] sm:$0xff]  ;;  %v233_v0 = vld [vmem:[%s1502_s7 + $0xf8] sm:$0xff] }
  0x44   : > { %v264_v63 = vld [vmem:[%s1502_s7 + $0x1f0] sm:$0xff]  ;;  %v265_v1 = vld [vmem:[%s1502_s7 + $0x1f8] sm:$0xff] }
  0x45   : > { %1231 = vmatmul.mubr.msk.f32.gmra.mxu0 %vm275_vm1, %v213_v24  ;;  %v1632_v2 = vld [vmem:[#allocation4] ss:$0 sm:$0xff] }
  0x46   : > { %1279 = vmatmul.mubr.msk.f32.gmra.mxu1 %vm275_vm1, %v245_v25  ;;  %1233 = vmatprep.mubr.msk.f32.mxu0 %vm275_vm1, %v214_v26 }
  0x47   : > { %1281 = vmatprep.mubr.msk.f32.mxu1 %vm275_vm1, %v246_v27 }
  0x49   : > { %1234 = vmatmul.mubr.msk.f32.gmra.mxu0 %vm275_vm1, %v215_v28 }
  0x4a   : > { %1282 = vmatmul.mubr.msk.f32.gmra.mxu1 %vm275_vm1, %v247_v29  ;;  %1236 = vmatprep.mubr.msk.f32.mxu0 %vm275_vm1, %v216_v30 }
  0x4b   : > { %1284 = vmatprep.mubr.msk.f32.mxu1 %vm275_vm1, %v248_v31 }
  0x4d   : > { %1237 = vmatmul.mubr.msk.f32.gmra.mxu0 %vm275_vm1, %v217_v32 }
  0x4e   : > { %1285 = vmatmul.mubr.msk.f32.gmra.mxu1 %vm275_vm1, %v249_v33  ;;  %1239 = vmatprep.mubr.msk.f32.mxu0 %vm275_vm1, %v218_v34 }
  0x4f   : > { %1287 = vmatprep.mubr.msk.f32.mxu1 %vm275_vm1, %v250_v35 }
  0x51   : > { %1240 = vmatmul.mubr.msk.f32.gmra.mxu0 %vm275_vm1, %v219_v36 }
  0x52   : > { %1288 = vmatmul.mubr.msk.f32.gmra.mxu1 %vm275_vm1, %v251_v37  ;;  %1242 = vmatprep.mubr.msk.f32.mxu0 %vm275_vm1, %v220_v38 }
  0x53   : > { %1290 = vmatprep.mubr.msk.f32.mxu1 %vm275_vm1, %v252_v39 }
  0x55   : > { %1243 = vmatmul.mubr.msk.f32.gmra.mxu0 %vm275_vm1, %v221_v40 }
  0x56   : > { %1291 = vmatmul.mubr.msk.f32.gmra.mxu1 %vm275_vm1, %v253_v41  ;;  %1245 = vmatprep.mubr.msk.f32.mxu0 %vm275_vm1, %v222_v42 }
  0x57   : > { %1293 = vmatprep.mubr.msk.f32.mxu1 %vm275_vm1, %v254_v43 }
  0x59   : > { %1246 = vmatmul.mubr.msk.f32.gmra.mxu0 %vm275_vm1, %v223_v44 }
  0x5a   : > { %1294 = vmatmul.mubr.msk.f32.gmra.mxu1 %vm275_vm1, %v255_v45  ;;  %1248 = vmatprep.mubr.msk.f32.mxu0 %vm275_vm1, %v224_v46 }
  0x5b   : > { %1296 = vmatprep.mubr.msk.f32.mxu1 %vm275_vm1, %v256_v47 }
  0x5d   : > { %1249 = vmatmul.mubr.msk.f32.gmra.mxu0 %vm275_vm1, %v225_v48 }
  0x5e   : > { %1297 = vmatmul.mubr.msk.f32.gmra.mxu1 %vm275_vm1, %v257_v49  ;;  %1251 = vmatprep.mubr.msk.f32.mxu0 %vm275_vm1, %v226_v50 }
  0x5f   : > { %1299 = vmatprep.mubr.msk.f32.mxu1 %vm275_vm1, %v258_v51 }
  0x61   : > { %1252 = vmatmul.mubr.msk.f32.gmra.mxu0 %vm275_vm1, %v227_v52 }
  0x62   : > { %1300 = vmatmul.mubr.msk.f32.gmra.mxu1 %vm275_vm1, %v259_v53  ;;  %1254 = vmatprep.mubr.msk.f32.mxu0 %vm275_vm1, %v228_v54 }
  0x63   : > { %1302 = vmatprep.mubr.msk.f32.mxu1 %vm275_vm1, %v260_v55 }
  0x65   : > { %1255 = vmatmul.mubr.msk.f32.gmra.mxu0 %vm275_vm1, %v229_v56 }
  0x66   : > { %1303 = vmatmul.mubr.msk.f32.gmra.mxu1 %vm275_vm1, %v261_v57  ;;  %1257 = vmatprep.mubr.msk.f32.mxu0 %vm275_vm1, %v230_v58 }
  0x67   : > { %1305 = vmatprep.mubr.msk.f32.mxu1 %vm275_vm1, %v262_v59 }
  0x69   : > { %1258 = vmatmul.mubr.msk.f32.gmra.mxu0 %vm275_vm1, %v231_v60 }
  0x6a   : > { %1306 = vmatmul.mubr.msk.f32.gmra.mxu1 %vm275_vm1, %v263_v61  ;;  %1260 = vmatprep.mubr.msk.f32.mxu0 %vm275_vm1, %v232_v62 }
  0x6b   : > { %1308 = vmatprep.mubr.msk.f32.mxu1 %vm275_vm1, %v264_v63 }
  0x6d   : > { %1261 = vmatmul.mubr.msk.f32.gmra.mxu0 %vm275_vm1, %v233_v0 }
  0x6e   : > { %1309 = vmatmul.mubr.msk.f32.gmra.mxu1 %vm275_vm1, %v265_v1 }
  0xf1   : > { %v1217_v3 = vpop.f32.mrf.mxu0 }
  0xf2   : > { %v1265_v4 = vpop.f32.mrf.mxu1  ;;  %v544_v5 = vadd.f32 %v1217_v3, %v1632_v2 }
  0xf3   : > { %v704_v6 = vadd.f32 %v1265_v4, %v1632_v2  ;;  %v538_v7 = vpop.f32.mrf.mxu0 }
  0xf4   : > { %v698_v8 = vpop.f32.mrf.mxu1  ;;  %v858_v9 = vmax.f32 %v544_v5, 0.0  ;;  %v539_v11 = vadd.f32 %v1632_v2, %v538_v7 }
  0xf5   : > { %v890_v10 = vmax.f32 %v704_v6, 0.0  ;;  %v699_v12 = vadd.f32 %v1632_v2, %v698_v8  ;;  %v1220_v13 = vpop.f32.mrf.mxu0 }
  0xf6   : > { %v1268_v14 = vpop.f32.mrf.mxu1  ;;  %923 = vst.msk [vmem:[%s1641_s10 + $0x8] sm:$0xff] %vm921_vm2, %v858_v9  ;;  %v857_v15 = vmax.f32 %v539_v11, 0.0  ;;  %v554_v17 = vadd.f32 %v1220_v13, %v1632_v2 }
  0xf7   : > { %955 = vst.msk [vmem:[%s1641_s10 + $0x108] sm:$0xff] %vm921_vm2, %v890_v10  ;;  %v889_v16 = vmax.f32 %v699_v12, 0.0  ;;  %v714_v18 = vadd.f32 %v1268_v14, %v1632_v2  ;;  %v548_v19 = vpop.f32.mrf.mxu0 }
  0xf8   : > { %v708_v20 = vpop.f32.mrf.mxu1  ;;  %922 = vst.msk [vmem:[%s1641_s10] sm:$0xff] %vm921_vm2, %v857_v15  ;;  %v860_v21 = vmax.f32 %v554_v17, 0.0  ;;  %v549_v23 = vadd.f32 %v1632_v2, %v548_v19 }
  0xf9   : > { %954 = vst.msk [vmem:[%s1641_s10 + $0x100] sm:$0xff] %vm921_vm2, %v889_v16  ;;  %v892_v22 = vmax.f32 %v714_v18, 0.0  ;;  %v709_v24 = vadd.f32 %v1632_v2, %v708_v20  ;;  %v1223_v25 = vpop.f32.mrf.mxu0 }
  0xfa   : > { %v1271_v26 = vpop.f32.mrf.mxu1  ;;  %925 = vst.msk [vmem:[%s1641_s10 + $0x18] sm:$0xff] %vm921_vm2, %v860_v21  ;;  %v859_v27 = vmax.f32 %v549_v23, 0.0  ;;  %v564_v29 = vadd.f32 %v1223_v25, %v1632_v2 }
  0xfb   : > { %957 = vst.msk [vmem:[%s1641_s10 + $0x118] sm:$0xff] %vm921_vm2, %v892_v22  ;;  %v891_v28 = vmax.f32 %v709_v24, 0.0  ;;  %v724_v30 = vadd.f32 %v1271_v26, %v1632_v2  ;;  %v558_v31 = vpop.f32.mrf.mxu0 }
  0xfc   : > { %v718_v32 = vpop.f32.mrf.mxu1  ;;  %924 = vst.msk [vmem:[%s1641_s10 + $0x10] sm:$0xff] %vm921_vm2, %v859_v27  ;;  %v862_v33 = vmax.f32 %v564_v29, 0.0  ;;  %v559_v35 = vadd.f32 %v1632_v2, %v558_v31 }
  0xfd   : > { %956 = vst.msk [vmem:[%s1641_s10 + $0x110] sm:$0xff] %vm921_vm2, %v891_v28  ;;  %v894_v34 = vmax.f32 %v724_v30, 0.0  ;;  %v719_v36 = vadd.f32 %v1632_v2, %v718_v32  ;;  %v1226_v37 = vpop.f32.mrf.mxu0 }
  0xfe   : > { %v1274_v38 = vpop.f32.mrf.mxu1  ;;  %927 = vst.msk [vmem:[%s1641_s10 + $0x28] sm:$0xff] %vm921_vm2, %v862_v33  ;;  %v861_v39 = vmax.f32 %v559_v35, 0.0  ;;  %v574_v41 = vadd.f32 %v1226_v37, %v1632_v2 }
  0xff   : > { %959 = vst.msk [vmem:[%s1641_s10 + $0x128] sm:$0xff] %vm921_vm2, %v894_v34  ;;  %v893_v40 = vmax.f32 %v719_v36, 0.0  ;;  %v734_v42 = vadd.f32 %v1274_v38, %v1632_v2  ;;  %v568_v43 = vpop.f32.mrf.mxu0 }
 0x100   : > { %v728_v44 = vpop.f32.mrf.mxu1  ;;  %926 = vst.msk [vmem:[%s1641_s10 + $0x20] sm:$0xff] %vm921_vm2, %v861_v39  ;;  %v864_v45 = vmax.f32 %v574_v41, 0.0  ;;  %v569_v47 = vadd.f32 %v1632_v2, %v568_v43 }
 0x101   : > { %958 = vst.msk [vmem:[%s1641_s10 + $0x120] sm:$0xff] %vm921_vm2, %v893_v40  ;;  %v896_v46 = vmax.f32 %v734_v42, 0.0  ;;  %v729_v48 = vadd.f32 %v1632_v2, %v728_v44  ;;  %v1229_v49 = vpop.f32.mrf.mxu0 }
 0x102   : > { %v1277_v50 = vpop.f32.mrf.mxu1  ;;  %929 = vst.msk [vmem:[%s1641_s10 + $0x38] sm:$0xff] %vm921_vm2, %v864_v45  ;;  %v863_v51 = vmax.f32 %v569_v47, 0.0  ;;  %v584_v53 = vadd.f32 %v1229_v49, %v1632_v2 }
 0x103   : > { %961 = vst.msk [vmem:[%s1641_s10 + $0x138] sm:$0xff] %vm921_vm2, %v896_v46  ;;  %v895_v52 = vmax.f32 %v729_v48, 0.0  ;;  %v744_v54 = vadd.f32 %v1277_v50, %v1632_v2  ;;  %v578_v55 = vpop.f32.mrf.mxu0 }
 0x104   : > { %v738_v56 = vpop.f32.mrf.mxu1  ;;  %928 = vst.msk [vmem:[%s1641_s10 + $0x30] sm:$0xff] %vm921_vm2, %v863_v51  ;;  %v866_v57 = vmax.f32 %v584_v53, 0.0  ;;  %v579_v59 = vadd.f32 %v1632_v2, %v578_v55 }
 0x105   : > { %960 = vst.msk [vmem:[%s1641_s10 + $0x130] sm:$0xff] %vm921_vm2, %v895_v52  ;;  %v898_v58 = vmax.f32 %v744_v54, 0.0  ;;  %v739_v60 = vadd.f32 %v1632_v2, %v738_v56  ;;  %v1232_v61 = vpop.f32.mrf.mxu0 }
 0x106   : > { %v1280_v62 = vpop.f32.mrf.mxu1  ;;  %931 = vst.msk [vmem:[%s1641_s10 + $0x48] sm:$0xff] %vm921_vm2, %v866_v57  ;;  %v865_v63 = vmax.f32 %v579_v59, 0.0  ;;  %v594_v1 = vadd.f32 %v1232_v61, %v1632_v2 }
 0x107   : > { %963 = vst.msk [vmem:[%s1641_s10 + $0x148] sm:$0xff] %vm921_vm2, %v898_v58  ;;  %v897_v0 = vmax.f32 %v739_v60, 0.0  ;;  %v754_v3 = vadd.f32 %v1280_v62, %v1632_v2  ;;  %v588_v4 = vpop.f32.mrf.mxu0 }
 0x108   : > { %v748_v5 = vpop.f32.mrf.mxu1  ;;  %930 = vst.msk [vmem:[%s1641_s10 + $0x40] sm:$0xff] %vm921_vm2, %v865_v63  ;;  %v868_v6 = vmax.f32 %v594_v1, 0.0  ;;  %v589_v8 = vadd.f32 %v1632_v2, %v588_v4 }
 0x109   : > { %962 = vst.msk [vmem:[%s1641_s10 + $0x140] sm:$0xff] %vm921_vm2, %v897_v0  ;;  %v900_v7 = vmax.f32 %v754_v3, 0.0  ;;  %v749_v9 = vadd.f32 %v1632_v2, %v748_v5  ;;  %v1235_v10 = vpop.f32.mrf.mxu0 }
 0x10a   : > { %v1283_v11 = vpop.f32.mrf.mxu1  ;;  %933 = vst.msk [vmem:[%s1641_s10 + $0x58] sm:$0xff] %vm921_vm2, %v868_v6  ;;  %v867_v12 = vmax.f32 %v589_v8, 0.0  ;;  %v604_v14 = vadd.f32 %v1235_v10, %v1632_v2 }
 0x10b   : > { %965 = vst.msk [vmem:[%s1641_s10 + $0x158] sm:$0xff] %vm921_vm2, %v900_v7  ;;  %v899_v13 = vmax.f32 %v749_v9, 0.0  ;;  %v764_v15 = vadd.f32 %v1283_v11, %v1632_v2  ;;  %v598_v16 = vpop.f32.mrf.mxu0 }
 0x10c   : > { %v758_v17 = vpop.f32.mrf.mxu1  ;;  %932 = vst.msk [vmem:[%s1641_s10 + $0x50] sm:$0xff] %vm921_vm2, %v867_v12  ;;  %v870_v18 = vmax.f32 %v604_v14, 0.0  ;;  %v599_v20 = vadd.f32 %v1632_v2, %v598_v16 }
 0x10d   : > { %964 = vst.msk [vmem:[%s1641_s10 + $0x150] sm:$0xff] %vm921_vm2, %v899_v13  ;;  %v902_v19 = vmax.f32 %v764_v15, 0.0  ;;  %v759_v21 = vadd.f32 %v1632_v2, %v758_v17  ;;  %v1238_v22 = vpop.f32.mrf.mxu0 }
 0x10e   : > { %v1286_v23 = vpop.f32.mrf.mxu1  ;;  %935 = vst.msk [vmem:[%s1641_s10 + $0x68] sm:$0xff] %vm921_vm2, %v870_v18  ;;  %v869_v24 = vmax.f32 %v599_v20, 0.0  ;;  %v614_v26 = vadd.f32 %v1238_v22, %v1632_v2 }
 0x10f   : > { %967 = vst.msk [vmem:[%s1641_s10 + $0x168] sm:$0xff] %vm921_vm2, %v902_v19  ;;  %v901_v25 = vmax.f32 %v759_v21, 0.0  ;;  %v774_v27 = vadd.f32 %v1286_v23, %v1632_v2  ;;  %v608_v28 = vpop.f32.mrf.mxu0 }
 0x110   : > { %v768_v29 = vpop.f32.mrf.mxu1  ;;  %934 = vst.msk [vmem:[%s1641_s10 + $0x60] sm:$0xff] %vm921_vm2, %v869_v24  ;;  %v872_v30 = vmax.f32 %v614_v26, 0.0  ;;  %v609_v32 = vadd.f32 %v1632_v2, %v608_v28 }
 0x111   : > { %966 = vst.msk [vmem:[%s1641_s10 + $0x160] sm:$0xff] %vm921_vm2, %v901_v25  ;;  %v904_v31 = vmax.f32 %v774_v27, 0.0  ;;  %v769_v33 = vadd.f32 %v1632_v2, %v768_v29  ;;  %v1241_v34 = vpop.f32.mrf.mxu0 }
 0x112   : > { %v1289_v35 = vpop.f32.mrf.mxu1  ;;  %937 = vst.msk [vmem:[%s1641_s10 + $0x78] sm:$0xff] %vm921_vm2, %v872_v30  ;;  %v871_v36 = vmax.f32 %v609_v32, 0.0  ;;  %v624_v38 = vadd.f32 %v1241_v34, %v1632_v2 }
 0x113   : > { %969 = vst.msk [vmem:[%s1641_s10 + $0x178] sm:$0xff] %vm921_vm2, %v904_v31  ;;  %v903_v37 = vmax.f32 %v769_v33, 0.0  ;;  %v784_v39 = vadd.f32 %v1289_v35, %v1632_v2  ;;  %v618_v40 = vpop.f32.mrf.mxu0 }
 0x114   : > { %v778_v41 = vpop.f32.mrf.mxu1  ;;  %936 = vst.msk [vmem:[%s1641_s10 + $0x70] sm:$0xff] %vm921_vm2, %v871_v36  ;;  %v874_v42 = vmax.f32 %v624_v38, 0.0  ;;  %v619_v44 = vadd.f32 %v1632_v2, %v618_v40 }
 0x115   : > { %968 = vst.msk [vmem:[%s1641_s10 + $0x170] sm:$0xff] %vm921_vm2, %v903_v37  ;;  %v906_v43 = vmax.f32 %v784_v39, 0.0  ;;  %v779_v45 = vadd.f32 %v1632_v2, %v778_v41  ;;  %v1244_v46 = vpop.f32.mrf.mxu0 }
 0x116   : > { %v1292_v47 = vpop.f32.mrf.mxu1  ;;  %939 = vst.msk [vmem:[%s1641_s10 + $0x88] sm:$0xff] %vm921_vm2, %v874_v42  ;;  %v873_v48 = vmax.f32 %v619_v44, 0.0  ;;  %v634_v50 = vadd.f32 %v1244_v46, %v1632_v2 }
 0x117   : > { %971 = vst.msk [vmem:[%s1641_s10 + $0x188] sm:$0xff] %vm921_vm2, %v906_v43  ;;  %v905_v49 = vmax.f32 %v779_v45, 0.0  ;;  %v794_v51 = vadd.f32 %v1292_v47, %v1632_v2  ;;  %v628_v52 = vpop.f32.mrf.mxu0 }
 0x118   : > { %v788_v53 = vpop.f32.mrf.mxu1  ;;  %938 = vst.msk [vmem:[%s1641_s10 + $0x80] sm:$0xff] %vm921_vm2, %v873_v48  ;;  %v876_v54 = vmax.f32 %v634_v50, 0.0  ;;  %v629_v56 = vadd.f32 %v1632_v2, %v628_v52 }
 0x119   : > { %970 = vst.msk [vmem:[%s1641_s10 + $0x180] sm:$0xff] %vm921_vm2, %v905_v49  ;;  %v908_v55 = vmax.f32 %v794_v51, 0.0  ;;  %v789_v57 = vadd.f32 %v1632_v2, %v788_v53  ;;  %v1247_v58 = vpop.f32.mrf.mxu0 }
 0x11a   : > { %v1295_v59 = vpop.f32.mrf.mxu1  ;;  %941 = vst.msk [vmem:[%s1641_s10 + $0x98] sm:$0xff] %vm921_vm2, %v876_v54  ;;  %v875_v60 = vmax.f32 %v629_v56, 0.0  ;;  %v644_v62 = vadd.f32 %v1247_v58, %v1632_v2 }
 0x11b   : > { %973 = vst.msk [vmem:[%s1641_s10 + $0x198] sm:$0xff] %vm921_vm2, %v908_v55  ;;  %v907_v61 = vmax.f32 %v789_v57, 0.0  ;;  %v804_v63 = vadd.f32 %v1295_v59, %v1632_v2  ;;  %v638_v0 = vpop.f32.mrf.mxu0 }
 0x11c   : > { %v798_v1 = vpop.f32.mrf.mxu1  ;;  %940 = vst.msk [vmem:[%s1641_s10 + $0x90] sm:$0xff] %vm921_vm2, %v875_v60  ;;  %v878_v3 = vmax.f32 %v644_v62, 0.0  ;;  %v639_v5 = vadd.f32 %v1632_v2, %v638_v0 }
 0x11d   : > { %972 = vst.msk [vmem:[%s1641_s10 + $0x190] sm:$0xff] %vm921_vm2, %v907_v61  ;;  %v910_v4 = vmax.f32 %v804_v63, 0.0  ;;  %v799_v6 = vadd.f32 %v1632_v2, %v798_v1  ;;  %v1250_v7 = vpop.f32.mrf.mxu0 }
 0x11e   : > { %v1298_v8 = vpop.f32.mrf.mxu1  ;;  %943 = vst.msk [vmem:[%s1641_s10 + $0xa8] sm:$0xff] %vm921_vm2, %v878_v3  ;;  %v877_v9 = vmax.f32 %v639_v5, 0.0  ;;  %v654_v11 = vadd.f32 %v1250_v7, %v1632_v2 }
 0x11f   : > { %975 = vst.msk [vmem:[%s1641_s10 + $0x1a8] sm:$0xff] %vm921_vm2, %v910_v4  ;;  %v909_v10 = vmax.f32 %v799_v6, 0.0  ;;  %v814_v12 = vadd.f32 %v1298_v8, %v1632_v2  ;;  %v648_v13 = vpop.f32.mrf.mxu0 }
 0x120   : > { %v808_v14 = vpop.f32.mrf.mxu1  ;;  %942 = vst.msk [vmem:[%s1641_s10 + $0xa0] sm:$0xff] %vm921_vm2, %v877_v9  ;;  %v880_v15 = vmax.f32 %v654_v11, 0.0  ;;  %v649_v17 = vadd.f32 %v1632_v2, %v648_v13 }
 0x121   : > { %974 = vst.msk [vmem:[%s1641_s10 + $0x1a0] sm:$0xff] %vm921_vm2, %v909_v10  ;;  %v912_v16 = vmax.f32 %v814_v12, 0.0  ;;  %v809_v18 = vadd.f32 %v1632_v2, %v808_v14  ;;  %v1253_v19 = vpop.f32.mrf.mxu0 }
 0x122   : > { %v1301_v20 = vpop.f32.mrf.mxu1  ;;  %945 = vst.msk [vmem:[%s1641_s10 + $0xb8] sm:$0xff] %vm921_vm2, %v880_v15  ;;  %v879_v21 = vmax.f32 %v649_v17, 0.0  ;;  %v664_v23 = vadd.f32 %v1253_v19, %v1632_v2 }
 0x123   : > { %977 = vst.msk [vmem:[%s1641_s10 + $0x1b8] sm:$0xff] %vm921_vm2, %v912_v16  ;;  %v911_v22 = vmax.f32 %v809_v18, 0.0  ;;  %v824_v24 = vadd.f32 %v1301_v20, %v1632_v2  ;;  %v658_v25 = vpop.f32.mrf.mxu0 }
 0x124   : > { %v818_v26 = vpop.f32.mrf.mxu1  ;;  %944 = vst.msk [vmem:[%s1641_s10 + $0xb0] sm:$0xff] %vm921_vm2, %v879_v21  ;;  %v882_v27 = vmax.f32 %v664_v23, 0.0  ;;  %v659_v29 = vadd.f32 %v1632_v2, %v658_v25 }
 0x125   : > { %976 = vst.msk [vmem:[%s1641_s10 + $0x1b0] sm:$0xff] %vm921_vm2, %v911_v22  ;;  %v914_v28 = vmax.f32 %v824_v24, 0.0  ;;  %v819_v30 = vadd.f32 %v1632_v2, %v818_v26  ;;  %v1256_v31 = vpop.f32.mrf.mxu0 }
 0x126   : > { %v1304_v32 = vpop.f32.mrf.mxu1  ;;  %947 = vst.msk [vmem:[%s1641_s10 + $0xc8] sm:$0xff] %vm921_vm2, %v882_v27  ;;  %v881_v33 = vmax.f32 %v659_v29, 0.0  ;;  %v674_v35 = vadd.f32 %v1256_v31, %v1632_v2 }
 0x127   : > { %979 = vst.msk [vmem:[%s1641_s10 + $0x1c8] sm:$0xff] %vm921_vm2, %v914_v28  ;;  %v913_v34 = vmax.f32 %v819_v30, 0.0  ;;  %v834_v36 = vadd.f32 %v1304_v32, %v1632_v2  ;;  %v668_v37 = vpop.f32.mrf.mxu0 }
 0x128   : > { %v828_v38 = vpop.f32.mrf.mxu1  ;;  %946 = vst.msk [vmem:[%s1641_s10 + $0xc0] sm:$0xff] %vm921_vm2, %v881_v33  ;;  %v884_v39 = vmax.f32 %v674_v35, 0.0  ;;  %v669_v41 = vadd.f32 %v1632_v2, %v668_v37 }
 0x129   : > { %978 = vst.msk [vmem:[%s1641_s10 + $0x1c0] sm:$0xff] %vm921_vm2, %v913_v34  ;;  %v916_v40 = vmax.f32 %v834_v36, 0.0  ;;  %v829_v42 = vadd.f32 %v1632_v2, %v828_v38  ;;  %v1259_v43 = vpop.f32.mrf.mxu0 }
 0x12a   : > { %v1307_v44 = vpop.f32.mrf.mxu1  ;;  %949 = vst.msk [vmem:[%s1641_s10 + $0xd8] sm:$0xff] %vm921_vm2, %v884_v39  ;;  %v883_v45 = vmax.f32 %v669_v41, 0.0  ;;  %v684_v47 = vadd.f32 %v1259_v43, %v1632_v2 }
 0x12b   : > { %981 = vst.msk [vmem:[%s1641_s10 + $0x1d8] sm:$0xff] %vm921_vm2, %v916_v40  ;;  %v915_v46 = vmax.f32 %v829_v42, 0.0  ;;  %v844_v48 = vadd.f32 %v1307_v44, %v1632_v2  ;;  %v678_v49 = vpop.f32.mrf.mxu0 }
 0x12c   : > { %v838_v50 = vpop.f32.mrf.mxu1  ;;  %948 = vst.msk [vmem:[%s1641_s10 + $0xd0] sm:$0xff] %vm921_vm2, %v883_v45  ;;  %v886_v51 = vmax.f32 %v684_v47, 0.0  ;;  %v679_v53 = vadd.f32 %v1632_v2, %v678_v49 }
 0x12d   : > { %980 = vst.msk [vmem:[%s1641_s10 + $0x1d0] sm:$0xff] %vm921_vm2, %v915_v46  ;;  %v918_v52 = vmax.f32 %v844_v48, 0.0  ;;  %v839_v54 = vadd.f32 %v1632_v2, %v838_v50  ;;  %v1262_v55 = vpop.f32.mrf.mxu0 }
 0x12e   : > { %v1310_v56 = vpop.f32.mrf.mxu1  ;;  %951 = vst.msk [vmem:[%s1641_s10 + $0xe8] sm:$0xff] %vm921_vm2, %v886_v51  ;;  %v885_v57 = vmax.f32 %v679_v53, 0.0  ;;  %v694_v59 = vadd.f32 %v1262_v55, %v1632_v2 }
 0x12f   : > { %983 = vst.msk [vmem:[%s1641_s10 + $0x1e8] sm:$0xff] %vm921_vm2, %v918_v52  ;;  %v917_v58 = vmax.f32 %v839_v54, 0.0  ;;  %v854_v60 = vadd.f32 %v1310_v56, %v1632_v2  ;;  %v688_v61 = vpop.f32.mrf.mxu0 }
 0x130   : > { %v848_v62 = vpop.f32.mrf.mxu1  ;;  %950 = vst.msk [vmem:[%s1641_s10 + $0xe0] sm:$0xff] %vm921_vm2, %v885_v57  ;;  %v888_v63 = vmax.f32 %v694_v59, 0.0  ;;  %v689_v1 = vadd.f32 %v1632_v2, %v688_v61 }
 0x131   : > { %982 = vst.msk [vmem:[%s1641_s10 + $0x1e0] sm:$0xff] %vm921_vm2, %v917_v58  ;;  %v920_v0 = vmax.f32 %v854_v60, 0.0  ;;  %v849_v3 = vadd.f32 %v1632_v2, %v848_v62 }
 0x132   : > { %953 = vst.msk [vmem:[%s1641_s10 + $0xf8] sm:$0xff] %vm921_vm2, %v888_v63  ;;  %v887_v4 = vmax.f32 %v689_v1, 0.0 }
 0x133   : > { %985 = vst.msk [vmem:[%s1641_s10 + $0x1f8] sm:$0xff] %vm921_vm2, %v920_v0  ;;  %v919_v5 = vmax.f32 %v849_v3, 0.0 }
 0x134   : > { %952 = vst.msk [vmem:[%s1641_s10 + $0xf0] sm:$0xff] %vm921_vm2, %v887_v4 }
 0x135   : > { %984 = vst.msk [vmem:[%s1641_s10 + $0x1f0] sm:$0xff] %vm921_vm2, %v919_v5 }
 0x136 PF: > { %s15_s12 = sadd.s32 1, %s1412_s12  }
 0x137   : > { %p12_p2 = scmp.ge.s32.totalorder %s15_s12, 5  }
 0x139   :  { %14 = sbr.rel (!%p12_p2) target bundleno = 2 (0x2), region = 71 }
 0x13e   :  { %1008 = vsyncpa [#allocation3], 1 }
 0x13f   :  { %1010 = vsyncpa [#allocation3 + $0x1], 1 }
 0x140   :  { %1011 = vsyncpa [#allocation5], 1 }

// kernel: net_forward.5
= control target key start
LH: loop header
LB: loop body
LE: loop exit
PB: predicated region body
PF: predicated region fallthrough
CT: control target
= control target key end

     0   :  { %s1911_s12 = smov 0   ;;  %s2686_s0 = inlined_call_operand.vmem [shape: f32[1536,288], index: 0, kind: input, shape index: {}]   ;;  %s2687_s1 = inlined_call_operand.vmem [shape: f32[288,64], index: 1, kind: input, shape index: {}]   ;;  %s2688_s2 = inlined_call_operand.vmem [shape: f32[1,64], index: 2, kind: input, shape index: {}]   ;;  %s2689_s3 = inlined_call_operand.vmem [shape: f32[1536,64], index: 3, kind: output, shape index: {}]  }
   0x1 LB: > { %s1560_s13 = sadd.s32 4294967295, %s1888_s12   ;;  %p1564_p0 = scmp.ge.s32.totalorder %s1888_s12, 1  ;;  %s1888_s12 = sphi %s1911_s12, %s13_s12  }
   0x2   : > { %p139_p1 = scmp.lt.s32.totalorder %s1888_s12, 4 }
   0x4   : > { %p140_p2 = pnand %p1564_p0, %p139_p1 }
   0x5   : > { %s1565_s8 = sshll.u32 (!%p140_p2), %s1560_s13, 6 }
   0x6   : > { %143 = sbr.rel (%p140_p2) target bundleno = 465 (0x1d1), region = 32  ;;  %p165_p3 = scmp.lt.s32.totalorder (!%p140_p2), %s1565_s8, 191 }
   0xb   : > { %v384_v0 = vld [vmem:[%s2687_s1 + $0x78] sm:$0xff]  ;;  %v1890_v1 = vmov 0.0   ;;  %v383_v2 = vld [vmem:[%s2687_s1 + $0x70] sm:$0xff]  ;;  %v382_v3 = vld [vmem:[%s2687_s1 + $0x68] sm:$0xff]  ;;  %s2691_s8 = smov (!%p165_p3, %s1565_s8), 191  ;;  %vm412_vm0 = vcmask 261120  }
   0xc   : > { %605 = vmatprep.subr.mxu0 %v1890_v1  ;;  %1808 = vmatprep.subr.mxu1 %v1890_v1  ;;  %v381_v4 = vld [vmem:[%s2687_s1 + $0x60] sm:$0xff]  ;;  %v380_v5 = vld [vmem:[%s2687_s1 + $0x58] sm:$0xff]  ;;  %v379_v6 = vld [vmem:[%s2687_s1 + $0x50] sm:$0xff]  ;;  %s1872_s22 = smul.u32 24, %s2691_s8  ;;  %s1568_s17 = sshll.u32 %s2691_s8, 3  ;;  %vm1439_vm1 = vcmask 523264  }
   0xd   : > { %606 = vmatpush1.msra.mxu0 %v384_v0  ;;  %1840 = vmatpush1.msra.mxu1 %v384_v0  ;;  %v378_v7 = vld [vmem:[%s2687_s1 + $0x48] sm:$0xff]  ;;  %v377_v8 = vld [vmem:[%s2687_s1 + $0x40] sm:$0xff]  ;;  %v376_v9 = vld [vmem:[%s2687_s1 + $0x38] sm:$0xff]  ;;  %s2433_s20 = scalar_lea.vmem %s2689_s3, %s1568_s17 }
   0xe   : > { %607 = vmatprep.subr.mxu0 %v1890_v1  ;;  %1809 = vmatprep.subr.mxu1 %v1890_v1  ;;  %v375_v10 = vld [vmem:[%s2687_s1 + $0x30] sm:$0xff]  ;;  %v374_v11 = vld [vmem:[%s2687_s1 + $0x28] sm:$0xff]  ;;  %v373_v12 = vld [vmem:[%s2687_s1 + $0x20] sm:$0xff]  ;;  %s2080_s29 = scalar_lea.vmem %s2686_s0, %s1872_s22 }
   0xf   : > { %608 = vmatpush1.msra.mxu0 %v383_v2  ;;  %1841 = vmatpush1.msra.mxu1 %v383_v2  ;;  %v372_v13 = vld [vmem:[%s2687_s1 + $0x18] sm:$0xff]  ;;  %v371_v14 = vld [vmem:[%s2687_s1 + $0x10] sm:$0xff]  ;;  %v370_v15 = vld [vmem:[%s2687_s1 + $0x8] sm:$0xff] }
  0x10   : > { %609 = vmatprep.subr.mxu0 %v1890_v1  ;;  %1810 = vmatprep.subr.mxu1 %v1890_v1  ;;  %v369_v16 = vld [vmem:[%s2687_s1] sm:$0xff]  ;;  %v400_v17 = vld [vmem:[%s2687_s1 + $0xf8] sm:$0xff]  ;;  %v399_v18 = vld [vmem:[%s2687_s1 + $0xf0] sm:$0xff] }
  0x11   : > { %610 = vmatpush1.msra.mxu0 %v382_v3  ;;  %1842 = vmatpush1.msra.mxu1 %v382_v3  ;;  %v398_v19 = vld [vmem:[%s2687_s1 + $0xe8] sm:$0xff]  ;;  %v397_v20 = vld [vmem:[%s2687_s1 + $0xe0] sm:$0xff]  ;;  %v396_v21 = vld [vmem:[%s2687_s1 + $0xd8] sm:$0xff] }
  0x12   : > { %611 = vmatprep.subr.mxu0 %v1890_v1  ;;  %1811 = vmatprep.subr.mxu1 %v1890_v1  ;;  %v395_v22 = vld [vmem:[%s2687_s1 + $0xd0] sm:$0xff]  ;;  %v394_v23 = vld [vmem:[%s2687_s1 + $0xc8] sm:$0xff]  ;;  %v393_v24 = vld [vmem:[%s2687_s1 + $0xc0] sm:$0xff] }
  0x13   : > { %612 = vmatpush1.msra.mxu0 %v381_v4  ;;  %1843 = vmatpush1.msra.mxu1 %v381_v4  ;;  %v392_v25 = vld [vmem:[%s2687_s1 + $0xb8] sm:$0xff]  ;;  %v391_v26 = vld [vmem:[%s2687_s1 + $0xb0] sm:$0xff]  ;;  %v390_v27 = vld [vmem:[%s2687_s1 + $0xa8] sm:$0xff] }
  0x14   : > { %613 = vmatprep.subr.mxu0 %v1890_v1  ;;  %1812 = vmatprep.subr.mxu1 %v1890_v1  ;;  %v389_v28 = vld [vmem:[%s2687_s1 + $0xa0] sm:$0xff]  ;;  %v388_v29 = vld [vmem:[%s2687_s1 + $0x98] sm:$0xff]  ;;  %v387_v30 = vld [vmem:[%s2687_s1 + $0x90] sm:$0xff] }
  0x15   : > { %614 = vmatpush1.msra.mxu0 %v380_v5  ;;  %1844 = vmatpush1.msra.mxu1 %v380_v5  ;;  %v386_v31 = vld [vmem:[%s2687_s1 + $0x88] sm:$0xff]  ;;  %v385_v32 = vld [vmem:[%s2687_s1 + $0x80] sm:$0xff]  ;;  %v404_v37 = vld [vmem:[%s2687_s1 + $0x118] sm:$0xff] }
  0x16   : > { %615 = vmatprep.subr.mxu0 %v1890_v1  ;;  %1813 = vmatprep.subr.mxu1 %v1890_v1  ;;  %v178_v33 = vld [vmem:[%s2080_s29 + $0x8] sm:$0xff]  ;;  %v177_v35 = vld [vmem:[%s2080_s29] sm:$0xff]  ;;  %v403_v40 = vld [vmem:[%s2687_s1 + $0x110] sm:$0xff] }
  0x17   : > { %616 = vmatpush1.msra.mxu0 %v379_v6  ;;  %1845 = vmatpush1.msra.mxu1 %v379_v6  ;;  %v322_v34 = vld [vmem:[%s2080_s29 + $0x488] sm:$0xff]  ;;  %v321_v36 = vld [vmem:[%s2080_s29 + $0x480] sm:$0xff]  ;;  %v180_v41 = vld [vmem:[%s2080_s29 + $0x18] sm:$0xff] }
  0x18   : > { %617 = vmatprep.subr.mxu0 %v1890_v1  ;;  %1814 = vmatprep.subr.mxu1 %v1890_v1  ;;  %v181_v38 = vld [vmem:[%s2080_s29 + $0x20] sm:$0xff]  ;;  %v324_v42 = vld [vmem:[%s2080_s29 + $0x498] sm:$0xff]  ;;  %v402_v45 = vld [vmem:[%s2687_s1 + $0x108] sm:$0xff] }
  0x19   : > { %618 = vmatpush1.msra.mxu0 %v378_v7  ;;  %1846 = vmatpush1.msra.mxu1 %v378_v7  ;;  %v325_v39 = vld [vmem:[%s2080_s29 + $0x4a0] sm:$0xff]  ;;  %v184_v43 = vld [vmem:[%s2080_s29 + $0x38] sm:$0xff]  ;;  %v183_v46 = vld [vmem:[%s2080_s29 + $0x30] sm:$0xff] }
  0x1a   : > { %619 = vmatprep.subr.mxu0 %v1890_v1  ;;  %1815 = vmatprep.subr.mxu1 %v1890_v1  ;;  %v328_v44 = vld [vmem:[%s2080_s29 + $0x4b8] sm:$0xff]  ;;  %v327_v47 = vld [vmem:[%s2080_s29 + $0x4b0] sm:$0xff]  ;;  %v401_v50 = vld [vmem:[%s2687_s1 + $0x100] sm:$0xff] }
  0x1b   : > { %620 = vmatpush1.msra.mxu0 %v377_v8  ;;  %1847 = vmatpush1.msra.mxu1 %v377_v8  ;;  %v187_v48 = vld [vmem:[%s2080_s29 + $0x50] sm:$0xff]  ;;  %v186_v51 = vld [vmem:[%s2080_s29 + $0x48] sm:$0xff]  ;;  %v189_v55 = vld [vmem:[%s2080_s29 + $0x60] sm:$0xff] }
  0x1c   : > { %621 = vmatprep.subr.mxu0 %v1890_v1  ;;  %1816 = vmatprep.subr.mxu1 %v1890_v1  ;;  %v331_v49 = vld [vmem:[%s2080_s29 + $0x4d0] sm:$0xff]  ;;  %v330_v52 = vld [vmem:[%s2080_s29 + $0x4c8] sm:$0xff]  ;;  %v333_v56 = vld [vmem:[%s2080_s29 + $0x4e0] sm:$0xff] }
  0x1d   : > { %622 = vmatpush1.msra.mxu0 %v376_v9  ;;  %1848 = vmatpush1.msra.mxu1 %v376_v9  ;;  %v190_v53 = vld [vmem:[%s2080_s29 + $0x68] sm:$0xff]  ;;  %v193_v57 = vld [vmem:[%s2080_s29 + $0x80] sm:$0xff]  ;;  %v192_v59 = vld [vmem:[%s2080_s29 + $0x78] sm:$0xff] }
  0x1e   : > { %623 = vmatprep.subr.mxu0 %v1890_v1  ;;  %1817 = vmatprep.subr.mxu1 %v1890_v1  ;;  %v334_v54 = vld [vmem:[%s2080_s29 + $0x4e8] sm:$0xff]  ;;  %v337_v58 = vld [vmem:[%s2080_s29 + $0x500] sm:$0xff]  ;;  %v336_v60 = vld [vmem:[%s2080_s29 + $0x4f8] sm:$0xff] }
  0x1f   : > { %624 = vmatpush1.msra.mxu0 %v375_v10  ;;  %1849 = vmatpush1.msra.mxu1 %v375_v10  ;;  %v196_v61 = vld [vmem:[%s2080_s29 + $0x98] sm:$0xff]  ;;  %v195_v63 = vld [vmem:[%s2080_s29 + $0x90] sm:$0xff]  ;;  %v198_v3 = vld [vmem:[%s2080_s29 + $0xa8] sm:$0xff] }
  0x20   : > { %625 = vmatprep.subr.mxu0 %v1890_v1  ;;  %1818 = vmatprep.subr.mxu1 %v1890_v1  ;;  %v340_v62 = vld [vmem:[%s2080_s29 + $0x518] sm:$0xff]  ;;  %v339_v0 = vld [vmem:[%s2080_s29 + $0x510] sm:$0xff]  ;;  %v342_v4 = vld [vmem:[%s2080_s29 + $0x528] sm:$0xff] }
  0x21   : > { %626 = vmatpush1.msra.mxu0 %v374_v11  ;;  %1850 = vmatpush1.msra.mxu1 %v374_v11  ;;  %v343_v2 = vld [vmem:[%s2080_s29 + $0x530] sm:$0xff]  ;;  %v202_v5 = vld [vmem:[%s2080_s29 + $0xc8] sm:$0xff]  ;;  %v201_v7 = vld [vmem:[%s2080_s29 + $0xc0] sm:$0xff] }
  0x22   : > { %627 = vmatprep.subr.mxu0 %v1890_v1  ;;  %1819 = vmatprep.subr.mxu1 %v1890_v1  ;;  %v346_v6 = vld [vmem:[%s2080_s29 + $0x548] sm:$0xff]  ;;  %v345_v8 = vld [vmem:[%s2080_s29 + $0x540] sm:$0xff]  ;;  %v204_v11 = vld [vmem:[%s2080_s29 + $0xd8] sm:$0xff] }
  0x23   : > { %628 = vmatpush1.msra.mxu0 %v373_v12  ;;  %1851 = vmatpush1.msra.mxu1 %v373_v12  ;;  %v205_v9 = vld [vmem:[%s2080_s29 + $0xe0] sm:$0xff]  ;;  %v348_v12 = vld [vmem:[%s2080_s29 + $0x558] sm:$0xff] }
  0x24   : > { %629 = vmatprep.subr.mxu0 %v1890_v1  ;;  %1820 = vmatprep.subr.mxu1 %v1890_v1  ;;  %v349_v10 = vld [vmem:[%s2080_s29 + $0x560] sm:$0xff] }
  0x25   : > { %630 = vmatpush1.msra.mxu0 %v372_v13  ;;  %1852 = vmatpush1.msra.mxu1 %v372_v13  ;;  %v208_v13 = vld [vmem:[%s2080_s29 + $0xf8] sm:$0xff] }
  0x26   : > { %631 = vmatprep.subr.mxu0 %v1890_v1  ;;  %1821 = vmatprep.subr.mxu1 %v1890_v1 }
  0x27   : > { %632 = vmatpush1.msra.mxu0 %v371_v14  ;;  %1853 = vmatpush1.msra.mxu1 %v371_v14  ;;  %v352_v14 = vld [vmem:[%s2080_s29 + $0x578] sm:$0xff] }
  0x28   : > { %633 = vmatprep.subr.mxu0 %v1890_v1  ;;  %1822 = vmatprep.subr.mxu1 %v1890_v1 }
  0x29   : > { %634 = vmatpush1.msra.mxu0 %v370_v15  ;;  %1854 = vmatpush1.msra.mxu1 %v370_v15  ;;  %v207_v15 = vld [vmem:[%s2080_s29 + $0xf0] sm:$0xff] }
  0x2a   : > { %635 = vmatprep.subr.mxu0 %v1890_v1  ;;  %1823 = vmatprep.subr.mxu1 %v1890_v1 }
  0x2b   : > { %636 = vmatpush1.msra.mxu0 %v369_v16  ;;  %1855 = vmatpush1.msra.mxu1 %v369_v16  ;;  %v351_v16 = vld [vmem:[%s2080_s29 + $0x570] sm:$0xff] }
  0x2c   : > { %637 = vmatprep.subr.mxu0 %v1890_v1  ;;  %1824 = vmatprep.subr.mxu1 %v1890_v1 }
  0x2d   : > { %638 = vmatpush2.msra.mxu0 %v400_v17  ;;  %1856 = vmatpush2.msra.mxu1 %v400_v17  ;;  %v211_v17 = vld [vmem:[%s2080_s29 + $0x110] sm:$0xff] }
  0x2e   : > { %639 = vmatprep.subr.mxu0 %v1890_v1  ;;  %1825 = vmatprep.subr.mxu1 %v1890_v1 }
  0x2f   : > { %640 = vmatpush2.msra.mxu0 %v399_v18  ;;  %1857 = vmatpush2.msra.mxu1 %v399_v18  ;;  %v355_v18 = vld [vmem:[%s2080_s29 + $0x590] sm:$0xff] }
  0x30   : > { %641 = vmatprep.subr.mxu0 %v1890_v1  ;;  %1826 = vmatprep.subr.mxu1 %v1890_v1 }
  0x31   : > { %642 = vmatpush2.msra.mxu0 %v398_v19  ;;  %1858 = vmatpush2.msra.mxu1 %v398_v19  ;;  %v210_v19 = vld [vmem:[%s2080_s29 + $0x108] sm:$0xff] }
  0x32   : > { %643 = vmatprep.subr.mxu0 %v1890_v1  ;;  %1827 = vmatprep.subr.mxu1 %v1890_v1 }
  0x33   : > { %644 = vmatpush2.msra.mxu0 %v397_v20  ;;  %1859 = vmatpush2.msra.mxu1 %v397_v20  ;;  %v354_v20 = vld [vmem:[%s2080_s29 + $0x588] sm:$0xff] }
  0x34   : > { %645 = vmatprep.subr.mxu0 %v1890_v1  ;;  %1828 = vmatprep.subr.mxu1 %v1890_v1 }
  0x35   : > { %646 = vmatpush2.msra.mxu0 %v396_v21  ;;  %1860 = vmatpush2.msra.mxu1 %v396_v21  ;;  %v214_v21 = vld [vmem:[%s2080_s29 + $0x128] sm:$0xff] }
  0x36   : > { %647 = vmatprep.subr.mxu0 %v1890_v1  ;;  %1829 = vmatprep.subr.mxu1 %v1890_v1 }
  0x37   : > { %648 = vmatpush2.msra.mxu0 %v395_v22  ;;  %1861 = vmatpush2.msra.mxu1 %v395_v22  ;;  %v358_v22 = vld [vmem:[%s2080_s29 + $0x5a8] sm:$0xff] }
  0x38   : > { %649 = vmatprep.subr.mxu0 %v1890_v1  ;;  %1830 = vmatprep.subr.mxu1 %v1890_v1 }
  0x39   : > { %650 = vmatpush2.msra.mxu0 %v394_v23  ;;  %1862 = vmatpush2.msra.mxu1 %v394_v23  ;;  %v213_v23 = vld [vmem:[%s2080_s29 + $0x120] sm:$0xff] }
  0x3a   : > { %651 = vmatprep.subr.mxu0 %v1890_v1  ;;  %1831 = vmatprep.subr.mxu1 %v1890_v1 }
  0x3b   : > { %652 = vmatpush2.msra.mxu0 %v393_v24  ;;  %1863 = vmatpush2.msra.mxu1 %v393_v24  ;;  %v357_v24 = vld [vmem:[%s2080_s29 + $0x5a0] sm:$0xff] }
  0x3c   : > { %653 = vmatprep.subr.mxu0 %v1890_v1  ;;  %1832 = vmatprep.subr.mxu1 %v1890_v1 }
  0x3d   : > { %654 = vmatpush2.msra.mxu0 %v392_v25  ;;  %1864 = vmatpush2.msra.mxu1 %v392_v25  ;;  %v217_v25 = vld [vmem:[%s2080_s29 + $0x140] sm:$0xff] }
  0x3e   : > { %655 = vmatprep.subr.mxu0 %v1890_v1  ;;  %1833 = vmatprep.subr.mxu1 %v1890_v1 }
  0x3f   : > { %656 = vmatpush2.msra.mxu0 %v391_v26  ;;  %1865 = vmatpush2.msra.mxu1 %v391_v26  ;;  %v361_v26 = vld [vmem:[%s2080_s29 + $0x5c0] sm:$0xff] }
  0x40   : > { %657 = vmatprep.subr.mxu0 %v1890_v1  ;;  %1834 = vmatprep.subr.mxu1 %v1890_v1 }
  0x41   : > { %658 = vmatpush2.msra.mxu0 %v390_v27  ;;  %1866 = vmatpush2.msra.mxu1 %v390_v27  ;;  %v216_v27 = vld [vmem:[%s2080_s29 + $0x138] sm:$0xff] }
  0x42   : > { %659 = vmatprep.subr.mxu0 %v1890_v1  ;;  %1835 = vmatprep.subr.mxu1 %v1890_v1 }
  0x43   : > { %660 = vmatpush2.msra.mxu0 %v389_v28  ;;  %1867 = vmatpush2.msra.mxu1 %v389_v28  ;;  %v360_v28 = vld [vmem:[%s2080_s29 + $0x5b8] sm:$0xff] }
  0x44   : > { %661 = vmatprep.subr.mxu0 %v1890_v1  ;;  %1836 = vmatprep.subr.mxu1 %v1890_v1 }
  0x45   : > { %662 = vmatpush2.msra.mxu0 %v388_v29  ;;  %1868 = vmatpush2.msra.mxu1 %v388_v29  ;;  %v220_v29 = vld [vmem:[%s2080_s29 + $0x158] sm:$0xff] }
  0x46   : > { %663 = vmatprep.subr.mxu0 %v1890_v1  ;;  %1837 = vmatprep.subr.mxu1 %v1890_v1 }
  0x47   : > { %664 = vmatpush2.msra.mxu0 %v387_v30  ;;  %1869 = vmatpush2.msra.mxu1 %v387_v30  ;;  %v364_v30 = vld [vmem:[%s2080_s29 + $0x5d8] sm:$0xff] }
  0x48   : > { %665 = vmatprep.subr.mxu0 %v1890_v1  ;;  %1838 = vmatprep.subr.mxu1 %v1890_v1 }
  0x49   : > { %666 = vmatpush2.msra.mxu0 %v386_v31  ;;  %1870 = vmatpush2.msra.mxu1 %v386_v31  ;;  %v219_v31 = vld [vmem:[%s2080_s29 + $0x150] sm:$0xff] }
  0x4a   : > { %667 = vmatprep.subr.mxu0 %v1890_v1  ;;  %1839 = vmatprep.subr.mxu1 %v1890_v1  ;;  %v199_v1 = vld [vmem:[%s2080_s29 + $0xb0] sm:$0xff] }
  0x4b   : > { %668 = vmatpush2.msra.mxu0 %v385_v32  ;;  %1871 = vmatpush2.msra.mxu1 %v385_v32  ;;  %v363_v32 = vld [vmem:[%s2080_s29 + $0x5d0] sm:$0xff] }
  0x4c   : > { %669 = vmatprep.mubr.f32.mxu0 %v178_v33  ;;  %909 = vmatprep.mubr.f32.mxu1 %v322_v34  ;;  %v223_v33 = vld [vmem:[%s2080_s29 + $0x170] sm:$0xff] }
  0x4d   : > { %670 = vmatmul.mubr.f32.vlgmr.msra.gmra.mxu0 %v177_v35  ;;  %910 = vmatmul.mubr.f32.vlgmr.msra.gmra.mxu1 %v321_v36  ;;  %v367_v34 = vld [vmem:[%s2080_s29 + $0x5f0] sm:$0xff]  ;;  %v222_v35 = vld [vmem:[%s2080_s29 + $0x168] sm:$0xff] }
  0x4e   : > { %1704 = vmatprep.subr.mxu1 %v404_v37  ;;  %674 = vmatprep.mubr.f32.mxu0 %v181_v38  ;;  %v366_v36 = vld [vmem:[%s2080_s29 + $0x5e8] sm:$0xff]  ;;  %v179_v38 = vld [vmem:[%s2080_s29 + $0x10] sm:$0xff] }
  0x4f   : > { %1705 = vmatpush3.msra.mxu1 %v404_v37  ;;  %914 = vmatprep.mubr.f32.mxu1 %v325_v39  ;;  %v226_v37 = vld [vmem:[%s2080_s29 + $0x188] sm:$0xff]  ;;  %v225_v39 = vld [vmem:[%s2080_s29 + $0x180] sm:$0xff] }
  0x50   : > { %1706 = vmatprep.subr.mxu1 %v403_v40 }
  0x51   : > { %675 = vmatmul.mubr.f32.gmra.mxu0 %v180_v41  ;;  %915 = vmatmul.mubr.f32.gmra.mxu1 %v324_v42  ;;  %v229_v41 = vld [vmem:[%s2080_s29 + $0x1a0] sm:$0xff] }
  0x52   : > { %679 = vmatprep.mubr.f32.mxu0 %v184_v43  ;;  %919 = vmatprep.mubr.f32.mxu1 %v328_v44  ;;  %v185_v42 = vld [vmem:[%s2080_s29 + $0x40] sm:$0xff]  ;;  %v228_v43 = vld [vmem:[%s2080_s29 + $0x198] sm:$0xff] }
  0x53   : > { %1707 = vmatpush3.msra.mxu1 %v403_v40  ;;  %v182_v40 = vld [vmem:[%s2080_s29 + $0x28] sm:$0xff]  ;;  %v188_v44 = vld [vmem:[%s2080_s29 + $0x58] sm:$0xff] }
  0x54   : > { %1708 = vmatprep.subr.mxu1 %v402_v45 }
  0x55   : > { %680 = vmatmul.mubr.f32.gmra.mxu0 %v183_v46  ;;  %920 = vmatmul.mubr.f32.gmra.mxu1 %v327_v47  ;;  %v191_v46 = vld [vmem:[%s2080_s29 + $0x70] sm:$0xff] }
  0x56   : > { %684 = vmatprep.mubr.f32.mxu0 %v187_v48  ;;  %924 = vmatprep.mubr.f32.mxu1 %v331_v49  ;;  %v231_v47 = vld [vmem:[%s2080_s29 + $0x1b0] sm:$0xff]  ;;  %v194_v48 = vld [vmem:[%s2080_s29 + $0x88] sm:$0xff] }
  0x57   : > { %1709 = vmatpush3.msra.mxu1 %v402_v45  ;;  %v232_v45 = vld [vmem:[%s2080_s29 + $0x1b8] sm:$0xff]  ;;  %v235_v49 = vld [vmem:[%s2080_s29 + $0x1d0] sm:$0xff] }
  0x58   : > { %1710 = vmatprep.subr.mxu1 %v401_v50 }
  0x59   : > { %685 = vmatmul.mubr.f32.gmra.mxu0 %v186_v51  ;;  %925 = vmatmul.mubr.f32.gmra.mxu1 %v330_v52  ;;  %v234_v51 = vld [vmem:[%s2080_s29 + $0x1c8] sm:$0xff]  ;;  %v200_v52 = vld [vmem:[%s2080_s29 + $0xb8] sm:$0xff] }
  0x5a   : > { %689 = vmatprep.mubr.f32.mxu0 %v190_v53  ;;  %929 = vmatprep.mubr.f32.mxu1 %v334_v54  ;;  %v238_v53 = vld [vmem:[%s2080_s29 + $0x1e8] sm:$0xff]  ;;  %v203_v54 = vld [vmem:[%s2080_s29 + $0xd0] sm:$0xff] }
  0x5b   : > { %1711 = vmatpush3.msra.mxu1 %v401_v50  ;;  %v197_v50 = vld [vmem:[%s2080_s29 + $0xa0] sm:$0xff] }
  0x5d   : > { %690 = vmatmul.mubr.f32.gmra.mxu0 %v189_v55  ;;  %930 = vmatmul.mubr.f32.gmra.mxu1 %v333_v56  ;;  %v237_v55 = vld [vmem:[%s2080_s29 + $0x1e0] sm:$0xff]  ;;  %v206_v56 = vld [vmem:[%s2080_s29 + $0xe8] sm:$0xff] }
  0x5e   : > { %694 = vmatprep.mubr.f32.mxu0 %v193_v57  ;;  %934 = vmatprep.mubr.f32.mxu1 %v337_v58  ;;  %v241_v57 = vld [vmem:[%s2080_s29 + $0x200] sm:$0xff] }
  0x5f   : > { %v209_v58 = vld [vmem:[%s2080_s29 + $0x100] sm:$0xff] }
  0x61   : > { %695 = vmatmul.mubr.f32.gmra.mxu0 %v192_v59  ;;  %935 = vmatmul.mubr.f32.gmra.mxu1 %v336_v60  ;;  %v240_v59 = vld [vmem:[%s2080_s29 + $0x1f8] sm:$0xff] }
  0x62   : > { %699 = vmatprep.mubr.f32.mxu0 %v196_v61  ;;  %939 = vmatprep.mubr.f32.mxu1 %v340_v62  ;;  %v212_v60 = vld [vmem:[%s2080_s29 + $0x118] sm:$0xff]  ;;  %v215_v62 = vld [vmem:[%s2080_s29 + $0x130] sm:$0xff] }
  0x63   : > { %v244_v61 = vld [vmem:[%s2080_s29 + $0x218] sm:$0xff] }
  0x65   : > { %700 = vmatmul.mubr.f32.gmra.mxu0 %v195_v63  ;;  %940 = vmatmul.mubr.f32.gmra.mxu1 %v339_v0  ;;  %v243_v63 = vld [vmem:[%s2080_s29 + $0x210] sm:$0xff]  ;;  %v218_v0 = vld [vmem:[%s2080_s29 + $0x148] sm:$0xff] }
  0x66   : > { %704 = vmatprep.mubr.f32.mxu0 %v199_v1  ;;  %944 = vmatprep.mubr.f32.mxu1 %v343_v2  ;;  %v247_v1 = vld [vmem:[%s2080_s29 + $0x230] sm:$0xff]  ;;  %v221_v2 = vld [vmem:[%s2080_s29 + $0x160] sm:$0xff] }
  0x69   : > { %705 = vmatmul.mubr.f32.gmra.mxu0 %v198_v3  ;;  %945 = vmatmul.mubr.f32.gmra.mxu1 %v342_v4  ;;  %v246_v3 = vld [vmem:[%s2080_s29 + $0x228] sm:$0xff]  ;;  %v224_v4 = vld [vmem:[%s2080_s29 + $0x178] sm:$0xff] }
  0x6a   : > { %709 = vmatprep.mubr.f32.mxu0 %v202_v5  ;;  %949 = vmatprep.mubr.f32.mxu1 %v346_v6  ;;  %v250_v5 = vld [vmem:[%s2080_s29 + $0x248] sm:$0xff]  ;;  %v227_v6 = vld [vmem:[%s2080_s29 + $0x190] sm:$0xff] }
  0x6d   : > { %710 = vmatmul.mubr.f32.gmra.mxu0 %v201_v7  ;;  %950 = vmatmul.mubr.f32.gmra.mxu1 %v345_v8  ;;  %v249_v7 = vld [vmem:[%s2080_s29 + $0x240] sm:$0xff]  ;;  %v230_v8 = vld [vmem:[%s2080_s29 + $0x1a8] sm:$0xff] }
  0x6e   : > { %714 = vmatprep.mubr.f32.mxu0 %v205_v9  ;;  %954 = vmatprep.mubr.f32.mxu1 %v349_v10  ;;  %v253_v9 = vld [vmem:[%s2080_s29 + $0x260] sm:$0xff] }
  0x6f   : > { %v233_v10 = vld [vmem:[%s2080_s29 + $0x1c0] sm:$0xff] }
  0x71   : > { %715 = vmatmul.mubr.f32.gmra.mxu0 %v204_v11  ;;  %955 = vmatmul.mubr.f32.gmra.mxu1 %v348_v12  ;;  %v252_v11 = vld [vmem:[%s2080_s29 + $0x258] sm:$0xff] }
  0x72   : > { %719 = vmatprep.mubr.f32.mxu0 %v208_v13  ;;  %959 = vmatprep.mubr.f32.mxu1 %v352_v14  ;;  %v236_v12 = vld [vmem:[%s2080_s29 + $0x1d8] sm:$0xff]  ;;  %v239_v14 = vld [vmem:[%s2080_s29 + $0x1f0] sm:$0xff] }
  0x73   : > { %v256_v13 = vld [vmem:[%s2080_s29 + $0x278] sm:$0xff] }
  0x75   : > { %720 = vmatmul.mubr.f32.gmra.mxu0 %v207_v15  ;;  %960 = vmatmul.mubr.f32.gmra.mxu1 %v351_v16  ;;  %v255_v15 = vld [vmem:[%s2080_s29 + $0x270] sm:$0xff]  ;;  %v242_v16 = vld [vmem:[%s2080_s29 + $0x208] sm:$0xff] }
  0x76   : > { %724 = vmatprep.mubr.f32.mxu0 %v211_v17  ;;  %964 = vmatprep.mubr.f32.mxu1 %v355_v18  ;;  %v259_v17 = vld [vmem:[%s2080_s29 + $0x290] sm:$0xff]  ;;  %v245_v18 = vld [vmem:[%s2080_s29 + $0x220] sm:$0xff] }
  0x79   : > { %725 = vmatmul.mubr.f32.gmra.mxu0 %v210_v19  ;;  %965 = vmatmul.mubr.f32.gmra.mxu1 %v354_v20  ;;  %v258_v19 = vld [vmem:[%s2080_s29 + $0x288] sm:$0xff]  ;;  %v248_v20 = vld [vmem:[%s2080_s29 + $0x238] sm:$0xff] }
  0x7a   : > { %729 = vmatprep.mubr.f32.mxu0 %v214_v21  ;;  %969 = vmatprep.mubr.f32.mxu1 %v358_v22  ;;  %v262_v21 = vld [vmem:[%s2080_s29 + $0x2a8] sm:$0xff]  ;;  %v251_v22 = vld [vmem:[%s2080_s29 + $0x250] sm:$0xff] }
  0x7d   : > { %730 = vmatmul.mubr.f32.gmra.mxu0 %v213_v23  ;;  %970 = vmatmul.mubr.f32.gmra.mxu1 %v357_v24  ;;  %v261_v23 = vld [vmem:[%s2080_s29 + $0x2a0] sm:$0xff]  ;;  %v254_v24 = vld [vmem:[%s2080_s29 + $0x268] sm:$0xff] }
  0x7e   : > { %734 = vmatprep.mubr.f32.mxu0 %v217_v25  ;;  %974 = vmatprep.mubr.f32.mxu1 %v361_v26  ;;  %v265_v25 = vld [vmem:[%s2080_s29 + $0x2c0] sm:$0xff] }
  0x7f   : > { %v257_v26 = vld [vmem:[%s2080_s29 + $0x280] sm:$0xff] }
  0x81   : > { %735 = vmatmul.mubr.f32.gmra.mxu0 %v216_v27  ;;  %975 = vmatmul.mubr.f32.gmra.mxu1 %v360_v28  ;;  %v264_v27 = vld [vmem:[%s2080_s29 + $0x2b8] sm:$0xff] }
  0x82   : > { %739 = vmatprep.mubr.f32.mxu0 %v220_v29  ;;  %979 = vmatprep.mubr.f32.mxu1 %v364_v30  ;;  %v260_v28 = vld [vmem:[%s2080_s29 + $0x298] sm:$0xff]  ;;  %v263_v30 = vld [vmem:[%s2080_s29 + $0x2b0] sm:$0xff] }
  0x83   : > { %v268_v29 = vld [vmem:[%s2080_s29 + $0x2d8] sm:$0xff] }
  0x85   : > { %740 = vmatmul.mubr.f32.gmra.mxu0 %v219_v31  ;;  %980 = vmatmul.mubr.f32.gmra.mxu1 %v363_v32  ;;  %v267_v31 = vld [vmem:[%s2080_s29 + $0x2d0] sm:$0xff]  ;;  %v266_v32 = vld [vmem:[%s2080_s29 + $0x2c8] sm:$0xff] }
  0x86   : > { %744 = vmatprep.mubr.f32.mxu0 %v223_v33  ;;  %984 = vmatprep.mubr.f32.mxu1 %v367_v34  ;;  %v271_v33 = vld [vmem:[%s2080_s29 + $0x2f0] sm:$0xff]  ;;  %v269_v34 = vld [vmem:[%s2080_s29 + $0x2e0] sm:$0xff] }
  0x89   : > { %745 = vmatmul.mubr.f32.gmra.mxu0 %v222_v35  ;;  %985 = vmatmul.mubr.f32.gmra.mxu1 %v366_v36  ;;  %v270_v35 = vld [vmem:[%s2080_s29 + $0x2e8] sm:$0xff]  ;;  %v272_v36 = vld [vmem:[%s2080_s29 + $0x2f8] sm:$0xff] }
  0x8a   : > { %749 = vmatprep.mubr.f32.mxu0 %v226_v37  ;;  %1712 = vmatprep.mubr.msk.f32.mxu1 %vm412_vm0, %v179_v38  ;;  %v274_v37 = vld [vmem:[%s2080_s29 + $0x308] sm:$0xff]  ;;  %v275_v38 = vld [vmem:[%s2080_s29 + $0x310] sm:$0xff] }
  0x8d   : > { %750 = vmatmul.mubr.f32.gmra.mxu0 %v225_v39  ;;  %1713 = vmatmul.mubr.msk.f32.vlgmr.msra.gmra.mxu1 %vm412_vm0, %v182_v40  ;;  %v273_v39 = vld [vmem:[%s2080_s29 + $0x300] sm:$0xff]  ;;  %v278_v40 = vld [vmem:[%s2080_s29 + $0x328] sm:$0xff] }
  0x8e   : > { %754 = vmatprep.mubr.f32.mxu0 %v229_v41  ;;  %1715 = vmatprep.mubr.msk.f32.mxu1 %vm412_vm0, %v185_v42  ;;  %v277_v41 = vld [vmem:[%s2080_s29 + $0x320] sm:$0xff] }
  0x8f   : > { %v281_v42 = vld [vmem:[%s2080_s29 + $0x340] sm:$0xff] }
  0x91   : > { %755 = vmatmul.mubr.f32.gmra.mxu0 %v228_v43  ;;  %1716 = vmatmul.mubr.msk.f32.gmra.mxu1 %vm412_vm0, %v188_v44  ;;  %v276_v43 = vld [vmem:[%s2080_s29 + $0x318] sm:$0xff] }
  0x92   : > { %759 = vmatprep.mubr.f32.mxu0 %v232_v45  ;;  %1718 = vmatprep.mubr.msk.f32.mxu1 %vm412_vm0, %v191_v46  ;;  %v284_v44 = vld [vmem:[%s2080_s29 + $0x358] sm:$0xff]  ;;  %v287_v46 = vld [vmem:[%s2080_s29 + $0x370] sm:$0xff] }
  0x93   : > { %v280_v45 = vld [vmem:[%s2080_s29 + $0x338] sm:$0xff] }
  0x95   : > { %760 = vmatmul.mubr.f32.gmra.mxu0 %v231_v47  ;;  %1719 = vmatmul.mubr.msk.f32.gmra.mxu1 %vm412_vm0, %v194_v48  ;;  %v279_v47 = vld [vmem:[%s2080_s29 + $0x330] sm:$0xff]  ;;  %v290_v48 = vld [vmem:[%s2080_s29 + $0x388] sm:$0xff] }
  0x96   : > { %764 = vmatprep.mubr.f32.mxu0 %v235_v49  ;;  %1721 = vmatprep.mubr.msk.f32.mxu1 %vm412_vm0, %v197_v50  ;;  %v283_v49 = vld [vmem:[%s2080_s29 + $0x350] sm:$0xff]  ;;  %v293_v50 = vld [vmem:[%s2080_s29 + $0x3a0] sm:$0xff] }
  0x99   : > { %765 = vmatmul.mubr.f32.gmra.mxu0 %v234_v51  ;;  %1722 = vmatmul.mubr.msk.f32.gmra.mxu1 %vm412_vm0, %v200_v52  ;;  %v282_v51 = vld [vmem:[%s2080_s29 + $0x348] sm:$0xff]  ;;  %v296_v52 = vld [vmem:[%s2080_s29 + $0x3b8] sm:$0xff] }
  0x9a   : > { %769 = vmatprep.mubr.f32.mxu0 %v238_v53  ;;  %1724 = vmatprep.mubr.msk.f32.mxu1 %vm412_vm0, %v203_v54  ;;  %v286_v53 = vld [vmem:[%s2080_s29 + $0x368] sm:$0xff]  ;;  %v299_v54 = vld [vmem:[%s2080_s29 + $0x3d0] sm:$0xff] }
  0x9d   : > { %770 = vmatmul.mubr.f32.gmra.mxu0 %v237_v55  ;;  %1725 = vmatmul.mubr.msk.f32.gmra.mxu1 %vm412_vm0, %v206_v56  ;;  %v285_v55 = vld [vmem:[%s2080_s29 + $0x360] sm:$0xff]  ;;  %v302_v56 = vld [vmem:[%s2080_s29 + $0x3e8] sm:$0xff] }
  0x9e   : > { %774 = vmatprep.mubr.f32.mxu0 %v241_v57  ;;  %1727 = vmatprep.mubr.msk.f32.mxu1 %vm412_vm0, %v209_v58  ;;  %v289_v57 = vld [vmem:[%s2080_s29 + $0x380] sm:$0xff] }
  0x9f   : > { %v305_v58 = vld [vmem:[%s2080_s29 + $0x400] sm:$0xff] }
  0xa1   : > { %775 = vmatmul.mubr.f32.gmra.mxu0 %v240_v59  ;;  %1728 = vmatmul.mubr.msk.f32.gmra.mxu1 %vm412_vm0, %v212_v60  ;;  %v288_v59 = vld [vmem:[%s2080_s29 + $0x378] sm:$0xff] }
  0xa2   : > { %779 = vmatprep.mubr.f32.mxu0 %v244_v61  ;;  %1730 = vmatprep.mubr.msk.f32.mxu1 %vm412_vm0, %v215_v62  ;;  %v308_v60 = vld [vmem:[%s2080_s29 + $0x418] sm:$0xff]  ;;  %v311_v62 = vld [vmem:[%s2080_s29 + $0x430] sm:$0xff] }
  0xa3   : > { %v292_v61 = vld [vmem:[%s2080_s29 + $0x398] sm:$0xff] }
  0xa5   : > { %780 = vmatmul.mubr.f32.gmra.mxu0 %v243_v63  ;;  %1731 = vmatmul.mubr.msk.f32.gmra.mxu1 %vm412_vm0, %v218_v0  ;;  %v291_v63 = vld [vmem:[%s2080_s29 + $0x390] sm:$0xff]  ;;  %v314_v0 = vld [vmem:[%s2080_s29 + $0x448] sm:$0xff] }
  0xa6   : > { %784 = vmatprep.mubr.f32.mxu0 %v247_v1  ;;  %1733 = vmatprep.mubr.msk.f32.mxu1 %vm412_vm0, %v221_v2  ;;  %v295_v1 = vld [vmem:[%s2080_s29 + $0x3b0] sm:$0xff]  ;;  %v317_v2 = vld [vmem:[%s2080_s29 + $0x460] sm:$0xff] }
  0xa9   : > { %785 = vmatmul.mubr.f32.gmra.mxu0 %v246_v3  ;;  %1734 = vmatmul.mubr.msk.f32.gmra.mxu1 %vm412_vm0, %v224_v4  ;;  %v294_v3 = vld [vmem:[%s2080_s29 + $0x3a8] sm:$0xff]  ;;  %v320_v4 = vld [vmem:[%s2080_s29 + $0x478] sm:$0xff] }
  0xaa   : > { %789 = vmatprep.mubr.f32.mxu0 %v250_v5  ;;  %1736 = vmatprep.mubr.msk.f32.mxu1 %vm412_vm0, %v227_v6  ;;  %v298_v5 = vld [vmem:[%s2080_s29 + $0x3c8] sm:$0xff]  ;;  %v323_v6 = vld [vmem:[%s2080_s29 + $0x490] sm:$0xff] }
  0xad   : > { %790 = vmatmul.mubr.f32.gmra.mxu0 %v249_v7  ;;  %1737 = vmatmul.mubr.msk.f32.gmra.mxu1 %vm412_vm0, %v230_v8  ;;  %v297_v7 = vld [vmem:[%s2080_s29 + $0x3c0] sm:$0xff]  ;;  %v326_v8 = vld [vmem:[%s2080_s29 + $0x4a8] sm:$0xff] }
  0xae   : > { %794 = vmatprep.mubr.f32.mxu0 %v253_v9  ;;  %1739 = vmatprep.mubr.msk.f32.mxu1 %vm412_vm0, %v233_v10  ;;  %v301_v9 = vld [vmem:[%s2080_s29 + $0x3e0] sm:$0xff] }
  0xaf   : > { %v329_v10 = vld [vmem:[%s2080_s29 + $0x4c0] sm:$0xff] }
  0xb1   : > { %795 = vmatmul.mubr.f32.gmra.mxu0 %v252_v11  ;;  %1740 = vmatmul.mubr.msk.f32.gmra.mxu1 %vm412_vm0, %v236_v12  ;;  %v300_v11 = vld [vmem:[%s2080_s29 + $0x3d8] sm:$0xff] }
  0xb2   : > { %799 = vmatprep.mubr.f32.mxu0 %v256_v13  ;;  %1742 = vmatprep.mubr.msk.f32.mxu1 %vm412_vm0, %v239_v14  ;;  %v332_v12 = vld [vmem:[%s2080_s29 + $0x4d8] sm:$0xff]  ;;  %v335_v14 = vld [vmem:[%s2080_s29 + $0x4f0] sm:$0xff] }
  0xb3   : > { %v304_v13 = vld [vmem:[%s2080_s29 + $0x3f8] sm:$0xff] }
  0xb5   : > { %800 = vmatmul.mubr.f32.gmra.mxu0 %v255_v15  ;;  %1743 = vmatmul.mubr.msk.f32.gmra.mxu1 %vm412_vm0, %v242_v16  ;;  %v303_v15 = vld [vmem:[%s2080_s29 + $0x3f0] sm:$0xff]  ;;  %v338_v16 = vld [vmem:[%s2080_s29 + $0x508] sm:$0xff] }
  0xb6   : > { %804 = vmatprep.mubr.f32.mxu0 %v259_v17  ;;  %1745 = vmatprep.mubr.msk.f32.mxu1 %vm412_vm0, %v245_v18  ;;  %v307_v17 = vld [vmem:[%s2080_s29 + $0x410] sm:$0xff]  ;;  %v341_v18 = vld [vmem:[%s2080_s29 + $0x520] sm:$0xff] }
  0xb9   : > { %805 = vmatmul.mubr.f32.gmra.mxu0 %v258_v19  ;;  %1746 = vmatmul.mubr.msk.f32.gmra.mxu1 %vm412_vm0, %v248_v20  ;;  %v306_v19 = vld [vmem:[%s2080_s29 + $0x408] sm:$0xff]  ;;  %v344_v20 = vld [vmem:[%s2080_s29 + $0x538] sm:$0xff] }
  0xba   : > { %809 = vmatprep.mubr.f32.mxu0 %v262_v21  ;;  %1748 = vmatprep.mubr.msk.f32.mxu1 %vm412_vm0, %v251_v22  ;;  %v310_v21 = vld [vmem:[%s2080_s29 + $0x428] sm:$0xff]  ;;  %v347_v22 = vld [vmem:[%s2080_s29 + $0x550] sm:$0xff] }
  0xbd   : > { %810 = vmatmul.mubr.f32.gmra.mxu0 %v261_v23  ;;  %1749 = vmatmul.mubr.msk.f32.gmra.mxu1 %vm412_vm0, %v254_v24  ;;  %v309_v23 = vld [vmem:[%s2080_s29 + $0x420] sm:$0xff]  ;;  %v350_v24 = vld [vmem:[%s2080_s29 + $0x568] sm:$0xff] }
  0xbe   : > { %814 = vmatprep.mubr.f32.mxu0 %v265_v25  ;;  %1751 = vmatprep.mubr.msk.f32.mxu1 %vm412_vm0, %v257_v26  ;;  %v313_v25 = vld [vmem:[%s2080_s29 + $0x440] sm:$0xff] }
  0xbf   : > { %v353_v26 = vld [vmem:[%s2080_s29 + $0x580] sm:$0xff] }
  0xc1   : > { %815 = vmatmul.mubr.f32.gmra.mxu0 %v264_v27  ;;  %1752 = vmatmul.mubr.msk.f32.gmra.mxu1 %vm412_vm0, %v260_v28  ;;  %v312_v27 = vld [vmem:[%s2080_s29 + $0x438] sm:$0xff] }
  0xc2   : > { %819 = vmatprep.mubr.f32.mxu0 %v268_v29  ;;  %1754 = vmatprep.mubr.msk.f32.mxu1 %vm412_vm0, %v263_v30  ;;  %v356_v28 = vld [vmem:[%s2080_s29 + $0x598] sm:$0xff]  ;;  %v359_v30 = vld [vmem:[%s2080_s29 + $0x5b0] sm:$0xff] }
  0xc3   : > { %v316_v29 = vld [vmem:[%s2080_s29 + $0x458] sm:$0xff] }
  0xc5   : > { %820 = vmatmul.mubr.f32.gmra.mxu0 %v267_v31  ;;  %1755 = vmatmul.mubr.msk.f32.gmra.mxu1 %vm412_vm0, %v266_v32  ;;  %v315_v31 = vld [vmem:[%s2080_s29 + $0x450] sm:$0xff]  ;;  %v362_v32 = vld [vmem:[%s2080_s29 + $0x5c8] sm:$0xff] }
  0xc6   : > { %824 = vmatprep.mubr.f32.mxu0 %v271_v33  ;;  %1757 = vmatprep.mubr.msk.f32.mxu1 %vm412_vm0, %v269_v34  ;;  %v319_v33 = vld [vmem:[%s2080_s29 + $0x470] sm:$0xff]  ;;  %v365_v34 = vld [vmem:[%s2080_s29 + $0x5e0] sm:$0xff] }
  0xc9   : > { %825 = vmatmul.mubr.f32.gmra.mxu0 %v270_v35  ;;  %1758 = vmatmul.mubr.msk.f32.gmra.mxu1 %vm412_vm0, %v272_v36  ;;  %v318_v35 = vld [vmem:[%s2080_s29 + $0x468] sm:$0xff]  ;;  %v368_v36 = vld [vmem:[%s2080_s29 + $0x5f8] sm:$0xff] }
  0xca   : > { %829 = vmatprep.mubr.f32.mxu0 %v274_v37  ;;  %1760 = vmatprep.mubr.msk.f32.mxu1 %vm412_vm0, %v275_v38 }
  0xcd   : > { %830 = vmatmul.mubr.f32.gmra.mxu0 %v273_v39  ;;  %1761 = vmatmul.mubr.msk.f32.gmra.mxu1 %vm412_vm0, %v278_v40 }
  0xce   : > { %834 = vmatprep.mubr.f32.mxu0 %v277_v41  ;;  %1763 = vmatprep.mubr.msk.f32.mxu1 %vm412_vm0, %v281_v42 }
  0xd1   : > { %835 = vmatmul.mubr.f32.gmra.mxu0 %v276_v43  ;;  %1764 = vmatmul.mubr.msk.f32.gmra.mxu1 %vm412_vm0, %v284_v44 }
  0xd2   : > { %839 = vmatprep.mubr.f32.mxu0 %v280_v45  ;;  %1766 = vmatprep.mubr.msk.f32.mxu1 %vm412_vm0, %v287_v46 }
  0xd5   : > { %840 = vmatmul.mubr.f32.gmra.mxu0 %v279_v47  ;;  %1767 = vmatmul.mubr.msk.f32.gmra.mxu1 %vm412_vm0, %v290_v48 }
  0xd6   : > { %844 = vmatprep.mubr.f32.mxu0 %v283_v49  ;;  %1769 = vmatprep.mubr.msk.f32.mxu1 %vm412_vm0, %v293_v50 }
  0xd9   : > { %845 = vmatmul.mubr.f32.gmra.mxu0 %v282_v51  ;;  %1770 = vmatmul.mubr.msk.f32.gmra.mxu1 %vm412_vm0, %v296_v52 }
  0xda   : > { %849 = vmatprep.mubr.f32.mxu0 %v286_v53  ;;  %1772 = vmatprep.mubr.msk.f32.mxu1 %vm412_vm0, %v299_v54 }
  0xdd   : > { %850 = vmatmul.mubr.f32.gmra.mxu0 %v285_v55  ;;  %1773 = vmatmul.mubr.msk.f32.gmra.mxu1 %vm412_vm0, %v302_v56 }
  0xde   : > { %854 = vmatprep.mubr.f32.mxu0 %v289_v57  ;;  %1775 = vmatprep.mubr.msk.f32.mxu1 %vm412_vm0, %v305_v58 }
  0xe1   : > { %855 = vmatmul.mubr.f32.gmra.mxu0 %v288_v59  ;;  %1776 = vmatmul.mubr.msk.f32.gmra.mxu1 %vm412_vm0, %v308_v60 }
  0xe2   : > { %859 = vmatprep.mubr.f32.mxu0 %v292_v61  ;;  %1778 = vmatprep.mubr.msk.f32.mxu1 %vm412_vm0, %v311_v62 }
  0xe5   : > { %860 = vmatmul.mubr.f32.gmra.mxu0 %v291_v63  ;;  %1779 = vmatmul.mubr.msk.f32.gmra.mxu1 %vm412_vm0, %v314_v0 }
  0xe6   : > { %864 = vmatprep.mubr.f32.mxu0 %v295_v1  ;;  %1781 = vmatprep.mubr.msk.f32.mxu1 %vm412_vm0, %v317_v2 }
  0xe9   : > { %865 = vmatmul.mubr.f32.gmra.mxu0 %v294_v3  ;;  %1782 = vmatmul.mubr.msk.f32.gmra.mxu1 %vm412_vm0, %v320_v4 }
  0xea   : > { %869 = vmatprep.mubr.f32.mxu0 %v298_v5  ;;  %1784 = vmatprep.mubr.msk.f32.mxu1 %vm412_vm0, %v323_v6 }
  0xed   : > { %870 = vmatmul.mubr.f32.gmra.mxu0 %v297_v7  ;;  %1785 = vmatmul.mubr.msk.f32.gmra.mxu1 %vm412_vm0, %v326_v8 }
  0xee   : > { %874 = vmatprep.mubr.f32.mxu0 %v301_v9  ;;  %1787 = vmatprep.mubr.msk.f32.mxu1 %vm412_vm0, %v329_v10 }
  0xf1   : > { %875 = vmatmul.mubr.f32.gmra.mxu0 %v300_v11  ;;  %1788 = vmatmul.mubr.msk.f32.gmra.mxu1 %vm412_vm0, %v332_v12 }
  0xf2   : > { %879 = vmatprep.mubr.f32.mxu0 %v304_v13  ;;  %1790 = vmatprep.mubr.msk.f32.mxu1 %vm412_vm0, %v335_v14 }
  0xf5   : > { %880 = vmatmul.mubr.f32.gmra.mxu0 %v303_v15  ;;  %1791 = vmatmul.mubr.msk.f32.gmra.mxu1 %vm412_vm0, %v338_v16 }
  0xf6   : > { %884 = vmatprep.mubr.f32.mxu0 %v307_v17  ;;  %1793 = vmatprep.mubr.msk.f32.mxu1 %vm412_vm0, %v341_v18 }
  0xf9   : > { %885 = vmatmul.mubr.f32.gmra.mxu0 %v306_v19  ;;  %1794 = vmatmul.mubr.msk.f32.gmra.mxu1 %vm412_vm0, %v344_v20 }
  0xfa   : > { %889 = vmatprep.mubr.f32.mxu0 %v310_v21  ;;  %1796 = vmatprep.mubr.msk.f32.mxu1 %vm412_vm0, %v347_v22 }
  0xfd   : > { %890 = vmatmul.mubr.f32.gmra.mxu0 %v309_v23  ;;  %1797 = vmatmul.mubr.msk.f32.gmra.mxu1 %vm412_vm0, %v350_v24 }
  0xfe   : > { %894 = vmatprep.mubr.f32.mxu0 %v313_v25  ;;  %1799 = vmatprep.mubr.msk.f32.mxu1 %vm412_vm0, %v353_v26 }
 0x101   : > { %895 = vmatmul.mubr.f32.gmra.mxu0 %v312_v27  ;;  %1800 = vmatmul.mubr.msk.f32.gmra.mxu1 %vm412_vm0, %v356_v28 }
 0x102   : > { %899 = vmatprep.mubr.f32.mxu0 %v316_v29  ;;  %1802 = vmatprep.mubr.msk.f32.mxu1 %vm412_vm0, %v359_v30 }
 0x105   : > { %900 = vmatmul.mubr.f32.gmra.mxu0 %v315_v31  ;;  %1803 = vmatmul.mubr.msk.f32.gmra.mxu1 %vm412_vm0, %v362_v32 }
 0x106   : > { %904 = vmatprep.mubr.f32.mxu0 %v319_v33  ;;  %1805 = vmatprep.mubr.msk.f32.mxu1 %vm412_vm0, %v365_v34 }
 0x109   : > { %905 = vmatmul.mubr.f32.gmra.mxu0 %v318_v35  ;;  %1806 = vmatmul.mubr.msk.f32.gmra.mxu1 %vm412_vm0, %v368_v36  ;;  %v2422_v35 = vld [vmem:[%s2688_s2] ss:$0 sm:$0xff] }
 0x10d   : > { %v2357_v37 = vpop.f32.mrf.mxu0  ;;  %v2359_v38 = vpop.f32.mrf.mxu1 }
 0x10f   : > { %v673_v39 = vpop.f32.mrf.mxu0  ;;  %v913_v40 = vpop.f32.mrf.mxu1 }
 0x111   : > { %v676_v41 = vpop.f32.mrf.mxu0  ;;  %v2361_v42 = vpop.f32.mrf.mxu1 }
 0x112   : > { %v677_v40 = vadd.f32 %v2422_v35, %v676_v41 }
 0x113   : > { %v678_v43 = vpop.f32.mrf.mxu0  ;;  %v918_v44 = vpop.f32.mrf.mxu1 }
 0x115   : > { %v2363_v45 = vpop.f32.mrf.mxu0  ;;  %v2365_v46 = vpop.f32.mrf.mxu1 }
 0x117   : > { %v683_v47 = vpop.f32.mrf.mxu0  ;;  %v923_v48 = vpop.f32.mrf.mxu1 }
 0x118   : > { %v672_v47 = vadd.f32 %v2422_v35, %v2357_v37 }
 0x119   : > { %v2367_v49 = vpop.f32.mrf.mxu0  ;;  %v2369_v50 = vpop.f32.mrf.mxu1 }
 0x11a   : > { %v687_v41 = vadd.f32 %v2422_v35, %v2367_v49 }
 0x11b   : > { %v688_v51 = vpop.f32.mrf.mxu0  ;;  %v928_v52 = vpop.f32.mrf.mxu1 }
 0x11d   : > { %v2371_v53 = vpop.f32.mrf.mxu0  ;;  %v2373_v54 = vpop.f32.mrf.mxu1 }
 0x11f   : > { %v693_v55 = vpop.f32.mrf.mxu0  ;;  %v933_v56 = vpop.f32.mrf.mxu1 }
 0x121   : > { %v2375_v57 = vpop.f32.mrf.mxu0  ;;  %v2377_v58 = vpop.f32.mrf.mxu1 }
 0x123   : > { %v698_v59 = vpop.f32.mrf.mxu0  ;;  %v938_v60 = vpop.f32.mrf.mxu1 }
 0x124   : > { %v682_v60 = vadd.f32 %v2422_v35, %v2363_v45  ;;  %v692_v45 = vadd.f32 %v2422_v35, %v2371_v53 }
 0x125   : > { %v2379_v61 = vpop.f32.mrf.mxu0  ;;  %v2381_v62 = vpop.f32.mrf.mxu1 }
 0x126   : > { %v702_v53 = vadd.f32 %v2422_v35, %v2379_v61 }
 0x127   : > { %v703_v63 = vpop.f32.mrf.mxu0  ;;  %v943_v0 = vpop.f32.mrf.mxu1 }
 0x129   : > { %v2383_v1 = vpop.f32.mrf.mxu0  ;;  %v2385_v2 = vpop.f32.mrf.mxu1 }
 0x12b   : > { %v708_v3 = vpop.f32.mrf.mxu0  ;;  %v948_v4 = vpop.f32.mrf.mxu1 }
 0x12d   : > { %v2387_v5 = vpop.f32.mrf.mxu0  ;;  %v2389_v6 = vpop.f32.mrf.mxu1 }
 0x12e   : > { %v712_v61 = vadd.f32 %v2422_v35, %v2387_v5 }
 0x12f   : > { %v713_v7 = vpop.f32.mrf.mxu0  ;;  %v953_v8 = vpop.f32.mrf.mxu1 }
 0x130   : > { %v697_v7 = vadd.f32 %v2422_v35, %v2375_v57  ;;  %v707_v57 = vadd.f32 %v2422_v35, %v2383_v1 }
 0x131   : > { %v2391_v9 = vpop.f32.mrf.mxu0  ;;  %v2393_v10 = vpop.f32.mrf.mxu1 }
 0x132   : > { %v717_v1 = vadd.f32 %v2422_v35, %v2391_v9 }
 0x133   : > { %v718_v11 = vpop.f32.mrf.mxu0  ;;  %v958_v12 = vpop.f32.mrf.mxu1 }
 0x135   : > { %v2395_v13 = vpop.f32.mrf.mxu0  ;;  %v2397_v14 = vpop.f32.mrf.mxu1 }
 0x136   : > { %v722_v5 = vadd.f32 %v2422_v35, %v2395_v13 }
 0x137   : > { %v723_v15 = vpop.f32.mrf.mxu0  ;;  %v963_v16 = vpop.f32.mrf.mxu1 }
 0x139   : > { %v2399_v17 = vpop.f32.mrf.mxu0  ;;  %v2401_v18 = vpop.f32.mrf.mxu1 }
 0x13a   : > { %v727_v9 = vadd.f32 %v2422_v35, %v2399_v17 }
 0x13b   : > { %v728_v19 = vpop.f32.mrf.mxu0  ;;  %v968_v20 = vpop.f32.mrf.mxu1 }
 0x13d   : > { %v2403_v21 = vpop.f32.mrf.mxu0  ;;  %v2405_v22 = vpop.f32.mrf.mxu1 }
 0x13e   : > { %v732_v13 = vadd.f32 %v2422_v35, %v2403_v21 }
 0x13f   : > { %v733_v23 = vpop.f32.mrf.mxu0  ;;  %v973_v24 = vpop.f32.mrf.mxu1 }
 0x141   : > { %v2407_v25 = vpop.f32.mrf.mxu0  ;;  %v2409_v26 = vpop.f32.mrf.mxu1 }
 0x142   : > { %v737_v17 = vadd.f32 %v2422_v35, %v2407_v25 }
 0x143   : > { %v738_v27 = vpop.f32.mrf.mxu0  ;;  %v978_v28 = vpop.f32.mrf.mxu1 }
 0x145   : > { %v2411_v29 = vpop.f32.mrf.mxu0  ;;  %v2413_v30 = vpop.f32.mrf.mxu1 }
 0x146   : > { %v742_v21 = vadd.f32 %v2422_v35, %v2411_v29 }
 0x147   : > { %v743_v31 = vpop.f32.mrf.mxu0  ;;  %v983_v32 = vpop.f32.mrf.mxu1 }
 0x149   : > { %v2415_v33 = vpop.f32.mrf.mxu0  ;;  %v2417_v34 = vpop.f32.mrf.mxu1 }
 0x14a   : > { %v747_v25 = vadd.f32 %v2422_v35, %v2415_v33 }
 0x14b   : > { %v748_v36 = vpop.f32.mrf.mxu0  ;;  %v988_v39 = vpop.f32.mrf.mxu1 }
 0x14d   : > { %v2426_v43 = vpop.f32.mrf.mxu0  ;;  %v1714_v44 = vpop.f32.mrf.mxu1 }
 0x14e   : > { %v1062_v48 = vadd.f32 %v1714_v44, %v677_v40  ;;  %v752_v29 = vadd.f32 %v2422_v35, %v2426_v43 }
 0x14f   : > { %v753_v51 = vpop.f32.mrf.mxu0  ;;  %v1056_v52 = vpop.f32.mrf.mxu1 }
 0x150   : > { %v1376_v55 = vmax.f32 %v1062_v48, 0.0  ;;  %v1057_v56 = vadd.f32 %v1056_v52, %v672_v47 }
 0x151   : > { %v2437_v59 = vpop.f32.mrf.mxu0  ;;  %v1717_v37 = vpop.f32.mrf.mxu1 }
 0x152   : > { %1441 = vst.msk [vmem:[%s2433_s20 + $0x8] sm:$0xff] %vm1439_vm1, %v1376_v55  ;;  %v1375_v63 = vmax.f32 %v1057_v56, 0.0  ;;  %v1072_v0 = vadd.f32 %v1717_v37, %v687_v41  ;;  %v757_v33 = vadd.f32 %v2422_v35, %v2437_v59 }
 0x153   : > { %v758_v3 = vpop.f32.mrf.mxu0  ;;  %v1066_v4 = vpop.f32.mrf.mxu1 }
 0x154   : > { %1440 = vst.msk [vmem:[%s2433_s20] sm:$0xff] %vm1439_vm1, %v1375_v63  ;;  %v1378_v49 = vmax.f32 %v1072_v0, 0.0  ;;  %v1067_v8 = vadd.f32 %v1066_v4, %v682_v60 }
 0x155   : > { %v2447_v11 = vpop.f32.mrf.mxu0  ;;  %v1720_v12 = vpop.f32.mrf.mxu1 }
 0x156   : > { %1443 = vst.msk [vmem:[%s2433_s20 + $0x18] sm:$0xff] %vm1439_vm1, %v1378_v49  ;;  %v1377_v15 = vmax.f32 %v1067_v8, 0.0  ;;  %v1082_v16 = vadd.f32 %v1720_v12, %v697_v7  ;;  %v762_v43 = vadd.f32 %v2422_v35, %v2447_v11 }
 0x157   : > { %v763_v19 = vpop.f32.mrf.mxu0  ;;  %v1076_v20 = vpop.f32.mrf.mxu1 }
 0x158   : > { %1442 = vst.msk [vmem:[%s2433_s20 + $0x10] sm:$0xff] %vm1439_vm1, %v1377_v15  ;;  %v1380_v23 = vmax.f32 %v1082_v16, 0.0  ;;  %v1077_v24 = vadd.f32 %v1076_v20, %v692_v45 }
 0x159   : > { %v2457_v27 = vpop.f32.mrf.mxu0  ;;  %v1723_v28 = vpop.f32.mrf.mxu1 }
 0x15a   : > { %1445 = vst.msk [vmem:[%s2433_s20 + $0x28] sm:$0xff] %vm1439_vm1, %v1380_v23  ;;  %v1379_v31 = vmax.f32 %v1077_v24, 0.0  ;;  %v1092_v32 = vadd.f32 %v1723_v28, %v707_v57  ;;  %v767_v59 = vadd.f32 %v2422_v35, %v2457_v27 }
 0x15b   : > { %v768_v36 = vpop.f32.mrf.mxu0  ;;  %v1086_v39 = vpop.f32.mrf.mxu1 }
 0x15c   : > { %1444 = vst.msk [vmem:[%s2433_s20 + $0x20] sm:$0xff] %vm1439_vm1, %v1379_v31  ;;  %v1382_v40 = vmax.f32 %v1092_v32, 0.0  ;;  %v1087_v44 = vadd.f32 %v1086_v39, %v702_v53 }
 0x15d   : > { %v2467_v47 = vpop.f32.mrf.mxu0  ;;  %v1726_v48 = vpop.f32.mrf.mxu1 }
 0x15e   : > { %1447 = vst.msk [vmem:[%s2433_s20 + $0x38] sm:$0xff] %vm1439_vm1, %v1382_v40  ;;  %v1381_v51 = vmax.f32 %v1087_v44, 0.0  ;;  %v1102_v52 = vadd.f32 %v1726_v48, %v717_v1 }
 0x15f   : > { %v773_v41 = vpop.f32.mrf.mxu0  ;;  %v1096_v55 = vpop.f32.mrf.mxu1 }
 0x160   : > { %1446 = vst.msk [vmem:[%s2433_s20 + $0x30] sm:$0xff] %vm1439_vm1, %v1381_v51  ;;  %v1384_v56 = vmax.f32 %v1102_v52, 0.0  ;;  %v1097_v37 = vadd.f32 %v1096_v55, %v712_v61 }
 0x161   : > { %v776_v60 = vpop.f32.mrf.mxu0  ;;  %v1729_v63 = vpop.f32.mrf.mxu1 }
 0x162   : > { %1449 = vst.msk [vmem:[%s2433_s20 + $0x48] sm:$0xff] %vm1439_vm1, %v1384_v56  ;;  %v1383_v0 = vmax.f32 %v1097_v37, 0.0  ;;  %v1112_v3 = vadd.f32 %v1729_v63, %v727_v9 }
 0x163   : > { %v778_v4 = vpop.f32.mrf.mxu0  ;;  %v1106_v7 = vpop.f32.mrf.mxu1 }
 0x164   : > { %1448 = vst.msk [vmem:[%s2433_s20 + $0x40] sm:$0xff] %vm1439_vm1, %v1383_v0  ;;  %v1386_v49 = vmax.f32 %v1112_v3, 0.0  ;;  %v1107_v8 = vadd.f32 %v1106_v7, %v722_v5  ;;  %v777_v3 = vadd.f32 %v2422_v35, %v776_v60 }
 0x165   : > { %v781_v12 = vpop.f32.mrf.mxu0  ;;  %v1732_v45 = vpop.f32.mrf.mxu1 }
 0x166   : > { %1451 = vst.msk [vmem:[%s2433_s20 + $0x58] sm:$0xff] %vm1439_vm1, %v1386_v49  ;;  %v1385_v15 = vmax.f32 %v1107_v8, 0.0  ;;  %v1122_v16 = vadd.f32 %v1732_v45, %v737_v17  ;;  %v772_v49 = vadd.f32 %v2422_v35, %v2467_v47 }
 0x167   : > { %v783_v19 = vpop.f32.mrf.mxu0  ;;  %v1116_v20 = vpop.f32.mrf.mxu1 }
 0x168   : > { %1450 = vst.msk [vmem:[%s2433_s20 + $0x50] sm:$0xff] %vm1439_vm1, %v1385_v15  ;;  %v1388_v57 = vmax.f32 %v1122_v16, 0.0  ;;  %v1117_v23 = vadd.f32 %v1116_v20, %v732_v13 }
 0x169   : > { %v786_v24 = vpop.f32.mrf.mxu0  ;;  %v1735_v28 = vpop.f32.mrf.mxu1 }
 0x16a   : > { %1453 = vst.msk [vmem:[%s2433_s20 + $0x68] sm:$0xff] %vm1439_vm1, %v1388_v57  ;;  %v1387_v53 = vmax.f32 %v1117_v23, 0.0  ;;  %v1132_v31 = vadd.f32 %v1735_v28, %v747_v25  ;;  %v787_v15 = vadd.f32 %v2422_v35, %v786_v24  ;;  %v782_v25 = vadd.f32 %v2422_v35, %v781_v12 }
 0x16b   : > { %v788_v32 = vpop.f32.mrf.mxu0  ;;  %v1126_v36 = vpop.f32.mrf.mxu1 }
 0x16c   : > { %1452 = vst.msk [vmem:[%s2433_s20 + $0x60] sm:$0xff] %vm1439_vm1, %v1387_v53  ;;  %v1390_v39 = vmax.f32 %v1132_v31, 0.0  ;;  %v1127_v1 = vadd.f32 %v1126_v36, %v742_v21 }
 0x16d   : > { %v791_v40 = vpop.f32.mrf.mxu0  ;;  %v1738_v44 = vpop.f32.mrf.mxu1 }
 0x16e   : > { %1455 = vst.msk [vmem:[%s2433_s20 + $0x78] sm:$0xff] %vm1439_vm1, %v1390_v39  ;;  %v1389_v48 = vmax.f32 %v1127_v1, 0.0  ;;  %v1142_v61 = vadd.f32 %v1738_v44, %v757_v33  ;;  %v792_v36 = vadd.f32 %v2422_v35, %v791_v40 }
 0x16f   : > { %v793_v51 = vpop.f32.mrf.mxu0  ;;  %v1136_v52 = vpop.f32.mrf.mxu1 }
 0x170   : > { %1454 = vst.msk [vmem:[%s2433_s20 + $0x70] sm:$0xff] %vm1439_vm1, %v1389_v48  ;;  %v1392_v41 = vmax.f32 %v1142_v61, 0.0  ;;  %v1137_v55 = vadd.f32 %v1136_v52, %v752_v29 }
 0x171   : > { %v796_v9 = vpop.f32.mrf.mxu0  ;;  %v1741_v56 = vpop.f32.mrf.mxu1 }
 0x172   : > { %1457 = vst.msk [vmem:[%s2433_s20 + $0x88] sm:$0xff] %vm1439_vm1, %v1392_v41  ;;  %v1391_v37 = vmax.f32 %v1137_v55, 0.0  ;;  %v1152_v63 = vadd.f32 %v1741_v56, %v767_v59  ;;  %v797_v21 = vadd.f32 %v2422_v35, %v796_v9 }
 0x173   : > { %v798_v5 = vpop.f32.mrf.mxu0  ;;  %v1146_v0 = vpop.f32.mrf.mxu1 }
 0x174   : > { %1456 = vst.msk [vmem:[%s2433_s20 + $0x80] sm:$0xff] %vm1439_vm1, %v1391_v37  ;;  %v1394_v27 = vmax.f32 %v1152_v63, 0.0  ;;  %v1147_v4 = vadd.f32 %v1146_v0, %v762_v43 }
 0x175   : > { %v801_v7 = vpop.f32.mrf.mxu0  ;;  %v1744_v17 = vpop.f32.mrf.mxu1 }
 0x176   : > { %1459 = vst.msk [vmem:[%s2433_s20 + $0x98] sm:$0xff] %vm1439_vm1, %v1394_v27  ;;  %v1393_v11 = vmax.f32 %v1147_v4, 0.0  ;;  %v1162_v8 = vadd.f32 %v1744_v17, %v777_v3  ;;  %v802_v52 = vadd.f32 %v2422_v35, %v801_v7 }
 0x177   : > { %v803_v45 = vpop.f32.mrf.mxu0  ;;  %v1156_v13 = vpop.f32.mrf.mxu1 }
 0x178   : > { %1458 = vst.msk [vmem:[%s2433_s20 + $0x90] sm:$0xff] %vm1439_vm1, %v1393_v11  ;;  %v1396_v60 = vmax.f32 %v1162_v8, 0.0  ;;  %v1157_v16 = vadd.f32 %v1156_v13, %v772_v49 }
 0x179   : > { %v806_v19 = vpop.f32.mrf.mxu0  ;;  %v1747_v20 = vpop.f32.mrf.mxu1 }
 0x17a   : > { %1461 = vst.msk [vmem:[%s2433_s20 + $0xa8] sm:$0xff] %vm1439_vm1, %v1396_v60  ;;  %v1395_v47 = vmax.f32 %v1157_v16, 0.0  ;;  %v1172_v57 = vadd.f32 %v1747_v20, %v787_v15  ;;  %v807_v44 = vadd.f32 %v2422_v35, %v806_v19 }
 0x17b   : > { %v808_v23 = vpop.f32.mrf.mxu0  ;;  %v1166_v28 = vpop.f32.mrf.mxu1 }
 0x17c   : > { %1460 = vst.msk [vmem:[%s2433_s20 + $0xa0] sm:$0xff] %vm1439_vm1, %v1395_v47  ;;  %v1398_v24 = vmax.f32 %v1172_v57, 0.0  ;;  %v1167_v53 = vadd.f32 %v1166_v28, %v782_v25 }
 0x17d   : > { %v811_v31 = vpop.f32.mrf.mxu0  ;;  %v1750_v32 = vpop.f32.mrf.mxu1 }
 0x17e   : > { %1463 = vst.msk [vmem:[%s2433_s20 + $0xb8] sm:$0xff] %vm1439_vm1, %v1398_v24  ;;  %v1397_v12 = vmax.f32 %v1167_v53, 0.0  ;;  %v1182_v33 = vadd.f32 %v1750_v32, %v797_v21  ;;  %v812_v5 = vadd.f32 %v2422_v35, %v811_v31 }
 0x17f   : > { %v813_v39 = vpop.f32.mrf.mxu0  ;;  %v1176_v1 = vpop.f32.mrf.mxu1 }
 0x180   : > { %1462 = vst.msk [vmem:[%s2433_s20 + $0xb0] sm:$0xff] %vm1439_vm1, %v1397_v12  ;;  %v1400_v29 = vmax.f32 %v1182_v33, 0.0  ;;  %v1177_v48 = vadd.f32 %v1176_v1, %v792_v36 }
 0x181   : > { %v816_v61 = vpop.f32.mrf.mxu0  ;;  %v1753_v51 = vpop.f32.mrf.mxu1 }
 0x182   : > { %1465 = vst.msk [vmem:[%s2433_s20 + $0xc8] sm:$0xff] %vm1439_vm1, %v1400_v29  ;;  %v1399_v40 = vmax.f32 %v1177_v48, 0.0  ;;  %v1192_v59 = vadd.f32 %v1753_v51, %v807_v44  ;;  %v817_v9 = vadd.f32 %v2422_v35, %v816_v61 }
 0x183   : > { %v818_v41 = vpop.f32.mrf.mxu0  ;;  %v1186_v55 = vpop.f32.mrf.mxu1 }
 0x184   : > { %1464 = vst.msk [vmem:[%s2433_s20 + $0xc0] sm:$0xff] %vm1439_vm1, %v1399_v40  ;;  %v1402_v56 = vmax.f32 %v1192_v59, 0.0  ;;  %v1187_v43 = vadd.f32 %v1186_v55, %v802_v52 }
 0x185   : > { %v821_v37 = vpop.f32.mrf.mxu0  ;;  %v1756_v63 = vpop.f32.mrf.mxu1 }
 0x186   : > { %1467 = vst.msk [vmem:[%s2433_s20 + $0xd8] sm:$0xff] %vm1439_vm1, %v1402_v56  ;;  %v1401_v0 = vmax.f32 %v1187_v43, 0.0  ;;  %v1202_v3 = vadd.f32 %v1756_v63, %v817_v9  ;;  %v822_v8 = vadd.f32 %v2422_v35, %v821_v37 }
 0x187   : > { %v823_v27 = vpop.f32.mrf.mxu0  ;;  %v1196_v4 = vpop.f32.mrf.mxu1 }
 0x188   : > { %1466 = vst.msk [vmem:[%s2433_s20 + $0xd0] sm:$0xff] %vm1439_vm1, %v1401_v0  ;;  %v1404_v7 = vmax.f32 %v1202_v3, 0.0  ;;  %v1197_v17 = vadd.f32 %v1196_v4, %v812_v5 }
 0x189   : > { %v826_v49 = vpop.f32.mrf.mxu0  ;;  %v1759_v11 = vpop.f32.mrf.mxu1 }
 0x18a   : > { %1469 = vst.msk [vmem:[%s2433_s20 + $0xe8] sm:$0xff] %vm1439_vm1, %v1404_v7  ;;  %v1403_v45 = vmax.f32 %v1197_v17, 0.0  ;;  %v827_v13 = vadd.f32 %v2422_v35, %v826_v49 }
 0x18b   : > { %v828_v15 = vpop.f32.mrf.mxu0  ;;  %v1206_v60 = vpop.f32.mrf.mxu1 }
 0x18c   : > { %1468 = vst.msk [vmem:[%s2433_s20 + $0xe0] sm:$0xff] %vm1439_vm1, %v1403_v45  ;;  %v1212_v16 = vadd.f32 %v1759_v11, %v827_v13  ;;  %v1207_v19 = vadd.f32 %v1206_v60, %v822_v8 }
 0x18d   : > { %v831_v20 = vpop.f32.mrf.mxu0  ;;  %v1762_v25 = vpop.f32.mrf.mxu1 }
 0x18e   : > { %v1406_v47 = vmax.f32 %v1212_v16, 0.0  ;;  %v1405_v57 = vmax.f32 %v1207_v19, 0.0  ;;  %v832_v23 = vadd.f32 %v2422_v35, %v831_v20 }
 0x18f   : > { %v833_v28 = vpop.f32.mrf.mxu0  ;;  %v1216_v21 = vpop.f32.mrf.mxu1 }
 0x190   : > { %1471 = vst.msk [vmem:[%s2433_s20 + $0xf8] sm:$0xff] %vm1439_vm1, %v1406_v47  ;;  %1470 = vst.msk [vmem:[%s2433_s20 + $0xf0] sm:$0xff] %vm1439_vm1, %v1405_v57  ;;  %v1217_v24 = vadd.f32 %v1216_v21, %v832_v23 }
 0x191   : > { %v836_v53 = vpop.f32.mrf.mxu0  ;;  %v1765_v31 = vpop.f32.mrf.mxu1 }
 0x192   : > { %v1407_v32 = vmax.f32 %v1217_v24, 0.0  ;;  %v837_v36 = vadd.f32 %v2422_v35, %v836_v53 }
 0x193   : > { %v838_v12 = vpop.f32.mrf.mxu0  ;;  %v1226_v33 = vpop.f32.mrf.mxu1 }
 0x194   : > { %1472 = vst.msk [vmem:[%s2433_s20 + $0x100] sm:$0xff] %vm1439_vm1, %v1407_v32  ;;  %v1222_v39 = vadd.f32 %v1762_v25, %v837_v36 }
 0x195   : > { %v841_v1 = vpop.f32.mrf.mxu0  ;;  %v1768_v44 = vpop.f32.mrf.mxu1 }
 0x196   : > { %v1408_v29 = vmax.f32 %v1222_v39, 0.0  ;;  %v842_v48 = vadd.f32 %v2422_v35, %v841_v1 }
 0x197   : > { %v843_v61 = vpop.f32.mrf.mxu0  ;;  %v1236_v51 = vpop.f32.mrf.mxu1 }
 0x198   : > { %1473 = vst.msk [vmem:[%s2433_s20 + $0x108] sm:$0xff] %vm1439_vm1, %v1408_v29  ;;  %v1227_v52 = vadd.f32 %v1226_v33, %v842_v48  ;;  %v912_v33 = vadd.f32 %v2422_v35, %v2359_v38  ;;  %v927_v61 = vadd.f32 %v2422_v35, %v2369_v50 }
 0x199   : > { %v846_v40 = vpop.f32.mrf.mxu0  ;;  %v1771_v59 = vpop.f32.mrf.mxu1 }
 0x19a   : > { %v1409_v41 = vmax.f32 %v1227_v52, 0.0  ;;  %v847_v55 = vadd.f32 %v2422_v35, %v846_v40  ;;  %v922_v40 = vadd.f32 %v2422_v35, %v2365_v46 }
 0x19b   : > { %v848_v9 = vpop.f32.mrf.mxu0  ;;  %v1246_v56 = vpop.f32.mrf.mxu1 }
 0x19c   : > { %1474 = vst.msk [vmem:[%s2433_s20 + $0x110] sm:$0xff] %vm1439_vm1, %v1409_v41  ;;  %v1232_v43 = vadd.f32 %v1765_v31, %v847_v55  ;;  %v917_v31 = vadd.f32 %v2422_v35, %v2361_v42 }
 0x19d   : > { %v851_v37 = vpop.f32.mrf.mxu0  ;;  %v1774_v63 = vpop.f32.mrf.mxu1 }
 0x19e   : > { %v1410_v5 = vmax.f32 %v1232_v43, 0.0  ;;  %v852_v0 = vadd.f32 %v2422_v35, %v851_v37  ;;  %v937_v37 = vadd.f32 %v2422_v35, %v2377_v58 }
 0x19f   : > { %v853_v3 = vpop.f32.mrf.mxu0  ;;  %v1256_v27 = vpop.f32.mrf.mxu1 }
 0x1a0   : > { %1475 = vst.msk [vmem:[%s2433_s20 + $0x118] sm:$0xff] %vm1439_vm1, %v1410_v5  ;;  %v1237_v4 = vadd.f32 %v1236_v51, %v852_v0  ;;  %v932_v3 = vadd.f32 %v2422_v35, %v2373_v54 }
 0x1a1   : > { %v856_v7 = vpop.f32.mrf.mxu0  ;;  %v2569_v17 = vpop.f32.mrf.mxu1 }
 0x1a2   : > { %v1411_v49 = vmax.f32 %v1237_v4, 0.0  ;;  %v857_v11 = vadd.f32 %v2422_v35, %v856_v7 }
 0x1a3   : > { %v858_v8 = vpop.f32.mrf.mxu0  ;;  %v1266_v45 = vpop.f32.mrf.mxu1 }
 0x1a4   : > { %1476 = vst.msk [vmem:[%s2433_s20 + $0x120] sm:$0xff] %vm1439_vm1, %v1411_v49  ;;  %v1242_v13 = vadd.f32 %v1768_v44, %v857_v11 }
 0x1a5   : > { %v861_v15 = vpop.f32.mrf.mxu0  ;;  %v2574_v60 = vpop.f32.mrf.mxu1 }
 0x1a6   : > { %v1412_v16 = vmax.f32 %v1242_v13, 0.0  ;;  %v862_v19 = vadd.f32 %v2422_v35, %v861_v15 }
 0x1a7   : > { %v863_v20 = vpop.f32.mrf.mxu0  ;;  %v2577_v25 = vpop.f32.mrf.mxu1 }
 0x1a8   : > { %1477 = vst.msk [vmem:[%s2433_s20 + $0x128] sm:$0xff] %vm1439_vm1, %v1412_v16  ;;  %v1247_v47 = vadd.f32 %v1246_v56, %v862_v19  ;;  %v942_v19 = vadd.f32 %v2422_v35, %v2381_v62 }
 0x1a9   : > { %v866_v57 = vpop.f32.mrf.mxu0  ;;  %v2581_v23 = vpop.f32.mrf.mxu1 }
 0x1aa   : > { %v1413_v28 = vmax.f32 %v1247_v47, 0.0  ;;  %v867_v21 = vadd.f32 %v2422_v35, %v866_v57 }
 0x1ab   : > { %v868_v24 = vpop.f32.mrf.mxu0  ;;  %v2584_v53 = vpop.f32.mrf.mxu1 }
 0x1ac   : > { %1478 = vst.msk [vmem:[%s2433_s20 + $0x130] sm:$0xff] %vm1439_vm1, %v1413_v28  ;;  %v1252_v32 = vadd.f32 %v1771_v59, %v867_v21 }
 0x1ad   : > { %v871_v36 = vpop.f32.mrf.mxu0  ;;  %v1786_v12 = vpop.f32.mrf.mxu1 }
 0x1ae   : > { %v1414_v39 = vmax.f32 %v1252_v32, 0.0  ;;  %v872_v1 = vadd.f32 %v2422_v35, %v871_v36  ;;  %v1302_v44 = vadd.f32 %v1786_v12, %v917_v31  ;;  %v952_v12 = vadd.f32 %v2422_v35, %v2389_v6 }
 0x1af   : > { %v873_v29 = vpop.f32.mrf.mxu0  ;;  %v1296_v48 = vpop.f32.mrf.mxu1 }
 0x1b0   : > { %1479 = vst.msk [vmem:[%s2433_s20 + $0x138] sm:$0xff] %vm1439_vm1, %v1414_v39  ;;  %v1257_v42 = vadd.f32 %v1256_v27, %v872_v1  ;;  %v1424_v51 = vmax.f32 %v1302_v44, 0.0  ;;  %v1297_v52 = vadd.f32 %v1296_v48, %v912_v33 }
 0x1b1   : > { %v876_v38 = vpop.f32.mrf.mxu0  ;;  %v1789_v59 = vpop.f32.mrf.mxu1 }
 0x1b2   : > { %v1415_v41 = vmax.f32 %v1257_v42, 0.0  ;;  %1489 = vst.msk [vmem:[%s2433_s20 + $0x188] sm:$0xff] %vm1439_vm1, %v1424_v51  ;;  %v1423_v55 = vmax.f32 %v1297_v52, 0.0  ;;  %v877_v9 = vadd.f32 %v2422_v35, %v876_v38  ;;  %v1312_v50 = vadd.f32 %v1789_v59, %v927_v61 }
 0x1b3   : > { %v878_v56 = vpop.f32.mrf.mxu0  ;;  %v1306_v43 = vpop.f32.mrf.mxu1  ;;  %v962_v52 = vadd.f32 %v2422_v35, %v2397_v14 }
 0x1b4   : > { %1480 = vst.msk [vmem:[%s2433_s20 + $0x140] sm:$0xff] %vm1439_vm1, %v1415_v41  ;;  %1488 = vst.msk [vmem:[%s2433_s20 + $0x180] sm:$0xff] %vm1439_vm1, %v1423_v55  ;;  %v1262_v46 = vadd.f32 %v1774_v63, %v877_v9  ;;  %v1426_v5 = vmax.f32 %v1312_v50, 0.0  ;;  %v1307_v0 = vadd.f32 %v1306_v43, %v922_v40  ;;  %v947_v63 = vadd.f32 %v2422_v35, %v2385_v2 }
 0x1b5   : > { %v881_v27 = vpop.f32.mrf.mxu0  ;;  %v1792_v4 = vpop.f32.mrf.mxu1 }
 0x1b6   : > { %v1416_v7 = vmax.f32 %v1262_v46, 0.0  ;;  %1491 = vst.msk [vmem:[%s2433_s20 + $0x198] sm:$0xff] %vm1439_vm1, %v1426_v5  ;;  %v1425_v49 = vmax.f32 %v1307_v0, 0.0  ;;  %v882_v58 = vadd.f32 %v2422_v35, %v881_v27  ;;  %v1322_v11 = vadd.f32 %v1792_v4, %v937_v37 }
 0x1b7   : > { %v883_v8 = vpop.f32.mrf.mxu0  ;;  %v1316_v13 = vpop.f32.mrf.mxu1  ;;  %v972_v37 = vadd.f32 %v2422_v35, %v2405_v22 }
 0x1b8   : > { %1481 = vst.msk [vmem:[%s2433_s20 + $0x148] sm:$0xff] %vm1439_vm1, %v1416_v7  ;;  %1490 = vst.msk [vmem:[%s2433_s20 + $0x190] sm:$0xff] %vm1439_vm1, %v1425_v49  ;;  %v1267_v54 = vadd.f32 %v1266_v45, %v882_v58  ;;  %v1428_v15 = vmax.f32 %v1322_v11, 0.0  ;;  %v1317_v16 = vadd.f32 %v1316_v13, %v932_v3  ;;  %v957_v45 = vadd.f32 %v2422_v35, %v2393_v10 }
 0x1b9   : > { %v886_v20 = vpop.f32.mrf.mxu0  ;;  %v1795_v47 = vpop.f32.mrf.mxu1  ;;  %v982_v11 = vadd.f32 %v2422_v35, %v2413_v30 }
 0x1ba   : > { %v1417_v57 = vmax.f32 %v1267_v54, 0.0  ;;  %1493 = vst.msk [vmem:[%s2433_s20 + $0x1a8] sm:$0xff] %vm1439_vm1, %v1428_v15  ;;  %v1427_v28 = vmax.f32 %v1317_v16, 0.0  ;;  %v887_v2 = vadd.f32 %v2422_v35, %v886_v20  ;;  %v1332_v21 = vadd.f32 %v1795_v47, %v947_v63 }
 0x1bb   : > { %v888_v24 = vpop.f32.mrf.mxu0  ;;  %v1326_v31 = vpop.f32.mrf.mxu1 }
 0x1bc   : > { %1482 = vst.msk [vmem:[%s2433_s20 + $0x150] sm:$0xff] %vm1439_vm1, %v1417_v57  ;;  %1492 = vst.msk [vmem:[%s2433_s20 + $0x1a0] sm:$0xff] %vm1439_vm1, %v1427_v28  ;;  %v1272_v62 = vadd.f32 %v2569_v17, %v887_v2  ;;  %v1430_v32 = vmax.f32 %v1332_v21, 0.0  ;;  %v1327_v36 = vadd.f32 %v1326_v31, %v942_v19  ;;  %v967_v17 = vadd.f32 %v2422_v35, %v2401_v18 }
 0x1bd   : > { %v891_v33 = vpop.f32.mrf.mxu0  ;;  %v1798_v39 = vpop.f32.mrf.mxu1 }
 0x1be   : > { %v1418_v1 = vmax.f32 %v1272_v62, 0.0  ;;  %1495 = vst.msk [vmem:[%s2433_s20 + $0x1b8] sm:$0xff] %vm1439_vm1, %v1430_v32  ;;  %v1429_v10 = vmax.f32 %v1327_v36, 0.0  ;;  %v892_v44 = vadd.f32 %v2422_v35, %v891_v33  ;;  %v1342_v29 = vadd.f32 %v1798_v39, %v957_v45 }
 0x1bf   : > { %v893_v48 = vpop.f32.mrf.mxu0  ;;  %v1336_v61 = vpop.f32.mrf.mxu1 }
 0x1c0   : > { %1483 = vst.msk [vmem:[%s2433_s20 + $0x158] sm:$0xff] %vm1439_vm1, %v1418_v1  ;;  %1494 = vst.msk [vmem:[%s2433_s20 + $0x1b0] sm:$0xff] %vm1439_vm1, %v1429_v10  ;;  %v1277_v6 = vadd.f32 %v2577_v25, %v892_v44  ;;  %v1432_v42 = vmax.f32 %v1342_v29, 0.0  ;;  %v1337_v51 = vadd.f32 %v1336_v61, %v952_v12  ;;  %v977_v25 = vadd.f32 %v2422_v35, %v2409_v26 }
 0x1c1   : > { %v896_v40 = vpop.f32.mrf.mxu0  ;;  %v1801_v38 = vpop.f32.mrf.mxu1 }
 0x1c2   : > { %v1419_v59 = vmax.f32 %v1277_v6, 0.0  ;;  %1497 = vst.msk [vmem:[%s2433_s20 + $0x1c8] sm:$0xff] %vm1439_vm1, %v1432_v42  ;;  %v1431_v18 = vmax.f32 %v1337_v51, 0.0  ;;  %v897_v41 = vadd.f32 %v2422_v35, %v896_v40  ;;  %v1352_v55 = vadd.f32 %v1801_v38, %v967_v17 }
 0x1c3   : > { %v898_v9 = vpop.f32.mrf.mxu0  ;;  %v1346_v50 = vpop.f32.mrf.mxu1 }
 0x1c4   : > { %1484 = vst.msk [vmem:[%s2433_s20 + $0x160] sm:$0xff] %vm1439_vm1, %v1419_v59  ;;  %1496 = vst.msk [vmem:[%s2433_s20 + $0x1c0] sm:$0xff] %vm1439_vm1, %v1431_v18  ;;  %v1282_v14 = vadd.f32 %v2574_v60, %v897_v41  ;;  %v1434_v56 = vmax.f32 %v1352_v55, 0.0  ;;  %v1347_v43 = vadd.f32 %v1346_v50, %v962_v52  ;;  %v987_v60 = vadd.f32 %v2422_v35, %v2417_v34 }
 0x1c5   : > { %v901_v46 = vpop.f32.mrf.mxu0  ;;  %v1804_v5 = vpop.f32.mrf.mxu1 }
 0x1c6   : > { %v1420_v0 = vmax.f32 %v1282_v14, 0.0  ;;  %1499 = vst.msk [vmem:[%s2433_s20 + $0x1d8] sm:$0xff] %vm1439_vm1, %v1434_v56  ;;  %v1433_v26 = vmax.f32 %v1347_v43, 0.0  ;;  %v902_v3 = vadd.f32 %v2422_v35, %v901_v46  ;;  %v1362_v27 = vadd.f32 %v1804_v5, %v977_v25 }
 0x1c7   : > { %v903_v4 = vpop.f32.mrf.mxu0  ;;  %v1356_v7 = vpop.f32.mrf.mxu1 }
 0x1c8   : > { %1485 = vst.msk [vmem:[%s2433_s20 + $0x168] sm:$0xff] %vm1439_vm1, %v1420_v0  ;;  %1498 = vst.msk [vmem:[%s2433_s20 + $0x1d0] sm:$0xff] %vm1439_vm1, %v1433_v26  ;;  %v1287_v22 = vadd.f32 %v2584_v53, %v902_v3  ;;  %v1436_v49 = vmax.f32 %v1362_v27, 0.0  ;;  %v1357_v58 = vadd.f32 %v1356_v7, %v972_v37 }
 0x1c9   : > { %v906_v8 = vpop.f32.mrf.mxu0  ;;  %v1807_v13 = vpop.f32.mrf.mxu1 }
 0x1ca   : > { %v1421_v63 = vmax.f32 %v1287_v22, 0.0  ;;  %1501 = vst.msk [vmem:[%s2433_s20 + $0x1e8] sm:$0xff] %vm1439_vm1, %v1436_v49  ;;  %v1435_v34 = vmax.f32 %v1357_v58, 0.0  ;;  %v907_v54 = vadd.f32 %v2422_v35, %v906_v8  ;;  %v1372_v15 = vadd.f32 %v1807_v13, %v987_v60 }
 0x1cb   : > { %v908_v16 = vpop.f32.mrf.mxu0  ;;  %v1366_v19 = vpop.f32.mrf.mxu1 }
 0x1cc   : > { %1486 = vst.msk [vmem:[%s2433_s20 + $0x170] sm:$0xff] %vm1439_vm1, %v1421_v63  ;;  %1500 = vst.msk [vmem:[%s2433_s20 + $0x1e0] sm:$0xff] %vm1439_vm1, %v1435_v34  ;;  %v1292_v30 = vadd.f32 %v2581_v23, %v907_v54  ;;  %v1438_v53 = vmax.f32 %v1372_v15, 0.0  ;;  %v1367_v20 = vadd.f32 %v1366_v19, %v982_v11 }
 0x1ce   : > { %v1422_v47 = vmax.f32 %v1292_v30, 0.0  ;;  %1503 = vst.msk [vmem:[%s2433_s20 + $0x1f8] sm:$0xff] %vm1439_vm1, %v1438_v53  ;;  %v1437_v57 = vmax.f32 %v1367_v20, 0.0 }
 0x1d0   : > { %1487 = vst.msk [vmem:[%s2433_s20 + $0x178] sm:$0xff] %vm1439_vm1, %v1422_v47  ;;  %1502 = vst.msk [vmem:[%s2433_s20 + $0x1f0] sm:$0xff] %vm1439_vm1, %v1437_v57 }
 0x1d1 PF: > { %s13_s12 = sadd.s32 1, %s1888_s12  }
 0x1d2   : > { %p10_p4 = scmp.ge.s32.totalorder %s13_s12, 5  }
 0x1d4   :  { %12 = sbr.rel (!%p10_p4) target bundleno = 1 (0x1), region = 62 }

// kernel: net_forward.6
= control target key start
LH: loop header
LB: loop body
LE: loop exit
PB: predicated region body
PF: predicated region fallthrough
CT: control target
= control target key end

     0   :  { %vm263_vm0 = vcmask 523264   ;;  %s998_s0 = inlined_call_operand.vmem [shape: f32[4,288,64], index: 0, kind: input, shape index: {}]   ;;  %s999_s1 = inlined_call_operand.vmem [shape: f32[288,64], index: 1, kind: output, shape index: {}]  }
   0x1   :  { %v8_v0 = vld [vmem:[%s998_s0] sm:$0xff]  ;;  %v9_v5 = vld [vmem:[%s998_s0 + $0x8] sm:$0xff]  ;;  %v10_v11 = vld [vmem:[%s998_s0 + $0x10] sm:$0xff] }
   0x2   :  { %v304_v1 = vld [vmem:[%s998_s0 + $0x120] sm:$0xff]  ;;  %v305_v6 = vld [vmem:[%s998_s0 + $0x128] sm:$0xff]  ;;  %v306_v13 = vld [vmem:[%s998_s0 + $0x130] sm:$0xff] }
   0x3   :  { %v340_v2 = vld [vmem:[%s998_s0 + $0x240] sm:$0xff]  ;;  %v81_v3 = vmax.f32 %v8_v0, %v304_v1  ;;  %v82_v8 = vmax.f32 %v9_v5, %v305_v6  ;;  %v341_v9 = vld [vmem:[%s998_s0 + $0x248] sm:$0xff]  ;;  %v342_v14 = vld [vmem:[%s998_s0 + $0x250] sm:$0xff]  ;;  %v83_v17 = vmax.f32 %v10_v11, %v306_v13 }
   0x4   :  { %v376_v4 = vld [vmem:[%s998_s0 + $0x360] sm:$0xff]  ;;  %v377_v10 = vld [vmem:[%s998_s0 + $0x368] sm:$0xff]  ;;  %v378_v15 = vld [vmem:[%s998_s0 + $0x370] sm:$0xff] }
   0x5   :  { %v191_v7 = vmax.f32 %v340_v2, %v376_v4  ;;  %v192_v12 = vmax.f32 %v341_v9, %v377_v10  ;;  %v193_v18 = vmax.f32 %v342_v14, %v378_v15  ;;  %v11_v19 = vld [vmem:[%s998_s0 + $0x18] sm:$0xff]  ;;  %v12_v25 = vld [vmem:[%s998_s0 + $0x20] sm:$0xff]  ;;  %v13_v32 = vld [vmem:[%s998_s0 + $0x28] sm:$0xff] }
   0x6   :  { %v307_v20 = vld [vmem:[%s998_s0 + $0x138] sm:$0xff]  ;;  %v308_v26 = vld [vmem:[%s998_s0 + $0x140] sm:$0xff]  ;;  %v309_v34 = vld [vmem:[%s998_s0 + $0x148] sm:$0xff] }
   0x7   :  { %v227_v16 = vmax.f32 %v81_v3, %v191_v7  ;;  %v343_v21 = vld [vmem:[%s998_s0 + $0x258] sm:$0xff]  ;;  %v228_v22 = vmax.f32 %v82_v8, %v192_v12  ;;  %v84_v23 = vmax.f32 %v11_v19, %v307_v20  ;;  %v229_v27 = vmax.f32 %v83_v17, %v193_v18  ;;  %v344_v30 = vld [vmem:[%s998_s0 + $0x260] sm:$0xff]  ;;  %v345_v35 = vld [vmem:[%s998_s0 + $0x268] sm:$0xff] }
   0x8   :  { %v379_v24 = vld [vmem:[%s998_s0 + $0x378] sm:$0xff]  ;;  %v85_v29 = vmax.f32 %v12_v25, %v308_v26  ;;  %v380_v31 = vld [vmem:[%s998_s0 + $0x380] sm:$0xff]  ;;  %v381_v36 = vld [vmem:[%s998_s0 + $0x388] sm:$0xff]  ;;  %v86_v38 = vmax.f32 %v13_v32, %v309_v34 }
   0x9   :  { %264 = vst.msk [vmem:[%s999_s1] sm:$0xff] %vm263_vm0, %v227_v16  ;;  %v194_v28 = vmax.f32 %v343_v21, %v379_v24  ;;  %265 = vst.msk [vmem:[%s999_s1 + $0x8] sm:$0xff] %vm263_vm0, %v228_v22  ;;  %v195_v33 = vmax.f32 %v344_v30, %v380_v31  ;;  %v196_v39 = vmax.f32 %v345_v35, %v381_v36  ;;  %v14_v40 = vld [vmem:[%s998_s0 + $0x30] sm:$0xff]  ;;  %v15_v46 = vld [vmem:[%s998_s0 + $0x38] sm:$0xff] }
   0xa   :  { %266 = vst.msk [vmem:[%s999_s1 + $0x10] sm:$0xff] %vm263_vm0, %v229_v27  ;;  %v310_v41 = vld [vmem:[%s998_s0 + $0x150] sm:$0xff]  ;;  %v311_v47 = vld [vmem:[%s998_s0 + $0x158] sm:$0xff]  ;;  %v16_v53 = vld [vmem:[%s998_s0 + $0x40] sm:$0xff] }
   0xb   :  { %v230_v37 = vmax.f32 %v84_v23, %v194_v28  ;;  %v346_v42 = vld [vmem:[%s998_s0 + $0x270] sm:$0xff]  ;;  %v231_v43 = vmax.f32 %v85_v29, %v195_v33  ;;  %v87_v44 = vmax.f32 %v14_v40, %v310_v41  ;;  %v232_v48 = vmax.f32 %v86_v38, %v196_v39  ;;  %v347_v51 = vld [vmem:[%s998_s0 + $0x278] sm:$0xff]  ;;  %v312_v55 = vld [vmem:[%s998_s0 + $0x160] sm:$0xff] }
   0xc   :  { %v382_v45 = vld [vmem:[%s998_s0 + $0x390] sm:$0xff]  ;;  %v88_v50 = vmax.f32 %v15_v46, %v311_v47  ;;  %v383_v52 = vld [vmem:[%s998_s0 + $0x398] sm:$0xff]  ;;  %v348_v56 = vld [vmem:[%s998_s0 + $0x280] sm:$0xff]  ;;  %v89_v59 = vmax.f32 %v16_v53, %v312_v55 }
   0xd   :  { %267 = vst.msk [vmem:[%s999_s1 + $0x18] sm:$0xff] %vm263_vm0, %v230_v37  ;;  %v197_v49 = vmax.f32 %v346_v42, %v382_v45  ;;  %268 = vst.msk [vmem:[%s999_s1 + $0x20] sm:$0xff] %vm263_vm0, %v231_v43  ;;  %v198_v54 = vmax.f32 %v347_v51, %v383_v52  ;;  %v384_v57 = vld [vmem:[%s998_s0 + $0x3a0] sm:$0xff]  ;;  %v17_v61 = vld [vmem:[%s998_s0 + $0x48] sm:$0xff] }
   0xe   :  { %269 = vst.msk [vmem:[%s999_s1 + $0x28] sm:$0xff] %vm263_vm0, %v232_v48  ;;  %v199_v60 = vmax.f32 %v348_v56, %v384_v57  ;;  %v313_v62 = vld [vmem:[%s998_s0 + $0x168] sm:$0xff]  ;;  %v18_v3 = vld [vmem:[%s998_s0 + $0x50] sm:$0xff]  ;;  %v19_v10 = vld [vmem:[%s998_s0 + $0x58] sm:$0xff] }
   0xf   :  { %v233_v58 = vmax.f32 %v87_v44, %v197_v49  ;;  %v349_v63 = vld [vmem:[%s998_s0 + $0x288] sm:$0xff]  ;;  %v234_v0 = vmax.f32 %v88_v50, %v198_v54  ;;  %v90_v1 = vmax.f32 %v17_v61, %v313_v62  ;;  %v314_v4 = vld [vmem:[%s998_s0 + $0x170] sm:$0xff]  ;;  %v315_v12 = vld [vmem:[%s998_s0 + $0x178] sm:$0xff] }
  0x10   :  { %v385_v2 = vld [vmem:[%s998_s0 + $0x3a8] sm:$0xff]  ;;  %v235_v5 = vmax.f32 %v89_v59, %v199_v60  ;;  %v91_v7 = vmax.f32 %v18_v3, %v314_v4  ;;  %v350_v8 = vld [vmem:[%s998_s0 + $0x290] sm:$0xff]  ;;  %v351_v13 = vld [vmem:[%s998_s0 + $0x298] sm:$0xff]  ;;  %v92_v16 = vmax.f32 %v19_v10, %v315_v12 }
  0x11   :  { %270 = vst.msk [vmem:[%s999_s1 + $0x30] sm:$0xff] %vm263_vm0, %v233_v58  ;;  %v200_v6 = vmax.f32 %v349_v63, %v385_v2  ;;  %v386_v9 = vld [vmem:[%s998_s0 + $0x3b0] sm:$0xff]  ;;  %271 = vst.msk [vmem:[%s999_s1 + $0x38] sm:$0xff] %vm263_vm0, %v234_v0  ;;  %v387_v14 = vld [vmem:[%s998_s0 + $0x3b8] sm:$0xff] }
  0x12   :  { %v201_v11 = vmax.f32 %v350_v8, %v386_v9  ;;  %272 = vst.msk [vmem:[%s999_s1 + $0x40] sm:$0xff] %vm263_vm0, %v235_v5  ;;  %v202_v17 = vmax.f32 %v351_v13, %v387_v14  ;;  %v20_v18 = vld [vmem:[%s998_s0 + $0x60] sm:$0xff]  ;;  %v21_v24 = vld [vmem:[%s998_s0 + $0x68] sm:$0xff]  ;;  %v22_v31 = vld [vmem:[%s998_s0 + $0x70] sm:$0xff] }
  0x13   :  { %v236_v15 = vmax.f32 %v90_v1, %v200_v6  ;;  %v316_v19 = vld [vmem:[%s998_s0 + $0x180] sm:$0xff]  ;;  %v317_v25 = vld [vmem:[%s998_s0 + $0x188] sm:$0xff]  ;;  %v318_v33 = vld [vmem:[%s998_s0 + $0x190] sm:$0xff] }
  0x14   :  { %v352_v20 = vld [vmem:[%s998_s0 + $0x2a0] sm:$0xff]  ;;  %v237_v21 = vmax.f32 %v91_v7, %v201_v11  ;;  %v93_v22 = vmax.f32 %v20_v18, %v316_v19  ;;  %v238_v26 = vmax.f32 %v92_v16, %v202_v17  ;;  %v94_v28 = vmax.f32 %v21_v24, %v317_v25  ;;  %v353_v29 = vld [vmem:[%s998_s0 + $0x2a8] sm:$0xff]  ;;  %v354_v34 = vld [vmem:[%s998_s0 + $0x2b0] sm:$0xff] }
  0x15   :  { %v388_v23 = vld [vmem:[%s998_s0 + $0x3c0] sm:$0xff]  ;;  %273 = vst.msk [vmem:[%s999_s1 + $0x48] sm:$0xff] %vm263_vm0, %v236_v15  ;;  %v389_v30 = vld [vmem:[%s998_s0 + $0x3c8] sm:$0xff]  ;;  %v390_v35 = vld [vmem:[%s998_s0 + $0x3d0] sm:$0xff]  ;;  %v95_v37 = vmax.f32 %v22_v31, %v318_v33 }
  0x16   :  { %v203_v27 = vmax.f32 %v352_v20, %v388_v23  ;;  %274 = vst.msk [vmem:[%s999_s1 + $0x50] sm:$0xff] %vm263_vm0, %v237_v21  ;;  %v204_v32 = vmax.f32 %v353_v29, %v389_v30  ;;  %275 = vst.msk [vmem:[%s999_s1 + $0x58] sm:$0xff] %vm263_vm0, %v238_v26  ;;  %v205_v38 = vmax.f32 %v354_v34, %v390_v35  ;;  %v23_v39 = vld [vmem:[%s998_s0 + $0x78] sm:$0xff]  ;;  %v24_v45 = vld [vmem:[%s998_s0 + $0x80] sm:$0xff] }
  0x17   :  { %v319_v40 = vld [vmem:[%s998_s0 + $0x198] sm:$0xff]  ;;  %v320_v46 = vld [vmem:[%s998_s0 + $0x1a0] sm:$0xff]  ;;  %v25_v52 = vld [vmem:[%s998_s0 + $0x88] sm:$0xff] }
  0x18   :  { %v239_v36 = vmax.f32 %v93_v22, %v203_v27  ;;  %v355_v41 = vld [vmem:[%s998_s0 + $0x2b8] sm:$0xff]  ;;  %v240_v42 = vmax.f32 %v94_v28, %v204_v32  ;;  %v96_v43 = vmax.f32 %v23_v39, %v319_v40  ;;  %v241_v47 = vmax.f32 %v95_v37, %v205_v38  ;;  %v356_v50 = vld [vmem:[%s998_s0 + $0x2c0] sm:$0xff]  ;;  %v321_v54 = vld [vmem:[%s998_s0 + $0x1a8] sm:$0xff] }
  0x19   :  { %v391_v44 = vld [vmem:[%s998_s0 + $0x3d8] sm:$0xff]  ;;  %v97_v49 = vmax.f32 %v24_v45, %v320_v46  ;;  %v392_v51 = vld [vmem:[%s998_s0 + $0x3e0] sm:$0xff]  ;;  %v357_v55 = vld [vmem:[%s998_s0 + $0x2c8] sm:$0xff]  ;;  %v98_v58 = vmax.f32 %v25_v52, %v321_v54 }
  0x1a   :  { %276 = vst.msk [vmem:[%s999_s1 + $0x60] sm:$0xff] %vm263_vm0, %v239_v36  ;;  %v206_v48 = vmax.f32 %v355_v41, %v391_v44  ;;  %277 = vst.msk [vmem:[%s999_s1 + $0x68] sm:$0xff] %vm263_vm0, %v240_v42  ;;  %v207_v53 = vmax.f32 %v356_v50, %v392_v51  ;;  %v393_v56 = vld [vmem:[%s998_s0 + $0x3e8] sm:$0xff]  ;;  %v26_v60 = vld [vmem:[%s998_s0 + $0x90] sm:$0xff] }
  0x1b   :  { %278 = vst.msk [vmem:[%s999_s1 + $0x70] sm:$0xff] %vm263_vm0, %v241_v47  ;;  %v208_v59 = vmax.f32 %v357_v55, %v393_v56  ;;  %v322_v61 = vld [vmem:[%s998_s0 + $0x1b0] sm:$0xff]  ;;  %v27_v2 = vld [vmem:[%s998_s0 + $0x98] sm:$0xff]  ;;  %v28_v9 = vld [vmem:[%s998_s0 + $0xa0] sm:$0xff] }
  0x1c   :  { %v242_v57 = vmax.f32 %v96_v43, %v206_v48  ;;  %v358_v62 = vld [vmem:[%s998_s0 + $0x2d0] sm:$0xff]  ;;  %v243_v63 = vmax.f32 %v97_v49, %v207_v53  ;;  %v99_v0 = vmax.f32 %v26_v60, %v322_v61  ;;  %v323_v3 = vld [vmem:[%s998_s0 + $0x1b8] sm:$0xff]  ;;  %v324_v11 = vld [vmem:[%s998_s0 + $0x1c0] sm:$0xff] }
  0x1d   :  { %v394_v1 = vld [vmem:[%s998_s0 + $0x3f0] sm:$0xff]  ;;  %v244_v4 = vmax.f32 %v98_v58, %v208_v59  ;;  %v100_v6 = vmax.f32 %v27_v2, %v323_v3  ;;  %v359_v7 = vld [vmem:[%s998_s0 + $0x2d8] sm:$0xff]  ;;  %v360_v12 = vld [vmem:[%s998_s0 + $0x2e0] sm:$0xff]  ;;  %v101_v15 = vmax.f32 %v28_v9, %v324_v11 }
  0x1e   :  { %279 = vst.msk [vmem:[%s999_s1 + $0x78] sm:$0xff] %vm263_vm0, %v242_v57  ;;  %v209_v5 = vmax.f32 %v358_v62, %v394_v1  ;;  %v395_v8 = vld [vmem:[%s998_s0 + $0x3f8] sm:$0xff]  ;;  %280 = vst.msk [vmem:[%s999_s1 + $0x80] sm:$0xff] %vm263_vm0, %v243_v63  ;;  %v396_v13 = vld [vmem:[%s998_s0 + $0x400] sm:$0xff] }
  0x1f   :  { %v210_v10 = vmax.f32 %v359_v7, %v395_v8  ;;  %281 = vst.msk [vmem:[%s999_s1 + $0x88] sm:$0xff] %vm263_vm0, %v244_v4  ;;  %v211_v16 = vmax.f32 %v360_v12, %v396_v13  ;;  %v29_v17 = vld [vmem:[%s998_s0 + $0xa8] sm:$0xff]  ;;  %v30_v23 = vld [vmem:[%s998_s0 + $0xb0] sm:$0xff]  ;;  %v31_v30 = vld [vmem:[%s998_s0 + $0xb8] sm:$0xff] }
  0x20   :  { %v245_v14 = vmax.f32 %v99_v0, %v209_v5  ;;  %v325_v18 = vld [vmem:[%s998_s0 + $0x1c8] sm:$0xff]  ;;  %v326_v24 = vld [vmem:[%s998_s0 + $0x1d0] sm:$0xff]  ;;  %v327_v32 = vld [vmem:[%s998_s0 + $0x1d8] sm:$0xff] }
  0x21   :  { %v361_v19 = vld [vmem:[%s998_s0 + $0x2e8] sm:$0xff]  ;;  %v246_v20 = vmax.f32 %v100_v6, %v210_v10  ;;  %v102_v21 = vmax.f32 %v29_v17, %v325_v18  ;;  %v247_v25 = vmax.f32 %v101_v15, %v211_v16  ;;  %v103_v27 = vmax.f32 %v30_v23, %v326_v24  ;;  %v362_v28 = vld [vmem:[%s998_s0 + $0x2f0] sm:$0xff]  ;;  %v363_v33 = vld [vmem:[%s998_s0 + $0x2f8] sm:$0xff] }
  0x22   :  { %v397_v22 = vld [vmem:[%s998_s0 + $0x408] sm:$0xff]  ;;  %282 = vst.msk [vmem:[%s999_s1 + $0x90] sm:$0xff] %vm263_vm0, %v245_v14  ;;  %v398_v29 = vld [vmem:[%s998_s0 + $0x410] sm:$0xff]  ;;  %v399_v34 = vld [vmem:[%s998_s0 + $0x418] sm:$0xff]  ;;  %v104_v36 = vmax.f32 %v31_v30, %v327_v32 }
  0x23   :  { %v212_v26 = vmax.f32 %v361_v19, %v397_v22  ;;  %283 = vst.msk [vmem:[%s999_s1 + $0x98] sm:$0xff] %vm263_vm0, %v246_v20  ;;  %v213_v31 = vmax.f32 %v362_v28, %v398_v29  ;;  %284 = vst.msk [vmem:[%s999_s1 + $0xa0] sm:$0xff] %vm263_vm0, %v247_v25  ;;  %v214_v37 = vmax.f32 %v363_v33, %v399_v34  ;;  %v32_v38 = vld [vmem:[%s998_s0 + $0xc0] sm:$0xff]  ;;  %v33_v44 = vld [vmem:[%s998_s0 + $0xc8] sm:$0xff] }
  0x24   :  { %v328_v39 = vld [vmem:[%s998_s0 + $0x1e0] sm:$0xff]  ;;  %v329_v45 = vld [vmem:[%s998_s0 + $0x1e8] sm:$0xff]  ;;  %v34_v51 = vld [vmem:[%s998_s0 + $0xd0] sm:$0xff] }
  0x25   :  { %v248_v35 = vmax.f32 %v102_v21, %v212_v26  ;;  %v364_v40 = vld [vmem:[%s998_s0 + $0x300] sm:$0xff]  ;;  %v249_v41 = vmax.f32 %v103_v27, %v213_v31  ;;  %v105_v42 = vmax.f32 %v32_v38, %v328_v39  ;;  %v250_v46 = vmax.f32 %v104_v36, %v214_v37  ;;  %v365_v49 = vld [vmem:[%s998_s0 + $0x308] sm:$0xff]  ;;  %v330_v53 = vld [vmem:[%s998_s0 + $0x1f0] sm:$0xff] }
  0x26   :  { %v400_v43 = vld [vmem:[%s998_s0 + $0x420] sm:$0xff]  ;;  %v106_v48 = vmax.f32 %v33_v44, %v329_v45  ;;  %v401_v50 = vld [vmem:[%s998_s0 + $0x428] sm:$0xff]  ;;  %v366_v54 = vld [vmem:[%s998_s0 + $0x310] sm:$0xff]  ;;  %v107_v57 = vmax.f32 %v34_v51, %v330_v53 }
  0x27   :  { %285 = vst.msk [vmem:[%s999_s1 + $0xa8] sm:$0xff] %vm263_vm0, %v248_v35  ;;  %v215_v47 = vmax.f32 %v364_v40, %v400_v43  ;;  %286 = vst.msk [vmem:[%s999_s1 + $0xb0] sm:$0xff] %vm263_vm0, %v249_v41  ;;  %v216_v52 = vmax.f32 %v365_v49, %v401_v50  ;;  %v402_v55 = vld [vmem:[%s998_s0 + $0x430] sm:$0xff]  ;;  %v35_v59 = vld [vmem:[%s998_s0 + $0xd8] sm:$0xff] }
  0x28   :  { %287 = vst.msk [vmem:[%s999_s1 + $0xb8] sm:$0xff] %vm263_vm0, %v250_v46  ;;  %v217_v58 = vmax.f32 %v366_v54, %v402_v55  ;;  %v331_v60 = vld [vmem:[%s998_s0 + $0x1f8] sm:$0xff]  ;;  %v36_v1 = vld [vmem:[%s998_s0 + $0xe0] sm:$0xff]  ;;  %v37_v8 = vld [vmem:[%s998_s0 + $0xe8] sm:$0xff] }
  0x29   :  { %v251_v56 = vmax.f32 %v105_v42, %v215_v47  ;;  %v367_v61 = vld [vmem:[%s998_s0 + $0x318] sm:$0xff]  ;;  %v252_v62 = vmax.f32 %v106_v48, %v216_v52  ;;  %v108_v63 = vmax.f32 %v35_v59, %v331_v60  ;;  %v332_v2 = vld [vmem:[%s998_s0 + $0x200] sm:$0xff]  ;;  %v333_v10 = vld [vmem:[%s998_s0 + $0x208] sm:$0xff] }
  0x2a   :  { %v403_v0 = vld [vmem:[%s998_s0 + $0x438] sm:$0xff]  ;;  %v253_v3 = vmax.f32 %v107_v57, %v217_v58  ;;  %v109_v5 = vmax.f32 %v36_v1, %v332_v2  ;;  %v368_v6 = vld [vmem:[%s998_s0 + $0x320] sm:$0xff]  ;;  %v369_v11 = vld [vmem:[%s998_s0 + $0x328] sm:$0xff]  ;;  %v110_v14 = vmax.f32 %v37_v8, %v333_v10 }
  0x2b   :  { %288 = vst.msk [vmem:[%s999_s1 + $0xc0] sm:$0xff] %vm263_vm0, %v251_v56  ;;  %v218_v4 = vmax.f32 %v367_v61, %v403_v0  ;;  %v404_v7 = vld [vmem:[%s998_s0 + $0x440] sm:$0xff]  ;;  %289 = vst.msk [vmem:[%s999_s1 + $0xc8] sm:$0xff] %vm263_vm0, %v252_v62  ;;  %v405_v12 = vld [vmem:[%s998_s0 + $0x448] sm:$0xff] }
  0x2c   :  { %v219_v9 = vmax.f32 %v368_v6, %v404_v7  ;;  %290 = vst.msk [vmem:[%s999_s1 + $0xd0] sm:$0xff] %vm263_vm0, %v253_v3  ;;  %v220_v15 = vmax.f32 %v369_v11, %v405_v12  ;;  %v38_v16 = vld [vmem:[%s998_s0 + $0xf0] sm:$0xff]  ;;  %v39_v22 = vld [vmem:[%s998_s0 + $0xf8] sm:$0xff]  ;;  %v40_v29 = vld [vmem:[%s998_s0 + $0x100] sm:$0xff] }
  0x2d   :  { %v254_v13 = vmax.f32 %v108_v63, %v218_v4  ;;  %v334_v17 = vld [vmem:[%s998_s0 + $0x210] sm:$0xff]  ;;  %v335_v23 = vld [vmem:[%s998_s0 + $0x218] sm:$0xff]  ;;  %v336_v31 = vld [vmem:[%s998_s0 + $0x220] sm:$0xff] }
  0x2e   :  { %v370_v18 = vld [vmem:[%s998_s0 + $0x330] sm:$0xff]  ;;  %v255_v19 = vmax.f32 %v109_v5, %v219_v9  ;;  %v111_v20 = vmax.f32 %v38_v16, %v334_v17  ;;  %v256_v24 = vmax.f32 %v110_v14, %v220_v15  ;;  %v112_v26 = vmax.f32 %v39_v22, %v335_v23  ;;  %v371_v27 = vld [vmem:[%s998_s0 + $0x338] sm:$0xff]  ;;  %v372_v32 = vld [vmem:[%s998_s0 + $0x340] sm:$0xff] }
  0x2f   :  { %v406_v21 = vld [vmem:[%s998_s0 + $0x450] sm:$0xff]  ;;  %291 = vst.msk [vmem:[%s999_s1 + $0xd8] sm:$0xff] %vm263_vm0, %v254_v13  ;;  %v407_v28 = vld [vmem:[%s998_s0 + $0x458] sm:$0xff]  ;;  %v408_v33 = vld [vmem:[%s998_s0 + $0x460] sm:$0xff]  ;;  %v113_v35 = vmax.f32 %v40_v29, %v336_v31 }
  0x30   :  { %v221_v25 = vmax.f32 %v370_v18, %v406_v21  ;;  %292 = vst.msk [vmem:[%s999_s1 + $0xe0] sm:$0xff] %vm263_vm0, %v255_v19  ;;  %v222_v30 = vmax.f32 %v371_v27, %v407_v28  ;;  %293 = vst.msk [vmem:[%s999_s1 + $0xe8] sm:$0xff] %vm263_vm0, %v256_v24  ;;  %v223_v36 = vmax.f32 %v372_v32, %v408_v33  ;;  %v41_v37 = vld [vmem:[%s998_s0 + $0x108] sm:$0xff]  ;;  %v42_v43 = vld [vmem:[%s998_s0 + $0x110] sm:$0xff] }
  0x31   :  { %v337_v38 = vld [vmem:[%s998_s0 + $0x228] sm:$0xff]  ;;  %v338_v44 = vld [vmem:[%s998_s0 + $0x230] sm:$0xff]  ;;  %v43_v50 = vld [vmem:[%s998_s0 + $0x118] sm:$0xff] }
  0x32   :  { %v257_v34 = vmax.f32 %v111_v20, %v221_v25  ;;  %v373_v39 = vld [vmem:[%s998_s0 + $0x348] sm:$0xff]  ;;  %v258_v40 = vmax.f32 %v112_v26, %v222_v30  ;;  %v114_v41 = vmax.f32 %v41_v37, %v337_v38  ;;  %v259_v45 = vmax.f32 %v113_v35, %v223_v36  ;;  %v374_v48 = vld [vmem:[%s998_s0 + $0x350] sm:$0xff]  ;;  %v339_v52 = vld [vmem:[%s998_s0 + $0x238] sm:$0xff] }
  0x33   :  { %v409_v42 = vld [vmem:[%s998_s0 + $0x468] sm:$0xff]  ;;  %v115_v47 = vmax.f32 %v42_v43, %v338_v44  ;;  %v410_v49 = vld [vmem:[%s998_s0 + $0x470] sm:$0xff]  ;;  %v375_v53 = vld [vmem:[%s998_s0 + $0x358] sm:$0xff]  ;;  %v116_v56 = vmax.f32 %v43_v50, %v339_v52 }
  0x34   :  { %294 = vst.msk [vmem:[%s999_s1 + $0xf0] sm:$0xff] %vm263_vm0, %v257_v34  ;;  %v224_v46 = vmax.f32 %v373_v39, %v409_v42  ;;  %295 = vst.msk [vmem:[%s999_s1 + $0xf8] sm:$0xff] %vm263_vm0, %v258_v40  ;;  %v225_v51 = vmax.f32 %v374_v48, %v410_v49  ;;  %v411_v54 = vld [vmem:[%s998_s0 + $0x478] sm:$0xff] }
  0x35   :  { %296 = vst.msk [vmem:[%s999_s1 + $0x100] sm:$0xff] %vm263_vm0, %v259_v45  ;;  %v226_v57 = vmax.f32 %v375_v53, %v411_v54 }
  0x36   :  { %v260_v55 = vmax.f32 %v114_v41, %v224_v46  ;;  %v261_v58 = vmax.f32 %v115_v47, %v225_v51 }
  0x37   :  { %v262_v59 = vmax.f32 %v116_v56, %v226_v57 }
  0x38   :  { %297 = vst.msk [vmem:[%s999_s1 + $0x108] sm:$0xff] %vm263_vm0, %v260_v55  ;;  %298 = vst.msk [vmem:[%s999_s1 + $0x110] sm:$0xff] %vm263_vm0, %v261_v58 }
  0x39   :  { %299 = vst.msk [vmem:[%s999_s1 + $0x118] sm:$0xff] %vm263_vm0, %v262_v59 }

// kernel: net_forward.7
= control target key start
LH: loop header
LB: loop body
LE: loop exit
PB: predicated region body
PF: predicated region fallthrough
CT: control target
= control target key end

     0   :  { %vm5205_vm0 = vmmov 0   ;;  %vm3865_vm1 = vcmask 80896   ;;  %s8968_s1 = inlined_call_operand.vmem [shape: f32[9216,128], index: 1, kind: input, shape index: {}]   ;;  %s8969_s0 = inlined_call_operand.vmem [shape: f32[8,9216], index: 0, kind: input, shape index: {}]   ;;  %s8970_s3 = inlined_call_operand.vmem [shape: f32[128,10], index: 3, kind: input, shape index: {}]   ;;  %s8971_s2 = inlined_call_operand.vmem [shape: f32[1,128], index: 2, kind: input, shape index: {}]   ;;  %s8972_s4 = inlined_call_operand.vmem [shape: f32[1,10], index: 4, kind: input, shape index: {}]   ;;  %s8973_s5 = inlined_call_operand.vmem [shape: f32[8,10], index: 5, kind: output, shape index: {}]  }
   0x1   :  { %v123_v0 = vld [vmem:[%s8968_s1 + $0xf8] sm:$0xff]  ;;  %v122_v4 = vld [vmem:[%s8968_s1 + $0xf0] sm:$0xff]  ;;  %v121_v8 = vld [vmem:[%s8968_s1 + $0xe8] sm:$0xff] }
   0x2   :  { %v155_v1 = vld [vmem:[%s8968_s1 + $0x1f8] sm:$0xff]  ;;  %3886 = vmatprep.subr.mxu0 %v123_v0  ;;  %v154_v5 = vld [vmem:[%s8968_s1 + $0x1f0] sm:$0xff]  ;;  %v153_v9 = vld [vmem:[%s8968_s1 + $0x1e8] sm:$0xff] }
   0x3   :  { %v107_v2 = vld [vmem:[%s8968_s1 + $0x78] sm:$0xff]  ;;  %3921 = vmatprep.subr.mxu1 %v155_v1  ;;  %v106_v6 = vld [vmem:[%s8968_s1 + $0x70] sm:$0xff]  ;;  %v105_v10 = vld [vmem:[%s8968_s1 + $0x68] sm:$0xff] }
   0x4   :  { %v139_v3 = vld [vmem:[%s8968_s1 + $0x178] sm:$0xff]  ;;  %3887 = vmatpush3.msra.mxu0 %v107_v2  ;;  %v138_v7 = vld [vmem:[%s8968_s1 + $0x170] sm:$0xff]  ;;  %v137_v11 = vld [vmem:[%s8968_s1 + $0x168] sm:$0xff] }
   0x5   :  { %3922 = vmatpush3.msra.mxu1 %v139_v3  ;;  %3888 = vmatprep.subr.mxu0 %v122_v4  ;;  %v120_v12 = vld [vmem:[%s8968_s1 + $0xe0] sm:$0xff]  ;;  %v119_v16 = vld [vmem:[%s8968_s1 + $0xd8] sm:$0xff]  ;;  %v118_v20 = vld [vmem:[%s8968_s1 + $0xd0] sm:$0xff] }
   0x6   :  { %3923 = vmatprep.subr.mxu1 %v154_v5  ;;  %3889 = vmatpush3.msra.mxu0 %v106_v6  ;;  %v152_v13 = vld [vmem:[%s8968_s1 + $0x1e0] sm:$0xff]  ;;  %v151_v17 = vld [vmem:[%s8968_s1 + $0x1d8] sm:$0xff]  ;;  %v150_v21 = vld [vmem:[%s8968_s1 + $0x1d0] sm:$0xff] }
   0x7   :  { %3924 = vmatpush3.msra.mxu1 %v138_v7  ;;  %3890 = vmatprep.subr.mxu0 %v121_v8  ;;  %v104_v14 = vld [vmem:[%s8968_s1 + $0x60] sm:$0xff]  ;;  %v103_v18 = vld [vmem:[%s8968_s1 + $0x58] sm:$0xff]  ;;  %v102_v22 = vld [vmem:[%s8968_s1 + $0x50] sm:$0xff] }
   0x8   :  { %3925 = vmatprep.subr.mxu1 %v153_v9  ;;  %v136_v15 = vld [vmem:[%s8968_s1 + $0x160] sm:$0xff]  ;;  %3891 = vmatpush3.msra.mxu0 %v105_v10  ;;  %v135_v19 = vld [vmem:[%s8968_s1 + $0x158] sm:$0xff]  ;;  %v134_v23 = vld [vmem:[%s8968_s1 + $0x150] sm:$0xff] }
   0x9   :  { %3926 = vmatpush3.msra.mxu1 %v137_v11  ;;  %3892 = vmatprep.subr.mxu0 %v120_v12  ;;  %v117_v24 = vld [vmem:[%s8968_s1 + $0xc8] sm:$0xff]  ;;  %v116_v28 = vld [vmem:[%s8968_s1 + $0xc0] sm:$0xff]  ;;  %v115_v32 = vld [vmem:[%s8968_s1 + $0xb8] sm:$0xff] }
   0xa   :  { %3927 = vmatprep.subr.mxu1 %v152_v13  ;;  %3893 = vmatpush3.msra.mxu0 %v104_v14  ;;  %v149_v25 = vld [vmem:[%s8968_s1 + $0x1c8] sm:$0xff]  ;;  %v148_v29 = vld [vmem:[%s8968_s1 + $0x1c0] sm:$0xff]  ;;  %v147_v33 = vld [vmem:[%s8968_s1 + $0x1b8] sm:$0xff] }
   0xb   :  { %3928 = vmatpush3.msra.mxu1 %v136_v15  ;;  %3894 = vmatprep.subr.mxu0 %v119_v16  ;;  %v101_v26 = vld [vmem:[%s8968_s1 + $0x48] sm:$0xff]  ;;  %v100_v30 = vld [vmem:[%s8968_s1 + $0x40] sm:$0xff]  ;;  %v99_v34 = vld [vmem:[%s8968_s1 + $0x38] sm:$0xff] }
   0xc   :  { %3929 = vmatprep.subr.mxu1 %v151_v17  ;;  %3895 = vmatpush3.msra.mxu0 %v103_v18  ;;  %v133_v27 = vld [vmem:[%s8968_s1 + $0x148] sm:$0xff]  ;;  %v132_v31 = vld [vmem:[%s8968_s1 + $0x140] sm:$0xff]  ;;  %v131_v35 = vld [vmem:[%s8968_s1 + $0x138] sm:$0xff] }
   0xd   :  { %3930 = vmatpush3.msra.mxu1 %v135_v19  ;;  %3896 = vmatprep.subr.mxu0 %v118_v20  ;;  %v114_v36 = vld [vmem:[%s8968_s1 + $0xb0] sm:$0xff]  ;;  %v113_v40 = vld [vmem:[%s8968_s1 + $0xa8] sm:$0xff]  ;;  %v112_v44 = vld [vmem:[%s8968_s1 + $0xa0] sm:$0xff] }
   0xe   :  { %3931 = vmatprep.subr.mxu1 %v150_v21  ;;  %3897 = vmatpush3.msra.mxu0 %v102_v22  ;;  %v146_v37 = vld [vmem:[%s8968_s1 + $0x1b0] sm:$0xff]  ;;  %v145_v41 = vld [vmem:[%s8968_s1 + $0x1a8] sm:$0xff]  ;;  %v144_v45 = vld [vmem:[%s8968_s1 + $0x1a0] sm:$0xff] }
   0xf   :  { %3932 = vmatpush3.msra.mxu1 %v134_v23  ;;  %3898 = vmatprep.subr.mxu0 %v117_v24  ;;  %v98_v38 = vld [vmem:[%s8968_s1 + $0x30] sm:$0xff]  ;;  %v97_v42 = vld [vmem:[%s8968_s1 + $0x28] sm:$0xff]  ;;  %v96_v46 = vld [vmem:[%s8968_s1 + $0x20] sm:$0xff] }
  0x10   :  { %3933 = vmatprep.subr.mxu1 %v149_v25  ;;  %3899 = vmatpush3.msra.mxu0 %v101_v26  ;;  %v130_v39 = vld [vmem:[%s8968_s1 + $0x130] sm:$0xff]  ;;  %v129_v43 = vld [vmem:[%s8968_s1 + $0x128] sm:$0xff]  ;;  %v128_v47 = vld [vmem:[%s8968_s1 + $0x120] sm:$0xff] }
  0x11   :  { %3934 = vmatpush3.msra.mxu1 %v133_v27  ;;  %3900 = vmatprep.subr.mxu0 %v116_v28  ;;  %v111_v48 = vld [vmem:[%s8968_s1 + $0x98] sm:$0xff]  ;;  %v110_v52 = vld [vmem:[%s8968_s1 + $0x90] sm:$0xff]  ;;  %v109_v56 = vld [vmem:[%s8968_s1 + $0x88] sm:$0xff] }
  0x12   :  { %3935 = vmatprep.subr.mxu1 %v148_v29  ;;  %3901 = vmatpush3.msra.mxu0 %v100_v30  ;;  %v143_v49 = vld [vmem:[%s8968_s1 + $0x198] sm:$0xff]  ;;  %v142_v53 = vld [vmem:[%s8968_s1 + $0x190] sm:$0xff]  ;;  %v141_v57 = vld [vmem:[%s8968_s1 + $0x188] sm:$0xff] }
  0x13   :  { %3936 = vmatpush3.msra.mxu1 %v132_v31  ;;  %3902 = vmatprep.subr.mxu0 %v115_v32  ;;  %v95_v50 = vld [vmem:[%s8968_s1 + $0x18] sm:$0xff]  ;;  %v94_v54 = vld [vmem:[%s8968_s1 + $0x10] sm:$0xff]  ;;  %v93_v58 = vld [vmem:[%s8968_s1 + $0x8] sm:$0xff] }
  0x14   :  { %3937 = vmatprep.subr.mxu1 %v147_v33  ;;  %3903 = vmatpush3.msra.mxu0 %v99_v34  ;;  %v127_v51 = vld [vmem:[%s8968_s1 + $0x118] sm:$0xff]  ;;  %v126_v55 = vld [vmem:[%s8968_s1 + $0x110] sm:$0xff]  ;;  %v125_v59 = vld [vmem:[%s8968_s1 + $0x108] sm:$0xff] }
  0x15   :  { %3938 = vmatpush3.msra.mxu1 %v131_v35  ;;  %3904 = vmatprep.subr.mxu0 %v114_v36  ;;  %v108_v60 = vld [vmem:[%s8968_s1 + $0x80] sm:$0xff]  ;;  %v21_v63 = vld [vmem:[%s8969_s0 + $0x8] sm:$0xff]  ;;  %v23_v2 = vld [vmem:[%s8969_s0 + $0x18] sm:$0xff] }
  0x16   :  { %3939 = vmatprep.subr.mxu1 %v146_v37  ;;  %3905 = vmatpush3.msra.mxu0 %v98_v38  ;;  %v140_v61 = vld [vmem:[%s8968_s1 + $0x180] sm:$0xff]  ;;  %v187_v3 = vld [vmem:[%s8968_s1 + $0x2f8] sm:$0xff]  ;;  %v22_v5 = vld [vmem:[%s8969_s0 + $0x10] sm:$0xff] }
  0x17   :  { %3940 = vmatpush3.msra.mxu1 %v130_v39  ;;  %3906 = vmatprep.subr.mxu0 %v113_v40  ;;  %v92_v62 = vld [vmem:[%s8968_s1] sm:$0xff]  ;;  %v219_v4 = vld [vmem:[%s8968_s1 + $0x3f8] sm:$0xff]  ;;  %v186_v8 = vld [vmem:[%s8968_s1 + $0x2f0] sm:$0xff] }
  0x18   :  { %3941 = vmatprep.subr.mxu1 %v145_v41  ;;  %3907 = vmatpush3.msra.mxu0 %v97_v42  ;;  %v124_v0 = vld [vmem:[%s8968_s1 + $0x100] sm:$0xff]  ;;  %v171_v6 = vld [vmem:[%s8968_s1 + $0x278] sm:$0xff]  ;;  %v218_v9 = vld [vmem:[%s8968_s1 + $0x3f0] sm:$0xff] }
  0x19   :  { %3942 = vmatpush3.msra.mxu1 %v129_v43  ;;  %3908 = vmatprep.subr.mxu0 %v112_v44  ;;  %v20_v1 = vld [vmem:[%s8969_s0] sm:$0xff]  ;;  %v203_v7 = vld [vmem:[%s8968_s1 + $0x378] sm:$0xff]  ;;  %v170_v10 = vld [vmem:[%s8968_s1 + $0x270] sm:$0xff] }
  0x1a   :  { %3943 = vmatprep.subr.mxu1 %v144_v45  ;;  %3909 = vmatpush3.msra.mxu0 %v96_v46  ;;  %v202_v11 = vld [vmem:[%s8968_s1 + $0x370] sm:$0xff]  ;;  %v185_v12 = vld [vmem:[%s8968_s1 + $0x2e8] sm:$0xff]  ;;  %v184_v16 = vld [vmem:[%s8968_s1 + $0x2e0] sm:$0xff] }
  0x1b   :  { %3944 = vmatpush3.msra.mxu1 %v128_v47  ;;  %3910 = vmatprep.subr.mxu0 %v111_v48  ;;  %v217_v13 = vld [vmem:[%s8968_s1 + $0x3e8] sm:$0xff]  ;;  %v216_v17 = vld [vmem:[%s8968_s1 + $0x3e0] sm:$0xff]  ;;  %v183_v20 = vld [vmem:[%s8968_s1 + $0x2d8] sm:$0xff] }
  0x1c   :  { %3945 = vmatprep.subr.mxu1 %v143_v49  ;;  %3911 = vmatpush3.msra.mxu0 %v95_v50  ;;  %v169_v14 = vld [vmem:[%s8968_s1 + $0x268] sm:$0xff]  ;;  %v168_v18 = vld [vmem:[%s8968_s1 + $0x260] sm:$0xff]  ;;  %v215_v21 = vld [vmem:[%s8968_s1 + $0x3d8] sm:$0xff] }
  0x1d   :  { %3946 = vmatpush3.msra.mxu1 %v127_v51  ;;  %3912 = vmatprep.subr.mxu0 %v110_v52  ;;  %v201_v15 = vld [vmem:[%s8968_s1 + $0x368] sm:$0xff]  ;;  %v200_v19 = vld [vmem:[%s8968_s1 + $0x360] sm:$0xff]  ;;  %v167_v22 = vld [vmem:[%s8968_s1 + $0x258] sm:$0xff] }
  0x1e   :  { %3947 = vmatprep.subr.mxu1 %v142_v53  ;;  %3913 = vmatpush3.msra.mxu0 %v94_v54  ;;  %v199_v23 = vld [vmem:[%s8968_s1 + $0x358] sm:$0xff]  ;;  %v182_v24 = vld [vmem:[%s8968_s1 + $0x2d0] sm:$0xff]  ;;  %v181_v28 = vld [vmem:[%s8968_s1 + $0x2c8] sm:$0xff] }
  0x1f   :  { %3948 = vmatpush3.msra.mxu1 %v126_v55  ;;  %3914 = vmatprep.subr.mxu0 %v109_v56  ;;  %v214_v25 = vld [vmem:[%s8968_s1 + $0x3d0] sm:$0xff]  ;;  %v213_v29 = vld [vmem:[%s8968_s1 + $0x3c8] sm:$0xff]  ;;  %v180_v32 = vld [vmem:[%s8968_s1 + $0x2c0] sm:$0xff] }
  0x20   :  { %3949 = vmatprep.subr.mxu1 %v141_v57  ;;  %3915 = vmatpush3.msra.mxu0 %v93_v58  ;;  %v166_v26 = vld [vmem:[%s8968_s1 + $0x250] sm:$0xff]  ;;  %v165_v30 = vld [vmem:[%s8968_s1 + $0x248] sm:$0xff]  ;;  %v212_v33 = vld [vmem:[%s8968_s1 + $0x3c0] sm:$0xff] }
  0x21   :  { %3950 = vmatpush3.msra.mxu1 %v125_v59  ;;  %3916 = vmatprep.subr.mxu0 %v108_v60  ;;  %v198_v27 = vld [vmem:[%s8968_s1 + $0x350] sm:$0xff]  ;;  %v197_v31 = vld [vmem:[%s8968_s1 + $0x348] sm:$0xff]  ;;  %v164_v34 = vld [vmem:[%s8968_s1 + $0x240] sm:$0xff] }
  0x22   :  { %3951 = vmatprep.subr.mxu1 %v140_v61  ;;  %3917 = vmatpush3.msra.mxu0 %v92_v62  ;;  %v196_v35 = vld [vmem:[%s8968_s1 + $0x340] sm:$0xff]  ;;  %v179_v36 = vld [vmem:[%s8968_s1 + $0x2b8] sm:$0xff]  ;;  %v178_v40 = vld [vmem:[%s8968_s1 + $0x2b0] sm:$0xff] }
  0x23   :  { %1315 = vmatprep.mubr.f32.mxu0 %v21_v63  ;;  %3952 = vmatpush3.msra.mxu1 %v124_v0  ;;  %v211_v37 = vld [vmem:[%s8968_s1 + $0x3b8] sm:$0xff]  ;;  %v210_v41 = vld [vmem:[%s8968_s1 + $0x3b0] sm:$0xff]  ;;  %v177_v44 = vld [vmem:[%s8968_s1 + $0x2a8] sm:$0xff] }
  0x24   :  { %1316 = vmatmul.mubr.f32.vlgmr.msra.gmra.mxu0 %v20_v1  ;;  %1385 = vmatprep.mubr.f32.mxu1 %v23_v2  ;;  %v163_v38 = vld [vmem:[%s8968_s1 + $0x238] sm:$0xff]  ;;  %v162_v42 = vld [vmem:[%s8968_s1 + $0x230] sm:$0xff]  ;;  %v209_v45 = vld [vmem:[%s8968_s1 + $0x3a8] sm:$0xff] }
  0x25   :  { %3956 = vmatprep.subr.mxu0 %v187_v3  ;;  %3991 = vmatprep.subr.mxu1 %v219_v4  ;;  %v195_v39 = vld [vmem:[%s8968_s1 + $0x338] sm:$0xff]  ;;  %v194_v43 = vld [vmem:[%s8968_s1 + $0x330] sm:$0xff]  ;;  %v161_v46 = vld [vmem:[%s8968_s1 + $0x228] sm:$0xff] }
  0x26   :  { %1386 = vmatmul.mubr.f32.vlgmr.msra.gmra.mxu1 %v22_v5  ;;  %3957 = vmatpush3.msra.mxu0 %v171_v6  ;;  %v193_v47 = vld [vmem:[%s8968_s1 + $0x328] sm:$0xff]  ;;  %v176_v48 = vld [vmem:[%s8968_s1 + $0x2a0] sm:$0xff]  ;;  %v175_v52 = vld [vmem:[%s8968_s1 + $0x298] sm:$0xff] }
  0x27   :  { %3992 = vmatpush3.msra.mxu1 %v203_v7  ;;  %3958 = vmatprep.subr.mxu0 %v186_v8  ;;  %v208_v49 = vld [vmem:[%s8968_s1 + $0x3a0] sm:$0xff]  ;;  %v207_v53 = vld [vmem:[%s8968_s1 + $0x398] sm:$0xff]  ;;  %v174_v56 = vld [vmem:[%s8968_s1 + $0x290] sm:$0xff] }
  0x28   :  { %3993 = vmatprep.subr.mxu1 %v218_v9  ;;  %3959 = vmatpush3.msra.mxu0 %v170_v10  ;;  %v160_v50 = vld [vmem:[%s8968_s1 + $0x220] sm:$0xff]  ;;  %v159_v54 = vld [vmem:[%s8968_s1 + $0x218] sm:$0xff]  ;;  %v206_v57 = vld [vmem:[%s8968_s1 + $0x390] sm:$0xff] }
  0x29   :  { %3994 = vmatpush3.msra.mxu1 %v202_v11  ;;  %3960 = vmatprep.subr.mxu0 %v185_v12  ;;  %v192_v51 = vld [vmem:[%s8968_s1 + $0x320] sm:$0xff]  ;;  %v191_v55 = vld [vmem:[%s8968_s1 + $0x318] sm:$0xff]  ;;  %v158_v58 = vld [vmem:[%s8968_s1 + $0x210] sm:$0xff] }
  0x2a   :  { %3995 = vmatprep.subr.mxu1 %v217_v13  ;;  %3961 = vmatpush3.msra.mxu0 %v169_v14  ;;  %v190_v59 = vld [vmem:[%s8968_s1 + $0x310] sm:$0xff]  ;;  %v173_v60 = vld [vmem:[%s8968_s1 + $0x288] sm:$0xff]  ;;  %v172_v0 = vld [vmem:[%s8968_s1 + $0x280] sm:$0xff] }
  0x2b   :  { %3996 = vmatpush3.msra.mxu1 %v201_v15  ;;  %3962 = vmatprep.subr.mxu0 %v184_v16  ;;  %v205_v61 = vld [vmem:[%s8968_s1 + $0x388] sm:$0xff]  ;;  %v204_v1 = vld [vmem:[%s8968_s1 + $0x380] sm:$0xff]  ;;  %v27_v6 = vld [vmem:[%s8969_s0 + $0x38] sm:$0xff] }
  0x2c   :  { %3997 = vmatprep.subr.mxu1 %v216_v17  ;;  %3963 = vmatpush3.msra.mxu0 %v168_v18  ;;  %v157_v62 = vld [vmem:[%s8968_s1 + $0x208] sm:$0xff]  ;;  %v156_v2 = vld [vmem:[%s8968_s1 + $0x200] sm:$0xff]  ;;  %v251_v7 = vld [vmem:[%s8968_s1 + $0x4f8] sm:$0xff] }
  0x2d   :  { %3998 = vmatpush3.msra.mxu1 %v200_v19  ;;  %3964 = vmatprep.subr.mxu0 %v183_v20  ;;  %v189_v63 = vld [vmem:[%s8968_s1 + $0x308] sm:$0xff]  ;;  %v188_v4 = vld [vmem:[%s8968_s1 + $0x300] sm:$0xff]  ;;  %v283_v8 = vld [vmem:[%s8968_s1 + $0x5f8] sm:$0xff] }
  0x2e   :  { %3999 = vmatprep.subr.mxu1 %v215_v21  ;;  %3965 = vmatpush3.msra.mxu0 %v167_v22  ;;  %v25_v3 = vld [vmem:[%s8969_s0 + $0x28] sm:$0xff]  ;;  %v24_v5 = vld [vmem:[%s8969_s0 + $0x20] sm:$0xff]  ;;  %v26_v9 = vld [vmem:[%s8969_s0 + $0x30] sm:$0xff] }
  0x2f   :  { %4000 = vmatpush3.msra.mxu1 %v199_v23  ;;  %3966 = vmatprep.subr.mxu0 %v182_v24  ;;  %v235_v10 = vld [vmem:[%s8968_s1 + $0x478] sm:$0xff]  ;;  %v250_v12 = vld [vmem:[%s8968_s1 + $0x4f0] sm:$0xff]  ;;  %v249_v16 = vld [vmem:[%s8968_s1 + $0x4e8] sm:$0xff] }
  0x30   :  { %4001 = vmatprep.subr.mxu1 %v214_v25  ;;  %3967 = vmatpush3.msra.mxu0 %v166_v26  ;;  %v267_v11 = vld [vmem:[%s8968_s1 + $0x578] sm:$0xff]  ;;  %v282_v13 = vld [vmem:[%s8968_s1 + $0x5f0] sm:$0xff]  ;;  %v281_v17 = vld [vmem:[%s8968_s1 + $0x5e8] sm:$0xff] }
  0x31   :  { %4002 = vmatpush3.msra.mxu1 %v198_v27  ;;  %3968 = vmatprep.subr.mxu0 %v181_v28  ;;  %v234_v14 = vld [vmem:[%s8968_s1 + $0x470] sm:$0xff]  ;;  %v233_v18 = vld [vmem:[%s8968_s1 + $0x468] sm:$0xff]  ;;  %v248_v20 = vld [vmem:[%s8968_s1 + $0x4e0] sm:$0xff] }
  0x32   :  { %4003 = vmatprep.subr.mxu1 %v213_v29  ;;  %3969 = vmatpush3.msra.mxu0 %v165_v30  ;;  %v266_v15 = vld [vmem:[%s8968_s1 + $0x570] sm:$0xff]  ;;  %v265_v19 = vld [vmem:[%s8968_s1 + $0x568] sm:$0xff]  ;;  %v280_v21 = vld [vmem:[%s8968_s1 + $0x5e0] sm:$0xff] }
  0x33   :  { %4004 = vmatpush3.msra.mxu1 %v197_v31  ;;  %3970 = vmatprep.subr.mxu0 %v180_v32  ;;  %v232_v22 = vld [vmem:[%s8968_s1 + $0x460] sm:$0xff]  ;;  %v247_v24 = vld [vmem:[%s8968_s1 + $0x4d8] sm:$0xff]  ;;  %v246_v28 = vld [vmem:[%s8968_s1 + $0x4d0] sm:$0xff] }
  0x34   :  { %4005 = vmatprep.subr.mxu1 %v212_v33  ;;  %3971 = vmatpush3.msra.mxu0 %v164_v34  ;;  %v264_v23 = vld [vmem:[%s8968_s1 + $0x560] sm:$0xff]  ;;  %v279_v25 = vld [vmem:[%s8968_s1 + $0x5d8] sm:$0xff]  ;;  %v278_v29 = vld [vmem:[%s8968_s1 + $0x5d0] sm:$0xff] }
  0x35   :  { %4006 = vmatpush3.msra.mxu1 %v196_v35  ;;  %3972 = vmatprep.subr.mxu0 %v179_v36  ;;  %v231_v26 = vld [vmem:[%s8968_s1 + $0x458] sm:$0xff]  ;;  %v230_v30 = vld [vmem:[%s8968_s1 + $0x450] sm:$0xff]  ;;  %v245_v32 = vld [vmem:[%s8968_s1 + $0x4c8] sm:$0xff] }
  0x36   :  { %4007 = vmatprep.subr.mxu1 %v211_v37  ;;  %3973 = vmatpush3.msra.mxu0 %v163_v38  ;;  %v263_v27 = vld [vmem:[%s8968_s1 + $0x558] sm:$0xff]  ;;  %v262_v31 = vld [vmem:[%s8968_s1 + $0x550] sm:$0xff]  ;;  %v277_v33 = vld [vmem:[%s8968_s1 + $0x5c8] sm:$0xff] }
  0x37   :  { %4008 = vmatpush3.msra.mxu1 %v195_v39  ;;  %3974 = vmatprep.subr.mxu0 %v178_v40  ;;  %v229_v34 = vld [vmem:[%s8968_s1 + $0x448] sm:$0xff]  ;;  %v244_v36 = vld [vmem:[%s8968_s1 + $0x4c0] sm:$0xff]  ;;  %v243_v40 = vld [vmem:[%s8968_s1 + $0x4b8] sm:$0xff] }
  0x38   :  { %4009 = vmatprep.subr.mxu1 %v210_v41  ;;  %3975 = vmatpush3.msra.mxu0 %v162_v42  ;;  %v261_v35 = vld [vmem:[%s8968_s1 + $0x548] sm:$0xff]  ;;  %v276_v37 = vld [vmem:[%s8968_s1 + $0x5c0] sm:$0xff]  ;;  %v275_v41 = vld [vmem:[%s8968_s1 + $0x5b8] sm:$0xff] }
  0x39   :  { %4010 = vmatpush3.msra.mxu1 %v194_v43  ;;  %3976 = vmatprep.subr.mxu0 %v177_v44  ;;  %v228_v38 = vld [vmem:[%s8968_s1 + $0x440] sm:$0xff]  ;;  %v227_v42 = vld [vmem:[%s8968_s1 + $0x438] sm:$0xff]  ;;  %v242_v44 = vld [vmem:[%s8968_s1 + $0x4b0] sm:$0xff] }
  0x3a   :  { %4011 = vmatprep.subr.mxu1 %v209_v45  ;;  %3977 = vmatpush3.msra.mxu0 %v161_v46  ;;  %v260_v39 = vld [vmem:[%s8968_s1 + $0x540] sm:$0xff]  ;;  %v259_v43 = vld [vmem:[%s8968_s1 + $0x538] sm:$0xff]  ;;  %v274_v45 = vld [vmem:[%s8968_s1 + $0x5b0] sm:$0xff] }
  0x3b   :  { %4012 = vmatpush3.msra.mxu1 %v193_v47  ;;  %3978 = vmatprep.subr.mxu0 %v176_v48  ;;  %v226_v46 = vld [vmem:[%s8968_s1 + $0x430] sm:$0xff]  ;;  %v241_v48 = vld [vmem:[%s8968_s1 + $0x4a8] sm:$0xff] }
  0x3c   :  { %4013 = vmatprep.subr.mxu1 %v208_v49  ;;  %3979 = vmatpush3.msra.mxu0 %v160_v50  ;;  %v258_v47 = vld [vmem:[%s8968_s1 + $0x530] sm:$0xff]  ;;  %v273_v49 = vld [vmem:[%s8968_s1 + $0x5a8] sm:$0xff] }
  0x3d   :  { %4014 = vmatpush3.msra.mxu1 %v192_v51  ;;  %3980 = vmatprep.subr.mxu0 %v175_v52  ;;  %v225_v50 = vld [vmem:[%s8968_s1 + $0x428] sm:$0xff]  ;;  %v240_v52 = vld [vmem:[%s8968_s1 + $0x4a0] sm:$0xff] }
  0x3e   :  { %4015 = vmatprep.subr.mxu1 %v207_v53  ;;  %3981 = vmatpush3.msra.mxu0 %v159_v54  ;;  %v257_v51 = vld [vmem:[%s8968_s1 + $0x528] sm:$0xff]  ;;  %v272_v53 = vld [vmem:[%s8968_s1 + $0x5a0] sm:$0xff] }
  0x3f   :  { %4016 = vmatpush3.msra.mxu1 %v191_v55  ;;  %3982 = vmatprep.subr.mxu0 %v174_v56  ;;  %v224_v54 = vld [vmem:[%s8968_s1 + $0x420] sm:$0xff]  ;;  %v239_v56 = vld [vmem:[%s8968_s1 + $0x498] sm:$0xff] }
  0x40   :  { %4017 = vmatprep.subr.mxu1 %v206_v57  ;;  %3983 = vmatpush3.msra.mxu0 %v158_v58  ;;  %v256_v55 = vld [vmem:[%s8968_s1 + $0x520] sm:$0xff]  ;;  %v271_v57 = vld [vmem:[%s8968_s1 + $0x598] sm:$0xff] }
  0x41   :  { %4018 = vmatpush3.msra.mxu1 %v190_v59  ;;  %3984 = vmatprep.subr.mxu0 %v173_v60  ;;  %v223_v58 = vld [vmem:[%s8968_s1 + $0x418] sm:$0xff]  ;;  %v238_v60 = vld [vmem:[%s8968_s1 + $0x490] sm:$0xff] }
  0x42   :  { %4019 = vmatprep.subr.mxu1 %v205_v61  ;;  %3985 = vmatpush3.msra.mxu0 %v157_v62  ;;  %v255_v59 = vld [vmem:[%s8968_s1 + $0x518] sm:$0xff]  ;;  %v270_v61 = vld [vmem:[%s8968_s1 + $0x590] sm:$0xff] }
  0x43   :  { %4020 = vmatpush3.msra.mxu1 %v189_v63  ;;  %3986 = vmatprep.subr.mxu0 %v172_v0  ;;  %v222_v62 = vld [vmem:[%s8968_s1 + $0x410] sm:$0xff]  ;;  %v237_v0 = vld [vmem:[%s8968_s1 + $0x488] sm:$0xff] }
  0x44   :  { %4021 = vmatprep.subr.mxu1 %v204_v1  ;;  %3987 = vmatpush3.msra.mxu0 %v156_v2  ;;  %v254_v63 = vld [vmem:[%s8968_s1 + $0x510] sm:$0xff]  ;;  %v269_v1 = vld [vmem:[%s8968_s1 + $0x588] sm:$0xff] }
  0x45   :  { %1455 = vmatprep.mubr.f32.mxu0 %v25_v3  ;;  %4022 = vmatpush3.msra.mxu1 %v188_v4  ;;  %v221_v2 = vld [vmem:[%s8968_s1 + $0x408] sm:$0xff]  ;;  %v236_v4 = vld [vmem:[%s8968_s1 + $0x480] sm:$0xff] }
  0x46   :  { %1456 = vmatmul.mubr.f32.vlgmr.msra.gmra.mxu0 %v24_v5  ;;  %1525 = vmatprep.mubr.f32.mxu1 %v27_v6  ;;  %v253_v3 = vld [vmem:[%s8968_s1 + $0x508] sm:$0xff]  ;;  %v268_v5 = vld [vmem:[%s8968_s1 + $0x580] sm:$0xff] }
  0x47   :  { %4026 = vmatprep.subr.mxu0 %v251_v7  ;;  %4061 = vmatprep.subr.mxu1 %v283_v8  ;;  %v220_v6 = vld [vmem:[%s8968_s1 + $0x400] sm:$0xff]  ;;  %v29_v7 = vld [vmem:[%s8969_s0 + $0x48] sm:$0xff] }
  0x48   :  { %1526 = vmatmul.mubr.f32.vlgmr.msra.gmra.mxu1 %v26_v9  ;;  %4027 = vmatpush3.msra.mxu0 %v235_v10  ;;  %v252_v8 = vld [vmem:[%s8968_s1 + $0x500] sm:$0xff]  ;;  %v31_v10 = vld [vmem:[%s8969_s0 + $0x58] sm:$0xff] }
  0x49   :  { %4062 = vmatpush3.msra.mxu1 %v267_v11  ;;  %4028 = vmatprep.subr.mxu0 %v250_v12  ;;  %v28_v9 = vld [vmem:[%s8969_s0 + $0x40] sm:$0xff]  ;;  %v315_v11 = vld [vmem:[%s8968_s1 + $0x6f8] sm:$0xff] }
  0x4a   :  { %4063 = vmatprep.subr.mxu1 %v282_v13  ;;  %4029 = vmatpush3.msra.mxu0 %v234_v14  ;;  %v347_v12 = vld [vmem:[%s8968_s1 + $0x7f8] sm:$0xff]  ;;  %v30_v13 = vld [vmem:[%s8969_s0 + $0x50] sm:$0xff] }
  0x4b   :  { %4064 = vmatpush3.msra.mxu1 %v266_v15  ;;  %4030 = vmatprep.subr.mxu0 %v249_v16  ;;  %v299_v14 = vld [vmem:[%s8968_s1 + $0x678] sm:$0xff]  ;;  %v314_v16 = vld [vmem:[%s8968_s1 + $0x6f0] sm:$0xff] }
  0x4c   :  { %4065 = vmatprep.subr.mxu1 %v281_v17  ;;  %4031 = vmatpush3.msra.mxu0 %v233_v18  ;;  %v331_v15 = vld [vmem:[%s8968_s1 + $0x778] sm:$0xff]  ;;  %v346_v17 = vld [vmem:[%s8968_s1 + $0x7f0] sm:$0xff] }
  0x4d   :  { %4066 = vmatpush3.msra.mxu1 %v265_v19  ;;  %4032 = vmatprep.subr.mxu0 %v248_v20  ;;  %v298_v18 = vld [vmem:[%s8968_s1 + $0x670] sm:$0xff]  ;;  %v313_v20 = vld [vmem:[%s8968_s1 + $0x6e8] sm:$0xff] }
  0x4e   :  { %4067 = vmatprep.subr.mxu1 %v280_v21  ;;  %4033 = vmatpush3.msra.mxu0 %v232_v22  ;;  %v330_v19 = vld [vmem:[%s8968_s1 + $0x770] sm:$0xff]  ;;  %v345_v21 = vld [vmem:[%s8968_s1 + $0x7e8] sm:$0xff] }
  0x4f   :  { %4068 = vmatpush3.msra.mxu1 %v264_v23  ;;  %4034 = vmatprep.subr.mxu0 %v247_v24  ;;  %v297_v22 = vld [vmem:[%s8968_s1 + $0x668] sm:$0xff]  ;;  %v312_v24 = vld [vmem:[%s8968_s1 + $0x6e0] sm:$0xff] }
  0x50   :  { %4069 = vmatprep.subr.mxu1 %v279_v25  ;;  %4035 = vmatpush3.msra.mxu0 %v231_v26  ;;  %v329_v23 = vld [vmem:[%s8968_s1 + $0x768] sm:$0xff]  ;;  %v344_v25 = vld [vmem:[%s8968_s1 + $0x7e0] sm:$0xff] }
  0x51   :  { %4070 = vmatpush3.msra.mxu1 %v263_v27  ;;  %4036 = vmatprep.subr.mxu0 %v246_v28  ;;  %v296_v26 = vld [vmem:[%s8968_s1 + $0x660] sm:$0xff]  ;;  %v311_v28 = vld [vmem:[%s8968_s1 + $0x6d8] sm:$0xff] }
  0x52   :  { %4071 = vmatprep.subr.mxu1 %v278_v29  ;;  %4037 = vmatpush3.msra.mxu0 %v230_v30  ;;  %v328_v27 = vld [vmem:[%s8968_s1 + $0x760] sm:$0xff]  ;;  %v343_v29 = vld [vmem:[%s8968_s1 + $0x7d8] sm:$0xff] }
  0x53   :  { %4072 = vmatpush3.msra.mxu1 %v262_v31  ;;  %4038 = vmatprep.subr.mxu0 %v245_v32  ;;  %v295_v30 = vld [vmem:[%s8968_s1 + $0x658] sm:$0xff]  ;;  %v310_v32 = vld [vmem:[%s8968_s1 + $0x6d0] sm:$0xff] }
  0x54   :  { %4073 = vmatprep.subr.mxu1 %v277_v33  ;;  %4039 = vmatpush3.msra.mxu0 %v229_v34  ;;  %v327_v31 = vld [vmem:[%s8968_s1 + $0x758] sm:$0xff]  ;;  %v342_v33 = vld [vmem:[%s8968_s1 + $0x7d0] sm:$0xff] }
  0x55   :  { %4074 = vmatpush3.msra.mxu1 %v261_v35  ;;  %4040 = vmatprep.subr.mxu0 %v244_v36  ;;  %v294_v34 = vld [vmem:[%s8968_s1 + $0x650] sm:$0xff]  ;;  %v309_v36 = vld [vmem:[%s8968_s1 + $0x6c8] sm:$0xff] }
  0x56   :  { %4075 = vmatprep.subr.mxu1 %v276_v37  ;;  %4041 = vmatpush3.msra.mxu0 %v228_v38  ;;  %v326_v35 = vld [vmem:[%s8968_s1 + $0x750] sm:$0xff]  ;;  %v341_v37 = vld [vmem:[%s8968_s1 + $0x7c8] sm:$0xff] }
  0x57   :  { %4076 = vmatpush3.msra.mxu1 %v260_v39  ;;  %4042 = vmatprep.subr.mxu0 %v243_v40  ;;  %v293_v38 = vld [vmem:[%s8968_s1 + $0x648] sm:$0xff]  ;;  %v308_v40 = vld [vmem:[%s8968_s1 + $0x6c0] sm:$0xff] }
  0x58   :  { %4077 = vmatprep.subr.mxu1 %v275_v41  ;;  %4043 = vmatpush3.msra.mxu0 %v227_v42  ;;  %v325_v39 = vld [vmem:[%s8968_s1 + $0x748] sm:$0xff]  ;;  %v340_v41 = vld [vmem:[%s8968_s1 + $0x7c0] sm:$0xff] }
  0x59   :  { %4078 = vmatpush3.msra.mxu1 %v259_v43  ;;  %4044 = vmatprep.subr.mxu0 %v242_v44  ;;  %v292_v42 = vld [vmem:[%s8968_s1 + $0x640] sm:$0xff]  ;;  %v307_v44 = vld [vmem:[%s8968_s1 + $0x6b8] sm:$0xff] }
  0x5a   :  { %4079 = vmatprep.subr.mxu1 %v274_v45  ;;  %4045 = vmatpush3.msra.mxu0 %v226_v46  ;;  %v324_v43 = vld [vmem:[%s8968_s1 + $0x740] sm:$0xff]  ;;  %v339_v45 = vld [vmem:[%s8968_s1 + $0x7b8] sm:$0xff] }
  0x5b   :  { %4080 = vmatpush3.msra.mxu1 %v258_v47  ;;  %4046 = vmatprep.subr.mxu0 %v241_v48  ;;  %v291_v46 = vld [vmem:[%s8968_s1 + $0x638] sm:$0xff]  ;;  %v306_v48 = vld [vmem:[%s8968_s1 + $0x6b0] sm:$0xff] }
  0x5c   :  { %4081 = vmatprep.subr.mxu1 %v273_v49  ;;  %4047 = vmatpush3.msra.mxu0 %v225_v50  ;;  %v323_v47 = vld [vmem:[%s8968_s1 + $0x738] sm:$0xff]  ;;  %v338_v49 = vld [vmem:[%s8968_s1 + $0x7b0] sm:$0xff] }
  0x5d   :  { %4082 = vmatpush3.msra.mxu1 %v257_v51  ;;  %4048 = vmatprep.subr.mxu0 %v240_v52  ;;  %v290_v50 = vld [vmem:[%s8968_s1 + $0x630] sm:$0xff]  ;;  %v305_v52 = vld [vmem:[%s8968_s1 + $0x6a8] sm:$0xff] }
  0x5e   :  { %4083 = vmatprep.subr.mxu1 %v272_v53  ;;  %4049 = vmatpush3.msra.mxu0 %v224_v54  ;;  %v322_v51 = vld [vmem:[%s8968_s1 + $0x730] sm:$0xff]  ;;  %v337_v53 = vld [vmem:[%s8968_s1 + $0x7a8] sm:$0xff] }
  0x5f   :  { %4084 = vmatpush3.msra.mxu1 %v256_v55  ;;  %4050 = vmatprep.subr.mxu0 %v239_v56  ;;  %v289_v54 = vld [vmem:[%s8968_s1 + $0x628] sm:$0xff]  ;;  %v304_v56 = vld [vmem:[%s8968_s1 + $0x6a0] sm:$0xff] }
  0x60   :  { %4085 = vmatprep.subr.mxu1 %v271_v57  ;;  %4051 = vmatpush3.msra.mxu0 %v223_v58  ;;  %v321_v55 = vld [vmem:[%s8968_s1 + $0x728] sm:$0xff]  ;;  %v336_v57 = vld [vmem:[%s8968_s1 + $0x7a0] sm:$0xff] }
  0x61   :  { %4086 = vmatpush3.msra.mxu1 %v255_v59  ;;  %4052 = vmatprep.subr.mxu0 %v238_v60  ;;  %v288_v58 = vld [vmem:[%s8968_s1 + $0x620] sm:$0xff]  ;;  %v303_v60 = vld [vmem:[%s8968_s1 + $0x698] sm:$0xff] }
  0x62   :  { %4087 = vmatprep.subr.mxu1 %v270_v61  ;;  %4053 = vmatpush3.msra.mxu0 %v222_v62  ;;  %v320_v59 = vld [vmem:[%s8968_s1 + $0x720] sm:$0xff]  ;;  %v335_v61 = vld [vmem:[%s8968_s1 + $0x798] sm:$0xff] }
  0x63   :  { %4088 = vmatpush3.msra.mxu1 %v254_v63  ;;  %4054 = vmatprep.subr.mxu0 %v237_v0  ;;  %v287_v62 = vld [vmem:[%s8968_s1 + $0x618] sm:$0xff]  ;;  %v302_v0 = vld [vmem:[%s8968_s1 + $0x690] sm:$0xff] }
  0x64   :  { %4089 = vmatprep.subr.mxu1 %v269_v1  ;;  %4055 = vmatpush3.msra.mxu0 %v221_v2  ;;  %v319_v63 = vld [vmem:[%s8968_s1 + $0x718] sm:$0xff]  ;;  %v334_v1 = vld [vmem:[%s8968_s1 + $0x790] sm:$0xff] }
  0x65   :  { %4090 = vmatpush3.msra.mxu1 %v253_v3  ;;  %4056 = vmatprep.subr.mxu0 %v236_v4  ;;  %v286_v2 = vld [vmem:[%s8968_s1 + $0x610] sm:$0xff]  ;;  %v301_v4 = vld [vmem:[%s8968_s1 + $0x688] sm:$0xff] }
  0x66   :  { %4091 = vmatprep.subr.mxu1 %v268_v5  ;;  %4057 = vmatpush3.msra.mxu0 %v220_v6  ;;  %v318_v3 = vld [vmem:[%s8968_s1 + $0x710] sm:$0xff]  ;;  %v333_v5 = vld [vmem:[%s8968_s1 + $0x788] sm:$0xff] }
  0x67   :  { %1595 = vmatprep.mubr.f32.mxu0 %v29_v7  ;;  %4092 = vmatpush3.msra.mxu1 %v252_v8  ;;  %v285_v6 = vld [vmem:[%s8968_s1 + $0x608] sm:$0xff]  ;;  %v300_v8 = vld [vmem:[%s8968_s1 + $0x680] sm:$0xff] }
  0x68   :  { %1596 = vmatmul.mubr.f32.vlgmr.msra.gmra.mxu0 %v28_v9  ;;  %1665 = vmatprep.mubr.f32.mxu1 %v31_v10  ;;  %v317_v7 = vld [vmem:[%s8968_s1 + $0x708] sm:$0xff]  ;;  %v332_v9 = vld [vmem:[%s8968_s1 + $0x780] sm:$0xff] }
  0x69   :  { %4096 = vmatprep.subr.mxu0 %v315_v11  ;;  %4131 = vmatprep.subr.mxu1 %v347_v12  ;;  %v284_v10 = vld [vmem:[%s8968_s1 + $0x600] sm:$0xff]  ;;  %v33_v11 = vld [vmem:[%s8969_s0 + $0x68] sm:$0xff] }
  0x6a   :  { %1666 = vmatmul.mubr.f32.vlgmr.msra.gmra.mxu1 %v30_v13  ;;  %4097 = vmatpush3.msra.mxu0 %v299_v14  ;;  %v316_v12 = vld [vmem:[%s8968_s1 + $0x700] sm:$0xff]  ;;  %v35_v14 = vld [vmem:[%s8969_s0 + $0x78] sm:$0xff] }
  0x6b   :  { %4132 = vmatpush3.msra.mxu1 %v331_v15  ;;  %4098 = vmatprep.subr.mxu0 %v314_v16  ;;  %v32_v13 = vld [vmem:[%s8969_s0 + $0x60] sm:$0xff]  ;;  %v379_v15 = vld [vmem:[%s8968_s1 + $0x8f8] sm:$0xff] }
  0x6c   :  { %4133 = vmatprep.subr.mxu1 %v346_v17  ;;  %4099 = vmatpush3.msra.mxu0 %v298_v18  ;;  %v411_v16 = vld [vmem:[%s8968_s1 + $0x9f8] sm:$0xff]  ;;  %v34_v17 = vld [vmem:[%s8969_s0 + $0x70] sm:$0xff] }
  0x6d   :  { %4134 = vmatpush3.msra.mxu1 %v330_v19  ;;  %4100 = vmatprep.subr.mxu0 %v313_v20  ;;  %v363_v18 = vld [vmem:[%s8968_s1 + $0x878] sm:$0xff]  ;;  %v378_v20 = vld [vmem:[%s8968_s1 + $0x8f0] sm:$0xff] }
  0x6e   :  { %4135 = vmatprep.subr.mxu1 %v345_v21  ;;  %4101 = vmatpush3.msra.mxu0 %v297_v22  ;;  %v395_v19 = vld [vmem:[%s8968_s1 + $0x978] sm:$0xff]  ;;  %v410_v21 = vld [vmem:[%s8968_s1 + $0x9f0] sm:$0xff] }
  0x6f   :  { %4136 = vmatpush3.msra.mxu1 %v329_v23  ;;  %4102 = vmatprep.subr.mxu0 %v312_v24  ;;  %v362_v22 = vld [vmem:[%s8968_s1 + $0x870] sm:$0xff]  ;;  %v377_v24 = vld [vmem:[%s8968_s1 + $0x8e8] sm:$0xff] }
  0x70   :  { %4137 = vmatprep.subr.mxu1 %v344_v25  ;;  %4103 = vmatpush3.msra.mxu0 %v296_v26  ;;  %v394_v23 = vld [vmem:[%s8968_s1 + $0x970] sm:$0xff]  ;;  %v409_v25 = vld [vmem:[%s8968_s1 + $0x9e8] sm:$0xff] }
  0x71   :  { %4138 = vmatpush3.msra.mxu1 %v328_v27  ;;  %4104 = vmatprep.subr.mxu0 %v311_v28  ;;  %v361_v26 = vld [vmem:[%s8968_s1 + $0x868] sm:$0xff]  ;;  %v376_v28 = vld [vmem:[%s8968_s1 + $0x8e0] sm:$0xff] }
  0x72   :  { %4139 = vmatprep.subr.mxu1 %v343_v29  ;;  %4105 = vmatpush3.msra.mxu0 %v295_v30  ;;  %v393_v27 = vld [vmem:[%s8968_s1 + $0x968] sm:$0xff]  ;;  %v408_v29 = vld [vmem:[%s8968_s1 + $0x9e0] sm:$0xff] }
  0x73   :  { %4140 = vmatpush3.msra.mxu1 %v327_v31  ;;  %4106 = vmatprep.subr.mxu0 %v310_v32  ;;  %v360_v30 = vld [vmem:[%s8968_s1 + $0x860] sm:$0xff]  ;;  %v375_v32 = vld [vmem:[%s8968_s1 + $0x8d8] sm:$0xff] }
  0x74   :  { %4141 = vmatprep.subr.mxu1 %v342_v33  ;;  %4107 = vmatpush3.msra.mxu0 %v294_v34  ;;  %v392_v31 = vld [vmem:[%s8968_s1 + $0x960] sm:$0xff]  ;;  %v407_v33 = vld [vmem:[%s8968_s1 + $0x9d8] sm:$0xff] }
  0x75   :  { %4142 = vmatpush3.msra.mxu1 %v326_v35  ;;  %4108 = vmatprep.subr.mxu0 %v309_v36  ;;  %v359_v34 = vld [vmem:[%s8968_s1 + $0x858] sm:$0xff]  ;;  %v374_v36 = vld [vmem:[%s8968_s1 + $0x8d0] sm:$0xff] }
  0x76   :  { %4143 = vmatprep.subr.mxu1 %v341_v37  ;;  %4109 = vmatpush3.msra.mxu0 %v293_v38  ;;  %v391_v35 = vld [vmem:[%s8968_s1 + $0x958] sm:$0xff]  ;;  %v406_v37 = vld [vmem:[%s8968_s1 + $0x9d0] sm:$0xff] }
  0x77   :  { %4144 = vmatpush3.msra.mxu1 %v325_v39  ;;  %4110 = vmatprep.subr.mxu0 %v308_v40  ;;  %v358_v38 = vld [vmem:[%s8968_s1 + $0x850] sm:$0xff]  ;;  %v373_v40 = vld [vmem:[%s8968_s1 + $0x8c8] sm:$0xff] }
  0x78   :  { %4145 = vmatprep.subr.mxu1 %v340_v41  ;;  %4111 = vmatpush3.msra.mxu0 %v292_v42  ;;  %v390_v39 = vld [vmem:[%s8968_s1 + $0x950] sm:$0xff]  ;;  %v405_v41 = vld [vmem:[%s8968_s1 + $0x9c8] sm:$0xff] }
  0x79   :  { %4146 = vmatpush3.msra.mxu1 %v324_v43  ;;  %4112 = vmatprep.subr.mxu0 %v307_v44  ;;  %v357_v42 = vld [vmem:[%s8968_s1 + $0x848] sm:$0xff]  ;;  %v372_v44 = vld [vmem:[%s8968_s1 + $0x8c0] sm:$0xff] }
  0x7a   :  { %4147 = vmatprep.subr.mxu1 %v339_v45  ;;  %4113 = vmatpush3.msra.mxu0 %v291_v46  ;;  %v389_v43 = vld [vmem:[%s8968_s1 + $0x948] sm:$0xff]  ;;  %v404_v45 = vld [vmem:[%s8968_s1 + $0x9c0] sm:$0xff] }
  0x7b   :  { %4148 = vmatpush3.msra.mxu1 %v323_v47  ;;  %4114 = vmatprep.subr.mxu0 %v306_v48  ;;  %v356_v46 = vld [vmem:[%s8968_s1 + $0x840] sm:$0xff]  ;;  %v371_v48 = vld [vmem:[%s8968_s1 + $0x8b8] sm:$0xff] }
  0x7c   :  { %4149 = vmatprep.subr.mxu1 %v338_v49  ;;  %4115 = vmatpush3.msra.mxu0 %v290_v50  ;;  %v388_v47 = vld [vmem:[%s8968_s1 + $0x940] sm:$0xff]  ;;  %v403_v49 = vld [vmem:[%s8968_s1 + $0x9b8] sm:$0xff] }
  0x7d   :  { %4150 = vmatpush3.msra.mxu1 %v322_v51  ;;  %4116 = vmatprep.subr.mxu0 %v305_v52  ;;  %v355_v50 = vld [vmem:[%s8968_s1 + $0x838] sm:$0xff]  ;;  %v370_v52 = vld [vmem:[%s8968_s1 + $0x8b0] sm:$0xff] }
  0x7e   :  { %4151 = vmatprep.subr.mxu1 %v337_v53  ;;  %4117 = vmatpush3.msra.mxu0 %v289_v54  ;;  %v387_v51 = vld [vmem:[%s8968_s1 + $0x938] sm:$0xff]  ;;  %v402_v53 = vld [vmem:[%s8968_s1 + $0x9b0] sm:$0xff] }
  0x7f   :  { %4152 = vmatpush3.msra.mxu1 %v321_v55  ;;  %4118 = vmatprep.subr.mxu0 %v304_v56  ;;  %v354_v54 = vld [vmem:[%s8968_s1 + $0x830] sm:$0xff]  ;;  %v369_v56 = vld [vmem:[%s8968_s1 + $0x8a8] sm:$0xff] }
  0x80   :  { %4153 = vmatprep.subr.mxu1 %v336_v57  ;;  %4119 = vmatpush3.msra.mxu0 %v288_v58  ;;  %v386_v55 = vld [vmem:[%s8968_s1 + $0x930] sm:$0xff]  ;;  %v401_v57 = vld [vmem:[%s8968_s1 + $0x9a8] sm:$0xff] }
  0x81   :  { %4154 = vmatpush3.msra.mxu1 %v320_v59  ;;  %4120 = vmatprep.subr.mxu0 %v303_v60  ;;  %v353_v58 = vld [vmem:[%s8968_s1 + $0x828] sm:$0xff]  ;;  %v368_v60 = vld [vmem:[%s8968_s1 + $0x8a0] sm:$0xff] }
  0x82   :  { %4155 = vmatprep.subr.mxu1 %v335_v61  ;;  %4121 = vmatpush3.msra.mxu0 %v287_v62  ;;  %v385_v59 = vld [vmem:[%s8968_s1 + $0x928] sm:$0xff]  ;;  %v400_v61 = vld [vmem:[%s8968_s1 + $0x9a0] sm:$0xff] }
  0x83   :  { %4156 = vmatpush3.msra.mxu1 %v319_v63  ;;  %4122 = vmatprep.subr.mxu0 %v302_v0  ;;  %v352_v62 = vld [vmem:[%s8968_s1 + $0x820] sm:$0xff]  ;;  %v367_v0 = vld [vmem:[%s8968_s1 + $0x898] sm:$0xff] }
  0x84   :  { %4157 = vmatprep.subr.mxu1 %v334_v1  ;;  %4123 = vmatpush3.msra.mxu0 %v286_v2  ;;  %v384_v63 = vld [vmem:[%s8968_s1 + $0x920] sm:$0xff]  ;;  %v399_v1 = vld [vmem:[%s8968_s1 + $0x998] sm:$0xff] }
  0x85   :  { %4158 = vmatpush3.msra.mxu1 %v318_v3  ;;  %4124 = vmatprep.subr.mxu0 %v301_v4  ;;  %v351_v2 = vld [vmem:[%s8968_s1 + $0x818] sm:$0xff]  ;;  %v366_v4 = vld [vmem:[%s8968_s1 + $0x890] sm:$0xff] }
  0x86   :  { %4159 = vmatprep.subr.mxu1 %v333_v5  ;;  %4125 = vmatpush3.msra.mxu0 %v285_v6  ;;  %v383_v3 = vld [vmem:[%s8968_s1 + $0x918] sm:$0xff]  ;;  %v398_v5 = vld [vmem:[%s8968_s1 + $0x990] sm:$0xff] }
  0x87   :  { %4160 = vmatpush3.msra.mxu1 %v317_v7  ;;  %4126 = vmatprep.subr.mxu0 %v300_v8  ;;  %v350_v6 = vld [vmem:[%s8968_s1 + $0x810] sm:$0xff]  ;;  %v365_v8 = vld [vmem:[%s8968_s1 + $0x888] sm:$0xff] }
  0x88   :  { %4161 = vmatprep.subr.mxu1 %v332_v9  ;;  %4127 = vmatpush3.msra.mxu0 %v284_v10  ;;  %v382_v7 = vld [vmem:[%s8968_s1 + $0x910] sm:$0xff]  ;;  %v397_v9 = vld [vmem:[%s8968_s1 + $0x988] sm:$0xff] }
  0x89   :  { %1735 = vmatprep.mubr.f32.mxu0 %v33_v11  ;;  %4162 = vmatpush3.msra.mxu1 %v316_v12  ;;  %v349_v10 = vld [vmem:[%s8968_s1 + $0x808] sm:$0xff]  ;;  %v364_v12 = vld [vmem:[%s8968_s1 + $0x880] sm:$0xff] }
  0x8a   :  { %1736 = vmatmul.mubr.f32.vlgmr.msra.gmra.mxu0 %v32_v13  ;;  %1805 = vmatprep.mubr.f32.mxu1 %v35_v14  ;;  %v381_v11 = vld [vmem:[%s8968_s1 + $0x908] sm:$0xff]  ;;  %v396_v13 = vld [vmem:[%s8968_s1 + $0x980] sm:$0xff] }
  0x8b   :  { %4166 = vmatprep.subr.mxu0 %v379_v15  ;;  %4201 = vmatprep.subr.mxu1 %v411_v16  ;;  %v348_v14 = vld [vmem:[%s8968_s1 + $0x800] sm:$0xff]  ;;  %v37_v15 = vld [vmem:[%s8969_s0 + $0x88] sm:$0xff] }
  0x8c   :  { %1806 = vmatmul.mubr.f32.vlgmr.msra.gmra.mxu1 %v34_v17  ;;  %4167 = vmatpush3.msra.mxu0 %v363_v18  ;;  %v380_v16 = vld [vmem:[%s8968_s1 + $0x900] sm:$0xff]  ;;  %v39_v18 = vld [vmem:[%s8969_s0 + $0x98] sm:$0xff] }
  0x8d   :  { %4202 = vmatpush3.msra.mxu1 %v395_v19  ;;  %4168 = vmatprep.subr.mxu0 %v378_v20  ;;  %v36_v17 = vld [vmem:[%s8969_s0 + $0x80] sm:$0xff]  ;;  %v443_v19 = vld [vmem:[%s8968_s1 + $0xaf8] sm:$0xff] }
  0x8e   :  { %4203 = vmatprep.subr.mxu1 %v410_v21  ;;  %4169 = vmatpush3.msra.mxu0 %v362_v22  ;;  %v475_v20 = vld [vmem:[%s8968_s1 + $0xbf8] sm:$0xff]  ;;  %v38_v21 = vld [vmem:[%s8969_s0 + $0x90] sm:$0xff] }
  0x8f   :  { %4204 = vmatpush3.msra.mxu1 %v394_v23  ;;  %4170 = vmatprep.subr.mxu0 %v377_v24  ;;  %v427_v22 = vld [vmem:[%s8968_s1 + $0xa78] sm:$0xff]  ;;  %v442_v24 = vld [vmem:[%s8968_s1 + $0xaf0] sm:$0xff] }
  0x90   :  { %4205 = vmatprep.subr.mxu1 %v409_v25  ;;  %4171 = vmatpush3.msra.mxu0 %v361_v26  ;;  %v459_v23 = vld [vmem:[%s8968_s1 + $0xb78] sm:$0xff]  ;;  %v474_v25 = vld [vmem:[%s8968_s1 + $0xbf0] sm:$0xff] }
  0x91   :  { %4206 = vmatpush3.msra.mxu1 %v393_v27  ;;  %4172 = vmatprep.subr.mxu0 %v376_v28  ;;  %v426_v26 = vld [vmem:[%s8968_s1 + $0xa70] sm:$0xff]  ;;  %v441_v28 = vld [vmem:[%s8968_s1 + $0xae8] sm:$0xff] }
  0x92   :  { %4207 = vmatprep.subr.mxu1 %v408_v29  ;;  %4173 = vmatpush3.msra.mxu0 %v360_v30  ;;  %v458_v27 = vld [vmem:[%s8968_s1 + $0xb70] sm:$0xff]  ;;  %v473_v29 = vld [vmem:[%s8968_s1 + $0xbe8] sm:$0xff] }
  0x93   :  { %4208 = vmatpush3.msra.mxu1 %v392_v31  ;;  %4174 = vmatprep.subr.mxu0 %v375_v32  ;;  %v425_v30 = vld [vmem:[%s8968_s1 + $0xa68] sm:$0xff]  ;;  %v440_v32 = vld [vmem:[%s8968_s1 + $0xae0] sm:$0xff] }
  0x94   :  { %4209 = vmatprep.subr.mxu1 %v407_v33  ;;  %4175 = vmatpush3.msra.mxu0 %v359_v34  ;;  %v457_v31 = vld [vmem:[%s8968_s1 + $0xb68] sm:$0xff]  ;;  %v472_v33 = vld [vmem:[%s8968_s1 + $0xbe0] sm:$0xff] }
  0x95   :  { %4210 = vmatpush3.msra.mxu1 %v391_v35  ;;  %4176 = vmatprep.subr.mxu0 %v374_v36  ;;  %v424_v34 = vld [vmem:[%s8968_s1 + $0xa60] sm:$0xff]  ;;  %v439_v36 = vld [vmem:[%s8968_s1 + $0xad8] sm:$0xff] }
  0x96   :  { %4211 = vmatprep.subr.mxu1 %v406_v37  ;;  %4177 = vmatpush3.msra.mxu0 %v358_v38  ;;  %v456_v35 = vld [vmem:[%s8968_s1 + $0xb60] sm:$0xff]  ;;  %v471_v37 = vld [vmem:[%s8968_s1 + $0xbd8] sm:$0xff] }
  0x97   :  { %4212 = vmatpush3.msra.mxu1 %v390_v39  ;;  %4178 = vmatprep.subr.mxu0 %v373_v40  ;;  %v423_v38 = vld [vmem:[%s8968_s1 + $0xa58] sm:$0xff]  ;;  %v438_v40 = vld [vmem:[%s8968_s1 + $0xad0] sm:$0xff] }
  0x98   :  { %4213 = vmatprep.subr.mxu1 %v405_v41  ;;  %4179 = vmatpush3.msra.mxu0 %v357_v42  ;;  %v455_v39 = vld [vmem:[%s8968_s1 + $0xb58] sm:$0xff]  ;;  %v470_v41 = vld [vmem:[%s8968_s1 + $0xbd0] sm:$0xff] }
  0x99   :  { %4214 = vmatpush3.msra.mxu1 %v389_v43  ;;  %4180 = vmatprep.subr.mxu0 %v372_v44  ;;  %v422_v42 = vld [vmem:[%s8968_s1 + $0xa50] sm:$0xff]  ;;  %v437_v44 = vld [vmem:[%s8968_s1 + $0xac8] sm:$0xff] }
  0x9a   :  { %4215 = vmatprep.subr.mxu1 %v404_v45  ;;  %4181 = vmatpush3.msra.mxu0 %v356_v46  ;;  %v454_v43 = vld [vmem:[%s8968_s1 + $0xb50] sm:$0xff]  ;;  %v469_v45 = vld [vmem:[%s8968_s1 + $0xbc8] sm:$0xff] }
  0x9b   :  { %4216 = vmatpush3.msra.mxu1 %v388_v47  ;;  %4182 = vmatprep.subr.mxu0 %v371_v48  ;;  %v421_v46 = vld [vmem:[%s8968_s1 + $0xa48] sm:$0xff]  ;;  %v436_v48 = vld [vmem:[%s8968_s1 + $0xac0] sm:$0xff] }
  0x9c   :  { %4217 = vmatprep.subr.mxu1 %v403_v49  ;;  %4183 = vmatpush3.msra.mxu0 %v355_v50  ;;  %v453_v47 = vld [vmem:[%s8968_s1 + $0xb48] sm:$0xff]  ;;  %v468_v49 = vld [vmem:[%s8968_s1 + $0xbc0] sm:$0xff] }
  0x9d   :  { %4218 = vmatpush3.msra.mxu1 %v387_v51  ;;  %4184 = vmatprep.subr.mxu0 %v370_v52  ;;  %v420_v50 = vld [vmem:[%s8968_s1 + $0xa40] sm:$0xff]  ;;  %v435_v52 = vld [vmem:[%s8968_s1 + $0xab8] sm:$0xff] }
  0x9e   :  { %4219 = vmatprep.subr.mxu1 %v402_v53  ;;  %4185 = vmatpush3.msra.mxu0 %v354_v54  ;;  %v452_v51 = vld [vmem:[%s8968_s1 + $0xb40] sm:$0xff]  ;;  %v467_v53 = vld [vmem:[%s8968_s1 + $0xbb8] sm:$0xff] }
  0x9f   :  { %4220 = vmatpush3.msra.mxu1 %v386_v55  ;;  %4186 = vmatprep.subr.mxu0 %v369_v56  ;;  %v419_v54 = vld [vmem:[%s8968_s1 + $0xa38] sm:$0xff]  ;;  %v434_v56 = vld [vmem:[%s8968_s1 + $0xab0] sm:$0xff] }
  0xa0   :  { %4221 = vmatprep.subr.mxu1 %v401_v57  ;;  %4187 = vmatpush3.msra.mxu0 %v353_v58  ;;  %v451_v55 = vld [vmem:[%s8968_s1 + $0xb38] sm:$0xff]  ;;  %v466_v57 = vld [vmem:[%s8968_s1 + $0xbb0] sm:$0xff] }
  0xa1   :  { %4222 = vmatpush3.msra.mxu1 %v385_v59  ;;  %4188 = vmatprep.subr.mxu0 %v368_v60  ;;  %v418_v58 = vld [vmem:[%s8968_s1 + $0xa30] sm:$0xff]  ;;  %v433_v60 = vld [vmem:[%s8968_s1 + $0xaa8] sm:$0xff] }
  0xa2   :  { %4223 = vmatprep.subr.mxu1 %v400_v61  ;;  %4189 = vmatpush3.msra.mxu0 %v352_v62  ;;  %v450_v59 = vld [vmem:[%s8968_s1 + $0xb30] sm:$0xff]  ;;  %v465_v61 = vld [vmem:[%s8968_s1 + $0xba8] sm:$0xff] }
  0xa3   :  { %4224 = vmatpush3.msra.mxu1 %v384_v63  ;;  %4190 = vmatprep.subr.mxu0 %v367_v0  ;;  %v417_v62 = vld [vmem:[%s8968_s1 + $0xa28] sm:$0xff]  ;;  %v432_v0 = vld [vmem:[%s8968_s1 + $0xaa0] sm:$0xff] }
  0xa4   :  { %4225 = vmatprep.subr.mxu1 %v399_v1  ;;  %4191 = vmatpush3.msra.mxu0 %v351_v2  ;;  %v449_v63 = vld [vmem:[%s8968_s1 + $0xb28] sm:$0xff]  ;;  %v464_v1 = vld [vmem:[%s8968_s1 + $0xba0] sm:$0xff] }
  0xa5   :  { %4226 = vmatpush3.msra.mxu1 %v383_v3  ;;  %4192 = vmatprep.subr.mxu0 %v366_v4  ;;  %v416_v2 = vld [vmem:[%s8968_s1 + $0xa20] sm:$0xff]  ;;  %v431_v4 = vld [vmem:[%s8968_s1 + $0xa98] sm:$0xff] }
  0xa6   :  { %4227 = vmatprep.subr.mxu1 %v398_v5  ;;  %4193 = vmatpush3.msra.mxu0 %v350_v6  ;;  %v448_v3 = vld [vmem:[%s8968_s1 + $0xb20] sm:$0xff]  ;;  %v463_v5 = vld [vmem:[%s8968_s1 + $0xb98] sm:$0xff] }
  0xa7   :  { %4228 = vmatpush3.msra.mxu1 %v382_v7  ;;  %4194 = vmatprep.subr.mxu0 %v365_v8  ;;  %v415_v6 = vld [vmem:[%s8968_s1 + $0xa18] sm:$0xff]  ;;  %v430_v8 = vld [vmem:[%s8968_s1 + $0xa90] sm:$0xff] }
  0xa8   :  { %4229 = vmatprep.subr.mxu1 %v397_v9  ;;  %4195 = vmatpush3.msra.mxu0 %v349_v10  ;;  %v447_v7 = vld [vmem:[%s8968_s1 + $0xb18] sm:$0xff]  ;;  %v462_v9 = vld [vmem:[%s8968_s1 + $0xb90] sm:$0xff] }
  0xa9   :  { %4230 = vmatpush3.msra.mxu1 %v381_v11  ;;  %4196 = vmatprep.subr.mxu0 %v364_v12  ;;  %v414_v10 = vld [vmem:[%s8968_s1 + $0xa10] sm:$0xff]  ;;  %v429_v12 = vld [vmem:[%s8968_s1 + $0xa88] sm:$0xff] }
  0xaa   :  { %4231 = vmatprep.subr.mxu1 %v396_v13  ;;  %4197 = vmatpush3.msra.mxu0 %v348_v14  ;;  %v446_v11 = vld [vmem:[%s8968_s1 + $0xb10] sm:$0xff]  ;;  %v461_v13 = vld [vmem:[%s8968_s1 + $0xb88] sm:$0xff] }
  0xab   :  { %1875 = vmatprep.mubr.f32.mxu0 %v37_v15  ;;  %4232 = vmatpush3.msra.mxu1 %v380_v16  ;;  %v413_v14 = vld [vmem:[%s8968_s1 + $0xa08] sm:$0xff]  ;;  %v428_v16 = vld [vmem:[%s8968_s1 + $0xa80] sm:$0xff] }
  0xac   :  { %1876 = vmatmul.mubr.f32.vlgmr.msra.gmra.mxu0 %v36_v17  ;;  %1945 = vmatprep.mubr.f32.mxu1 %v39_v18  ;;  %v445_v15 = vld [vmem:[%s8968_s1 + $0xb08] sm:$0xff]  ;;  %v460_v17 = vld [vmem:[%s8968_s1 + $0xb80] sm:$0xff] }
  0xad   :  { %4236 = vmatprep.subr.mxu0 %v443_v19  ;;  %4271 = vmatprep.subr.mxu1 %v475_v20  ;;  %v412_v18 = vld [vmem:[%s8968_s1 + $0xa00] sm:$0xff]  ;;  %v41_v19 = vld [vmem:[%s8969_s0 + $0xa8] sm:$0xff] }
  0xae   :  { %1946 = vmatmul.mubr.f32.vlgmr.msra.gmra.mxu1 %v38_v21  ;;  %4237 = vmatpush3.msra.mxu0 %v427_v22  ;;  %v444_v20 = vld [vmem:[%s8968_s1 + $0xb00] sm:$0xff]  ;;  %v43_v22 = vld [vmem:[%s8969_s0 + $0xb8] sm:$0xff] }
  0xaf   :  { %4272 = vmatpush3.msra.mxu1 %v459_v23  ;;  %4238 = vmatprep.subr.mxu0 %v442_v24  ;;  %v40_v21 = vld [vmem:[%s8969_s0 + $0xa0] sm:$0xff]  ;;  %v507_v23 = vld [vmem:[%s8968_s1 + $0xcf8] sm:$0xff] }
  0xb0   :  { %4273 = vmatprep.subr.mxu1 %v474_v25  ;;  %4239 = vmatpush3.msra.mxu0 %v426_v26  ;;  %v539_v24 = vld [vmem:[%s8968_s1 + $0xdf8] sm:$0xff]  ;;  %v42_v25 = vld [vmem:[%s8969_s0 + $0xb0] sm:$0xff] }
  0xb1   :  { %4274 = vmatpush3.msra.mxu1 %v458_v27  ;;  %4240 = vmatprep.subr.mxu0 %v441_v28  ;;  %v491_v26 = vld [vmem:[%s8968_s1 + $0xc78] sm:$0xff]  ;;  %v506_v28 = vld [vmem:[%s8968_s1 + $0xcf0] sm:$0xff] }
  0xb2   :  { %4275 = vmatprep.subr.mxu1 %v473_v29  ;;  %4241 = vmatpush3.msra.mxu0 %v425_v30  ;;  %v523_v27 = vld [vmem:[%s8968_s1 + $0xd78] sm:$0xff]  ;;  %v538_v29 = vld [vmem:[%s8968_s1 + $0xdf0] sm:$0xff] }
  0xb3   :  { %4276 = vmatpush3.msra.mxu1 %v457_v31  ;;  %4242 = vmatprep.subr.mxu0 %v440_v32  ;;  %v490_v30 = vld [vmem:[%s8968_s1 + $0xc70] sm:$0xff]  ;;  %v505_v32 = vld [vmem:[%s8968_s1 + $0xce8] sm:$0xff] }
  0xb4   :  { %4277 = vmatprep.subr.mxu1 %v472_v33  ;;  %4243 = vmatpush3.msra.mxu0 %v424_v34  ;;  %v522_v31 = vld [vmem:[%s8968_s1 + $0xd70] sm:$0xff]  ;;  %v537_v33 = vld [vmem:[%s8968_s1 + $0xde8] sm:$0xff] }
  0xb5   :  { %4278 = vmatpush3.msra.mxu1 %v456_v35  ;;  %4244 = vmatprep.subr.mxu0 %v439_v36  ;;  %v489_v34 = vld [vmem:[%s8968_s1 + $0xc68] sm:$0xff]  ;;  %v504_v36 = vld [vmem:[%s8968_s1 + $0xce0] sm:$0xff] }
  0xb6   :  { %4279 = vmatprep.subr.mxu1 %v471_v37  ;;  %4245 = vmatpush3.msra.mxu0 %v423_v38  ;;  %v521_v35 = vld [vmem:[%s8968_s1 + $0xd68] sm:$0xff]  ;;  %v536_v37 = vld [vmem:[%s8968_s1 + $0xde0] sm:$0xff] }
  0xb7   :  { %4280 = vmatpush3.msra.mxu1 %v455_v39  ;;  %4246 = vmatprep.subr.mxu0 %v438_v40  ;;  %v488_v38 = vld [vmem:[%s8968_s1 + $0xc60] sm:$0xff]  ;;  %v503_v40 = vld [vmem:[%s8968_s1 + $0xcd8] sm:$0xff] }
  0xb8   :  { %4281 = vmatprep.subr.mxu1 %v470_v41  ;;  %4247 = vmatpush3.msra.mxu0 %v422_v42  ;;  %v520_v39 = vld [vmem:[%s8968_s1 + $0xd60] sm:$0xff]  ;;  %v535_v41 = vld [vmem:[%s8968_s1 + $0xdd8] sm:$0xff] }
  0xb9   :  { %4282 = vmatpush3.msra.mxu1 %v454_v43  ;;  %4248 = vmatprep.subr.mxu0 %v437_v44  ;;  %v487_v42 = vld [vmem:[%s8968_s1 + $0xc58] sm:$0xff]  ;;  %v502_v44 = vld [vmem:[%s8968_s1 + $0xcd0] sm:$0xff] }
  0xba   :  { %4283 = vmatprep.subr.mxu1 %v469_v45  ;;  %4249 = vmatpush3.msra.mxu0 %v421_v46  ;;  %v519_v43 = vld [vmem:[%s8968_s1 + $0xd58] sm:$0xff]  ;;  %v534_v45 = vld [vmem:[%s8968_s1 + $0xdd0] sm:$0xff] }
  0xbb   :  { %4284 = vmatpush3.msra.mxu1 %v453_v47  ;;  %4250 = vmatprep.subr.mxu0 %v436_v48  ;;  %v486_v46 = vld [vmem:[%s8968_s1 + $0xc50] sm:$0xff]  ;;  %v501_v48 = vld [vmem:[%s8968_s1 + $0xcc8] sm:$0xff] }
  0xbc   :  { %4285 = vmatprep.subr.mxu1 %v468_v49  ;;  %4251 = vmatpush3.msra.mxu0 %v420_v50  ;;  %v518_v47 = vld [vmem:[%s8968_s1 + $0xd50] sm:$0xff]  ;;  %v533_v49 = vld [vmem:[%s8968_s1 + $0xdc8] sm:$0xff] }
  0xbd   :  { %4286 = vmatpush3.msra.mxu1 %v452_v51  ;;  %4252 = vmatprep.subr.mxu0 %v435_v52  ;;  %v485_v50 = vld [vmem:[%s8968_s1 + $0xc48] sm:$0xff]  ;;  %v500_v52 = vld [vmem:[%s8968_s1 + $0xcc0] sm:$0xff] }
  0xbe   :  { %4287 = vmatprep.subr.mxu1 %v467_v53  ;;  %4253 = vmatpush3.msra.mxu0 %v419_v54  ;;  %v517_v51 = vld [vmem:[%s8968_s1 + $0xd48] sm:$0xff]  ;;  %v532_v53 = vld [vmem:[%s8968_s1 + $0xdc0] sm:$0xff] }
  0xbf   :  { %4288 = vmatpush3.msra.mxu1 %v451_v55  ;;  %4254 = vmatprep.subr.mxu0 %v434_v56  ;;  %v484_v54 = vld [vmem:[%s8968_s1 + $0xc40] sm:$0xff]  ;;  %v499_v56 = vld [vmem:[%s8968_s1 + $0xcb8] sm:$0xff] }
  0xc0   :  { %4289 = vmatprep.subr.mxu1 %v466_v57  ;;  %4255 = vmatpush3.msra.mxu0 %v418_v58  ;;  %v516_v55 = vld [vmem:[%s8968_s1 + $0xd40] sm:$0xff]  ;;  %v531_v57 = vld [vmem:[%s8968_s1 + $0xdb8] sm:$0xff] }
  0xc1   :  { %4290 = vmatpush3.msra.mxu1 %v450_v59  ;;  %4256 = vmatprep.subr.mxu0 %v433_v60  ;;  %v483_v58 = vld [vmem:[%s8968_s1 + $0xc38] sm:$0xff]  ;;  %v498_v60 = vld [vmem:[%s8968_s1 + $0xcb0] sm:$0xff] }
  0xc2   :  { %4291 = vmatprep.subr.mxu1 %v465_v61  ;;  %4257 = vmatpush3.msra.mxu0 %v417_v62  ;;  %v515_v59 = vld [vmem:[%s8968_s1 + $0xd38] sm:$0xff]  ;;  %v530_v61 = vld [vmem:[%s8968_s1 + $0xdb0] sm:$0xff] }
  0xc3   :  { %4292 = vmatpush3.msra.mxu1 %v449_v63  ;;  %4258 = vmatprep.subr.mxu0 %v432_v0  ;;  %v482_v62 = vld [vmem:[%s8968_s1 + $0xc30] sm:$0xff]  ;;  %v497_v0 = vld [vmem:[%s8968_s1 + $0xca8] sm:$0xff] }
  0xc4   :  { %4293 = vmatprep.subr.mxu1 %v464_v1  ;;  %4259 = vmatpush3.msra.mxu0 %v416_v2  ;;  %v514_v63 = vld [vmem:[%s8968_s1 + $0xd30] sm:$0xff]  ;;  %v529_v1 = vld [vmem:[%s8968_s1 + $0xda8] sm:$0xff] }
  0xc5   :  { %4294 = vmatpush3.msra.mxu1 %v448_v3  ;;  %4260 = vmatprep.subr.mxu0 %v431_v4  ;;  %v481_v2 = vld [vmem:[%s8968_s1 + $0xc28] sm:$0xff]  ;;  %v496_v4 = vld [vmem:[%s8968_s1 + $0xca0] sm:$0xff] }
  0xc6   :  { %4295 = vmatprep.subr.mxu1 %v463_v5  ;;  %4261 = vmatpush3.msra.mxu0 %v415_v6  ;;  %v513_v3 = vld [vmem:[%s8968_s1 + $0xd28] sm:$0xff]  ;;  %v528_v5 = vld [vmem:[%s8968_s1 + $0xda0] sm:$0xff] }
  0xc7   :  { %4296 = vmatpush3.msra.mxu1 %v447_v7  ;;  %4262 = vmatprep.subr.mxu0 %v430_v8  ;;  %v480_v6 = vld [vmem:[%s8968_s1 + $0xc20] sm:$0xff]  ;;  %v495_v8 = vld [vmem:[%s8968_s1 + $0xc98] sm:$0xff] }
  0xc8   :  { %4297 = vmatprep.subr.mxu1 %v462_v9  ;;  %4263 = vmatpush3.msra.mxu0 %v414_v10  ;;  %v512_v7 = vld [vmem:[%s8968_s1 + $0xd20] sm:$0xff]  ;;  %v527_v9 = vld [vmem:[%s8968_s1 + $0xd98] sm:$0xff] }
  0xc9   :  { %4298 = vmatpush3.msra.mxu1 %v446_v11  ;;  %4264 = vmatprep.subr.mxu0 %v429_v12  ;;  %v479_v10 = vld [vmem:[%s8968_s1 + $0xc18] sm:$0xff]  ;;  %v494_v12 = vld [vmem:[%s8968_s1 + $0xc90] sm:$0xff] }
  0xca   :  { %4299 = vmatprep.subr.mxu1 %v461_v13  ;;  %4265 = vmatpush3.msra.mxu0 %v413_v14  ;;  %v511_v11 = vld [vmem:[%s8968_s1 + $0xd18] sm:$0xff]  ;;  %v526_v13 = vld [vmem:[%s8968_s1 + $0xd90] sm:$0xff] }
  0xcb   :  { %4300 = vmatpush3.msra.mxu1 %v445_v15  ;;  %4266 = vmatprep.subr.mxu0 %v428_v16  ;;  %v478_v14 = vld [vmem:[%s8968_s1 + $0xc10] sm:$0xff]  ;;  %v493_v16 = vld [vmem:[%s8968_s1 + $0xc88] sm:$0xff] }
  0xcc   :  { %4301 = vmatprep.subr.mxu1 %v460_v17  ;;  %4267 = vmatpush3.msra.mxu0 %v412_v18  ;;  %v510_v15 = vld [vmem:[%s8968_s1 + $0xd10] sm:$0xff]  ;;  %v525_v17 = vld [vmem:[%s8968_s1 + $0xd88] sm:$0xff] }
  0xcd   :  { %2015 = vmatprep.mubr.f32.mxu0 %v41_v19  ;;  %4302 = vmatpush3.msra.mxu1 %v444_v20  ;;  %v477_v18 = vld [vmem:[%s8968_s1 + $0xc08] sm:$0xff]  ;;  %v492_v20 = vld [vmem:[%s8968_s1 + $0xc80] sm:$0xff] }
  0xce   :  { %2016 = vmatmul.mubr.f32.vlgmr.msra.gmra.mxu0 %v40_v21  ;;  %2085 = vmatprep.mubr.f32.mxu1 %v43_v22  ;;  %v509_v19 = vld [vmem:[%s8968_s1 + $0xd08] sm:$0xff]  ;;  %v524_v21 = vld [vmem:[%s8968_s1 + $0xd80] sm:$0xff] }
  0xcf   :  { %4306 = vmatprep.subr.mxu0 %v507_v23  ;;  %4341 = vmatprep.subr.mxu1 %v539_v24  ;;  %v476_v22 = vld [vmem:[%s8968_s1 + $0xc00] sm:$0xff]  ;;  %v45_v23 = vld [vmem:[%s8969_s0 + $0xc8] sm:$0xff] }
  0xd0   :  { %2086 = vmatmul.mubr.f32.vlgmr.msra.gmra.mxu1 %v42_v25  ;;  %4307 = vmatpush3.msra.mxu0 %v491_v26  ;;  %v508_v24 = vld [vmem:[%s8968_s1 + $0xd00] sm:$0xff]  ;;  %v47_v26 = vld [vmem:[%s8969_s0 + $0xd8] sm:$0xff] }
  0xd1   :  { %4342 = vmatpush3.msra.mxu1 %v523_v27  ;;  %4308 = vmatprep.subr.mxu0 %v506_v28  ;;  %v44_v25 = vld [vmem:[%s8969_s0 + $0xc0] sm:$0xff]  ;;  %v571_v27 = vld [vmem:[%s8968_s1 + $0xef8] sm:$0xff] }
  0xd2   :  { %4343 = vmatprep.subr.mxu1 %v538_v29  ;;  %4309 = vmatpush3.msra.mxu0 %v490_v30  ;;  %v603_v28 = vld [vmem:[%s8968_s1 + $0xff8] sm:$0xff]  ;;  %v46_v29 = vld [vmem:[%s8969_s0 + $0xd0] sm:$0xff] }
  0xd3   :  { %4344 = vmatpush3.msra.mxu1 %v522_v31  ;;  %4310 = vmatprep.subr.mxu0 %v505_v32  ;;  %v555_v30 = vld [vmem:[%s8968_s1 + $0xe78] sm:$0xff]  ;;  %v570_v32 = vld [vmem:[%s8968_s1 + $0xef0] sm:$0xff] }
  0xd4   :  { %4345 = vmatprep.subr.mxu1 %v537_v33  ;;  %4311 = vmatpush3.msra.mxu0 %v489_v34  ;;  %v587_v31 = vld [vmem:[%s8968_s1 + $0xf78] sm:$0xff]  ;;  %v602_v33 = vld [vmem:[%s8968_s1 + $0xff0] sm:$0xff] }
  0xd5   :  { %4346 = vmatpush3.msra.mxu1 %v521_v35  ;;  %4312 = vmatprep.subr.mxu0 %v504_v36  ;;  %v554_v34 = vld [vmem:[%s8968_s1 + $0xe70] sm:$0xff]  ;;  %v569_v36 = vld [vmem:[%s8968_s1 + $0xee8] sm:$0xff] }
  0xd6   :  { %4347 = vmatprep.subr.mxu1 %v536_v37  ;;  %4313 = vmatpush3.msra.mxu0 %v488_v38  ;;  %v586_v35 = vld [vmem:[%s8968_s1 + $0xf70] sm:$0xff]  ;;  %v601_v37 = vld [vmem:[%s8968_s1 + $0xfe8] sm:$0xff] }
  0xd7   :  { %4348 = vmatpush3.msra.mxu1 %v520_v39  ;;  %4314 = vmatprep.subr.mxu0 %v503_v40  ;;  %v553_v38 = vld [vmem:[%s8968_s1 + $0xe68] sm:$0xff]  ;;  %v568_v40 = vld [vmem:[%s8968_s1 + $0xee0] sm:$0xff] }
  0xd8   :  { %4349 = vmatprep.subr.mxu1 %v535_v41  ;;  %4315 = vmatpush3.msra.mxu0 %v487_v42  ;;  %v585_v39 = vld [vmem:[%s8968_s1 + $0xf68] sm:$0xff]  ;;  %v600_v41 = vld [vmem:[%s8968_s1 + $0xfe0] sm:$0xff] }
  0xd9   :  { %4350 = vmatpush3.msra.mxu1 %v519_v43  ;;  %4316 = vmatprep.subr.mxu0 %v502_v44  ;;  %v552_v42 = vld [vmem:[%s8968_s1 + $0xe60] sm:$0xff]  ;;  %v567_v44 = vld [vmem:[%s8968_s1 + $0xed8] sm:$0xff] }
  0xda   :  { %4351 = vmatprep.subr.mxu1 %v534_v45  ;;  %4317 = vmatpush3.msra.mxu0 %v486_v46  ;;  %v584_v43 = vld [vmem:[%s8968_s1 + $0xf60] sm:$0xff]  ;;  %v599_v45 = vld [vmem:[%s8968_s1 + $0xfd8] sm:$0xff] }
  0xdb   :  { %4352 = vmatpush3.msra.mxu1 %v518_v47  ;;  %4318 = vmatprep.subr.mxu0 %v501_v48  ;;  %v551_v46 = vld [vmem:[%s8968_s1 + $0xe58] sm:$0xff]  ;;  %v566_v48 = vld [vmem:[%s8968_s1 + $0xed0] sm:$0xff] }
  0xdc   :  { %4353 = vmatprep.subr.mxu1 %v533_v49  ;;  %4319 = vmatpush3.msra.mxu0 %v485_v50  ;;  %v583_v47 = vld [vmem:[%s8968_s1 + $0xf58] sm:$0xff]  ;;  %v598_v49 = vld [vmem:[%s8968_s1 + $0xfd0] sm:$0xff] }
  0xdd   :  { %4354 = vmatpush3.msra.mxu1 %v517_v51  ;;  %4320 = vmatprep.subr.mxu0 %v500_v52  ;;  %v550_v50 = vld [vmem:[%s8968_s1 + $0xe50] sm:$0xff]  ;;  %v565_v52 = vld [vmem:[%s8968_s1 + $0xec8] sm:$0xff] }
  0xde   :  { %4355 = vmatprep.subr.mxu1 %v532_v53  ;;  %4321 = vmatpush3.msra.mxu0 %v484_v54  ;;  %v582_v51 = vld [vmem:[%s8968_s1 + $0xf50] sm:$0xff]  ;;  %v597_v53 = vld [vmem:[%s8968_s1 + $0xfc8] sm:$0xff] }
  0xdf   :  { %4356 = vmatpush3.msra.mxu1 %v516_v55  ;;  %4322 = vmatprep.subr.mxu0 %v499_v56  ;;  %v549_v54 = vld [vmem:[%s8968_s1 + $0xe48] sm:$0xff]  ;;  %v564_v56 = vld [vmem:[%s8968_s1 + $0xec0] sm:$0xff] }
  0xe0   :  { %4357 = vmatprep.subr.mxu1 %v531_v57  ;;  %4323 = vmatpush3.msra.mxu0 %v483_v58  ;;  %v581_v55 = vld [vmem:[%s8968_s1 + $0xf48] sm:$0xff]  ;;  %v596_v57 = vld [vmem:[%s8968_s1 + $0xfc0] sm:$0xff] }
  0xe1   :  { %4358 = vmatpush3.msra.mxu1 %v515_v59  ;;  %4324 = vmatprep.subr.mxu0 %v498_v60  ;;  %v548_v58 = vld [vmem:[%s8968_s1 + $0xe40] sm:$0xff]  ;;  %v563_v60 = vld [vmem:[%s8968_s1 + $0xeb8] sm:$0xff] }
  0xe2   :  { %4359 = vmatprep.subr.mxu1 %v530_v61  ;;  %4325 = vmatpush3.msra.mxu0 %v482_v62  ;;  %v580_v59 = vld [vmem:[%s8968_s1 + $0xf40] sm:$0xff]  ;;  %v595_v61 = vld [vmem:[%s8968_s1 + $0xfb8] sm:$0xff] }
  0xe3   :  { %4360 = vmatpush3.msra.mxu1 %v514_v63  ;;  %4326 = vmatprep.subr.mxu0 %v497_v0  ;;  %v547_v62 = vld [vmem:[%s8968_s1 + $0xe38] sm:$0xff]  ;;  %v562_v0 = vld [vmem:[%s8968_s1 + $0xeb0] sm:$0xff] }
  0xe4   :  { %4361 = vmatprep.subr.mxu1 %v529_v1  ;;  %4327 = vmatpush3.msra.mxu0 %v481_v2  ;;  %v579_v63 = vld [vmem:[%s8968_s1 + $0xf38] sm:$0xff]  ;;  %v594_v1 = vld [vmem:[%s8968_s1 + $0xfb0] sm:$0xff] }
  0xe5   :  { %4362 = vmatpush3.msra.mxu1 %v513_v3  ;;  %4328 = vmatprep.subr.mxu0 %v496_v4  ;;  %v546_v2 = vld [vmem:[%s8968_s1 + $0xe30] sm:$0xff]  ;;  %v561_v4 = vld [vmem:[%s8968_s1 + $0xea8] sm:$0xff] }
  0xe6   :  { %4363 = vmatprep.subr.mxu1 %v528_v5  ;;  %4329 = vmatpush3.msra.mxu0 %v480_v6  ;;  %v578_v3 = vld [vmem:[%s8968_s1 + $0xf30] sm:$0xff]  ;;  %v593_v5 = vld [vmem:[%s8968_s1 + $0xfa8] sm:$0xff] }
  0xe7   :  { %4364 = vmatpush3.msra.mxu1 %v512_v7  ;;  %4330 = vmatprep.subr.mxu0 %v495_v8  ;;  %v545_v6 = vld [vmem:[%s8968_s1 + $0xe28] sm:$0xff]  ;;  %v560_v8 = vld [vmem:[%s8968_s1 + $0xea0] sm:$0xff] }
  0xe8   :  { %4365 = vmatprep.subr.mxu1 %v527_v9  ;;  %4331 = vmatpush3.msra.mxu0 %v479_v10  ;;  %v577_v7 = vld [vmem:[%s8968_s1 + $0xf28] sm:$0xff]  ;;  %v592_v9 = vld [vmem:[%s8968_s1 + $0xfa0] sm:$0xff] }
  0xe9   :  { %4366 = vmatpush3.msra.mxu1 %v511_v11  ;;  %4332 = vmatprep.subr.mxu0 %v494_v12  ;;  %v544_v10 = vld [vmem:[%s8968_s1 + $0xe20] sm:$0xff]  ;;  %v559_v12 = vld [vmem:[%s8968_s1 + $0xe98] sm:$0xff] }
  0xea   :  { %4367 = vmatprep.subr.mxu1 %v526_v13  ;;  %4333 = vmatpush3.msra.mxu0 %v478_v14  ;;  %v576_v11 = vld [vmem:[%s8968_s1 + $0xf20] sm:$0xff]  ;;  %v591_v13 = vld [vmem:[%s8968_s1 + $0xf98] sm:$0xff] }
  0xeb   :  { %4368 = vmatpush3.msra.mxu1 %v510_v15  ;;  %4334 = vmatprep.subr.mxu0 %v493_v16  ;;  %v543_v14 = vld [vmem:[%s8968_s1 + $0xe18] sm:$0xff]  ;;  %v558_v16 = vld [vmem:[%s8968_s1 + $0xe90] sm:$0xff] }
  0xec   :  { %4369 = vmatprep.subr.mxu1 %v525_v17  ;;  %4335 = vmatpush3.msra.mxu0 %v477_v18  ;;  %v575_v15 = vld [vmem:[%s8968_s1 + $0xf18] sm:$0xff]  ;;  %v590_v17 = vld [vmem:[%s8968_s1 + $0xf90] sm:$0xff] }
  0xed   :  { %4370 = vmatpush3.msra.mxu1 %v509_v19  ;;  %4336 = vmatprep.subr.mxu0 %v492_v20  ;;  %v542_v18 = vld [vmem:[%s8968_s1 + $0xe10] sm:$0xff]  ;;  %v557_v20 = vld [vmem:[%s8968_s1 + $0xe88] sm:$0xff] }
  0xee   :  { %4371 = vmatprep.subr.mxu1 %v524_v21  ;;  %4337 = vmatpush3.msra.mxu0 %v476_v22  ;;  %v574_v19 = vld [vmem:[%s8968_s1 + $0xf10] sm:$0xff]  ;;  %v589_v21 = vld [vmem:[%s8968_s1 + $0xf88] sm:$0xff] }
  0xef   :  { %2155 = vmatprep.mubr.f32.mxu0 %v45_v23  ;;  %4372 = vmatpush3.msra.mxu1 %v508_v24  ;;  %v541_v22 = vld [vmem:[%s8968_s1 + $0xe08] sm:$0xff]  ;;  %v556_v24 = vld [vmem:[%s8968_s1 + $0xe80] sm:$0xff] }
  0xf0   :  { %2156 = vmatmul.mubr.f32.vlgmr.msra.gmra.mxu0 %v44_v25  ;;  %2225 = vmatprep.mubr.f32.mxu1 %v47_v26  ;;  %v573_v23 = vld [vmem:[%s8968_s1 + $0xf08] sm:$0xff]  ;;  %v588_v25 = vld [vmem:[%s8968_s1 + $0xf80] sm:$0xff] }
  0xf1   :  { %4376 = vmatprep.subr.mxu0 %v571_v27  ;;  %4411 = vmatprep.subr.mxu1 %v603_v28  ;;  %v540_v26 = vld [vmem:[%s8968_s1 + $0xe00] sm:$0xff]  ;;  %v49_v27 = vld [vmem:[%s8969_s0 + $0xe8] sm:$0xff] }
  0xf2   :  { %2226 = vmatmul.mubr.f32.vlgmr.msra.gmra.mxu1 %v46_v29  ;;  %4377 = vmatpush3.msra.mxu0 %v555_v30  ;;  %v572_v28 = vld [vmem:[%s8968_s1 + $0xf00] sm:$0xff]  ;;  %v51_v30 = vld [vmem:[%s8969_s0 + $0xf8] sm:$0xff] }
  0xf3   :  { %4412 = vmatpush3.msra.mxu1 %v587_v31  ;;  %4378 = vmatprep.subr.mxu0 %v570_v32  ;;  %v48_v29 = vld [vmem:[%s8969_s0 + $0xe0] sm:$0xff]  ;;  %v635_v31 = vld [vmem:[%s8968_s1 + $0x10f8] sm:$0xff] }
  0xf4   :  { %4413 = vmatprep.subr.mxu1 %v602_v33  ;;  %4379 = vmatpush3.msra.mxu0 %v554_v34  ;;  %v667_v32 = vld [vmem:[%s8968_s1 + $0x11f8] sm:$0xff]  ;;  %v50_v33 = vld [vmem:[%s8969_s0 + $0xf0] sm:$0xff] }
  0xf5   :  { %4414 = vmatpush3.msra.mxu1 %v586_v35  ;;  %4380 = vmatprep.subr.mxu0 %v569_v36  ;;  %v619_v34 = vld [vmem:[%s8968_s1 + $0x1078] sm:$0xff]  ;;  %v634_v36 = vld [vmem:[%s8968_s1 + $0x10f0] sm:$0xff] }
  0xf6   :  { %4415 = vmatprep.subr.mxu1 %v601_v37  ;;  %4381 = vmatpush3.msra.mxu0 %v553_v38  ;;  %v651_v35 = vld [vmem:[%s8968_s1 + $0x1178] sm:$0xff]  ;;  %v666_v37 = vld [vmem:[%s8968_s1 + $0x11f0] sm:$0xff] }
  0xf7   :  { %4416 = vmatpush3.msra.mxu1 %v585_v39  ;;  %4382 = vmatprep.subr.mxu0 %v568_v40  ;;  %v618_v38 = vld [vmem:[%s8968_s1 + $0x1070] sm:$0xff]  ;;  %v633_v40 = vld [vmem:[%s8968_s1 + $0x10e8] sm:$0xff] }
  0xf8   :  { %4417 = vmatprep.subr.mxu1 %v600_v41  ;;  %4383 = vmatpush3.msra.mxu0 %v552_v42  ;;  %v650_v39 = vld [vmem:[%s8968_s1 + $0x1170] sm:$0xff]  ;;  %v665_v41 = vld [vmem:[%s8968_s1 + $0x11e8] sm:$0xff] }
  0xf9   :  { %4418 = vmatpush3.msra.mxu1 %v584_v43  ;;  %4384 = vmatprep.subr.mxu0 %v567_v44  ;;  %v617_v42 = vld [vmem:[%s8968_s1 + $0x1068] sm:$0xff]  ;;  %v632_v44 = vld [vmem:[%s8968_s1 + $0x10e0] sm:$0xff] }
  0xfa   :  { %4419 = vmatprep.subr.mxu1 %v599_v45  ;;  %4385 = vmatpush3.msra.mxu0 %v551_v46  ;;  %v649_v43 = vld [vmem:[%s8968_s1 + $0x1168] sm:$0xff]  ;;  %v664_v45 = vld [vmem:[%s8968_s1 + $0x11e0] sm:$0xff] }
  0xfb   :  { %4420 = vmatpush3.msra.mxu1 %v583_v47  ;;  %4386 = vmatprep.subr.mxu0 %v566_v48  ;;  %v616_v46 = vld [vmem:[%s8968_s1 + $0x1060] sm:$0xff]  ;;  %v631_v48 = vld [vmem:[%s8968_s1 + $0x10d8] sm:$0xff] }
  0xfc   :  { %4421 = vmatprep.subr.mxu1 %v598_v49  ;;  %4387 = vmatpush3.msra.mxu0 %v550_v50  ;;  %v648_v47 = vld [vmem:[%s8968_s1 + $0x1160] sm:$0xff]  ;;  %v663_v49 = vld [vmem:[%s8968_s1 + $0x11d8] sm:$0xff] }
  0xfd   :  { %4422 = vmatpush3.msra.mxu1 %v582_v51  ;;  %4388 = vmatprep.subr.mxu0 %v565_v52  ;;  %v615_v50 = vld [vmem:[%s8968_s1 + $0x1058] sm:$0xff]  ;;  %v630_v52 = vld [vmem:[%s8968_s1 + $0x10d0] sm:$0xff] }
  0xfe   :  { %4423 = vmatprep.subr.mxu1 %v597_v53  ;;  %4389 = vmatpush3.msra.mxu0 %v549_v54  ;;  %v647_v51 = vld [vmem:[%s8968_s1 + $0x1158] sm:$0xff]  ;;  %v662_v53 = vld [vmem:[%s8968_s1 + $0x11d0] sm:$0xff] }
  0xff   :  { %4424 = vmatpush3.msra.mxu1 %v581_v55  ;;  %4390 = vmatprep.subr.mxu0 %v564_v56  ;;  %v614_v54 = vld [vmem:[%s8968_s1 + $0x1050] sm:$0xff]  ;;  %v629_v56 = vld [vmem:[%s8968_s1 + $0x10c8] sm:$0xff] }
 0x100   :  { %4425 = vmatprep.subr.mxu1 %v596_v57  ;;  %4391 = vmatpush3.msra.mxu0 %v548_v58  ;;  %v646_v55 = vld [vmem:[%s8968_s1 + $0x1150] sm:$0xff]  ;;  %v661_v57 = vld [vmem:[%s8968_s1 + $0x11c8] sm:$0xff] }
 0x101   :  { %4426 = vmatpush3.msra.mxu1 %v580_v59  ;;  %4392 = vmatprep.subr.mxu0 %v563_v60  ;;  %v613_v58 = vld [vmem:[%s8968_s1 + $0x1048] sm:$0xff]  ;;  %v628_v60 = vld [vmem:[%s8968_s1 + $0x10c0] sm:$0xff] }
 0x102   :  { %4427 = vmatprep.subr.mxu1 %v595_v61  ;;  %4393 = vmatpush3.msra.mxu0 %v547_v62  ;;  %v645_v59 = vld [vmem:[%s8968_s1 + $0x1148] sm:$0xff]  ;;  %v660_v61 = vld [vmem:[%s8968_s1 + $0x11c0] sm:$0xff] }
 0x103   :  { %4428 = vmatpush3.msra.mxu1 %v579_v63  ;;  %4394 = vmatprep.subr.mxu0 %v562_v0  ;;  %v612_v62 = vld [vmem:[%s8968_s1 + $0x1040] sm:$0xff]  ;;  %v627_v0 = vld [vmem:[%s8968_s1 + $0x10b8] sm:$0xff] }
 0x104   :  { %4429 = vmatprep.subr.mxu1 %v594_v1  ;;  %4395 = vmatpush3.msra.mxu0 %v546_v2  ;;  %v644_v63 = vld [vmem:[%s8968_s1 + $0x1140] sm:$0xff]  ;;  %v659_v1 = vld [vmem:[%s8968_s1 + $0x11b8] sm:$0xff] }
 0x105   :  { %4430 = vmatpush3.msra.mxu1 %v578_v3  ;;  %4396 = vmatprep.subr.mxu0 %v561_v4  ;;  %v611_v2 = vld [vmem:[%s8968_s1 + $0x1038] sm:$0xff]  ;;  %v626_v4 = vld [vmem:[%s8968_s1 + $0x10b0] sm:$0xff] }
 0x106   :  { %4431 = vmatprep.subr.mxu1 %v593_v5  ;;  %4397 = vmatpush3.msra.mxu0 %v545_v6  ;;  %v643_v3 = vld [vmem:[%s8968_s1 + $0x1138] sm:$0xff]  ;;  %v658_v5 = vld [vmem:[%s8968_s1 + $0x11b0] sm:$0xff] }
 0x107   :  { %4432 = vmatpush3.msra.mxu1 %v577_v7  ;;  %4398 = vmatprep.subr.mxu0 %v560_v8  ;;  %v610_v6 = vld [vmem:[%s8968_s1 + $0x1030] sm:$0xff]  ;;  %v625_v8 = vld [vmem:[%s8968_s1 + $0x10a8] sm:$0xff] }
 0x108   :  { %4433 = vmatprep.subr.mxu1 %v592_v9  ;;  %4399 = vmatpush3.msra.mxu0 %v544_v10  ;;  %v642_v7 = vld [vmem:[%s8968_s1 + $0x1130] sm:$0xff]  ;;  %v657_v9 = vld [vmem:[%s8968_s1 + $0x11a8] sm:$0xff] }
 0x109   :  { %4434 = vmatpush3.msra.mxu1 %v576_v11  ;;  %4400 = vmatprep.subr.mxu0 %v559_v12  ;;  %v609_v10 = vld [vmem:[%s8968_s1 + $0x1028] sm:$0xff]  ;;  %v624_v12 = vld [vmem:[%s8968_s1 + $0x10a0] sm:$0xff] }
 0x10a   :  { %4435 = vmatprep.subr.mxu1 %v591_v13  ;;  %4401 = vmatpush3.msra.mxu0 %v543_v14  ;;  %v641_v11 = vld [vmem:[%s8968_s1 + $0x1128] sm:$0xff]  ;;  %v656_v13 = vld [vmem:[%s8968_s1 + $0x11a0] sm:$0xff] }
 0x10b   :  { %4436 = vmatpush3.msra.mxu1 %v575_v15  ;;  %4402 = vmatprep.subr.mxu0 %v558_v16  ;;  %v608_v14 = vld [vmem:[%s8968_s1 + $0x1020] sm:$0xff]  ;;  %v623_v16 = vld [vmem:[%s8968_s1 + $0x1098] sm:$0xff] }
 0x10c   :  { %4437 = vmatprep.subr.mxu1 %v590_v17  ;;  %4403 = vmatpush3.msra.mxu0 %v542_v18  ;;  %v640_v15 = vld [vmem:[%s8968_s1 + $0x1120] sm:$0xff]  ;;  %v655_v17 = vld [vmem:[%s8968_s1 + $0x1198] sm:$0xff] }
 0x10d   :  { %4438 = vmatpush3.msra.mxu1 %v574_v19  ;;  %4404 = vmatprep.subr.mxu0 %v557_v20  ;;  %v607_v18 = vld [vmem:[%s8968_s1 + $0x1018] sm:$0xff]  ;;  %v622_v20 = vld [vmem:[%s8968_s1 + $0x1090] sm:$0xff] }
 0x10e   :  { %4439 = vmatprep.subr.mxu1 %v589_v21  ;;  %4405 = vmatpush3.msra.mxu0 %v541_v22  ;;  %v639_v19 = vld [vmem:[%s8968_s1 + $0x1118] sm:$0xff]  ;;  %v654_v21 = vld [vmem:[%s8968_s1 + $0x1190] sm:$0xff] }
 0x10f   :  { %4440 = vmatpush3.msra.mxu1 %v573_v23  ;;  %4406 = vmatprep.subr.mxu0 %v556_v24  ;;  %v606_v22 = vld [vmem:[%s8968_s1 + $0x1010] sm:$0xff]  ;;  %v621_v24 = vld [vmem:[%s8968_s1 + $0x1088] sm:$0xff] }
 0x110   :  { %4441 = vmatprep.subr.mxu1 %v588_v25  ;;  %4407 = vmatpush3.msra.mxu0 %v540_v26  ;;  %v638_v23 = vld [vmem:[%s8968_s1 + $0x1110] sm:$0xff]  ;;  %v653_v25 = vld [vmem:[%s8968_s1 + $0x1188] sm:$0xff] }
 0x111   :  { %2295 = vmatprep.mubr.f32.mxu0 %v49_v27  ;;  %4442 = vmatpush3.msra.mxu1 %v572_v28  ;;  %v605_v26 = vld [vmem:[%s8968_s1 + $0x1008] sm:$0xff]  ;;  %v620_v28 = vld [vmem:[%s8968_s1 + $0x1080] sm:$0xff] }
 0x112   :  { %2296 = vmatmul.mubr.f32.vlgmr.msra.gmra.mxu0 %v48_v29  ;;  %2365 = vmatprep.mubr.f32.mxu1 %v51_v30  ;;  %v637_v27 = vld [vmem:[%s8968_s1 + $0x1108] sm:$0xff]  ;;  %v652_v29 = vld [vmem:[%s8968_s1 + $0x1180] sm:$0xff] }
 0x113   :  { %4446 = vmatprep.subr.mxu0 %v635_v31  ;;  %4481 = vmatprep.subr.mxu1 %v667_v32  ;;  %v604_v30 = vld [vmem:[%s8968_s1 + $0x1000] sm:$0xff]  ;;  %v53_v31 = vld [vmem:[%s8969_s0 + $0x108] sm:$0xff] }
 0x114   :  { %2366 = vmatmul.mubr.f32.vlgmr.msra.gmra.mxu1 %v50_v33  ;;  %4447 = vmatpush3.msra.mxu0 %v619_v34  ;;  %v636_v32 = vld [vmem:[%s8968_s1 + $0x1100] sm:$0xff]  ;;  %v55_v34 = vld [vmem:[%s8969_s0 + $0x118] sm:$0xff] }
 0x115   :  { %4482 = vmatpush3.msra.mxu1 %v651_v35  ;;  %4448 = vmatprep.subr.mxu0 %v634_v36  ;;  %v52_v33 = vld [vmem:[%s8969_s0 + $0x100] sm:$0xff]  ;;  %v699_v35 = vld [vmem:[%s8968_s1 + $0x12f8] sm:$0xff] }
 0x116   :  { %4483 = vmatprep.subr.mxu1 %v666_v37  ;;  %4449 = vmatpush3.msra.mxu0 %v618_v38  ;;  %v731_v36 = vld [vmem:[%s8968_s1 + $0x13f8] sm:$0xff]  ;;  %v54_v37 = vld [vmem:[%s8969_s0 + $0x110] sm:$0xff] }
 0x117   :  { %4484 = vmatpush3.msra.mxu1 %v650_v39  ;;  %4450 = vmatprep.subr.mxu0 %v633_v40  ;;  %v683_v38 = vld [vmem:[%s8968_s1 + $0x1278] sm:$0xff]  ;;  %v698_v40 = vld [vmem:[%s8968_s1 + $0x12f0] sm:$0xff] }
 0x118   :  { %4485 = vmatprep.subr.mxu1 %v665_v41  ;;  %4451 = vmatpush3.msra.mxu0 %v617_v42  ;;  %v715_v39 = vld [vmem:[%s8968_s1 + $0x1378] sm:$0xff]  ;;  %v730_v41 = vld [vmem:[%s8968_s1 + $0x13f0] sm:$0xff] }
 0x119   :  { %4486 = vmatpush3.msra.mxu1 %v649_v43  ;;  %4452 = vmatprep.subr.mxu0 %v632_v44  ;;  %v682_v42 = vld [vmem:[%s8968_s1 + $0x1270] sm:$0xff]  ;;  %v697_v44 = vld [vmem:[%s8968_s1 + $0x12e8] sm:$0xff] }
 0x11a   :  { %4487 = vmatprep.subr.mxu1 %v664_v45  ;;  %4453 = vmatpush3.msra.mxu0 %v616_v46  ;;  %v714_v43 = vld [vmem:[%s8968_s1 + $0x1370] sm:$0xff]  ;;  %v729_v45 = vld [vmem:[%s8968_s1 + $0x13e8] sm:$0xff] }
 0x11b   :  { %4488 = vmatpush3.msra.mxu1 %v648_v47  ;;  %4454 = vmatprep.subr.mxu0 %v631_v48  ;;  %v681_v46 = vld [vmem:[%s8968_s1 + $0x1268] sm:$0xff]  ;;  %v696_v48 = vld [vmem:[%s8968_s1 + $0x12e0] sm:$0xff] }
 0x11c   :  { %4489 = vmatprep.subr.mxu1 %v663_v49  ;;  %4455 = vmatpush3.msra.mxu0 %v615_v50  ;;  %v713_v47 = vld [vmem:[%s8968_s1 + $0x1368] sm:$0xff]  ;;  %v728_v49 = vld [vmem:[%s8968_s1 + $0x13e0] sm:$0xff] }
 0x11d   :  { %4490 = vmatpush3.msra.mxu1 %v647_v51  ;;  %4456 = vmatprep.subr.mxu0 %v630_v52  ;;  %v680_v50 = vld [vmem:[%s8968_s1 + $0x1260] sm:$0xff]  ;;  %v695_v52 = vld [vmem:[%s8968_s1 + $0x12d8] sm:$0xff] }
 0x11e   :  { %4491 = vmatprep.subr.mxu1 %v662_v53  ;;  %4457 = vmatpush3.msra.mxu0 %v614_v54  ;;  %v712_v51 = vld [vmem:[%s8968_s1 + $0x1360] sm:$0xff]  ;;  %v727_v53 = vld [vmem:[%s8968_s1 + $0x13d8] sm:$0xff] }
 0x11f   :  { %4492 = vmatpush3.msra.mxu1 %v646_v55  ;;  %4458 = vmatprep.subr.mxu0 %v629_v56  ;;  %v679_v54 = vld [vmem:[%s8968_s1 + $0x1258] sm:$0xff]  ;;  %v694_v56 = vld [vmem:[%s8968_s1 + $0x12d0] sm:$0xff] }
 0x120   :  { %4493 = vmatprep.subr.mxu1 %v661_v57  ;;  %4459 = vmatpush3.msra.mxu0 %v613_v58  ;;  %v711_v55 = vld [vmem:[%s8968_s1 + $0x1358] sm:$0xff]  ;;  %v726_v57 = vld [vmem:[%s8968_s1 + $0x13d0] sm:$0xff] }
 0x121   :  { %4494 = vmatpush3.msra.mxu1 %v645_v59  ;;  %4460 = vmatprep.subr.mxu0 %v628_v60  ;;  %v678_v58 = vld [vmem:[%s8968_s1 + $0x1250] sm:$0xff]  ;;  %v693_v60 = vld [vmem:[%s8968_s1 + $0x12c8] sm:$0xff] }
 0x122   :  { %4495 = vmatprep.subr.mxu1 %v660_v61  ;;  %4461 = vmatpush3.msra.mxu0 %v612_v62  ;;  %v710_v59 = vld [vmem:[%s8968_s1 + $0x1350] sm:$0xff]  ;;  %v725_v61 = vld [vmem:[%s8968_s1 + $0x13c8] sm:$0xff] }
 0x123   :  { %4496 = vmatpush3.msra.mxu1 %v644_v63  ;;  %4462 = vmatprep.subr.mxu0 %v627_v0  ;;  %v677_v62 = vld [vmem:[%s8968_s1 + $0x1248] sm:$0xff]  ;;  %v692_v0 = vld [vmem:[%s8968_s1 + $0x12c0] sm:$0xff] }
 0x124   :  { %4497 = vmatprep.subr.mxu1 %v659_v1  ;;  %4463 = vmatpush3.msra.mxu0 %v611_v2  ;;  %v709_v63 = vld [vmem:[%s8968_s1 + $0x1348] sm:$0xff]  ;;  %v724_v1 = vld [vmem:[%s8968_s1 + $0x13c0] sm:$0xff] }
 0x125   :  { %4498 = vmatpush3.msra.mxu1 %v643_v3  ;;  %4464 = vmatprep.subr.mxu0 %v626_v4  ;;  %v676_v2 = vld [vmem:[%s8968_s1 + $0x1240] sm:$0xff]  ;;  %v691_v4 = vld [vmem:[%s8968_s1 + $0x12b8] sm:$0xff] }
 0x126   :  { %4499 = vmatprep.subr.mxu1 %v658_v5  ;;  %4465 = vmatpush3.msra.mxu0 %v610_v6  ;;  %v708_v3 = vld [vmem:[%s8968_s1 + $0x1340] sm:$0xff]  ;;  %v723_v5 = vld [vmem:[%s8968_s1 + $0x13b8] sm:$0xff] }
 0x127   :  { %4500 = vmatpush3.msra.mxu1 %v642_v7  ;;  %4466 = vmatprep.subr.mxu0 %v625_v8  ;;  %v675_v6 = vld [vmem:[%s8968_s1 + $0x1238] sm:$0xff]  ;;  %v690_v8 = vld [vmem:[%s8968_s1 + $0x12b0] sm:$0xff] }
 0x128   :  { %4501 = vmatprep.subr.mxu1 %v657_v9  ;;  %4467 = vmatpush3.msra.mxu0 %v609_v10  ;;  %v707_v7 = vld [vmem:[%s8968_s1 + $0x1338] sm:$0xff]  ;;  %v722_v9 = vld [vmem:[%s8968_s1 + $0x13b0] sm:$0xff] }
 0x129   :  { %4502 = vmatpush3.msra.mxu1 %v641_v11  ;;  %4468 = vmatprep.subr.mxu0 %v624_v12  ;;  %v674_v10 = vld [vmem:[%s8968_s1 + $0x1230] sm:$0xff]  ;;  %v689_v12 = vld [vmem:[%s8968_s1 + $0x12a8] sm:$0xff] }
 0x12a   :  { %4503 = vmatprep.subr.mxu1 %v656_v13  ;;  %4469 = vmatpush3.msra.mxu0 %v608_v14  ;;  %v706_v11 = vld [vmem:[%s8968_s1 + $0x1330] sm:$0xff]  ;;  %v721_v13 = vld [vmem:[%s8968_s1 + $0x13a8] sm:$0xff] }
 0x12b   :  { %4504 = vmatpush3.msra.mxu1 %v640_v15  ;;  %4470 = vmatprep.subr.mxu0 %v623_v16  ;;  %v673_v14 = vld [vmem:[%s8968_s1 + $0x1228] sm:$0xff]  ;;  %v688_v16 = vld [vmem:[%s8968_s1 + $0x12a0] sm:$0xff] }
 0x12c   :  { %4505 = vmatprep.subr.mxu1 %v655_v17  ;;  %4471 = vmatpush3.msra.mxu0 %v607_v18  ;;  %v705_v15 = vld [vmem:[%s8968_s1 + $0x1328] sm:$0xff]  ;;  %v720_v17 = vld [vmem:[%s8968_s1 + $0x13a0] sm:$0xff] }
 0x12d   :  { %4506 = vmatpush3.msra.mxu1 %v639_v19  ;;  %4472 = vmatprep.subr.mxu0 %v622_v20  ;;  %v672_v18 = vld [vmem:[%s8968_s1 + $0x1220] sm:$0xff]  ;;  %v687_v20 = vld [vmem:[%s8968_s1 + $0x1298] sm:$0xff] }
 0x12e   :  { %4507 = vmatprep.subr.mxu1 %v654_v21  ;;  %4473 = vmatpush3.msra.mxu0 %v606_v22  ;;  %v704_v19 = vld [vmem:[%s8968_s1 + $0x1320] sm:$0xff]  ;;  %v719_v21 = vld [vmem:[%s8968_s1 + $0x1398] sm:$0xff] }
 0x12f   :  { %4508 = vmatpush3.msra.mxu1 %v638_v23  ;;  %4474 = vmatprep.subr.mxu0 %v621_v24  ;;  %v671_v22 = vld [vmem:[%s8968_s1 + $0x1218] sm:$0xff]  ;;  %v686_v24 = vld [vmem:[%s8968_s1 + $0x1290] sm:$0xff] }
 0x130   :  { %4509 = vmatprep.subr.mxu1 %v653_v25  ;;  %4475 = vmatpush3.msra.mxu0 %v605_v26  ;;  %v703_v23 = vld [vmem:[%s8968_s1 + $0x1318] sm:$0xff]  ;;  %v718_v25 = vld [vmem:[%s8968_s1 + $0x1390] sm:$0xff] }
 0x131   :  { %4510 = vmatpush3.msra.mxu1 %v637_v27  ;;  %4476 = vmatprep.subr.mxu0 %v620_v28  ;;  %v670_v26 = vld [vmem:[%s8968_s1 + $0x1210] sm:$0xff]  ;;  %v685_v28 = vld [vmem:[%s8968_s1 + $0x1288] sm:$0xff] }
 0x132   :  { %4511 = vmatprep.subr.mxu1 %v652_v29  ;;  %4477 = vmatpush3.msra.mxu0 %v604_v30  ;;  %v702_v27 = vld [vmem:[%s8968_s1 + $0x1310] sm:$0xff]  ;;  %v717_v29 = vld [vmem:[%s8968_s1 + $0x1388] sm:$0xff] }
 0x133   :  { %2435 = vmatprep.mubr.f32.mxu0 %v53_v31  ;;  %4512 = vmatpush3.msra.mxu1 %v636_v32  ;;  %v669_v30 = vld [vmem:[%s8968_s1 + $0x1208] sm:$0xff]  ;;  %v684_v32 = vld [vmem:[%s8968_s1 + $0x1280] sm:$0xff] }
 0x134   :  { %2436 = vmatmul.mubr.f32.vlgmr.msra.gmra.mxu0 %v52_v33  ;;  %2505 = vmatprep.mubr.f32.mxu1 %v55_v34  ;;  %v701_v31 = vld [vmem:[%s8968_s1 + $0x1308] sm:$0xff]  ;;  %v716_v33 = vld [vmem:[%s8968_s1 + $0x1380] sm:$0xff] }
 0x135   :  { %4516 = vmatprep.subr.mxu0 %v699_v35  ;;  %4551 = vmatprep.subr.mxu1 %v731_v36  ;;  %v668_v34 = vld [vmem:[%s8968_s1 + $0x1200] sm:$0xff]  ;;  %v57_v35 = vld [vmem:[%s8969_s0 + $0x128] sm:$0xff] }
 0x136   :  { %2506 = vmatmul.mubr.f32.vlgmr.msra.gmra.mxu1 %v54_v37  ;;  %4517 = vmatpush3.msra.mxu0 %v683_v38  ;;  %v700_v36 = vld [vmem:[%s8968_s1 + $0x1300] sm:$0xff]  ;;  %v59_v38 = vld [vmem:[%s8969_s0 + $0x138] sm:$0xff] }
 0x137   :  { %4552 = vmatpush3.msra.mxu1 %v715_v39  ;;  %4518 = vmatprep.subr.mxu0 %v698_v40  ;;  %v56_v37 = vld [vmem:[%s8969_s0 + $0x120] sm:$0xff]  ;;  %v763_v39 = vld [vmem:[%s8968_s1 + $0x14f8] sm:$0xff] }
 0x138   :  { %4553 = vmatprep.subr.mxu1 %v730_v41  ;;  %4519 = vmatpush3.msra.mxu0 %v682_v42  ;;  %v795_v40 = vld [vmem:[%s8968_s1 + $0x15f8] sm:$0xff]  ;;  %v58_v41 = vld [vmem:[%s8969_s0 + $0x130] sm:$0xff] }
 0x139   :  { %4554 = vmatpush3.msra.mxu1 %v714_v43  ;;  %4520 = vmatprep.subr.mxu0 %v697_v44  ;;  %v747_v42 = vld [vmem:[%s8968_s1 + $0x1478] sm:$0xff]  ;;  %v762_v44 = vld [vmem:[%s8968_s1 + $0x14f0] sm:$0xff] }
 0x13a   :  { %4555 = vmatprep.subr.mxu1 %v729_v45  ;;  %4521 = vmatpush3.msra.mxu0 %v681_v46  ;;  %v779_v43 = vld [vmem:[%s8968_s1 + $0x1578] sm:$0xff]  ;;  %v794_v45 = vld [vmem:[%s8968_s1 + $0x15f0] sm:$0xff] }
 0x13b   :  { %4556 = vmatpush3.msra.mxu1 %v713_v47  ;;  %4522 = vmatprep.subr.mxu0 %v696_v48  ;;  %v746_v46 = vld [vmem:[%s8968_s1 + $0x1470] sm:$0xff]  ;;  %v761_v48 = vld [vmem:[%s8968_s1 + $0x14e8] sm:$0xff] }
 0x13c   :  { %4557 = vmatprep.subr.mxu1 %v728_v49  ;;  %4523 = vmatpush3.msra.mxu0 %v680_v50  ;;  %v778_v47 = vld [vmem:[%s8968_s1 + $0x1570] sm:$0xff]  ;;  %v793_v49 = vld [vmem:[%s8968_s1 + $0x15e8] sm:$0xff] }
 0x13d   :  { %4558 = vmatpush3.msra.mxu1 %v712_v51  ;;  %4524 = vmatprep.subr.mxu0 %v695_v52  ;;  %v745_v50 = vld [vmem:[%s8968_s1 + $0x1468] sm:$0xff]  ;;  %v760_v52 = vld [vmem:[%s8968_s1 + $0x14e0] sm:$0xff] }
 0x13e   :  { %4559 = vmatprep.subr.mxu1 %v727_v53  ;;  %4525 = vmatpush3.msra.mxu0 %v679_v54  ;;  %v777_v51 = vld [vmem:[%s8968_s1 + $0x1568] sm:$0xff]  ;;  %v792_v53 = vld [vmem:[%s8968_s1 + $0x15e0] sm:$0xff] }
 0x13f   :  { %4560 = vmatpush3.msra.mxu1 %v711_v55  ;;  %4526 = vmatprep.subr.mxu0 %v694_v56  ;;  %v744_v54 = vld [vmem:[%s8968_s1 + $0x1460] sm:$0xff]  ;;  %v759_v56 = vld [vmem:[%s8968_s1 + $0x14d8] sm:$0xff] }
 0x140   :  { %4561 = vmatprep.subr.mxu1 %v726_v57  ;;  %4527 = vmatpush3.msra.mxu0 %v678_v58  ;;  %v776_v55 = vld [vmem:[%s8968_s1 + $0x1560] sm:$0xff]  ;;  %v791_v57 = vld [vmem:[%s8968_s1 + $0x15d8] sm:$0xff] }
 0x141   :  { %4562 = vmatpush3.msra.mxu1 %v710_v59  ;;  %4528 = vmatprep.subr.mxu0 %v693_v60  ;;  %v743_v58 = vld [vmem:[%s8968_s1 + $0x1458] sm:$0xff]  ;;  %v758_v60 = vld [vmem:[%s8968_s1 + $0x14d0] sm:$0xff] }
 0x142   :  { %4563 = vmatprep.subr.mxu1 %v725_v61  ;;  %4529 = vmatpush3.msra.mxu0 %v677_v62  ;;  %v775_v59 = vld [vmem:[%s8968_s1 + $0x1558] sm:$0xff]  ;;  %v790_v61 = vld [vmem:[%s8968_s1 + $0x15d0] sm:$0xff] }
 0x143   :  { %4564 = vmatpush3.msra.mxu1 %v709_v63  ;;  %4530 = vmatprep.subr.mxu0 %v692_v0  ;;  %v742_v62 = vld [vmem:[%s8968_s1 + $0x1450] sm:$0xff]  ;;  %v757_v0 = vld [vmem:[%s8968_s1 + $0x14c8] sm:$0xff] }
 0x144   :  { %4565 = vmatprep.subr.mxu1 %v724_v1  ;;  %4531 = vmatpush3.msra.mxu0 %v676_v2  ;;  %v774_v63 = vld [vmem:[%s8968_s1 + $0x1550] sm:$0xff]  ;;  %v789_v1 = vld [vmem:[%s8968_s1 + $0x15c8] sm:$0xff] }
 0x145   :  { %4566 = vmatpush3.msra.mxu1 %v708_v3  ;;  %4532 = vmatprep.subr.mxu0 %v691_v4  ;;  %v741_v2 = vld [vmem:[%s8968_s1 + $0x1448] sm:$0xff]  ;;  %v756_v4 = vld [vmem:[%s8968_s1 + $0x14c0] sm:$0xff] }
 0x146   :  { %4567 = vmatprep.subr.mxu1 %v723_v5  ;;  %4533 = vmatpush3.msra.mxu0 %v675_v6  ;;  %v773_v3 = vld [vmem:[%s8968_s1 + $0x1548] sm:$0xff]  ;;  %v788_v5 = vld [vmem:[%s8968_s1 + $0x15c0] sm:$0xff] }
 0x147   :  { %4568 = vmatpush3.msra.mxu1 %v707_v7  ;;  %4534 = vmatprep.subr.mxu0 %v690_v8  ;;  %v740_v6 = vld [vmem:[%s8968_s1 + $0x1440] sm:$0xff]  ;;  %v755_v8 = vld [vmem:[%s8968_s1 + $0x14b8] sm:$0xff] }
 0x148   :  { %4569 = vmatprep.subr.mxu1 %v722_v9  ;;  %4535 = vmatpush3.msra.mxu0 %v674_v10  ;;  %v772_v7 = vld [vmem:[%s8968_s1 + $0x1540] sm:$0xff]  ;;  %v787_v9 = vld [vmem:[%s8968_s1 + $0x15b8] sm:$0xff] }
 0x149   :  { %4570 = vmatpush3.msra.mxu1 %v706_v11  ;;  %4536 = vmatprep.subr.mxu0 %v689_v12  ;;  %v739_v10 = vld [vmem:[%s8968_s1 + $0x1438] sm:$0xff]  ;;  %v754_v12 = vld [vmem:[%s8968_s1 + $0x14b0] sm:$0xff] }
 0x14a   :  { %4571 = vmatprep.subr.mxu1 %v721_v13  ;;  %4537 = vmatpush3.msra.mxu0 %v673_v14  ;;  %v771_v11 = vld [vmem:[%s8968_s1 + $0x1538] sm:$0xff]  ;;  %v786_v13 = vld [vmem:[%s8968_s1 + $0x15b0] sm:$0xff] }
 0x14b   :  { %4572 = vmatpush3.msra.mxu1 %v705_v15  ;;  %4538 = vmatprep.subr.mxu0 %v688_v16  ;;  %v738_v14 = vld [vmem:[%s8968_s1 + $0x1430] sm:$0xff]  ;;  %v753_v16 = vld [vmem:[%s8968_s1 + $0x14a8] sm:$0xff] }
 0x14c   :  { %4573 = vmatprep.subr.mxu1 %v720_v17  ;;  %4539 = vmatpush3.msra.mxu0 %v672_v18  ;;  %v770_v15 = vld [vmem:[%s8968_s1 + $0x1530] sm:$0xff]  ;;  %v785_v17 = vld [vmem:[%s8968_s1 + $0x15a8] sm:$0xff] }
 0x14d   :  { %4574 = vmatpush3.msra.mxu1 %v704_v19  ;;  %4540 = vmatprep.subr.mxu0 %v687_v20  ;;  %v737_v18 = vld [vmem:[%s8968_s1 + $0x1428] sm:$0xff]  ;;  %v752_v20 = vld [vmem:[%s8968_s1 + $0x14a0] sm:$0xff] }
 0x14e   :  { %4575 = vmatprep.subr.mxu1 %v719_v21  ;;  %4541 = vmatpush3.msra.mxu0 %v671_v22  ;;  %v769_v19 = vld [vmem:[%s8968_s1 + $0x1528] sm:$0xff]  ;;  %v784_v21 = vld [vmem:[%s8968_s1 + $0x15a0] sm:$0xff] }
 0x14f   :  { %4576 = vmatpush3.msra.mxu1 %v703_v23  ;;  %4542 = vmatprep.subr.mxu0 %v686_v24  ;;  %v736_v22 = vld [vmem:[%s8968_s1 + $0x1420] sm:$0xff]  ;;  %v751_v24 = vld [vmem:[%s8968_s1 + $0x1498] sm:$0xff] }
 0x150   :  { %4577 = vmatprep.subr.mxu1 %v718_v25  ;;  %4543 = vmatpush3.msra.mxu0 %v670_v26  ;;  %v768_v23 = vld [vmem:[%s8968_s1 + $0x1520] sm:$0xff]  ;;  %v783_v25 = vld [vmem:[%s8968_s1 + $0x1598] sm:$0xff] }
 0x151   :  { %4578 = vmatpush3.msra.mxu1 %v702_v27  ;;  %4544 = vmatprep.subr.mxu0 %v685_v28  ;;  %v735_v26 = vld [vmem:[%s8968_s1 + $0x1418] sm:$0xff]  ;;  %v750_v28 = vld [vmem:[%s8968_s1 + $0x1490] sm:$0xff] }
 0x152   :  { %4579 = vmatprep.subr.mxu1 %v717_v29  ;;  %4545 = vmatpush3.msra.mxu0 %v669_v30  ;;  %v767_v27 = vld [vmem:[%s8968_s1 + $0x1518] sm:$0xff]  ;;  %v782_v29 = vld [vmem:[%s8968_s1 + $0x1590] sm:$0xff] }
 0x153   :  { %4580 = vmatpush3.msra.mxu1 %v701_v31  ;;  %4546 = vmatprep.subr.mxu0 %v684_v32  ;;  %v734_v30 = vld [vmem:[%s8968_s1 + $0x1410] sm:$0xff]  ;;  %v749_v32 = vld [vmem:[%s8968_s1 + $0x1488] sm:$0xff] }
 0x154   :  { %4581 = vmatprep.subr.mxu1 %v716_v33  ;;  %4547 = vmatpush3.msra.mxu0 %v668_v34  ;;  %v766_v31 = vld [vmem:[%s8968_s1 + $0x1510] sm:$0xff]  ;;  %v781_v33 = vld [vmem:[%s8968_s1 + $0x1588] sm:$0xff] }
 0x155   :  { %2575 = vmatprep.mubr.f32.mxu0 %v57_v35  ;;  %4582 = vmatpush3.msra.mxu1 %v700_v36  ;;  %v733_v34 = vld [vmem:[%s8968_s1 + $0x1408] sm:$0xff]  ;;  %v748_v36 = vld [vmem:[%s8968_s1 + $0x1480] sm:$0xff] }
 0x156   :  { %2576 = vmatmul.mubr.f32.vlgmr.msra.gmra.mxu0 %v56_v37  ;;  %2645 = vmatprep.mubr.f32.mxu1 %v59_v38  ;;  %v765_v35 = vld [vmem:[%s8968_s1 + $0x1508] sm:$0xff]  ;;  %v780_v37 = vld [vmem:[%s8968_s1 + $0x1580] sm:$0xff] }
 0x157   :  { %4586 = vmatprep.subr.mxu0 %v763_v39  ;;  %4621 = vmatprep.subr.mxu1 %v795_v40  ;;  %v732_v38 = vld [vmem:[%s8968_s1 + $0x1400] sm:$0xff]  ;;  %v61_v39 = vld [vmem:[%s8969_s0 + $0x148] sm:$0xff] }
 0x158   :  { %2646 = vmatmul.mubr.f32.vlgmr.msra.gmra.mxu1 %v58_v41  ;;  %4587 = vmatpush3.msra.mxu0 %v747_v42  ;;  %v764_v40 = vld [vmem:[%s8968_s1 + $0x1500] sm:$0xff]  ;;  %v63_v42 = vld [vmem:[%s8969_s0 + $0x158] sm:$0xff] }
 0x159   :  { %4622 = vmatpush3.msra.mxu1 %v779_v43  ;;  %4588 = vmatprep.subr.mxu0 %v762_v44  ;;  %v60_v41 = vld [vmem:[%s8969_s0 + $0x140] sm:$0xff]  ;;  %v827_v43 = vld [vmem:[%s8968_s1 + $0x16f8] sm:$0xff] }
 0x15a   :  { %4623 = vmatprep.subr.mxu1 %v794_v45  ;;  %4589 = vmatpush3.msra.mxu0 %v746_v46  ;;  %v859_v44 = vld [vmem:[%s8968_s1 + $0x17f8] sm:$0xff]  ;;  %v62_v45 = vld [vmem:[%s8969_s0 + $0x150] sm:$0xff] }
 0x15b   :  { %4624 = vmatpush3.msra.mxu1 %v778_v47  ;;  %4590 = vmatprep.subr.mxu0 %v761_v48  ;;  %v811_v46 = vld [vmem:[%s8968_s1 + $0x1678] sm:$0xff]  ;;  %v826_v48 = vld [vmem:[%s8968_s1 + $0x16f0] sm:$0xff] }
 0x15c   :  { %4625 = vmatprep.subr.mxu1 %v793_v49  ;;  %4591 = vmatpush3.msra.mxu0 %v745_v50  ;;  %v843_v47 = vld [vmem:[%s8968_s1 + $0x1778] sm:$0xff]  ;;  %v858_v49 = vld [vmem:[%s8968_s1 + $0x17f0] sm:$0xff] }
 0x15d   :  { %4626 = vmatpush3.msra.mxu1 %v777_v51  ;;  %4592 = vmatprep.subr.mxu0 %v760_v52  ;;  %v810_v50 = vld [vmem:[%s8968_s1 + $0x1670] sm:$0xff]  ;;  %v825_v52 = vld [vmem:[%s8968_s1 + $0x16e8] sm:$0xff] }
 0x15e   :  { %4627 = vmatprep.subr.mxu1 %v792_v53  ;;  %4593 = vmatpush3.msra.mxu0 %v744_v54  ;;  %v842_v51 = vld [vmem:[%s8968_s1 + $0x1770] sm:$0xff]  ;;  %v857_v53 = vld [vmem:[%s8968_s1 + $0x17e8] sm:$0xff] }
 0x15f   :  { %4628 = vmatpush3.msra.mxu1 %v776_v55  ;;  %4594 = vmatprep.subr.mxu0 %v759_v56  ;;  %v809_v54 = vld [vmem:[%s8968_s1 + $0x1668] sm:$0xff]  ;;  %v824_v56 = vld [vmem:[%s8968_s1 + $0x16e0] sm:$0xff] }
 0x160   :  { %4629 = vmatprep.subr.mxu1 %v791_v57  ;;  %4595 = vmatpush3.msra.mxu0 %v743_v58  ;;  %v841_v55 = vld [vmem:[%s8968_s1 + $0x1768] sm:$0xff]  ;;  %v856_v57 = vld [vmem:[%s8968_s1 + $0x17e0] sm:$0xff] }
 0x161   :  { %4630 = vmatpush3.msra.mxu1 %v775_v59  ;;  %4596 = vmatprep.subr.mxu0 %v758_v60  ;;  %v808_v58 = vld [vmem:[%s8968_s1 + $0x1660] sm:$0xff]  ;;  %v823_v60 = vld [vmem:[%s8968_s1 + $0x16d8] sm:$0xff] }
 0x162   :  { %4631 = vmatprep.subr.mxu1 %v790_v61  ;;  %4597 = vmatpush3.msra.mxu0 %v742_v62  ;;  %v840_v59 = vld [vmem:[%s8968_s1 + $0x1760] sm:$0xff]  ;;  %v855_v61 = vld [vmem:[%s8968_s1 + $0x17d8] sm:$0xff] }
 0x163   :  { %4632 = vmatpush3.msra.mxu1 %v774_v63  ;;  %4598 = vmatprep.subr.mxu0 %v757_v0  ;;  %v807_v62 = vld [vmem:[%s8968_s1 + $0x1658] sm:$0xff]  ;;  %v822_v0 = vld [vmem:[%s8968_s1 + $0x16d0] sm:$0xff] }
 0x164   :  { %4633 = vmatprep.subr.mxu1 %v789_v1  ;;  %4599 = vmatpush3.msra.mxu0 %v741_v2  ;;  %v839_v63 = vld [vmem:[%s8968_s1 + $0x1758] sm:$0xff]  ;;  %v854_v1 = vld [vmem:[%s8968_s1 + $0x17d0] sm:$0xff] }
 0x165   :  { %4634 = vmatpush3.msra.mxu1 %v773_v3  ;;  %4600 = vmatprep.subr.mxu0 %v756_v4  ;;  %v806_v2 = vld [vmem:[%s8968_s1 + $0x1650] sm:$0xff]  ;;  %v821_v4 = vld [vmem:[%s8968_s1 + $0x16c8] sm:$0xff] }
 0x166   :  { %4635 = vmatprep.subr.mxu1 %v788_v5  ;;  %4601 = vmatpush3.msra.mxu0 %v740_v6  ;;  %v838_v3 = vld [vmem:[%s8968_s1 + $0x1750] sm:$0xff]  ;;  %v853_v5 = vld [vmem:[%s8968_s1 + $0x17c8] sm:$0xff] }
 0x167   :  { %4636 = vmatpush3.msra.mxu1 %v772_v7  ;;  %4602 = vmatprep.subr.mxu0 %v755_v8  ;;  %v805_v6 = vld [vmem:[%s8968_s1 + $0x1648] sm:$0xff]  ;;  %v820_v8 = vld [vmem:[%s8968_s1 + $0x16c0] sm:$0xff] }
 0x168   :  { %4637 = vmatprep.subr.mxu1 %v787_v9  ;;  %4603 = vmatpush3.msra.mxu0 %v739_v10  ;;  %v837_v7 = vld [vmem:[%s8968_s1 + $0x1748] sm:$0xff]  ;;  %v852_v9 = vld [vmem:[%s8968_s1 + $0x17c0] sm:$0xff] }
 0x169   :  { %4638 = vmatpush3.msra.mxu1 %v771_v11  ;;  %4604 = vmatprep.subr.mxu0 %v754_v12  ;;  %v804_v10 = vld [vmem:[%s8968_s1 + $0x1640] sm:$0xff]  ;;  %v819_v12 = vld [vmem:[%s8968_s1 + $0x16b8] sm:$0xff] }
 0x16a   :  { %4639 = vmatprep.subr.mxu1 %v786_v13  ;;  %4605 = vmatpush3.msra.mxu0 %v738_v14  ;;  %v836_v11 = vld [vmem:[%s8968_s1 + $0x1740] sm:$0xff]  ;;  %v851_v13 = vld [vmem:[%s8968_s1 + $0x17b8] sm:$0xff] }
 0x16b   :  { %4640 = vmatpush3.msra.mxu1 %v770_v15  ;;  %4606 = vmatprep.subr.mxu0 %v753_v16  ;;  %v803_v14 = vld [vmem:[%s8968_s1 + $0x1638] sm:$0xff]  ;;  %v818_v16 = vld [vmem:[%s8968_s1 + $0x16b0] sm:$0xff] }
 0x16c   :  { %4641 = vmatprep.subr.mxu1 %v785_v17  ;;  %4607 = vmatpush3.msra.mxu0 %v737_v18  ;;  %v835_v15 = vld [vmem:[%s8968_s1 + $0x1738] sm:$0xff]  ;;  %v850_v17 = vld [vmem:[%s8968_s1 + $0x17b0] sm:$0xff] }
 0x16d   :  { %4642 = vmatpush3.msra.mxu1 %v769_v19  ;;  %4608 = vmatprep.subr.mxu0 %v752_v20  ;;  %v802_v18 = vld [vmem:[%s8968_s1 + $0x1630] sm:$0xff]  ;;  %v817_v20 = vld [vmem:[%s8968_s1 + $0x16a8] sm:$0xff] }
 0x16e   :  { %4643 = vmatprep.subr.mxu1 %v784_v21  ;;  %4609 = vmatpush3.msra.mxu0 %v736_v22  ;;  %v834_v19 = vld [vmem:[%s8968_s1 + $0x1730] sm:$0xff]  ;;  %v849_v21 = vld [vmem:[%s8968_s1 + $0x17a8] sm:$0xff] }
 0x16f   :  { %4644 = vmatpush3.msra.mxu1 %v768_v23  ;;  %4610 = vmatprep.subr.mxu0 %v751_v24  ;;  %v801_v22 = vld [vmem:[%s8968_s1 + $0x1628] sm:$0xff]  ;;  %v816_v24 = vld [vmem:[%s8968_s1 + $0x16a0] sm:$0xff] }
 0x170   :  { %4645 = vmatprep.subr.mxu1 %v783_v25  ;;  %4611 = vmatpush3.msra.mxu0 %v735_v26  ;;  %v833_v23 = vld [vmem:[%s8968_s1 + $0x1728] sm:$0xff]  ;;  %v848_v25 = vld [vmem:[%s8968_s1 + $0x17a0] sm:$0xff] }
 0x171   :  { %4646 = vmatpush3.msra.mxu1 %v767_v27  ;;  %4612 = vmatprep.subr.mxu0 %v750_v28  ;;  %v800_v26 = vld [vmem:[%s8968_s1 + $0x1620] sm:$0xff]  ;;  %v815_v28 = vld [vmem:[%s8968_s1 + $0x1698] sm:$0xff] }
 0x172   :  { %4647 = vmatprep.subr.mxu1 %v782_v29  ;;  %4613 = vmatpush3.msra.mxu0 %v734_v30  ;;  %v832_v27 = vld [vmem:[%s8968_s1 + $0x1720] sm:$0xff]  ;;  %v847_v29 = vld [vmem:[%s8968_s1 + $0x1798] sm:$0xff] }
 0x173   :  { %4648 = vmatpush3.msra.mxu1 %v766_v31  ;;  %4614 = vmatprep.subr.mxu0 %v749_v32  ;;  %v799_v30 = vld [vmem:[%s8968_s1 + $0x1618] sm:$0xff]  ;;  %v814_v32 = vld [vmem:[%s8968_s1 + $0x1690] sm:$0xff] }
 0x174   :  { %4649 = vmatprep.subr.mxu1 %v781_v33  ;;  %4615 = vmatpush3.msra.mxu0 %v733_v34  ;;  %v831_v31 = vld [vmem:[%s8968_s1 + $0x1718] sm:$0xff]  ;;  %v846_v33 = vld [vmem:[%s8968_s1 + $0x1790] sm:$0xff] }
 0x175   :  { %4650 = vmatpush3.msra.mxu1 %v765_v35  ;;  %4616 = vmatprep.subr.mxu0 %v748_v36  ;;  %v798_v34 = vld [vmem:[%s8968_s1 + $0x1610] sm:$0xff]  ;;  %v813_v36 = vld [vmem:[%s8968_s1 + $0x1688] sm:$0xff] }
 0x176   :  { %4651 = vmatprep.subr.mxu1 %v780_v37  ;;  %4617 = vmatpush3.msra.mxu0 %v732_v38  ;;  %v830_v35 = vld [vmem:[%s8968_s1 + $0x1710] sm:$0xff]  ;;  %v845_v37 = vld [vmem:[%s8968_s1 + $0x1788] sm:$0xff] }
 0x177   :  { %2715 = vmatprep.mubr.f32.mxu0 %v61_v39  ;;  %4652 = vmatpush3.msra.mxu1 %v764_v40  ;;  %v797_v38 = vld [vmem:[%s8968_s1 + $0x1608] sm:$0xff]  ;;  %v812_v40 = vld [vmem:[%s8968_s1 + $0x1680] sm:$0xff] }
 0x178   :  { %2716 = vmatmul.mubr.f32.vlgmr.msra.gmra.mxu0 %v60_v41  ;;  %2785 = vmatprep.mubr.f32.mxu1 %v63_v42  ;;  %v829_v39 = vld [vmem:[%s8968_s1 + $0x1708] sm:$0xff]  ;;  %v844_v41 = vld [vmem:[%s8968_s1 + $0x1780] sm:$0xff] }
 0x179   :  { %4656 = vmatprep.subr.mxu0 %v827_v43  ;;  %4691 = vmatprep.subr.mxu1 %v859_v44  ;;  %v796_v42 = vld [vmem:[%s8968_s1 + $0x1600] sm:$0xff]  ;;  %v65_v43 = vld [vmem:[%s8969_s0 + $0x168] sm:$0xff] }
 0x17a   :  { %2786 = vmatmul.mubr.f32.vlgmr.msra.gmra.mxu1 %v62_v45  ;;  %4657 = vmatpush3.msra.mxu0 %v811_v46  ;;  %v828_v44 = vld [vmem:[%s8968_s1 + $0x1700] sm:$0xff]  ;;  %v67_v46 = vld [vmem:[%s8969_s0 + $0x178] sm:$0xff] }
 0x17b   :  { %4692 = vmatpush3.msra.mxu1 %v843_v47  ;;  %4658 = vmatprep.subr.mxu0 %v826_v48  ;;  %v64_v45 = vld [vmem:[%s8969_s0 + $0x160] sm:$0xff]  ;;  %v891_v47 = vld [vmem:[%s8968_s1 + $0x18f8] sm:$0xff] }
 0x17c   :  { %4693 = vmatprep.subr.mxu1 %v858_v49  ;;  %4659 = vmatpush3.msra.mxu0 %v810_v50  ;;  %v923_v48 = vld [vmem:[%s8968_s1 + $0x19f8] sm:$0xff]  ;;  %v66_v49 = vld [vmem:[%s8969_s0 + $0x170] sm:$0xff] }
 0x17d   :  { %4694 = vmatpush3.msra.mxu1 %v842_v51  ;;  %4660 = vmatprep.subr.mxu0 %v825_v52  ;;  %v875_v50 = vld [vmem:[%s8968_s1 + $0x1878] sm:$0xff]  ;;  %v890_v52 = vld [vmem:[%s8968_s1 + $0x18f0] sm:$0xff] }
 0x17e   :  { %4695 = vmatprep.subr.mxu1 %v857_v53  ;;  %4661 = vmatpush3.msra.mxu0 %v809_v54  ;;  %v907_v51 = vld [vmem:[%s8968_s1 + $0x1978] sm:$0xff]  ;;  %v922_v53 = vld [vmem:[%s8968_s1 + $0x19f0] sm:$0xff] }
 0x17f   :  { %4696 = vmatpush3.msra.mxu1 %v841_v55  ;;  %4662 = vmatprep.subr.mxu0 %v824_v56  ;;  %v874_v54 = vld [vmem:[%s8968_s1 + $0x1870] sm:$0xff]  ;;  %v889_v56 = vld [vmem:[%s8968_s1 + $0x18e8] sm:$0xff] }
 0x180   :  { %4697 = vmatprep.subr.mxu1 %v856_v57  ;;  %4663 = vmatpush3.msra.mxu0 %v808_v58  ;;  %v906_v55 = vld [vmem:[%s8968_s1 + $0x1970] sm:$0xff]  ;;  %v921_v57 = vld [vmem:[%s8968_s1 + $0x19e8] sm:$0xff] }
 0x181   :  { %4698 = vmatpush3.msra.mxu1 %v840_v59  ;;  %4664 = vmatprep.subr.mxu0 %v823_v60  ;;  %v873_v58 = vld [vmem:[%s8968_s1 + $0x1868] sm:$0xff]  ;;  %v888_v60 = vld [vmem:[%s8968_s1 + $0x18e0] sm:$0xff] }
 0x182   :  { %4699 = vmatprep.subr.mxu1 %v855_v61  ;;  %4665 = vmatpush3.msra.mxu0 %v807_v62  ;;  %v905_v59 = vld [vmem:[%s8968_s1 + $0x1968] sm:$0xff]  ;;  %v920_v61 = vld [vmem:[%s8968_s1 + $0x19e0] sm:$0xff] }
 0x183   :  { %4700 = vmatpush3.msra.mxu1 %v839_v63  ;;  %4666 = vmatprep.subr.mxu0 %v822_v0  ;;  %v872_v62 = vld [vmem:[%s8968_s1 + $0x1860] sm:$0xff]  ;;  %v887_v0 = vld [vmem:[%s8968_s1 + $0x18d8] sm:$0xff] }
 0x184   :  { %4701 = vmatprep.subr.mxu1 %v854_v1  ;;  %4667 = vmatpush3.msra.mxu0 %v806_v2  ;;  %v904_v63 = vld [vmem:[%s8968_s1 + $0x1960] sm:$0xff]  ;;  %v919_v1 = vld [vmem:[%s8968_s1 + $0x19d8] sm:$0xff] }
 0x185   :  { %4702 = vmatpush3.msra.mxu1 %v838_v3  ;;  %4668 = vmatprep.subr.mxu0 %v821_v4  ;;  %v871_v2 = vld [vmem:[%s8968_s1 + $0x1858] sm:$0xff]  ;;  %v886_v4 = vld [vmem:[%s8968_s1 + $0x18d0] sm:$0xff] }
 0x186   :  { %4703 = vmatprep.subr.mxu1 %v853_v5  ;;  %4669 = vmatpush3.msra.mxu0 %v805_v6  ;;  %v903_v3 = vld [vmem:[%s8968_s1 + $0x1958] sm:$0xff]  ;;  %v918_v5 = vld [vmem:[%s8968_s1 + $0x19d0] sm:$0xff] }
 0x187   :  { %4704 = vmatpush3.msra.mxu1 %v837_v7  ;;  %4670 = vmatprep.subr.mxu0 %v820_v8  ;;  %v870_v6 = vld [vmem:[%s8968_s1 + $0x1850] sm:$0xff]  ;;  %v885_v8 = vld [vmem:[%s8968_s1 + $0x18c8] sm:$0xff] }
 0x188   :  { %4705 = vmatprep.subr.mxu1 %v852_v9  ;;  %4671 = vmatpush3.msra.mxu0 %v804_v10  ;;  %v902_v7 = vld [vmem:[%s8968_s1 + $0x1950] sm:$0xff]  ;;  %v917_v9 = vld [vmem:[%s8968_s1 + $0x19c8] sm:$0xff] }
 0x189   :  { %4706 = vmatpush3.msra.mxu1 %v836_v11  ;;  %4672 = vmatprep.subr.mxu0 %v819_v12  ;;  %v869_v10 = vld [vmem:[%s8968_s1 + $0x1848] sm:$0xff]  ;;  %v884_v12 = vld [vmem:[%s8968_s1 + $0x18c0] sm:$0xff] }
 0x18a   :  { %4707 = vmatprep.subr.mxu1 %v851_v13  ;;  %4673 = vmatpush3.msra.mxu0 %v803_v14  ;;  %v901_v11 = vld [vmem:[%s8968_s1 + $0x1948] sm:$0xff]  ;;  %v916_v13 = vld [vmem:[%s8968_s1 + $0x19c0] sm:$0xff] }
 0x18b   :  { %4708 = vmatpush3.msra.mxu1 %v835_v15  ;;  %4674 = vmatprep.subr.mxu0 %v818_v16  ;;  %v868_v14 = vld [vmem:[%s8968_s1 + $0x1840] sm:$0xff]  ;;  %v883_v16 = vld [vmem:[%s8968_s1 + $0x18b8] sm:$0xff] }
 0x18c   :  { %4709 = vmatprep.subr.mxu1 %v850_v17  ;;  %4675 = vmatpush3.msra.mxu0 %v802_v18  ;;  %v900_v15 = vld [vmem:[%s8968_s1 + $0x1940] sm:$0xff]  ;;  %v915_v17 = vld [vmem:[%s8968_s1 + $0x19b8] sm:$0xff] }
 0x18d   :  { %4710 = vmatpush3.msra.mxu1 %v834_v19  ;;  %4676 = vmatprep.subr.mxu0 %v817_v20  ;;  %v867_v18 = vld [vmem:[%s8968_s1 + $0x1838] sm:$0xff]  ;;  %v882_v20 = vld [vmem:[%s8968_s1 + $0x18b0] sm:$0xff] }
 0x18e   :  { %4711 = vmatprep.subr.mxu1 %v849_v21  ;;  %4677 = vmatpush3.msra.mxu0 %v801_v22  ;;  %v899_v19 = vld [vmem:[%s8968_s1 + $0x1938] sm:$0xff]  ;;  %v914_v21 = vld [vmem:[%s8968_s1 + $0x19b0] sm:$0xff] }
 0x18f   :  { %4712 = vmatpush3.msra.mxu1 %v833_v23  ;;  %4678 = vmatprep.subr.mxu0 %v816_v24  ;;  %v866_v22 = vld [vmem:[%s8968_s1 + $0x1830] sm:$0xff]  ;;  %v881_v24 = vld [vmem:[%s8968_s1 + $0x18a8] sm:$0xff] }
 0x190   :  { %4713 = vmatprep.subr.mxu1 %v848_v25  ;;  %4679 = vmatpush3.msra.mxu0 %v800_v26  ;;  %v898_v23 = vld [vmem:[%s8968_s1 + $0x1930] sm:$0xff]  ;;  %v913_v25 = vld [vmem:[%s8968_s1 + $0x19a8] sm:$0xff] }
 0x191   :  { %4714 = vmatpush3.msra.mxu1 %v832_v27  ;;  %4680 = vmatprep.subr.mxu0 %v815_v28  ;;  %v865_v26 = vld [vmem:[%s8968_s1 + $0x1828] sm:$0xff]  ;;  %v880_v28 = vld [vmem:[%s8968_s1 + $0x18a0] sm:$0xff] }
 0x192   :  { %4715 = vmatprep.subr.mxu1 %v847_v29  ;;  %4681 = vmatpush3.msra.mxu0 %v799_v30  ;;  %v897_v27 = vld [vmem:[%s8968_s1 + $0x1928] sm:$0xff]  ;;  %v912_v29 = vld [vmem:[%s8968_s1 + $0x19a0] sm:$0xff] }
 0x193   :  { %4716 = vmatpush3.msra.mxu1 %v831_v31  ;;  %4682 = vmatprep.subr.mxu0 %v814_v32  ;;  %v864_v30 = vld [vmem:[%s8968_s1 + $0x1820] sm:$0xff]  ;;  %v879_v32 = vld [vmem:[%s8968_s1 + $0x1898] sm:$0xff] }
 0x194   :  { %4717 = vmatprep.subr.mxu1 %v846_v33  ;;  %4683 = vmatpush3.msra.mxu0 %v798_v34  ;;  %v896_v31 = vld [vmem:[%s8968_s1 + $0x1920] sm:$0xff]  ;;  %v911_v33 = vld [vmem:[%s8968_s1 + $0x1998] sm:$0xff] }
 0x195   :  { %4718 = vmatpush3.msra.mxu1 %v830_v35  ;;  %4684 = vmatprep.subr.mxu0 %v813_v36  ;;  %v863_v34 = vld [vmem:[%s8968_s1 + $0x1818] sm:$0xff]  ;;  %v878_v36 = vld [vmem:[%s8968_s1 + $0x1890] sm:$0xff] }
 0x196   :  { %4719 = vmatprep.subr.mxu1 %v845_v37  ;;  %4685 = vmatpush3.msra.mxu0 %v797_v38  ;;  %v895_v35 = vld [vmem:[%s8968_s1 + $0x1918] sm:$0xff]  ;;  %v910_v37 = vld [vmem:[%s8968_s1 + $0x1990] sm:$0xff] }
 0x197   :  { %4720 = vmatpush3.msra.mxu1 %v829_v39  ;;  %4686 = vmatprep.subr.mxu0 %v812_v40  ;;  %v862_v38 = vld [vmem:[%s8968_s1 + $0x1810] sm:$0xff]  ;;  %v877_v40 = vld [vmem:[%s8968_s1 + $0x1888] sm:$0xff] }
 0x198   :  { %4721 = vmatprep.subr.mxu1 %v844_v41  ;;  %4687 = vmatpush3.msra.mxu0 %v796_v42  ;;  %v894_v39 = vld [vmem:[%s8968_s1 + $0x1910] sm:$0xff]  ;;  %v909_v41 = vld [vmem:[%s8968_s1 + $0x1988] sm:$0xff] }
 0x199   :  { %2855 = vmatprep.mubr.f32.mxu0 %v65_v43  ;;  %4722 = vmatpush3.msra.mxu1 %v828_v44  ;;  %v861_v42 = vld [vmem:[%s8968_s1 + $0x1808] sm:$0xff]  ;;  %v876_v44 = vld [vmem:[%s8968_s1 + $0x1880] sm:$0xff] }
 0x19a   :  { %2856 = vmatmul.mubr.f32.vlgmr.msra.gmra.mxu0 %v64_v45  ;;  %2925 = vmatprep.mubr.f32.mxu1 %v67_v46  ;;  %v893_v43 = vld [vmem:[%s8968_s1 + $0x1908] sm:$0xff]  ;;  %v908_v45 = vld [vmem:[%s8968_s1 + $0x1980] sm:$0xff] }
 0x19b   :  { %4726 = vmatprep.subr.mxu0 %v891_v47  ;;  %4761 = vmatprep.subr.mxu1 %v923_v48  ;;  %v860_v46 = vld [vmem:[%s8968_s1 + $0x1800] sm:$0xff]  ;;  %v69_v47 = vld [vmem:[%s8969_s0 + $0x188] sm:$0xff] }
 0x19c   :  { %2926 = vmatmul.mubr.f32.vlgmr.msra.gmra.mxu1 %v66_v49  ;;  %4727 = vmatpush3.msra.mxu0 %v875_v50  ;;  %v892_v48 = vld [vmem:[%s8968_s1 + $0x1900] sm:$0xff]  ;;  %v71_v50 = vld [vmem:[%s8969_s0 + $0x198] sm:$0xff] }
 0x19d   :  { %4762 = vmatpush3.msra.mxu1 %v907_v51  ;;  %4728 = vmatprep.subr.mxu0 %v890_v52  ;;  %v68_v49 = vld [vmem:[%s8969_s0 + $0x180] sm:$0xff]  ;;  %v955_v51 = vld [vmem:[%s8968_s1 + $0x1af8] sm:$0xff] }
 0x19e   :  { %4763 = vmatprep.subr.mxu1 %v922_v53  ;;  %4729 = vmatpush3.msra.mxu0 %v874_v54  ;;  %v987_v52 = vld [vmem:[%s8968_s1 + $0x1bf8] sm:$0xff]  ;;  %v70_v53 = vld [vmem:[%s8969_s0 + $0x190] sm:$0xff] }
 0x19f   :  { %4764 = vmatpush3.msra.mxu1 %v906_v55  ;;  %4730 = vmatprep.subr.mxu0 %v889_v56  ;;  %v939_v54 = vld [vmem:[%s8968_s1 + $0x1a78] sm:$0xff]  ;;  %v954_v56 = vld [vmem:[%s8968_s1 + $0x1af0] sm:$0xff] }
 0x1a0   :  { %4765 = vmatprep.subr.mxu1 %v921_v57  ;;  %4731 = vmatpush3.msra.mxu0 %v873_v58  ;;  %v971_v55 = vld [vmem:[%s8968_s1 + $0x1b78] sm:$0xff]  ;;  %v986_v57 = vld [vmem:[%s8968_s1 + $0x1bf0] sm:$0xff] }
 0x1a1   :  { %4766 = vmatpush3.msra.mxu1 %v905_v59  ;;  %4732 = vmatprep.subr.mxu0 %v888_v60  ;;  %v938_v58 = vld [vmem:[%s8968_s1 + $0x1a70] sm:$0xff]  ;;  %v953_v60 = vld [vmem:[%s8968_s1 + $0x1ae8] sm:$0xff] }
 0x1a2   :  { %4767 = vmatprep.subr.mxu1 %v920_v61  ;;  %4733 = vmatpush3.msra.mxu0 %v872_v62  ;;  %v970_v59 = vld [vmem:[%s8968_s1 + $0x1b70] sm:$0xff]  ;;  %v985_v61 = vld [vmem:[%s8968_s1 + $0x1be8] sm:$0xff] }
 0x1a3   :  { %4768 = vmatpush3.msra.mxu1 %v904_v63  ;;  %4734 = vmatprep.subr.mxu0 %v887_v0  ;;  %v937_v62 = vld [vmem:[%s8968_s1 + $0x1a68] sm:$0xff]  ;;  %v952_v0 = vld [vmem:[%s8968_s1 + $0x1ae0] sm:$0xff] }
 0x1a4   :  { %4769 = vmatprep.subr.mxu1 %v919_v1  ;;  %4735 = vmatpush3.msra.mxu0 %v871_v2  ;;  %v969_v63 = vld [vmem:[%s8968_s1 + $0x1b68] sm:$0xff]  ;;  %v984_v1 = vld [vmem:[%s8968_s1 + $0x1be0] sm:$0xff] }
 0x1a5   :  { %4770 = vmatpush3.msra.mxu1 %v903_v3  ;;  %4736 = vmatprep.subr.mxu0 %v886_v4  ;;  %v936_v2 = vld [vmem:[%s8968_s1 + $0x1a60] sm:$0xff]  ;;  %v951_v4 = vld [vmem:[%s8968_s1 + $0x1ad8] sm:$0xff] }
 0x1a6   :  { %4771 = vmatprep.subr.mxu1 %v918_v5  ;;  %4737 = vmatpush3.msra.mxu0 %v870_v6  ;;  %v968_v3 = vld [vmem:[%s8968_s1 + $0x1b60] sm:$0xff]  ;;  %v983_v5 = vld [vmem:[%s8968_s1 + $0x1bd8] sm:$0xff] }
 0x1a7   :  { %4772 = vmatpush3.msra.mxu1 %v902_v7  ;;  %4738 = vmatprep.subr.mxu0 %v885_v8  ;;  %v935_v6 = vld [vmem:[%s8968_s1 + $0x1a58] sm:$0xff]  ;;  %v950_v8 = vld [vmem:[%s8968_s1 + $0x1ad0] sm:$0xff] }
 0x1a8   :  { %4773 = vmatprep.subr.mxu1 %v917_v9  ;;  %4739 = vmatpush3.msra.mxu0 %v869_v10  ;;  %v967_v7 = vld [vmem:[%s8968_s1 + $0x1b58] sm:$0xff]  ;;  %v982_v9 = vld [vmem:[%s8968_s1 + $0x1bd0] sm:$0xff] }
 0x1a9   :  { %4774 = vmatpush3.msra.mxu1 %v901_v11  ;;  %4740 = vmatprep.subr.mxu0 %v884_v12  ;;  %v934_v10 = vld [vmem:[%s8968_s1 + $0x1a50] sm:$0xff]  ;;  %v949_v12 = vld [vmem:[%s8968_s1 + $0x1ac8] sm:$0xff] }
 0x1aa   :  { %4775 = vmatprep.subr.mxu1 %v916_v13  ;;  %4741 = vmatpush3.msra.mxu0 %v868_v14  ;;  %v966_v11 = vld [vmem:[%s8968_s1 + $0x1b50] sm:$0xff]  ;;  %v981_v13 = vld [vmem:[%s8968_s1 + $0x1bc8] sm:$0xff] }
 0x1ab   :  { %4776 = vmatpush3.msra.mxu1 %v900_v15  ;;  %4742 = vmatprep.subr.mxu0 %v883_v16  ;;  %v933_v14 = vld [vmem:[%s8968_s1 + $0x1a48] sm:$0xff]  ;;  %v948_v16 = vld [vmem:[%s8968_s1 + $0x1ac0] sm:$0xff] }
 0x1ac   :  { %4777 = vmatprep.subr.mxu1 %v915_v17  ;;  %4743 = vmatpush3.msra.mxu0 %v867_v18  ;;  %v965_v15 = vld [vmem:[%s8968_s1 + $0x1b48] sm:$0xff]  ;;  %v980_v17 = vld [vmem:[%s8968_s1 + $0x1bc0] sm:$0xff] }
 0x1ad   :  { %4778 = vmatpush3.msra.mxu1 %v899_v19  ;;  %4744 = vmatprep.subr.mxu0 %v882_v20  ;;  %v932_v18 = vld [vmem:[%s8968_s1 + $0x1a40] sm:$0xff]  ;;  %v947_v20 = vld [vmem:[%s8968_s1 + $0x1ab8] sm:$0xff] }
 0x1ae   :  { %4779 = vmatprep.subr.mxu1 %v914_v21  ;;  %4745 = vmatpush3.msra.mxu0 %v866_v22  ;;  %v964_v19 = vld [vmem:[%s8968_s1 + $0x1b40] sm:$0xff]  ;;  %v979_v21 = vld [vmem:[%s8968_s1 + $0x1bb8] sm:$0xff] }
 0x1af   :  { %4780 = vmatpush3.msra.mxu1 %v898_v23  ;;  %4746 = vmatprep.subr.mxu0 %v881_v24  ;;  %v931_v22 = vld [vmem:[%s8968_s1 + $0x1a38] sm:$0xff]  ;;  %v946_v24 = vld [vmem:[%s8968_s1 + $0x1ab0] sm:$0xff] }
 0x1b0   :  { %4781 = vmatprep.subr.mxu1 %v913_v25  ;;  %4747 = vmatpush3.msra.mxu0 %v865_v26  ;;  %v963_v23 = vld [vmem:[%s8968_s1 + $0x1b38] sm:$0xff]  ;;  %v978_v25 = vld [vmem:[%s8968_s1 + $0x1bb0] sm:$0xff] }
 0x1b1   :  { %4782 = vmatpush3.msra.mxu1 %v897_v27  ;;  %4748 = vmatprep.subr.mxu0 %v880_v28  ;;  %v930_v26 = vld [vmem:[%s8968_s1 + $0x1a30] sm:$0xff]  ;;  %v945_v28 = vld [vmem:[%s8968_s1 + $0x1aa8] sm:$0xff] }
 0x1b2   :  { %4783 = vmatprep.subr.mxu1 %v912_v29  ;;  %4749 = vmatpush3.msra.mxu0 %v864_v30  ;;  %v962_v27 = vld [vmem:[%s8968_s1 + $0x1b30] sm:$0xff]  ;;  %v977_v29 = vld [vmem:[%s8968_s1 + $0x1ba8] sm:$0xff] }
 0x1b3   :  { %4784 = vmatpush3.msra.mxu1 %v896_v31  ;;  %4750 = vmatprep.subr.mxu0 %v879_v32  ;;  %v929_v30 = vld [vmem:[%s8968_s1 + $0x1a28] sm:$0xff]  ;;  %v944_v32 = vld [vmem:[%s8968_s1 + $0x1aa0] sm:$0xff] }
 0x1b4   :  { %4785 = vmatprep.subr.mxu1 %v911_v33  ;;  %4751 = vmatpush3.msra.mxu0 %v863_v34  ;;  %v961_v31 = vld [vmem:[%s8968_s1 + $0x1b28] sm:$0xff]  ;;  %v976_v33 = vld [vmem:[%s8968_s1 + $0x1ba0] sm:$0xff] }
 0x1b5   :  { %4786 = vmatpush3.msra.mxu1 %v895_v35  ;;  %4752 = vmatprep.subr.mxu0 %v878_v36  ;;  %v928_v34 = vld [vmem:[%s8968_s1 + $0x1a20] sm:$0xff]  ;;  %v943_v36 = vld [vmem:[%s8968_s1 + $0x1a98] sm:$0xff] }
 0x1b6   :  { %4787 = vmatprep.subr.mxu1 %v910_v37  ;;  %4753 = vmatpush3.msra.mxu0 %v862_v38  ;;  %v960_v35 = vld [vmem:[%s8968_s1 + $0x1b20] sm:$0xff]  ;;  %v975_v37 = vld [vmem:[%s8968_s1 + $0x1b98] sm:$0xff] }
 0x1b7   :  { %4788 = vmatpush3.msra.mxu1 %v894_v39  ;;  %4754 = vmatprep.subr.mxu0 %v877_v40  ;;  %v927_v38 = vld [vmem:[%s8968_s1 + $0x1a18] sm:$0xff]  ;;  %v942_v40 = vld [vmem:[%s8968_s1 + $0x1a90] sm:$0xff] }
 0x1b8   :  { %4789 = vmatprep.subr.mxu1 %v909_v41  ;;  %4755 = vmatpush3.msra.mxu0 %v861_v42  ;;  %v959_v39 = vld [vmem:[%s8968_s1 + $0x1b18] sm:$0xff]  ;;  %v974_v41 = vld [vmem:[%s8968_s1 + $0x1b90] sm:$0xff] }
 0x1b9   :  { %4790 = vmatpush3.msra.mxu1 %v893_v43  ;;  %4756 = vmatprep.subr.mxu0 %v876_v44  ;;  %v926_v42 = vld [vmem:[%s8968_s1 + $0x1a10] sm:$0xff]  ;;  %v941_v44 = vld [vmem:[%s8968_s1 + $0x1a88] sm:$0xff] }
 0x1ba   :  { %4791 = vmatprep.subr.mxu1 %v908_v45  ;;  %4757 = vmatpush3.msra.mxu0 %v860_v46  ;;  %v958_v43 = vld [vmem:[%s8968_s1 + $0x1b10] sm:$0xff]  ;;  %v973_v45 = vld [vmem:[%s8968_s1 + $0x1b88] sm:$0xff] }
 0x1bb   :  { %2995 = vmatprep.mubr.f32.mxu0 %v69_v47  ;;  %4792 = vmatpush3.msra.mxu1 %v892_v48  ;;  %v925_v46 = vld [vmem:[%s8968_s1 + $0x1a08] sm:$0xff]  ;;  %v940_v48 = vld [vmem:[%s8968_s1 + $0x1a80] sm:$0xff] }
 0x1bc   :  { %2996 = vmatmul.mubr.f32.vlgmr.msra.gmra.mxu0 %v68_v49  ;;  %3065 = vmatprep.mubr.f32.mxu1 %v71_v50  ;;  %v957_v47 = vld [vmem:[%s8968_s1 + $0x1b08] sm:$0xff]  ;;  %v972_v49 = vld [vmem:[%s8968_s1 + $0x1b80] sm:$0xff] }
 0x1bd   :  { %4796 = vmatprep.subr.mxu0 %v955_v51  ;;  %4831 = vmatprep.subr.mxu1 %v987_v52  ;;  %v924_v50 = vld [vmem:[%s8968_s1 + $0x1a00] sm:$0xff]  ;;  %v73_v51 = vld [vmem:[%s8969_s0 + $0x1a8] sm:$0xff] }
 0x1be   :  { %3066 = vmatmul.mubr.f32.vlgmr.msra.gmra.mxu1 %v70_v53  ;;  %4797 = vmatpush3.msra.mxu0 %v939_v54  ;;  %v956_v52 = vld [vmem:[%s8968_s1 + $0x1b00] sm:$0xff]  ;;  %v75_v54 = vld [vmem:[%s8969_s0 + $0x1b8] sm:$0xff] }
 0x1bf   :  { %4832 = vmatpush3.msra.mxu1 %v971_v55  ;;  %4798 = vmatprep.subr.mxu0 %v954_v56  ;;  %v72_v53 = vld [vmem:[%s8969_s0 + $0x1a0] sm:$0xff]  ;;  %v1019_v55 = vld [vmem:[%s8968_s1 + $0x1cf8] sm:$0xff] }
 0x1c0   :  { %4833 = vmatprep.subr.mxu1 %v986_v57  ;;  %4799 = vmatpush3.msra.mxu0 %v938_v58  ;;  %v1051_v56 = vld [vmem:[%s8968_s1 + $0x1df8] sm:$0xff]  ;;  %v74_v57 = vld [vmem:[%s8969_s0 + $0x1b0] sm:$0xff] }
 0x1c1   :  { %4834 = vmatpush3.msra.mxu1 %v970_v59  ;;  %4800 = vmatprep.subr.mxu0 %v953_v60  ;;  %v1003_v58 = vld [vmem:[%s8968_s1 + $0x1c78] sm:$0xff]  ;;  %v1018_v60 = vld [vmem:[%s8968_s1 + $0x1cf0] sm:$0xff] }
 0x1c2   :  { %4835 = vmatprep.subr.mxu1 %v985_v61  ;;  %4801 = vmatpush3.msra.mxu0 %v937_v62  ;;  %v1035_v59 = vld [vmem:[%s8968_s1 + $0x1d78] sm:$0xff]  ;;  %v1050_v61 = vld [vmem:[%s8968_s1 + $0x1df0] sm:$0xff] }
 0x1c3   :  { %4836 = vmatpush3.msra.mxu1 %v969_v63  ;;  %4802 = vmatprep.subr.mxu0 %v952_v0  ;;  %v1002_v62 = vld [vmem:[%s8968_s1 + $0x1c70] sm:$0xff]  ;;  %v1017_v0 = vld [vmem:[%s8968_s1 + $0x1ce8] sm:$0xff] }
 0x1c4   :  { %4837 = vmatprep.subr.mxu1 %v984_v1  ;;  %4803 = vmatpush3.msra.mxu0 %v936_v2  ;;  %v1034_v63 = vld [vmem:[%s8968_s1 + $0x1d70] sm:$0xff]  ;;  %v1049_v1 = vld [vmem:[%s8968_s1 + $0x1de8] sm:$0xff] }
 0x1c5   :  { %4838 = vmatpush3.msra.mxu1 %v968_v3  ;;  %4804 = vmatprep.subr.mxu0 %v951_v4  ;;  %v1001_v2 = vld [vmem:[%s8968_s1 + $0x1c68] sm:$0xff]  ;;  %v1016_v4 = vld [vmem:[%s8968_s1 + $0x1ce0] sm:$0xff] }
 0x1c6   :  { %4839 = vmatprep.subr.mxu1 %v983_v5  ;;  %4805 = vmatpush3.msra.mxu0 %v935_v6  ;;  %v1033_v3 = vld [vmem:[%s8968_s1 + $0x1d68] sm:$0xff]  ;;  %v1048_v5 = vld [vmem:[%s8968_s1 + $0x1de0] sm:$0xff] }
 0x1c7   :  { %4840 = vmatpush3.msra.mxu1 %v967_v7  ;;  %4806 = vmatprep.subr.mxu0 %v950_v8  ;;  %v1000_v6 = vld [vmem:[%s8968_s1 + $0x1c60] sm:$0xff]  ;;  %v1015_v8 = vld [vmem:[%s8968_s1 + $0x1cd8] sm:$0xff] }
 0x1c8   :  { %4841 = vmatprep.subr.mxu1 %v982_v9  ;;  %4807 = vmatpush3.msra.mxu0 %v934_v10  ;;  %v1032_v7 = vld [vmem:[%s8968_s1 + $0x1d60] sm:$0xff]  ;;  %v1047_v9 = vld [vmem:[%s8968_s1 + $0x1dd8] sm:$0xff] }
 0x1c9   :  { %4842 = vmatpush3.msra.mxu1 %v966_v11  ;;  %4808 = vmatprep.subr.mxu0 %v949_v12  ;;  %v999_v10 = vld [vmem:[%s8968_s1 + $0x1c58] sm:$0xff]  ;;  %v1014_v12 = vld [vmem:[%s8968_s1 + $0x1cd0] sm:$0xff] }
 0x1ca   :  { %4843 = vmatprep.subr.mxu1 %v981_v13  ;;  %4809 = vmatpush3.msra.mxu0 %v933_v14  ;;  %v1031_v11 = vld [vmem:[%s8968_s1 + $0x1d58] sm:$0xff]  ;;  %v1046_v13 = vld [vmem:[%s8968_s1 + $0x1dd0] sm:$0xff] }
 0x1cb   :  { %4844 = vmatpush3.msra.mxu1 %v965_v15  ;;  %4810 = vmatprep.subr.mxu0 %v948_v16  ;;  %v998_v14 = vld [vmem:[%s8968_s1 + $0x1c50] sm:$0xff]  ;;  %v1013_v16 = vld [vmem:[%s8968_s1 + $0x1cc8] sm:$0xff] }
 0x1cc   :  { %4845 = vmatprep.subr.mxu1 %v980_v17  ;;  %4811 = vmatpush3.msra.mxu0 %v932_v18  ;;  %v1030_v15 = vld [vmem:[%s8968_s1 + $0x1d50] sm:$0xff]  ;;  %v1045_v17 = vld [vmem:[%s8968_s1 + $0x1dc8] sm:$0xff] }
 0x1cd   :  { %4846 = vmatpush3.msra.mxu1 %v964_v19  ;;  %4812 = vmatprep.subr.mxu0 %v947_v20  ;;  %v997_v18 = vld [vmem:[%s8968_s1 + $0x1c48] sm:$0xff]  ;;  %v1012_v20 = vld [vmem:[%s8968_s1 + $0x1cc0] sm:$0xff] }
 0x1ce   :  { %4847 = vmatprep.subr.mxu1 %v979_v21  ;;  %4813 = vmatpush3.msra.mxu0 %v931_v22  ;;  %v1029_v19 = vld [vmem:[%s8968_s1 + $0x1d48] sm:$0xff]  ;;  %v1044_v21 = vld [vmem:[%s8968_s1 + $0x1dc0] sm:$0xff] }
 0x1cf   :  { %4848 = vmatpush3.msra.mxu1 %v963_v23  ;;  %4814 = vmatprep.subr.mxu0 %v946_v24  ;;  %v996_v22 = vld [vmem:[%s8968_s1 + $0x1c40] sm:$0xff]  ;;  %v1011_v24 = vld [vmem:[%s8968_s1 + $0x1cb8] sm:$0xff] }
 0x1d0   :  { %4849 = vmatprep.subr.mxu1 %v978_v25  ;;  %4815 = vmatpush3.msra.mxu0 %v930_v26  ;;  %v1028_v23 = vld [vmem:[%s8968_s1 + $0x1d40] sm:$0xff]  ;;  %v1043_v25 = vld [vmem:[%s8968_s1 + $0x1db8] sm:$0xff] }
 0x1d1   :  { %4850 = vmatpush3.msra.mxu1 %v962_v27  ;;  %4816 = vmatprep.subr.mxu0 %v945_v28  ;;  %v995_v26 = vld [vmem:[%s8968_s1 + $0x1c38] sm:$0xff]  ;;  %v1010_v28 = vld [vmem:[%s8968_s1 + $0x1cb0] sm:$0xff] }
 0x1d2   :  { %4851 = vmatprep.subr.mxu1 %v977_v29  ;;  %4817 = vmatpush3.msra.mxu0 %v929_v30  ;;  %v1027_v27 = vld [vmem:[%s8968_s1 + $0x1d38] sm:$0xff]  ;;  %v1042_v29 = vld [vmem:[%s8968_s1 + $0x1db0] sm:$0xff] }
 0x1d3   :  { %4852 = vmatpush3.msra.mxu1 %v961_v31  ;;  %4818 = vmatprep.subr.mxu0 %v944_v32  ;;  %v994_v30 = vld [vmem:[%s8968_s1 + $0x1c30] sm:$0xff]  ;;  %v1009_v32 = vld [vmem:[%s8968_s1 + $0x1ca8] sm:$0xff] }
 0x1d4   :  { %4853 = vmatprep.subr.mxu1 %v976_v33  ;;  %4819 = vmatpush3.msra.mxu0 %v928_v34  ;;  %v1026_v31 = vld [vmem:[%s8968_s1 + $0x1d30] sm:$0xff]  ;;  %v1041_v33 = vld [vmem:[%s8968_s1 + $0x1da8] sm:$0xff] }
 0x1d5   :  { %4854 = vmatpush3.msra.mxu1 %v960_v35  ;;  %4820 = vmatprep.subr.mxu0 %v943_v36  ;;  %v993_v34 = vld [vmem:[%s8968_s1 + $0x1c28] sm:$0xff]  ;;  %v1008_v36 = vld [vmem:[%s8968_s1 + $0x1ca0] sm:$0xff] }
 0x1d6   :  { %4855 = vmatprep.subr.mxu1 %v975_v37  ;;  %4821 = vmatpush3.msra.mxu0 %v927_v38  ;;  %v1025_v35 = vld [vmem:[%s8968_s1 + $0x1d28] sm:$0xff]  ;;  %v1040_v37 = vld [vmem:[%s8968_s1 + $0x1da0] sm:$0xff] }
 0x1d7   :  { %4856 = vmatpush3.msra.mxu1 %v959_v39  ;;  %4822 = vmatprep.subr.mxu0 %v942_v40  ;;  %v992_v38 = vld [vmem:[%s8968_s1 + $0x1c20] sm:$0xff]  ;;  %v1007_v40 = vld [vmem:[%s8968_s1 + $0x1c98] sm:$0xff] }
 0x1d8   :  { %4857 = vmatprep.subr.mxu1 %v974_v41  ;;  %4823 = vmatpush3.msra.mxu0 %v926_v42  ;;  %v1024_v39 = vld [vmem:[%s8968_s1 + $0x1d20] sm:$0xff]  ;;  %v1039_v41 = vld [vmem:[%s8968_s1 + $0x1d98] sm:$0xff] }
 0x1d9   :  { %4858 = vmatpush3.msra.mxu1 %v958_v43  ;;  %4824 = vmatprep.subr.mxu0 %v941_v44  ;;  %v991_v42 = vld [vmem:[%s8968_s1 + $0x1c18] sm:$0xff]  ;;  %v1006_v44 = vld [vmem:[%s8968_s1 + $0x1c90] sm:$0xff] }
 0x1da   :  { %4859 = vmatprep.subr.mxu1 %v973_v45  ;;  %4825 = vmatpush3.msra.mxu0 %v925_v46  ;;  %v1023_v43 = vld [vmem:[%s8968_s1 + $0x1d18] sm:$0xff]  ;;  %v1038_v45 = vld [vmem:[%s8968_s1 + $0x1d90] sm:$0xff] }
 0x1db   :  { %4860 = vmatpush3.msra.mxu1 %v957_v47  ;;  %4826 = vmatprep.subr.mxu0 %v940_v48  ;;  %v990_v46 = vld [vmem:[%s8968_s1 + $0x1c10] sm:$0xff]  ;;  %v1005_v48 = vld [vmem:[%s8968_s1 + $0x1c88] sm:$0xff] }
 0x1dc   :  { %4861 = vmatprep.subr.mxu1 %v972_v49  ;;  %4827 = vmatpush3.msra.mxu0 %v924_v50  ;;  %v1022_v47 = vld [vmem:[%s8968_s1 + $0x1d10] sm:$0xff]  ;;  %v1037_v49 = vld [vmem:[%s8968_s1 + $0x1d88] sm:$0xff] }
 0x1dd   :  { %3135 = vmatprep.mubr.f32.mxu0 %v73_v51  ;;  %4862 = vmatpush3.msra.mxu1 %v956_v52  ;;  %v989_v50 = vld [vmem:[%s8968_s1 + $0x1c08] sm:$0xff]  ;;  %v1004_v52 = vld [vmem:[%s8968_s1 + $0x1c80] sm:$0xff] }
 0x1de   :  { %3136 = vmatmul.mubr.f32.vlgmr.msra.gmra.mxu0 %v72_v53  ;;  %3205 = vmatprep.mubr.f32.mxu1 %v75_v54  ;;  %v1021_v51 = vld [vmem:[%s8968_s1 + $0x1d08] sm:$0xff]  ;;  %v1036_v53 = vld [vmem:[%s8968_s1 + $0x1d80] sm:$0xff] }
 0x1df   :  { %4866 = vmatprep.subr.mxu0 %v1019_v55  ;;  %4901 = vmatprep.subr.mxu1 %v1051_v56  ;;  %v988_v54 = vld [vmem:[%s8968_s1 + $0x1c00] sm:$0xff]  ;;  %v77_v55 = vld [vmem:[%s8969_s0 + $0x1c8] sm:$0xff] }
 0x1e0   :  { %3206 = vmatmul.mubr.f32.vlgmr.msra.gmra.mxu1 %v74_v57  ;;  %4867 = vmatpush3.msra.mxu0 %v1003_v58  ;;  %v1020_v56 = vld [vmem:[%s8968_s1 + $0x1d00] sm:$0xff]  ;;  %v79_v58 = vld [vmem:[%s8969_s0 + $0x1d8] sm:$0xff] }
 0x1e1   :  { %4902 = vmatpush3.msra.mxu1 %v1035_v59  ;;  %4868 = vmatprep.subr.mxu0 %v1018_v60  ;;  %v76_v57 = vld [vmem:[%s8969_s0 + $0x1c0] sm:$0xff]  ;;  %v1083_v59 = vld [vmem:[%s8968_s1 + $0x1ef8] sm:$0xff] }
 0x1e2   :  { %4903 = vmatprep.subr.mxu1 %v1050_v61  ;;  %4869 = vmatpush3.msra.mxu0 %v1002_v62  ;;  %v1115_v60 = vld [vmem:[%s8968_s1 + $0x1ff8] sm:$0xff]  ;;  %v78_v61 = vld [vmem:[%s8969_s0 + $0x1d0] sm:$0xff] }
 0x1e3   :  { %4904 = vmatpush3.msra.mxu1 %v1034_v63  ;;  %4870 = vmatprep.subr.mxu0 %v1017_v0  ;;  %v1067_v62 = vld [vmem:[%s8968_s1 + $0x1e78] sm:$0xff]  ;;  %v1082_v0 = vld [vmem:[%s8968_s1 + $0x1ef0] sm:$0xff] }
 0x1e4   :  { %4905 = vmatprep.subr.mxu1 %v1049_v1  ;;  %4871 = vmatpush3.msra.mxu0 %v1001_v2  ;;  %v1099_v63 = vld [vmem:[%s8968_s1 + $0x1f78] sm:$0xff]  ;;  %v1114_v1 = vld [vmem:[%s8968_s1 + $0x1ff0] sm:$0xff] }
 0x1e5   :  { %4906 = vmatpush3.msra.mxu1 %v1033_v3  ;;  %4872 = vmatprep.subr.mxu0 %v1016_v4  ;;  %v1066_v2 = vld [vmem:[%s8968_s1 + $0x1e70] sm:$0xff]  ;;  %v1081_v4 = vld [vmem:[%s8968_s1 + $0x1ee8] sm:$0xff] }
 0x1e6   :  { %4907 = vmatprep.subr.mxu1 %v1048_v5  ;;  %4873 = vmatpush3.msra.mxu0 %v1000_v6  ;;  %v1098_v3 = vld [vmem:[%s8968_s1 + $0x1f70] sm:$0xff]  ;;  %v1113_v5 = vld [vmem:[%s8968_s1 + $0x1fe8] sm:$0xff] }
 0x1e7   :  { %4908 = vmatpush3.msra.mxu1 %v1032_v7  ;;  %4874 = vmatprep.subr.mxu0 %v1015_v8  ;;  %v1065_v6 = vld [vmem:[%s8968_s1 + $0x1e68] sm:$0xff]  ;;  %v1080_v8 = vld [vmem:[%s8968_s1 + $0x1ee0] sm:$0xff] }
 0x1e8   :  { %4909 = vmatprep.subr.mxu1 %v1047_v9  ;;  %4875 = vmatpush3.msra.mxu0 %v999_v10  ;;  %v1097_v7 = vld [vmem:[%s8968_s1 + $0x1f68] sm:$0xff]  ;;  %v1112_v9 = vld [vmem:[%s8968_s1 + $0x1fe0] sm:$0xff] }
 0x1e9   :  { %4910 = vmatpush3.msra.mxu1 %v1031_v11  ;;  %4876 = vmatprep.subr.mxu0 %v1014_v12  ;;  %v1064_v10 = vld [vmem:[%s8968_s1 + $0x1e60] sm:$0xff]  ;;  %v1079_v12 = vld [vmem:[%s8968_s1 + $0x1ed8] sm:$0xff] }
 0x1ea   :  { %4911 = vmatprep.subr.mxu1 %v1046_v13  ;;  %4877 = vmatpush3.msra.mxu0 %v998_v14  ;;  %v1096_v11 = vld [vmem:[%s8968_s1 + $0x1f60] sm:$0xff]  ;;  %v1111_v13 = vld [vmem:[%s8968_s1 + $0x1fd8] sm:$0xff] }
 0x1eb   :  { %4912 = vmatpush3.msra.mxu1 %v1030_v15  ;;  %4878 = vmatprep.subr.mxu0 %v1013_v16  ;;  %v1063_v14 = vld [vmem:[%s8968_s1 + $0x1e58] sm:$0xff]  ;;  %v1078_v16 = vld [vmem:[%s8968_s1 + $0x1ed0] sm:$0xff] }
 0x1ec   :  { %4913 = vmatprep.subr.mxu1 %v1045_v17  ;;  %4879 = vmatpush3.msra.mxu0 %v997_v18  ;;  %v1095_v15 = vld [vmem:[%s8968_s1 + $0x1f58] sm:$0xff]  ;;  %v1110_v17 = vld [vmem:[%s8968_s1 + $0x1fd0] sm:$0xff] }
 0x1ed   :  { %4914 = vmatpush3.msra.mxu1 %v1029_v19  ;;  %4880 = vmatprep.subr.mxu0 %v1012_v20  ;;  %v1062_v18 = vld [vmem:[%s8968_s1 + $0x1e50] sm:$0xff]  ;;  %v1077_v20 = vld [vmem:[%s8968_s1 + $0x1ec8] sm:$0xff] }
 0x1ee   :  { %4915 = vmatprep.subr.mxu1 %v1044_v21  ;;  %4881 = vmatpush3.msra.mxu0 %v996_v22  ;;  %v1094_v19 = vld [vmem:[%s8968_s1 + $0x1f50] sm:$0xff]  ;;  %v1109_v21 = vld [vmem:[%s8968_s1 + $0x1fc8] sm:$0xff] }
 0x1ef   :  { %4916 = vmatpush3.msra.mxu1 %v1028_v23  ;;  %4882 = vmatprep.subr.mxu0 %v1011_v24  ;;  %v1061_v22 = vld [vmem:[%s8968_s1 + $0x1e48] sm:$0xff]  ;;  %v1076_v24 = vld [vmem:[%s8968_s1 + $0x1ec0] sm:$0xff] }
 0x1f0   :  { %4917 = vmatprep.subr.mxu1 %v1043_v25  ;;  %4883 = vmatpush3.msra.mxu0 %v995_v26  ;;  %v1093_v23 = vld [vmem:[%s8968_s1 + $0x1f48] sm:$0xff]  ;;  %v1108_v25 = vld [vmem:[%s8968_s1 + $0x1fc0] sm:$0xff] }
 0x1f1   :  { %4918 = vmatpush3.msra.mxu1 %v1027_v27  ;;  %4884 = vmatprep.subr.mxu0 %v1010_v28  ;;  %v1060_v26 = vld [vmem:[%s8968_s1 + $0x1e40] sm:$0xff]  ;;  %v1075_v28 = vld [vmem:[%s8968_s1 + $0x1eb8] sm:$0xff] }
 0x1f2   :  { %4919 = vmatprep.subr.mxu1 %v1042_v29  ;;  %4885 = vmatpush3.msra.mxu0 %v994_v30  ;;  %v1092_v27 = vld [vmem:[%s8968_s1 + $0x1f40] sm:$0xff]  ;;  %v1107_v29 = vld [vmem:[%s8968_s1 + $0x1fb8] sm:$0xff] }
 0x1f3   :  { %4920 = vmatpush3.msra.mxu1 %v1026_v31  ;;  %4886 = vmatprep.subr.mxu0 %v1009_v32  ;;  %v1059_v30 = vld [vmem:[%s8968_s1 + $0x1e38] sm:$0xff]  ;;  %v1074_v32 = vld [vmem:[%s8968_s1 + $0x1eb0] sm:$0xff] }
 0x1f4   :  { %4921 = vmatprep.subr.mxu1 %v1041_v33  ;;  %4887 = vmatpush3.msra.mxu0 %v993_v34  ;;  %v1091_v31 = vld [vmem:[%s8968_s1 + $0x1f38] sm:$0xff]  ;;  %v1106_v33 = vld [vmem:[%s8968_s1 + $0x1fb0] sm:$0xff] }
 0x1f5   :  { %4922 = vmatpush3.msra.mxu1 %v1025_v35  ;;  %4888 = vmatprep.subr.mxu0 %v1008_v36  ;;  %v1058_v34 = vld [vmem:[%s8968_s1 + $0x1e30] sm:$0xff]  ;;  %v1073_v36 = vld [vmem:[%s8968_s1 + $0x1ea8] sm:$0xff] }
 0x1f6   :  { %4923 = vmatprep.subr.mxu1 %v1040_v37  ;;  %4889 = vmatpush3.msra.mxu0 %v992_v38  ;;  %v1090_v35 = vld [vmem:[%s8968_s1 + $0x1f30] sm:$0xff]  ;;  %v1105_v37 = vld [vmem:[%s8968_s1 + $0x1fa8] sm:$0xff] }
 0x1f7   :  { %4924 = vmatpush3.msra.mxu1 %v1024_v39  ;;  %4890 = vmatprep.subr.mxu0 %v1007_v40  ;;  %v1057_v38 = vld [vmem:[%s8968_s1 + $0x1e28] sm:$0xff]  ;;  %v1072_v40 = vld [vmem:[%s8968_s1 + $0x1ea0] sm:$0xff] }
 0x1f8   :  { %4925 = vmatprep.subr.mxu1 %v1039_v41  ;;  %4891 = vmatpush3.msra.mxu0 %v991_v42  ;;  %v1089_v39 = vld [vmem:[%s8968_s1 + $0x1f28] sm:$0xff]  ;;  %v1104_v41 = vld [vmem:[%s8968_s1 + $0x1fa0] sm:$0xff] }
 0x1f9   :  { %4926 = vmatpush3.msra.mxu1 %v1023_v43  ;;  %4892 = vmatprep.subr.mxu0 %v1006_v44  ;;  %v1056_v42 = vld [vmem:[%s8968_s1 + $0x1e20] sm:$0xff]  ;;  %v1071_v44 = vld [vmem:[%s8968_s1 + $0x1e98] sm:$0xff] }
 0x1fa   :  { %4927 = vmatprep.subr.mxu1 %v1038_v45  ;;  %4893 = vmatpush3.msra.mxu0 %v990_v46  ;;  %v1088_v43 = vld [vmem:[%s8968_s1 + $0x1f20] sm:$0xff]  ;;  %v1103_v45 = vld [vmem:[%s8968_s1 + $0x1f98] sm:$0xff] }
 0x1fb   :  { %4928 = vmatpush3.msra.mxu1 %v1022_v47  ;;  %4894 = vmatprep.subr.mxu0 %v1005_v48  ;;  %v1055_v46 = vld [vmem:[%s8968_s1 + $0x1e18] sm:$0xff]  ;;  %v1070_v48 = vld [vmem:[%s8968_s1 + $0x1e90] sm:$0xff] }
 0x1fc   :  { %4929 = vmatprep.subr.mxu1 %v1037_v49  ;;  %4895 = vmatpush3.msra.mxu0 %v989_v50  ;;  %v1087_v47 = vld [vmem:[%s8968_s1 + $0x1f18] sm:$0xff]  ;;  %v1102_v49 = vld [vmem:[%s8968_s1 + $0x1f90] sm:$0xff] }
 0x1fd   :  { %4930 = vmatpush3.msra.mxu1 %v1021_v51  ;;  %4896 = vmatprep.subr.mxu0 %v1004_v52  ;;  %v1054_v50 = vld [vmem:[%s8968_s1 + $0x1e10] sm:$0xff]  ;;  %v1069_v52 = vld [vmem:[%s8968_s1 + $0x1e88] sm:$0xff] }
 0x1fe   :  { %4931 = vmatprep.subr.mxu1 %v1036_v53  ;;  %4897 = vmatpush3.msra.mxu0 %v988_v54  ;;  %v1086_v51 = vld [vmem:[%s8968_s1 + $0x1f10] sm:$0xff]  ;;  %v1101_v53 = vld [vmem:[%s8968_s1 + $0x1f88] sm:$0xff] }
 0x1ff   :  { %3275 = vmatprep.mubr.f32.mxu0 %v77_v55  ;;  %4932 = vmatpush3.msra.mxu1 %v1020_v56  ;;  %v1053_v54 = vld [vmem:[%s8968_s1 + $0x1e08] sm:$0xff]  ;;  %v1068_v56 = vld [vmem:[%s8968_s1 + $0x1e80] sm:$0xff] }
 0x200   :  { %3276 = vmatmul.mubr.f32.vlgmr.msra.gmra.mxu0 %v76_v57  ;;  %3345 = vmatprep.mubr.f32.mxu1 %v79_v58  ;;  %v1085_v55 = vld [vmem:[%s8968_s1 + $0x1f08] sm:$0xff]  ;;  %v1100_v57 = vld [vmem:[%s8968_s1 + $0x1f80] sm:$0xff] }
 0x201   :  { %4936 = vmatprep.subr.mxu0 %v1083_v59  ;;  %4971 = vmatprep.subr.mxu1 %v1115_v60  ;;  %v1052_v58 = vld [vmem:[%s8968_s1 + $0x1e00] sm:$0xff]  ;;  %v81_v59 = vld [vmem:[%s8969_s0 + $0x1e8] sm:$0xff] }
 0x202   :  { %3346 = vmatmul.mubr.f32.vlgmr.msra.gmra.mxu1 %v78_v61  ;;  %4937 = vmatpush3.msra.mxu0 %v1067_v62  ;;  %v1084_v60 = vld [vmem:[%s8968_s1 + $0x1f00] sm:$0xff]  ;;  %v83_v62 = vld [vmem:[%s8969_s0 + $0x1f8] sm:$0xff] }
 0x203   :  { %4972 = vmatpush3.msra.mxu1 %v1099_v63  ;;  %4938 = vmatprep.subr.mxu0 %v1082_v0  ;;  %v80_v61 = vld [vmem:[%s8969_s0 + $0x1e0] sm:$0xff]  ;;  %v1147_v63 = vld [vmem:[%s8968_s1 + $0x20f8] sm:$0xff] }
 0x204   :  { %4973 = vmatprep.subr.mxu1 %v1114_v1  ;;  %4939 = vmatpush3.msra.mxu0 %v1066_v2  ;;  %v1179_v0 = vld [vmem:[%s8968_s1 + $0x21f8] sm:$0xff]  ;;  %v82_v1 = vld [vmem:[%s8969_s0 + $0x1f0] sm:$0xff] }
 0x205   :  { %4974 = vmatpush3.msra.mxu1 %v1098_v3  ;;  %4940 = vmatprep.subr.mxu0 %v1081_v4  ;;  %v1131_v2 = vld [vmem:[%s8968_s1 + $0x2078] sm:$0xff]  ;;  %v1146_v4 = vld [vmem:[%s8968_s1 + $0x20f0] sm:$0xff] }
 0x206   :  { %4975 = vmatprep.subr.mxu1 %v1113_v5  ;;  %4941 = vmatpush3.msra.mxu0 %v1065_v6  ;;  %v1163_v3 = vld [vmem:[%s8968_s1 + $0x2178] sm:$0xff]  ;;  %v1178_v5 = vld [vmem:[%s8968_s1 + $0x21f0] sm:$0xff] }
 0x207   :  { %4976 = vmatpush3.msra.mxu1 %v1097_v7  ;;  %4942 = vmatprep.subr.mxu0 %v1080_v8  ;;  %v1130_v6 = vld [vmem:[%s8968_s1 + $0x2070] sm:$0xff]  ;;  %v1145_v8 = vld [vmem:[%s8968_s1 + $0x20e8] sm:$0xff] }
 0x208   :  { %4977 = vmatprep.subr.mxu1 %v1112_v9  ;;  %4943 = vmatpush3.msra.mxu0 %v1064_v10  ;;  %v1162_v7 = vld [vmem:[%s8968_s1 + $0x2170] sm:$0xff]  ;;  %v1177_v9 = vld [vmem:[%s8968_s1 + $0x21e8] sm:$0xff] }
 0x209   :  { %4978 = vmatpush3.msra.mxu1 %v1096_v11  ;;  %4944 = vmatprep.subr.mxu0 %v1079_v12  ;;  %v1129_v10 = vld [vmem:[%s8968_s1 + $0x2068] sm:$0xff]  ;;  %v1144_v12 = vld [vmem:[%s8968_s1 + $0x20e0] sm:$0xff] }
 0x20a   :  { %4979 = vmatprep.subr.mxu1 %v1111_v13  ;;  %4945 = vmatpush3.msra.mxu0 %v1063_v14  ;;  %v1161_v11 = vld [vmem:[%s8968_s1 + $0x2168] sm:$0xff]  ;;  %v1176_v13 = vld [vmem:[%s8968_s1 + $0x21e0] sm:$0xff] }
 0x20b   :  { %4980 = vmatpush3.msra.mxu1 %v1095_v15  ;;  %4946 = vmatprep.subr.mxu0 %v1078_v16  ;;  %v1128_v14 = vld [vmem:[%s8968_s1 + $0x2060] sm:$0xff]  ;;  %v1143_v16 = vld [vmem:[%s8968_s1 + $0x20d8] sm:$0xff] }
 0x20c   :  { %4981 = vmatprep.subr.mxu1 %v1110_v17  ;;  %4947 = vmatpush3.msra.mxu0 %v1062_v18  ;;  %v1160_v15 = vld [vmem:[%s8968_s1 + $0x2160] sm:$0xff]  ;;  %v1175_v17 = vld [vmem:[%s8968_s1 + $0x21d8] sm:$0xff] }
 0x20d   :  { %4982 = vmatpush3.msra.mxu1 %v1094_v19  ;;  %4948 = vmatprep.subr.mxu0 %v1077_v20  ;;  %v1127_v18 = vld [vmem:[%s8968_s1 + $0x2058] sm:$0xff]  ;;  %v1142_v20 = vld [vmem:[%s8968_s1 + $0x20d0] sm:$0xff] }
 0x20e   :  { %4983 = vmatprep.subr.mxu1 %v1109_v21  ;;  %4949 = vmatpush3.msra.mxu0 %v1061_v22  ;;  %v1159_v19 = vld [vmem:[%s8968_s1 + $0x2158] sm:$0xff]  ;;  %v1174_v21 = vld [vmem:[%s8968_s1 + $0x21d0] sm:$0xff] }
 0x20f   :  { %4984 = vmatpush3.msra.mxu1 %v1093_v23  ;;  %4950 = vmatprep.subr.mxu0 %v1076_v24  ;;  %v1126_v22 = vld [vmem:[%s8968_s1 + $0x2050] sm:$0xff]  ;;  %v1141_v24 = vld [vmem:[%s8968_s1 + $0x20c8] sm:$0xff] }
 0x210   :  { %4985 = vmatprep.subr.mxu1 %v1108_v25  ;;  %4951 = vmatpush3.msra.mxu0 %v1060_v26  ;;  %v1158_v23 = vld [vmem:[%s8968_s1 + $0x2150] sm:$0xff]  ;;  %v1173_v25 = vld [vmem:[%s8968_s1 + $0x21c8] sm:$0xff] }
 0x211   :  { %4986 = vmatpush3.msra.mxu1 %v1092_v27  ;;  %4952 = vmatprep.subr.mxu0 %v1075_v28  ;;  %v1125_v26 = vld [vmem:[%s8968_s1 + $0x2048] sm:$0xff]  ;;  %v1140_v28 = vld [vmem:[%s8968_s1 + $0x20c0] sm:$0xff] }
 0x212   :  { %4987 = vmatprep.subr.mxu1 %v1107_v29  ;;  %4953 = vmatpush3.msra.mxu0 %v1059_v30  ;;  %v1157_v27 = vld [vmem:[%s8968_s1 + $0x2148] sm:$0xff]  ;;  %v1172_v29 = vld [vmem:[%s8968_s1 + $0x21c0] sm:$0xff] }
 0x213   :  { %4988 = vmatpush3.msra.mxu1 %v1091_v31  ;;  %4954 = vmatprep.subr.mxu0 %v1074_v32  ;;  %v1124_v30 = vld [vmem:[%s8968_s1 + $0x2040] sm:$0xff]  ;;  %v1139_v32 = vld [vmem:[%s8968_s1 + $0x20b8] sm:$0xff] }
 0x214   :  { %4989 = vmatprep.subr.mxu1 %v1106_v33  ;;  %4955 = vmatpush3.msra.mxu0 %v1058_v34  ;;  %v1156_v31 = vld [vmem:[%s8968_s1 + $0x2140] sm:$0xff]  ;;  %v1171_v33 = vld [vmem:[%s8968_s1 + $0x21b8] sm:$0xff] }
 0x215   :  { %4990 = vmatpush3.msra.mxu1 %v1090_v35  ;;  %4956 = vmatprep.subr.mxu0 %v1073_v36  ;;  %v1123_v34 = vld [vmem:[%s8968_s1 + $0x2038] sm:$0xff]  ;;  %v1138_v36 = vld [vmem:[%s8968_s1 + $0x20b0] sm:$0xff] }
 0x216   :  { %4991 = vmatprep.subr.mxu1 %v1105_v37  ;;  %4957 = vmatpush3.msra.mxu0 %v1057_v38  ;;  %v1155_v35 = vld [vmem:[%s8968_s1 + $0x2138] sm:$0xff]  ;;  %v1170_v37 = vld [vmem:[%s8968_s1 + $0x21b0] sm:$0xff] }
 0x217   :  { %4992 = vmatpush3.msra.mxu1 %v1089_v39  ;;  %4958 = vmatprep.subr.mxu0 %v1072_v40  ;;  %v1122_v38 = vld [vmem:[%s8968_s1 + $0x2030] sm:$0xff]  ;;  %v1137_v40 = vld [vmem:[%s8968_s1 + $0x20a8] sm:$0xff] }
 0x218   :  { %4993 = vmatprep.subr.mxu1 %v1104_v41  ;;  %4959 = vmatpush3.msra.mxu0 %v1056_v42  ;;  %v1154_v39 = vld [vmem:[%s8968_s1 + $0x2130] sm:$0xff]  ;;  %v1169_v41 = vld [vmem:[%s8968_s1 + $0x21a8] sm:$0xff] }
 0x219   :  { %4994 = vmatpush3.msra.mxu1 %v1088_v43  ;;  %4960 = vmatprep.subr.mxu0 %v1071_v44  ;;  %v1121_v42 = vld [vmem:[%s8968_s1 + $0x2028] sm:$0xff]  ;;  %v1136_v44 = vld [vmem:[%s8968_s1 + $0x20a0] sm:$0xff] }
 0x21a   :  { %4995 = vmatprep.subr.mxu1 %v1103_v45  ;;  %4961 = vmatpush3.msra.mxu0 %v1055_v46  ;;  %v1153_v43 = vld [vmem:[%s8968_s1 + $0x2128] sm:$0xff]  ;;  %v1168_v45 = vld [vmem:[%s8968_s1 + $0x21a0] sm:$0xff] }
 0x21b   :  { %4996 = vmatpush3.msra.mxu1 %v1087_v47  ;;  %4962 = vmatprep.subr.mxu0 %v1070_v48  ;;  %v1120_v46 = vld [vmem:[%s8968_s1 + $0x2020] sm:$0xff]  ;;  %v1135_v48 = vld [vmem:[%s8968_s1 + $0x2098] sm:$0xff] }
 0x21c   :  { %4997 = vmatprep.subr.mxu1 %v1102_v49  ;;  %4963 = vmatpush3.msra.mxu0 %v1054_v50  ;;  %v1152_v47 = vld [vmem:[%s8968_s1 + $0x2120] sm:$0xff]  ;;  %v1167_v49 = vld [vmem:[%s8968_s1 + $0x2198] sm:$0xff] }
 0x21d   :  { %4998 = vmatpush3.msra.mxu1 %v1086_v51  ;;  %4964 = vmatprep.subr.mxu0 %v1069_v52  ;;  %v1119_v50 = vld [vmem:[%s8968_s1 + $0x2018] sm:$0xff]  ;;  %v1134_v52 = vld [vmem:[%s8968_s1 + $0x2090] sm:$0xff] }
 0x21e   :  { %4999 = vmatprep.subr.mxu1 %v1101_v53  ;;  %4965 = vmatpush3.msra.mxu0 %v1053_v54  ;;  %v1151_v51 = vld [vmem:[%s8968_s1 + $0x2118] sm:$0xff]  ;;  %v1166_v53 = vld [vmem:[%s8968_s1 + $0x2190] sm:$0xff] }
 0x21f   :  { %5000 = vmatpush3.msra.mxu1 %v1085_v55  ;;  %4966 = vmatprep.subr.mxu0 %v1068_v56  ;;  %v1118_v54 = vld [vmem:[%s8968_s1 + $0x2010] sm:$0xff]  ;;  %v1133_v56 = vld [vmem:[%s8968_s1 + $0x2088] sm:$0xff] }
 0x220   :  { %5001 = vmatprep.subr.mxu1 %v1100_v57  ;;  %4967 = vmatpush3.msra.mxu0 %v1052_v58  ;;  %v1150_v55 = vld [vmem:[%s8968_s1 + $0x2110] sm:$0xff]  ;;  %v1165_v57 = vld [vmem:[%s8968_s1 + $0x2188] sm:$0xff] }
 0x221   :  { %3415 = vmatprep.mubr.f32.mxu0 %v81_v59  ;;  %5002 = vmatpush3.msra.mxu1 %v1084_v60  ;;  %v1117_v58 = vld [vmem:[%s8968_s1 + $0x2008] sm:$0xff]  ;;  %v1132_v60 = vld [vmem:[%s8968_s1 + $0x2080] sm:$0xff] }
 0x222   :  { %3416 = vmatmul.mubr.f32.vlgmr.msra.gmra.mxu0 %v80_v61  ;;  %3485 = vmatprep.mubr.f32.mxu1 %v83_v62  ;;  %v1149_v59 = vld [vmem:[%s8968_s1 + $0x2108] sm:$0xff]  ;;  %v1164_v61 = vld [vmem:[%s8968_s1 + $0x2180] sm:$0xff] }
 0x223   :  { %5006 = vmatprep.subr.mxu0 %v1147_v63  ;;  %5041 = vmatprep.subr.mxu1 %v1179_v0  ;;  %v1116_v62 = vld [vmem:[%s8968_s1 + $0x2000] sm:$0xff]  ;;  %v85_v63 = vld [vmem:[%s8969_s0 + $0x208] sm:$0xff] }
 0x224   :  { %3486 = vmatmul.mubr.f32.vlgmr.msra.gmra.mxu1 %v82_v1  ;;  %5007 = vmatpush3.msra.mxu0 %v1131_v2  ;;  %v1148_v0 = vld [vmem:[%s8968_s1 + $0x2100] sm:$0xff]  ;;  %v87_v2 = vld [vmem:[%s8969_s0 + $0x218] sm:$0xff] }
 0x225   :  { %5042 = vmatpush3.msra.mxu1 %v1163_v3  ;;  %5008 = vmatprep.subr.mxu0 %v1146_v4  ;;  %v84_v1 = vld [vmem:[%s8969_s0 + $0x200] sm:$0xff]  ;;  %v1211_v3 = vld [vmem:[%s8968_s1 + $0x22f8] sm:$0xff] }
 0x226   :  { %5043 = vmatprep.subr.mxu1 %v1178_v5  ;;  %5009 = vmatpush3.msra.mxu0 %v1130_v6  ;;  %v1243_v4 = vld [vmem:[%s8968_s1 + $0x23f8] sm:$0xff]  ;;  %v86_v5 = vld [vmem:[%s8969_s0 + $0x210] sm:$0xff] }
 0x227   :  { %5044 = vmatpush3.msra.mxu1 %v1162_v7  ;;  %5010 = vmatprep.subr.mxu0 %v1145_v8  ;;  %v1195_v6 = vld [vmem:[%s8968_s1 + $0x2278] sm:$0xff]  ;;  %v1210_v8 = vld [vmem:[%s8968_s1 + $0x22f0] sm:$0xff] }
 0x228   :  { %5045 = vmatprep.subr.mxu1 %v1177_v9  ;;  %5011 = vmatpush3.msra.mxu0 %v1129_v10  ;;  %v1227_v7 = vld [vmem:[%s8968_s1 + $0x2378] sm:$0xff]  ;;  %v1242_v9 = vld [vmem:[%s8968_s1 + $0x23f0] sm:$0xff] }
 0x229   :  { %5046 = vmatpush3.msra.mxu1 %v1161_v11  ;;  %5012 = vmatprep.subr.mxu0 %v1144_v12  ;;  %v1194_v10 = vld [vmem:[%s8968_s1 + $0x2270] sm:$0xff]  ;;  %v1209_v12 = vld [vmem:[%s8968_s1 + $0x22e8] sm:$0xff] }
 0x22a   :  { %5047 = vmatprep.subr.mxu1 %v1176_v13  ;;  %5013 = vmatpush3.msra.mxu0 %v1128_v14  ;;  %v1226_v11 = vld [vmem:[%s8968_s1 + $0x2370] sm:$0xff]  ;;  %v1241_v13 = vld [vmem:[%s8968_s1 + $0x23e8] sm:$0xff] }
 0x22b   :  { %5048 = vmatpush3.msra.mxu1 %v1160_v15  ;;  %5014 = vmatprep.subr.mxu0 %v1143_v16  ;;  %v1193_v14 = vld [vmem:[%s8968_s1 + $0x2268] sm:$0xff]  ;;  %v1208_v16 = vld [vmem:[%s8968_s1 + $0x22e0] sm:$0xff] }
 0x22c   :  { %5049 = vmatprep.subr.mxu1 %v1175_v17  ;;  %5015 = vmatpush3.msra.mxu0 %v1127_v18  ;;  %v1225_v15 = vld [vmem:[%s8968_s1 + $0x2368] sm:$0xff]  ;;  %v1240_v17 = vld [vmem:[%s8968_s1 + $0x23e0] sm:$0xff] }
 0x22d   :  { %5050 = vmatpush3.msra.mxu1 %v1159_v19  ;;  %5016 = vmatprep.subr.mxu0 %v1142_v20  ;;  %v1192_v18 = vld [vmem:[%s8968_s1 + $0x2260] sm:$0xff]  ;;  %v1207_v20 = vld [vmem:[%s8968_s1 + $0x22d8] sm:$0xff] }
 0x22e   :  { %5051 = vmatprep.subr.mxu1 %v1174_v21  ;;  %5017 = vmatpush3.msra.mxu0 %v1126_v22  ;;  %v1224_v19 = vld [vmem:[%s8968_s1 + $0x2360] sm:$0xff]  ;;  %v1239_v21 = vld [vmem:[%s8968_s1 + $0x23d8] sm:$0xff] }
 0x22f   :  { %5052 = vmatpush3.msra.mxu1 %v1158_v23  ;;  %5018 = vmatprep.subr.mxu0 %v1141_v24  ;;  %v1191_v22 = vld [vmem:[%s8968_s1 + $0x2258] sm:$0xff]  ;;  %v1206_v24 = vld [vmem:[%s8968_s1 + $0x22d0] sm:$0xff] }
 0x230   :  { %5053 = vmatprep.subr.mxu1 %v1173_v25  ;;  %5019 = vmatpush3.msra.mxu0 %v1125_v26  ;;  %v1223_v23 = vld [vmem:[%s8968_s1 + $0x2358] sm:$0xff]  ;;  %v1238_v25 = vld [vmem:[%s8968_s1 + $0x23d0] sm:$0xff] }
 0x231   :  { %5054 = vmatpush3.msra.mxu1 %v1157_v27  ;;  %5020 = vmatprep.subr.mxu0 %v1140_v28  ;;  %v1190_v26 = vld [vmem:[%s8968_s1 + $0x2250] sm:$0xff]  ;;  %v1205_v28 = vld [vmem:[%s8968_s1 + $0x22c8] sm:$0xff] }
 0x232   :  { %5055 = vmatprep.subr.mxu1 %v1172_v29  ;;  %5021 = vmatpush3.msra.mxu0 %v1124_v30  ;;  %v1222_v27 = vld [vmem:[%s8968_s1 + $0x2350] sm:$0xff]  ;;  %v1237_v29 = vld [vmem:[%s8968_s1 + $0x23c8] sm:$0xff] }
 0x233   :  { %5056 = vmatpush3.msra.mxu1 %v1156_v31  ;;  %5022 = vmatprep.subr.mxu0 %v1139_v32  ;;  %v1189_v30 = vld [vmem:[%s8968_s1 + $0x2248] sm:$0xff]  ;;  %v1204_v32 = vld [vmem:[%s8968_s1 + $0x22c0] sm:$0xff] }
 0x234   :  { %5057 = vmatprep.subr.mxu1 %v1171_v33  ;;  %5023 = vmatpush3.msra.mxu0 %v1123_v34  ;;  %v1221_v31 = vld [vmem:[%s8968_s1 + $0x2348] sm:$0xff]  ;;  %v1236_v33 = vld [vmem:[%s8968_s1 + $0x23c0] sm:$0xff] }
 0x235   :  { %5058 = vmatpush3.msra.mxu1 %v1155_v35  ;;  %5024 = vmatprep.subr.mxu0 %v1138_v36  ;;  %v1188_v34 = vld [vmem:[%s8968_s1 + $0x2240] sm:$0xff]  ;;  %v1203_v36 = vld [vmem:[%s8968_s1 + $0x22b8] sm:$0xff] }
 0x236   :  { %5059 = vmatprep.subr.mxu1 %v1170_v37  ;;  %5025 = vmatpush3.msra.mxu0 %v1122_v38  ;;  %v1220_v35 = vld [vmem:[%s8968_s1 + $0x2340] sm:$0xff]  ;;  %v1235_v37 = vld [vmem:[%s8968_s1 + $0x23b8] sm:$0xff] }
 0x237   :  { %5060 = vmatpush3.msra.mxu1 %v1154_v39  ;;  %5026 = vmatprep.subr.mxu0 %v1137_v40  ;;  %v1187_v38 = vld [vmem:[%s8968_s1 + $0x2238] sm:$0xff]  ;;  %v1202_v40 = vld [vmem:[%s8968_s1 + $0x22b0] sm:$0xff] }
 0x238   :  { %5061 = vmatprep.subr.mxu1 %v1169_v41  ;;  %5027 = vmatpush3.msra.mxu0 %v1121_v42  ;;  %v1219_v39 = vld [vmem:[%s8968_s1 + $0x2338] sm:$0xff]  ;;  %v1234_v41 = vld [vmem:[%s8968_s1 + $0x23b0] sm:$0xff] }
 0x239   :  { %5062 = vmatpush3.msra.mxu1 %v1153_v43  ;;  %5028 = vmatprep.subr.mxu0 %v1136_v44  ;;  %v1186_v42 = vld [vmem:[%s8968_s1 + $0x2230] sm:$0xff]  ;;  %v1201_v44 = vld [vmem:[%s8968_s1 + $0x22a8] sm:$0xff] }
 0x23a   :  { %5063 = vmatprep.subr.mxu1 %v1168_v45  ;;  %5029 = vmatpush3.msra.mxu0 %v1120_v46  ;;  %v1218_v43 = vld [vmem:[%s8968_s1 + $0x2330] sm:$0xff]  ;;  %v1233_v45 = vld [vmem:[%s8968_s1 + $0x23a8] sm:$0xff] }
 0x23b   :  { %5064 = vmatpush3.msra.mxu1 %v1152_v47  ;;  %5030 = vmatprep.subr.mxu0 %v1135_v48  ;;  %v1185_v46 = vld [vmem:[%s8968_s1 + $0x2228] sm:$0xff]  ;;  %v1200_v48 = vld [vmem:[%s8968_s1 + $0x22a0] sm:$0xff] }
 0x23c   :  { %5065 = vmatprep.subr.mxu1 %v1167_v49  ;;  %5031 = vmatpush3.msra.mxu0 %v1119_v50  ;;  %v1217_v47 = vld [vmem:[%s8968_s1 + $0x2328] sm:$0xff]  ;;  %v1232_v49 = vld [vmem:[%s8968_s1 + $0x23a0] sm:$0xff] }
 0x23d   :  { %5066 = vmatpush3.msra.mxu1 %v1151_v51  ;;  %5032 = vmatprep.subr.mxu0 %v1134_v52  ;;  %v1184_v50 = vld [vmem:[%s8968_s1 + $0x2220] sm:$0xff]  ;;  %v1199_v52 = vld [vmem:[%s8968_s1 + $0x2298] sm:$0xff] }
 0x23e   :  { %5067 = vmatprep.subr.mxu1 %v1166_v53  ;;  %5033 = vmatpush3.msra.mxu0 %v1118_v54  ;;  %v1216_v51 = vld [vmem:[%s8968_s1 + $0x2320] sm:$0xff]  ;;  %v1231_v53 = vld [vmem:[%s8968_s1 + $0x2398] sm:$0xff] }
 0x23f   :  { %5068 = vmatpush3.msra.mxu1 %v1150_v55  ;;  %5034 = vmatprep.subr.mxu0 %v1133_v56  ;;  %v1183_v54 = vld [vmem:[%s8968_s1 + $0x2218] sm:$0xff]  ;;  %v1198_v56 = vld [vmem:[%s8968_s1 + $0x2290] sm:$0xff] }
 0x240   :  { %5069 = vmatprep.subr.mxu1 %v1165_v57  ;;  %5035 = vmatpush3.msra.mxu0 %v1117_v58  ;;  %v1215_v55 = vld [vmem:[%s8968_s1 + $0x2318] sm:$0xff]  ;;  %v1230_v57 = vld [vmem:[%s8968_s1 + $0x2390] sm:$0xff] }
 0x241   :  { %5070 = vmatpush3.msra.mxu1 %v1149_v59  ;;  %5036 = vmatprep.subr.mxu0 %v1132_v60  ;;  %v1182_v58 = vld [vmem:[%s8968_s1 + $0x2210] sm:$0xff]  ;;  %v1197_v60 = vld [vmem:[%s8968_s1 + $0x2288] sm:$0xff] }
 0x242   :  { %5071 = vmatprep.subr.mxu1 %v1164_v61  ;;  %5037 = vmatpush3.msra.mxu0 %v1116_v62  ;;  %v1214_v59 = vld [vmem:[%s8968_s1 + $0x2310] sm:$0xff]  ;;  %v1229_v61 = vld [vmem:[%s8968_s1 + $0x2388] sm:$0xff] }
 0x243   :  { %3555 = vmatprep.mubr.f32.mxu0 %v85_v63  ;;  %5072 = vmatpush3.msra.mxu1 %v1148_v0  ;;  %v1181_v62 = vld [vmem:[%s8968_s1 + $0x2208] sm:$0xff]  ;;  %v1196_v0 = vld [vmem:[%s8968_s1 + $0x2280] sm:$0xff] }
 0x244   :  { %3556 = vmatmul.mubr.f32.vlgmr.msra.gmra.mxu0 %v84_v1  ;;  %3625 = vmatprep.mubr.f32.mxu1 %v87_v2  ;;  %v1213_v63 = vld [vmem:[%s8968_s1 + $0x2308] sm:$0xff]  ;;  %v1228_v1 = vld [vmem:[%s8968_s1 + $0x2380] sm:$0xff] }
 0x245   :  { %5076 = vmatprep.subr.mxu0 %v1211_v3  ;;  %5111 = vmatprep.subr.mxu1 %v1243_v4  ;;  %v1180_v2 = vld [vmem:[%s8968_s1 + $0x2200] sm:$0xff]  ;;  %v89_v3 = vld [vmem:[%s8969_s0 + $0x228] sm:$0xff] }
 0x246   :  { %3626 = vmatmul.mubr.f32.vlgmr.msra.gmra.mxu1 %v86_v5  ;;  %5077 = vmatpush3.msra.mxu0 %v1195_v6  ;;  %v1212_v4 = vld [vmem:[%s8968_s1 + $0x2300] sm:$0xff]  ;;  %v91_v5 = vld [vmem:[%s8969_s0 + $0x238] sm:$0xff] }
 0x247   :  { %5112 = vmatpush3.msra.mxu1 %v1227_v7  ;;  %5078 = vmatprep.subr.mxu0 %v1210_v8  ;;  %v88_v6 = vld [vmem:[%s8969_s0 + $0x220] sm:$0xff]  ;;  %v90_v7 = vld [vmem:[%s8969_s0 + $0x230] sm:$0xff]  ;;  %v5204_v8 = vmov 0.0  }
 0x248   :  { %5113 = vmatprep.subr.mxu1 %v1242_v9  ;;  %5079 = vmatpush3.msra.mxu0 %v1194_v10  ;;  %v3787_v9 = vld [vmem:[%s8970_s3 + $0x78] sm:$0xff]  ;;  %v3786_v10 = vld [vmem:[%s8970_s3 + $0x70] sm:$0xff] }
 0x249   :  { %5114 = vmatpush3.msra.mxu1 %v1226_v11  ;;  %5080 = vmatprep.subr.mxu0 %v1209_v12  ;;  %v3785_v11 = vld [vmem:[%s8970_s3 + $0x68] sm:$0xff]  ;;  %v3784_v12 = vld [vmem:[%s8970_s3 + $0x60] sm:$0xff] }
 0x24a   :  { %5115 = vmatprep.subr.mxu1 %v1241_v13  ;;  %5081 = vmatpush3.msra.mxu0 %v1193_v14  ;;  %v3783_v13 = vld [vmem:[%s8970_s3 + $0x58] sm:$0xff]  ;;  %v3782_v14 = vld [vmem:[%s8970_s3 + $0x50] sm:$0xff] }
 0x24b   :  { %5116 = vmatpush3.msra.mxu1 %v1225_v15  ;;  %5082 = vmatprep.subr.mxu0 %v1208_v16  ;;  %v3781_v15 = vld [vmem:[%s8970_s3 + $0x48] sm:$0xff]  ;;  %v3780_v16 = vld [vmem:[%s8970_s3 + $0x40] sm:$0xff] }
 0x24c   :  { %5117 = vmatprep.subr.mxu1 %v1240_v17  ;;  %5083 = vmatpush3.msra.mxu0 %v1192_v18  ;;  %v3779_v17 = vld [vmem:[%s8970_s3 + $0x38] sm:$0xff]  ;;  %v3778_v18 = vld [vmem:[%s8970_s3 + $0x30] sm:$0xff] }
 0x24d   :  { %5118 = vmatpush3.msra.mxu1 %v1224_v19  ;;  %5084 = vmatprep.subr.mxu0 %v1207_v20  ;;  %v3777_v19 = vld [vmem:[%s8970_s3 + $0x28] sm:$0xff]  ;;  %v3776_v20 = vld [vmem:[%s8970_s3 + $0x20] sm:$0xff] }
 0x24e   :  { %5119 = vmatprep.subr.mxu1 %v1239_v21  ;;  %5085 = vmatpush3.msra.mxu0 %v1191_v22  ;;  %v3775_v21 = vld [vmem:[%s8970_s3 + $0x18] sm:$0xff]  ;;  %v3774_v22 = vld [vmem:[%s8970_s3 + $0x10] sm:$0xff] }
 0x24f   :  { %5120 = vmatpush3.msra.mxu1 %v1223_v23  ;;  %5086 = vmatprep.subr.mxu0 %v1206_v24  ;;  %v3773_v23 = vld [vmem:[%s8970_s3 + $0x8] sm:$0xff]  ;;  %v3772_v24 = vld [vmem:[%s8970_s3] sm:$0xff] }
 0x250   :  { %5121 = vmatprep.subr.mxu1 %v1238_v25  ;;  %5087 = vmatpush3.msra.mxu0 %v1190_v26  ;;  %v3918_v25 = vpop.f32.mrf.mxu0  ;;  %v3953_v26 = vpop.f32.mrf.mxu1 }
 0x251   :  { %5122 = vmatpush3.msra.mxu1 %v1222_v27  ;;  %5088 = vmatprep.subr.mxu0 %v1205_v28 }
 0x252   :  { %5123 = vmatprep.subr.mxu1 %v1237_v29  ;;  %5089 = vmatpush3.msra.mxu0 %v1189_v30  ;;  %v3919_v27 = vpop.f32.mrf.mxu0  ;;  %v3884_v30 = vld [vmem:[%s8971_s2] ss:$0 sm:$0xff] }
 0x253   :  { %5124 = vmatpush3.msra.mxu1 %v1221_v31  ;;  %5090 = vmatprep.subr.mxu0 %v1204_v32  ;;  %v3920_v29 = vadd.f32 %v3919_v27, %v3918_v25  ;;  %v3954_v31 = vpop.f32.mrf.mxu1 }
 0x254   :  { %5125 = vmatprep.subr.mxu1 %v1236_v33  ;;  %5091 = vmatpush3.msra.mxu0 %v1188_v34  ;;  %v3988_v28 = vpop.f32.mrf.mxu0 }
 0x255   :  { %5126 = vmatpush3.msra.mxu1 %v1220_v35  ;;  %5092 = vmatprep.subr.mxu0 %v1203_v36  ;;  %v4023_v32 = vpop.f32.mrf.mxu1  ;;  %v1318_v34 = vadd.f32 %v3920_v29, %v3884_v30  ;;  %v3955_v35 = vadd.f32 %v3954_v31, %v3953_v26 }
 0x256   :  { %5127 = vmatprep.subr.mxu1 %v1235_v37  ;;  %5093 = vmatpush3.msra.mxu0 %v1187_v38  ;;  %v3989_v33 = vpop.f32.mrf.mxu0 }
 0x257   :  { %5128 = vmatpush3.msra.mxu1 %v1219_v39  ;;  %5094 = vmatprep.subr.mxu0 %v1202_v40  ;;  %v3990_v37 = vadd.f32 %v3989_v33, %v3988_v28  ;;  %v4024_v38 = vpop.f32.mrf.mxu1  ;;  %v1388_v39 = vadd.f32 %v3955_v35, %v1318_v34 }
 0x258   :  { %5129 = vmatprep.subr.mxu1 %v1234_v41  ;;  %5095 = vmatpush3.msra.mxu0 %v1186_v42  ;;  %v4058_v36 = vpop.f32.mrf.mxu0 }
 0x259   :  { %5130 = vmatpush3.msra.mxu1 %v1218_v43  ;;  %5096 = vmatprep.subr.mxu0 %v1201_v44  ;;  %v4093_v40 = vpop.f32.mrf.mxu1  ;;  %v1458_v42 = vadd.f32 %v3990_v37, %v1388_v39  ;;  %v4025_v43 = vadd.f32 %v4024_v38, %v4023_v32 }
 0x25a   :  { %5131 = vmatprep.subr.mxu1 %v1233_v45  ;;  %5097 = vmatpush3.msra.mxu0 %v1185_v46  ;;  %v4059_v41 = vpop.f32.mrf.mxu0 }
 0x25b   :  { %5132 = vmatpush3.msra.mxu1 %v1217_v47  ;;  %5098 = vmatprep.subr.mxu0 %v1200_v48  ;;  %v4060_v45 = vadd.f32 %v4059_v41, %v4058_v36  ;;  %v4094_v46 = vpop.f32.mrf.mxu1  ;;  %v1528_v47 = vadd.f32 %v4025_v43, %v1458_v42 }
 0x25c   :  { %5133 = vmatprep.subr.mxu1 %v1232_v49  ;;  %5099 = vmatpush3.msra.mxu0 %v1184_v50  ;;  %v4128_v44 = vpop.f32.mrf.mxu0 }
 0x25d   :  { %5134 = vmatpush3.msra.mxu1 %v1216_v51  ;;  %5100 = vmatprep.subr.mxu0 %v1199_v52  ;;  %v4163_v48 = vpop.f32.mrf.mxu1  ;;  %v1598_v50 = vadd.f32 %v4060_v45, %v1528_v47  ;;  %v4095_v51 = vadd.f32 %v4094_v46, %v4093_v40 }
 0x25e   :  { %5135 = vmatprep.subr.mxu1 %v1231_v53  ;;  %5101 = vmatpush3.msra.mxu0 %v1183_v54  ;;  %v4129_v49 = vpop.f32.mrf.mxu0 }
 0x25f   :  { %5136 = vmatpush3.msra.mxu1 %v1215_v55  ;;  %5102 = vmatprep.subr.mxu0 %v1198_v56  ;;  %v4130_v53 = vadd.f32 %v4129_v49, %v4128_v44  ;;  %v4164_v54 = vpop.f32.mrf.mxu1  ;;  %v1668_v55 = vadd.f32 %v4095_v51, %v1598_v50 }
 0x260   :  { %5137 = vmatprep.subr.mxu1 %v1230_v57  ;;  %5103 = vmatpush3.msra.mxu0 %v1182_v58  ;;  %v4198_v52 = vpop.f32.mrf.mxu0 }
 0x261   :  { %5138 = vmatpush3.msra.mxu1 %v1214_v59  ;;  %5104 = vmatprep.subr.mxu0 %v1197_v60  ;;  %v4233_v56 = vpop.f32.mrf.mxu1  ;;  %v1738_v58 = vadd.f32 %v4130_v53, %v1668_v55  ;;  %v4165_v59 = vadd.f32 %v4164_v54, %v4163_v48 }
 0x262   :  { %5139 = vmatprep.subr.mxu1 %v1229_v61  ;;  %5105 = vmatpush3.msra.mxu0 %v1181_v62  ;;  %v4199_v57 = vpop.f32.mrf.mxu0 }
 0x263   :  { %5140 = vmatpush3.msra.mxu1 %v1213_v63  ;;  %5106 = vmatprep.subr.mxu0 %v1196_v0  ;;  %v4200_v61 = vadd.f32 %v4199_v57, %v4198_v52  ;;  %v4234_v62 = vpop.f32.mrf.mxu1  ;;  %v1808_v63 = vadd.f32 %v4165_v59, %v1738_v58 }
 0x264   :  { %5141 = vmatprep.subr.mxu1 %v1228_v1  ;;  %5107 = vmatpush3.msra.mxu0 %v1180_v2  ;;  %v4268_v60 = vpop.f32.mrf.mxu0 }
 0x265   :  { %3695 = vmatprep.mubr.f32.mxu0 %v89_v3  ;;  %5142 = vmatpush3.msra.mxu1 %v1212_v4  ;;  %v4303_v0 = vpop.f32.mrf.mxu1  ;;  %v1878_v2 = vadd.f32 %v4200_v61, %v1808_v63  ;;  %v4235_v3 = vadd.f32 %v4234_v62, %v4233_v56 }
 0x266   :  { %3765 = vmatprep.mubr.f32.mxu1 %v91_v5  ;;  %3696 = vmatmul.mubr.f32.vlgmr.msra.gmra.mxu0 %v88_v6  ;;  %v4269_v1 = vpop.f32.mrf.mxu0 }
 0x267   :  { %3766 = vmatmul.mubr.f32.vlgmr.msra.gmra.mxu1 %v90_v7  ;;  %5163 = vmatprep.subr.mxu0 %v5204_v8  ;;  %v4270_v5 = vadd.f32 %v4269_v1, %v4268_v60  ;;  %v4304_v6 = vpop.f32.mrf.mxu1  ;;  %v1948_v7 = vadd.f32 %v4235_v3, %v1878_v2 }
 0x268   :  { %5164 = vmatpush3.msra.mxu0 %v3787_v9  ;;  %5195 = vmatprep.mubr.msk.f32.mxu0 %vm5205_vm0, %v5204_v8  ;;  %v4338_v4 = vpop.f32.mrf.mxu0 }
 0x269   :  { %5165 = vmatprep.subr.mxu0 %v5204_v8 }
 0x26a   :  { %5166 = vmatpush3.msra.mxu0 %v3786_v10  ;;  %v4339_v9 = vpop.f32.mrf.mxu0  ;;  %v2018_v10 = vadd.f32 %v4270_v5, %v1948_v7 }
 0x26b   :  { %5167 = vmatprep.subr.mxu0 %v5204_v8 }
 0x26c   :  { %5168 = vmatpush3.msra.mxu0 %v3785_v11  ;;  %v4305_v11 = vadd.f32 %v4304_v6, %v4303_v0 }
 0x26d   :  { %5169 = vmatprep.subr.mxu0 %v5204_v8 }
 0x26e   :  { %5170 = vmatpush3.msra.mxu0 %v3784_v12  ;;  %v4408_v12 = vpop.f32.mrf.mxu0 }
 0x26f   :  { %5171 = vmatprep.subr.mxu0 %v5204_v8 }
 0x270   :  { %5172 = vmatpush3.msra.mxu0 %v3783_v13  ;;  %v4340_v13 = vadd.f32 %v4339_v9, %v4338_v4 }
 0x271   :  { %5173 = vmatprep.subr.mxu0 %v5204_v8 }
 0x272   :  { %5174 = vmatpush3.msra.mxu0 %v3782_v14 }
 0x273   :  { %5175 = vmatprep.subr.mxu0 %v5204_v8 }
 0x274   :  { %5176 = vmatpush3.msra.mxu0 %v3781_v15  ;;  %v2088_v15 = vadd.f32 %v4305_v11, %v2018_v10 }
 0x275   :  { %5177 = vmatprep.subr.mxu0 %v5204_v8 }
 0x276   :  { %5178 = vmatpush3.msra.mxu0 %v3780_v16 }
 0x277   :  { %5179 = vmatprep.subr.mxu0 %v5204_v8 }
 0x278   :  { %5180 = vmatpush3.msra.mxu0 %v3779_v17  ;;  %v4409_v17 = vpop.f32.mrf.mxu0 }
 0x279   :  { %5181 = vmatprep.subr.mxu0 %v5204_v8 }
 0x27a   :  { %5182 = vmatpush3.msra.mxu0 %v3778_v18  ;;  %v2158_v18 = vadd.f32 %v4340_v13, %v2088_v15 }
 0x27b   :  { %5183 = vmatprep.subr.mxu0 %v5204_v8 }
 0x27c   :  { %5184 = vmatpush3.msra.mxu0 %v3777_v19 }
 0x27d   :  { %5185 = vmatprep.subr.mxu0 %v5204_v8 }
 0x27e   :  { %5186 = vmatpush3.msra.mxu0 %v3776_v20  ;;  %v4478_v20 = vpop.f32.mrf.mxu0 }
 0x27f   :  { %5187 = vmatprep.subr.mxu0 %v5204_v8 }
 0x280   :  { %5188 = vmatpush3.msra.mxu0 %v3775_v21  ;;  %v4410_v21 = vadd.f32 %v4409_v17, %v4408_v12  ;;  %v4479_v25 = vpop.f32.mrf.mxu0 }
 0x281   :  { %5189 = vmatprep.subr.mxu0 %v5204_v8  ;;  %v4480_v29 = vadd.f32 %v4479_v25, %v4478_v20 }
 0x282   :  { %5190 = vmatpush3.msra.mxu0 %v3774_v22  ;;  %v4548_v28 = vpop.f32.mrf.mxu0 }
 0x283   :  { %5191 = vmatprep.subr.mxu0 %v5204_v8 }
 0x284   :  { %5192 = vmatpush3.msra.mxu0 %v3773_v23  ;;  %v4549_v33 = vpop.f32.mrf.mxu0 }
 0x285   :  { %5193 = vmatprep.subr.mxu0 %v5204_v8  ;;  %v4373_v8 = vpop.f32.mrf.mxu1  ;;  %v4550_v37 = vadd.f32 %v4549_v33, %v4548_v28 }
 0x286   :  { %5194 = vmatpush3.msra.mxu0 %v3772_v24  ;;  %v4618_v36 = vpop.f32.mrf.mxu0 }
 0x287   :  { %v4374_v14 = vpop.f32.mrf.mxu1 }
 0x288   :  { %v4375_v19 = vadd.f32 %v4374_v14, %v4373_v8  ;;  %v4619_v41 = vpop.f32.mrf.mxu0 }
 0x289   :  { %v4443_v16 = vpop.f32.mrf.mxu1  ;;  %v4620_v45 = vadd.f32 %v4619_v41, %v4618_v36 }
 0x28a   :  { %v2228_v23 = vadd.f32 %v4375_v19, %v2158_v18  ;;  %v4688_v44 = vpop.f32.mrf.mxu0 }
 0x28b   :  { %v4444_v22 = vpop.f32.mrf.mxu1 }
 0x28c   :  { %v2298_v26 = vadd.f32 %v4410_v21, %v2228_v23  ;;  %v4445_v27 = vadd.f32 %v4444_v22, %v4443_v16  ;;  %v4689_v49 = vpop.f32.mrf.mxu0 }
 0x28d   :  { %v4513_v24 = vpop.f32.mrf.mxu1  ;;  %v4690_v53 = vadd.f32 %v4689_v49, %v4688_v44 }
 0x28e   :  { %v2368_v31 = vadd.f32 %v4445_v27, %v2298_v26  ;;  %v4758_v52 = vpop.f32.mrf.mxu0 }
 0x28f   :  { %v4514_v30 = vpop.f32.mrf.mxu1 }
 0x290   :  { %v2438_v34 = vadd.f32 %v4480_v29, %v2368_v31  ;;  %v4515_v35 = vadd.f32 %v4514_v30, %v4513_v24  ;;  %v4759_v57 = vpop.f32.mrf.mxu0 }
 0x291   :  { %v4583_v32 = vpop.f32.mrf.mxu1  ;;  %v4760_v61 = vadd.f32 %v4759_v57, %v4758_v52 }
 0x292   :  { %v2508_v39 = vadd.f32 %v4515_v35, %v2438_v34 }
 0x293   :  { %v4584_v38 = vpop.f32.mrf.mxu1 }
 0x294   :  { %v2578_v42 = vadd.f32 %v4550_v37, %v2508_v39  ;;  %v4585_v43 = vadd.f32 %v4584_v38, %v4583_v32 }
 0x295   :  { %v4653_v40 = vpop.f32.mrf.mxu1 }
 0x296   :  { %v2648_v47 = vadd.f32 %v4585_v43, %v2578_v42  ;;  %v3885_v43 = vld [vmem:[%s8972_s4] ss:$0 sm:$0xff] }
 0x297   :  { %v4654_v46 = vpop.f32.mrf.mxu1 }
 0x298   :  { %v2718_v50 = vadd.f32 %v4620_v45, %v2648_v47  ;;  %v4655_v51 = vadd.f32 %v4654_v46, %v4653_v40 }
 0x299   :  { %v4723_v48 = vpop.f32.mrf.mxu1 }
 0x29a   :  { %v2788_v55 = vadd.f32 %v4655_v51, %v2718_v50 }
 0x29b   :  { %v4724_v54 = vpop.f32.mrf.mxu1 }
 0x29c   :  { %v2858_v58 = vadd.f32 %v4690_v53, %v2788_v55  ;;  %v4725_v59 = vadd.f32 %v4724_v54, %v4723_v48 }
 0x29d   :  { %v4793_v56 = vpop.f32.mrf.mxu1 }
 0x29e   :  { %v4828_v60 = vpop.f32.mrf.mxu0  ;;  %v2928_v63 = vadd.f32 %v4725_v59, %v2858_v58 }
 0x29f   :  { %v4794_v62 = vpop.f32.mrf.mxu1 }
 0x2a0   :  { %v4829_v1 = vpop.f32.mrf.mxu0  ;;  %v2998_v2 = vadd.f32 %v4760_v61, %v2928_v63  ;;  %v4795_v3 = vadd.f32 %v4794_v62, %v4793_v56 }
 0x2a1   :  { %v4863_v0 = vpop.f32.mrf.mxu1  ;;  %v4830_v5 = vadd.f32 %v4829_v1, %v4828_v60 }
 0x2a2   :  { %v3068_v7 = vadd.f32 %v4795_v3, %v2998_v2 }
 0x2a3   :  { %v4864_v6 = vpop.f32.mrf.mxu1 }
 0x2a4   :  { %v3138_v10 = vadd.f32 %v4830_v5, %v3068_v7  ;;  %v4865_v11 = vadd.f32 %v4864_v6, %v4863_v0 }
 0x2a6   :  { %v3208_v15 = vadd.f32 %v4865_v11, %v3138_v10 }
 0x2c0   :  { %v4898_v4 = vpop.f32.mrf.mxu0 }
 0x2c2   :  { %v4933_v8 = vpop.f32.mrf.mxu1  ;;  %v4899_v9 = vpop.f32.mrf.mxu0 }
 0x2c3   :  { %v4900_v13 = vadd.f32 %v4899_v9, %v4898_v4 }
 0x2c4   :  { %v4934_v14 = vpop.f32.mrf.mxu1 }
 0x2c5   :  { %v3278_v18 = vadd.f32 %v4900_v13, %v3208_v15  ;;  %v4935_v19 = vadd.f32 %v4934_v14, %v4933_v8 }
 0x2c7   :  { %v3348_v23 = vadd.f32 %v4935_v19, %v3278_v18 }
 0x2e2   :  { %v4968_v12 = vpop.f32.mrf.mxu0 }
 0x2e4   :  { %v5003_v16 = vpop.f32.mrf.mxu1  ;;  %v4969_v17 = vpop.f32.mrf.mxu0 }
 0x2e5   :  { %v4970_v21 = vadd.f32 %v4969_v17, %v4968_v12 }
 0x2e6   :  { %v5004_v22 = vpop.f32.mrf.mxu1 }
 0x2e7   :  { %v3418_v26 = vadd.f32 %v4970_v21, %v3348_v23  ;;  %v5005_v27 = vadd.f32 %v5004_v22, %v5003_v16 }
 0x2e9   :  { %v3488_v30 = vadd.f32 %v5005_v27, %v3418_v26 }
 0x304   :  { %v5038_v20 = vpop.f32.mrf.mxu0 }
 0x306   :  { %v5073_v24 = vpop.f32.mrf.mxu1  ;;  %v5039_v25 = vpop.f32.mrf.mxu0 }
 0x307   :  { %v5040_v28 = vadd.f32 %v5039_v25, %v5038_v20 }
 0x308   :  { %v5074_v29 = vpop.f32.mrf.mxu1 }
 0x309   :  { %v3558_v31 = vadd.f32 %v5040_v28, %v3488_v30  ;;  %v5075_v32 = vadd.f32 %v5074_v29, %v5073_v24 }
 0x30b   :  { %v3628_v37 = vadd.f32 %v5075_v32, %v3558_v31 }
 0x326   :  { %v5108_v33 = vpop.f32.mrf.mxu0 }
 0x327   :  { %v5143_v34 = vpop.f32.mrf.mxu1 }
 0x328   :  { %v5109_v35 = vpop.f32.mrf.mxu0 }
 0x329   :  { %v5144_v36 = vpop.f32.mrf.mxu1  ;;  %v5110_v38 = vadd.f32 %v5109_v35, %v5108_v33 }
 0x32a   :  { %v5145_v40 = vadd.f32 %v5144_v36, %v5143_v34 }
 0x32b   :  { %v3698_v39 = vadd.f32 %v5110_v38, %v3628_v37 }
 0x32d   :  { %v3768_v41 = vadd.f32 %v5145_v40, %v3698_v39 }
 0x32f   :  { %v3771_v42 = vmax.f32 %v3768_v41, 0.0 }
 0x331   :  { %5196 = vmatmul.mubr.f32.vlgmr.msra.gmra.mxu0 %v3771_v42 }
 0x3f1   :  { %v3861_v44 = vpop.f32.mrf.mxu0 }
 0x3f2   :  { %v3862_v45 = vadd.f32 %v3885_v43, %v3861_v44 }
 0x3f3   :  { %v5197_v46 = vpop.f32.mrf.mxu0 }
 0x3f4   :  { %v3866_v47 = vsel %vm3865_vm1, %v3862_v45, -inf }
 0x3f5   :  { %3867 = vmax.xlane.f32.xlu0 %v3866_v47 }
 0x47e   :  { %v3868_v48 = vpop.xlane.xlu0 %3867 }
 0x47f   :  { %v3869_v49 = vsub.f32 %v3862_v45, %v3868_v48 }
 0x481   :  { %v3870_v50 = vmul.f32 1.442695, %v3869_v49 }
 0x483   :  { %5200 = vpow2.f32 %v3870_v50 }
 0x490   :  { %v5201_v51 = vpop.eup %5200 }
 0x491   :  { %v3872_v52 = vsel %vm3865_vm1, %v5201_v51, 0.0 }
 0x492   :  { %3873 = vadd.xlane.f32.xlu0 %v3872_v52 }
 0x51b   :  { %v3874_v53 = vpop.xlane.xlu0 %3873 }
 0x51c   :  { %5202 = vlog2.f32 %v3874_v53 }
 0x529   :  { %v5203_v54 = vpop.eup %5202 }
 0x52a   :  { %v3876_v55 = vmul.f32 0.6931472, %v5203_v54 }
 0x52c   :  { %v3877_v56 = vadd.f32 %v3876_v55, %v3868_v48 }
 0x52e   :  { %v3878_v57 = vsub.f32 %v3862_v45, %v3877_v56 }
 0x530   :  { %3879 = vst.msk [vmem:[%s8973_s5] sm:$0xff] %vm3865_vm1, %v3878_v57 }

</bundles_post_ra>
